<compile_context>
chip_gen: v5e
topology: v5e:2x2
jax: 0.10.0
libtpu: 0.0.40
codegen_flags: <defaults>
</compile_context>

<pallas_src>
import jax
import jax.numpy as jnp
from jax.experimental import pallas as pl
from jax.experimental.pallas import tpu as pltpu

LN_EPS = 1e-5          # torch.nn.LayerNorm default
LEAKY_SLOPE = 0.01     # torch.nn.LeakyReLU default


def mlp_kernel(x_ref, w1_ref, w2_ref, w3_ref, vec_ref, o_ref):
    """x_ref: (tm, D_in) bf16.  w*_ref: bf16 [in, out].
    vec_ref: (11, H) f32 packed rows
        [b1, g1, be1,  b2, g2, be2,  b3, g3, be3,  w_out_row, b_out(padded)].
    o_ref: (1, tm) f32 lane-dense output row."""

    def block(h_bf16, w_ref, b_row, g_row, be_row):
        # Linear: bf16 operands on the MXU, f32 accumulation / f32 VPU math.
        y = jnp.dot(h_bf16, w_ref[...], preferred_element_type=jnp.float32) + b_row
        # LayerNorm over the hidden dim: single-pass variance, clamped >= 0 so f32
        # cancellation can never feed rsqrt a negative argument.
        mu = jnp.mean(y, axis=-1, keepdims=True)
        var = jnp.maximum(jnp.mean(y * y, axis=-1, keepdims=True) - mu * mu, 0.0)
        y = (y - mu) * jax.lax.rsqrt(var + LN_EPS)
        y = y * g_row + be_row
        # LeakyReLU; Dropout is identity at inference (eval mode).
        y = jnp.where(y >= 0, y, LEAKY_SLOPE * y)
        # Carry the activation as bf16: halves inter-layer VMEM traffic and is
        # already the dtype the next MXU pass consumes.
        return y.astype(jnp.bfloat16)

    h = x_ref[...]                                                     # (tm, D_in) bf16
    h = block(h, w1_ref, vec_ref[0:1, :], vec_ref[1:2, :], vec_ref[2:3, :])
    h = block(h, w2_ref, vec_ref[3:4, :], vec_ref[4:5, :], vec_ref[5:6, :])
    h = block(h, w3_ref, vec_ref[6:7, :], vec_ref[7:8, :], vec_ref[8:9, :])

    # Final Linear (hidden -> 1) emitted directly as the lane-dense (1, tm) output
    # row: out[0, j] = sum_k h[j, k] * w_out[k] + b_out.  Contracting the last dims
    # of both operands avoids a separate transpose and keeps stores unmasked.
    wo_bf = vec_ref[9:10, :].astype(jnp.bfloat16)                      # (1, H)
    row = jax.lax.dot_general(wo_bf, h,
                              dimension_numbers=(((1,), (1,)), ((), ())),
                              preferred_element_type=jnp.float32)      # (1, tm)
    row = row + vec_ref[10:11, 0:1]                                    # + b_out scalar
    o_ref[...] = row.astype(o_ref.dtype)


def _round_up(n, m):
    return ((n + m - 1) // m) * m


def net_forward(x, params, *, tm=256):
    """Eval-mode forward pass of Net.  x: [B, INPUT] f32.  Returns [B, 1] f32."""
    B, D_in = x.shape
    H = params["w1"].shape[1]
    out_size = params["w_out"].shape[1]
    assert out_size == 1, "Net.fc_out is a hidden->1 regressor head"

    # Batch tile: multiple of 8 sublanes, at most `tm` (256 = v6e/v7x MXU width).
    tm_eff = min(tm, _round_up(B, 8))
    n_tiles = int(pl.cdiv(B, tm_eff))
    Bp = n_tiles * tm_eff

    # bf16 input: halves the x HBM->VMEM DMA bytes; the MXU consumes bf16 anyway.
    xb = x.astype(jnp.bfloat16)
    if Bp != B:
        xb = jnp.pad(xb, ((0, Bp - B), (0, 0)))     # zero tail rows, sliced off below

    # bf16 weight matrices (MXU operands, half the DMA/VMEM bytes).
    w1 = params["w1"].astype(jnp.bfloat16)
    w2 = params["w2"].astype(jnp.bfloat16)
    w3 = params["w3"].astype(jnp.bfloat16)

    # Pack the 11 small per-layer rows into a single (11, H) f32 block.
    bo_row = jnp.pad(params["b_out"].astype(jnp.float32),
                     ((0, 0), (0, H - out_size)))
    vecs = jnp.concatenate([
        params["b1"], params["g1"], params["be1"],
        params["b2"], params["g2"], params["be2"],
        params["b3"], params["g3"], params["be3"],
        params["w_out"].reshape(1, H), bo_row,
    ], axis=0).astype(jnp.float32)                  # (11, H)

    # Explicit VMEM budget: single-buffered weights + double-buffered x tile +
    # packed vectors + output + activation working set + headroom; capped for
    # v7x's 64 MiB per-TensorCore VMEM, floored at the 32 MiB scoped default.
    needed = (
        2 * (D_in * H + 2 * H * H)          # bf16 weights, single-buffered
        + 2 * 2 * tm_eff * D_in             # bf16 x tile, double-buffered
        + 4 * 16 * H                        # packed vector block (sublane padded)
        + 2 * 4 * 8 * max(tm_eff, 128)      # output row blocks (sublane padded)
        + 6 * tm_eff * H                    # f32 + bf16 activation working set
        + (8 << 20)                         # compiler scratch / spill headroom
    )
    vmem_limit = int(max(32 << 20, min(needed, 64 << 20)))

    # Megacore split only pays off when each core gets several tiles; with a tiny
    # grid it would just duplicate the weight DMA on v7x's second TensorCore.
    sem = "parallel" if n_tiles > 2 else "arbitrary"

    def run(single_buffer_weights):
        if single_buffer_weights:
            inv = lambda shape: pl.BlockSpec(shape, lambda i: (0, 0),
                                             pipeline_mode=pl.Buffered(1))
        else:
            inv = lambda shape: pl.BlockSpec(shape, lambda i: (0, 0))
        in_specs = [
            pl.BlockSpec((tm_eff, D_in), lambda i: (i, 0)),   # x tile (streamed)
            inv((D_in, H)), inv((H, H)), inv((H, H)),         # grid-invariant weights
            inv((11, H)),                                      # packed small vectors
        ]
        out_spec = pl.BlockSpec((1, tm_eff), lambda i: (0, i))  # lane-dense out row
        fn = pl.pallas_call(
            mlp_kernel,
            out_shape=jax.ShapeDtypeStruct((1, Bp), jnp.float32),
            grid_spec=pltpu.PrefetchScalarGridSpec(
                num_scalar_prefetch=0,
                grid=(n_tiles,),
                in_specs=in_specs,
                out_specs=out_spec,
            ),
            compiler_params=pltpu.CompilerParams(
                dimension_semantics=(sem,),
                vmem_limit_bytes=vmem_limit),
        )
        return fn(xb, w1, w2, w3, vecs)

    try:
        out_row = run(True)       # single-buffer the grid-invariant operands
    except Exception:
        # Fallback for JAX builds that reject pl.Buffered(1) on pallas_call specs:
        # identical kernel, default double-buffering.
        out_row = run(False)

    return out_row[0, :B].reshape(B, out_size)


def init_params(key, input_size, hidden_size, out_size):
    """Deterministic synthetic init (roughly PyTorch-style uniform fan-in scaling)."""
    ks = jax.random.split(key, 8)

    def lin(kw, kb, fan_in, fan_out):
        bound = 1.0 / jnp.sqrt(fan_in)
        w = jax.random.uniform(kw, (fan_in, fan_out), jnp.float32, -bound, bound)
        b = jax.random.uniform(kb, (1, fan_out), jnp.float32, -bound, bound)
        return w, b

    w1, b1 = lin(ks[0], ks[1], input_size, hidden_size)
    w2, b2 = lin(ks[2], ks[3], hidden_size, hidden_size)
    w3, b3 = lin(ks[4], ks[5], hidden_size, hidden_size)
    wo, bo = lin(ks[6], ks[7], hidden_size, out_size)

    ones = jnp.ones((1, hidden_size), jnp.float32)
    zeros = jnp.zeros((1, hidden_size), jnp.float32)
    return dict(
        w1=w1, b1=b1, g1=ones, be1=zeros,
        w2=w2, b2=b2, g2=ones, be2=zeros,
        w3=w3, b3=b3, g3=ones, be3=zeros,
        w_out=wo, b_out=bo,
    )


def net_forward_ref(x, p):
    """Pure-JAX reference mirroring the kernel's bf16-operand / f32-accumulate math."""
    bf = lambda a: a.astype(jnp.bfloat16)

    def block(h, w, b, g, be):
        y = jnp.dot(bf(h), bf(w), preferred_element_type=jnp.float32) + b
        mu = jnp.mean(y, axis=-1, keepdims=True)
        var = jnp.mean((y - mu) ** 2, axis=-1, keepdims=True)
        y = (y - mu) * jax.lax.rsqrt(var + LN_EPS) * g + be
        y = jnp.where(y >= 0, y, LEAKY_SLOPE * y)
        return y.astype(jnp.bfloat16).astype(jnp.float32)

    h = block(x, p["w1"], p["b1"], p["g1"], p["be1"])
    h = block(h, p["w2"], p["b2"], p["g2"], p["be2"])
    h = block(h, p["w3"], p["b3"], p["g3"], p["be3"])
    out = jnp.dot(bf(h), bf(p["w_out"]), preferred_element_type=jnp.float32)
    return out + p["b_out"]


if __name__ == "__main__":
    # Small shapes consistent with the module (fingerprint MLP regressor):
    # CFG batch=256, out=1; hidden scaled down from 1024 to 256 to stay small.
    B, INPUT, HIDDEN, OUT = 256, 256, 256, 1

    key = jax.random.PRNGKey(0)
    kx, kp = jax.random.split(key)
    x = jax.random.normal(kx, (B, INPUT), jnp.float32)
    params = init_params(kp, INPUT, HIDDEN, OUT)

    # Multi-tile path: grid=(2,) at tm=128.
    out = jax.block_until_ready(net_forward(x, params, tm=128))
    ref = net_forward_ref(x, params)
    assert out.shape == (B, OUT)
    assert jnp.allclose(out, ref, atol=1e-2, rtol=1e-2), (out, ref)

    # Default tile (tm=256) with a ragged batch exercises the cdiv + pad path
    # and the non-128-multiple lane-width output block.
    x2 = x[:100]
    out2 = jax.block_until_ready(net_forward(x2, params))
    ref2 = net_forward_ref(x2, params)
    assert out2.shape == (100, OUT)
    assert jnp.allclose(out2, ref2, atol=1e-2, rtol=1e-2), (out2, ref2)

    print("KERNEL_OK")
</pallas_src>

<mosaic_0001>
module attributes {stable_mosaic.version = 11 : i64} {
  func.func @mlp_kernel(%arg0: i32, %arg1: memref<128x256xbf16, #tpu.memory_space<vmem>>, %arg2: memref<256x256xbf16, #tpu.memory_space<vmem>>, %arg3: memref<256x256xbf16, #tpu.memory_space<vmem>>, %arg4: memref<256x256xbf16, #tpu.memory_space<vmem>>, %arg5: memref<11x256xf32, #tpu.memory_space<vmem>>, %arg6: memref<1x128xf32, #tpu.memory_space<vmem>>) attributes {dimension_semantics = [#tpu.dimension_semantics<arbitrary>], iteration_bounds = array<i64: 2>, scalar_prefetch = 0 : i64, scratch_operands = 0 : i64, tpu.core_type = #tpu.core_type<tc>, window_params = [{transform_indices = @transform_0, window_bounds = array<i64: 128, 256>}, {pipeline_mode = #tpu.pipeline_mode<synchronous>, transform_indices = @transform_1, window_bounds = array<i64: 256, 256>}, {pipeline_mode = #tpu.pipeline_mode<synchronous>, transform_indices = @transform_2, window_bounds = array<i64: 256, 256>}, {pipeline_mode = #tpu.pipeline_mode<synchronous>, transform_indices = @transform_3, window_bounds = array<i64: 256, 256>}, {pipeline_mode = #tpu.pipeline_mode<synchronous>, transform_indices = @transform_4, window_bounds = array<i64: 11, 256>}, {transform_indices = @transform_5, window_bounds = array<i64: 1, 128>}]} {
    %c0 = arith.constant 0 : index
    %c0_0 = arith.constant 0 : index
    %0 = vector.load %arg1[%c0, %c0_0] : memref<128x256xbf16, #tpu.memory_space<vmem>>, vector<128x256xbf16>
    %c0_1 = arith.constant 0 : index
    %c0_2 = arith.constant 0 : index
    %1 = vector.load %arg5[%c0_1, %c0_2] : memref<11x256xf32, #tpu.memory_space<vmem>>, vector<1x256xf32>
    %c1 = arith.constant 1 : index
    %c0_3 = arith.constant 0 : index
    %2 = vector.load %arg5[%c1, %c0_3] : memref<11x256xf32, #tpu.memory_space<vmem>>, vector<1x256xf32>
    %c2 = arith.constant 2 : index
    %c0_4 = arith.constant 0 : index
    %3 = vector.load %arg5[%c2, %c0_4] : memref<11x256xf32, #tpu.memory_space<vmem>>, vector<1x256xf32>
    %c0_5 = arith.constant 0 : index
    %c0_6 = arith.constant 0 : index
    %4 = vector.load %arg2[%c0_5, %c0_6] : memref<256x256xbf16, #tpu.memory_space<vmem>>, vector<256x256xbf16>
    %cst = arith.constant dense<0.000000e+00> : vector<128x256xf32>
    %5 = tpu.matmul %0, %4, %cst {dimension_numbers = #tpu.dot_dimension_numbers<[1], [0], [0], [1], [0, 0, 1, 1], [], []>} : vector<128x256xbf16>, vector<256x256xbf16>, vector<128x256xf32> -> vector<128x256xf32>
    %6 = vector.broadcast %1 : vector<1x256xf32> to vector<128x256xf32>
    %7 = arith.addf %5, %6 : vector<128x256xf32>
    %cst_7 = arith.constant dense<0.000000e+00> : vector<128xf32>
    %8 = vector.multi_reduction <add>, %7, %cst_7 [1] : vector<128x256xf32> to vector<128xf32>
    %9 = vector.shape_cast %8 : vector<128xf32> to vector<128x1xf32>
    %cst_8 = arith.constant 2.560000e+02 : f32
    %10 = vector.broadcast %cst_8 : f32 to vector<128x1xf32>
    %11 = arith.divf %9, %10 : vector<128x1xf32>
    %12 = arith.mulf %7, %7 : vector<128x256xf32>
    %cst_9 = arith.constant dense<0.000000e+00> : vector<128xf32>
    %13 = vector.multi_reduction <add>, %12, %cst_9 [1] : vector<128x256xf32> to vector<128xf32>
    %14 = vector.shape_cast %13 : vector<128xf32> to vector<128x1xf32>
    %cst_10 = arith.constant 2.560000e+02 : f32
    %15 = vector.broadcast %cst_10 : f32 to vector<128x1xf32>
    %16 = arith.divf %14, %15 : vector<128x1xf32>
    %17 = arith.mulf %11, %11 : vector<128x1xf32>
    %18 = arith.subf %16, %17 : vector<128x1xf32>
    %cst_11 = arith.constant 0.000000e+00 : f32
    %19 = vector.broadcast %cst_11 : f32 to vector<128x1xf32>
    %20 = arith.maximumf %18, %19 : vector<128x1xf32>
    %21 = vector.broadcast %11 : vector<128x1xf32> to vector<128x256xf32>
    %22 = arith.subf %7, %21 : vector<128x256xf32>
    %cst_12 = arith.constant 9.99999974E-6 : f32
    %23 = vector.broadcast %cst_12 : f32 to vector<128x1xf32>
    %24 = arith.addf %20, %23 : vector<128x1xf32>
    %25 = math.rsqrt %24 : vector<128x1xf32>
    %26 = vector.broadcast %25 : vector<128x1xf32> to vector<128x256xf32>
    %27 = arith.mulf %22, %26 : vector<128x256xf32>
    %28 = vector.broadcast %2 : vector<1x256xf32> to vector<128x256xf32>
    %29 = arith.mulf %27, %28 : vector<128x256xf32>
    %30 = vector.broadcast %3 : vector<1x256xf32> to vector<128x256xf32>
    %31 = arith.addf %29, %30 : vector<128x256xf32>
    %cst_13 = arith.constant 0.000000e+00 : f32
    %32 = vector.broadcast %cst_13 : f32 to vector<128x256xf32>
    %33 = arith.cmpf oge, %31, %32 : vector<128x256xf32>
    %cst_14 = arith.constant 0.00999999977 : f32
    %34 = vector.broadcast %cst_14 : f32 to vector<128x256xf32>
    %35 = arith.mulf %34, %31 : vector<128x256xf32>
    %36 = arith.select %33, %31, %35 : vector<128x256xi1>, vector<128x256xf32>
    %37 = arith.truncf %36 : vector<128x256xf32> to vector<128x256xbf16>
    %c3 = arith.constant 3 : index
    %c0_15 = arith.constant 0 : index
    %38 = vector.load %arg5[%c3, %c0_15] : memref<11x256xf32, #tpu.memory_space<vmem>>, vector<1x256xf32>
    %c4 = arith.constant 4 : index
    %c0_16 = arith.constant 0 : index
    %39 = vector.load %arg5[%c4, %c0_16] : memref<11x256xf32, #tpu.memory_space<vmem>>, vector<1x256xf32>
    %c5 = arith.constant 5 : index
    %c0_17 = arith.constant 0 : index
    %40 = vector.load %arg5[%c5, %c0_17] : memref<11x256xf32, #tpu.memory_space<vmem>>, vector<1x256xf32>
    %c0_18 = arith.constant 0 : index
    %c0_19 = arith.constant 0 : index
    %41 = vector.load %arg3[%c0_18, %c0_19] : memref<256x256xbf16, #tpu.memory_space<vmem>>, vector<256x256xbf16>
    %cst_20 = arith.constant dense<0.000000e+00> : vector<128x256xf32>
    %42 = tpu.matmul %37, %41, %cst_20 {dimension_numbers = #tpu.dot_dimension_numbers<[1], [0], [0], [1], [0, 0, 1, 1], [], []>} : vector<128x256xbf16>, vector<256x256xbf16>, vector<128x256xf32> -> vector<128x256xf32>
    %43 = vector.broadcast %38 : vector<1x256xf32> to vector<128x256xf32>
    %44 = arith.addf %42, %43 : vector<128x256xf32>
    %cst_21 = arith.constant dense<0.000000e+00> : vector<128xf32>
    %45 = vector.multi_reduction <add>, %44, %cst_21 [1] : vector<128x256xf32> to vector<128xf32>
    %46 = vector.shape_cast %45 : vector<128xf32> to vector<128x1xf32>
    %cst_22 = arith.constant 2.560000e+02 : f32
    %47 = vector.broadcast %cst_22 : f32 to vector<128x1xf32>
    %48 = arith.divf %46, %47 : vector<128x1xf32>
    %49 = arith.mulf %44, %44 : vector<128x256xf32>
    %cst_23 = arith.constant dense<0.000000e+00> : vector<128xf32>
    %50 = vector.multi_reduction <add>, %49, %cst_23 [1] : vector<128x256xf32> to vector<128xf32>
    %51 = vector.shape_cast %50 : vector<128xf32> to vector<128x1xf32>
    %cst_24 = arith.constant 2.560000e+02 : f32
    %52 = vector.broadcast %cst_24 : f32 to vector<128x1xf32>
    %53 = arith.divf %51, %52 : vector<128x1xf32>
    %54 = arith.mulf %48, %48 : vector<128x1xf32>
    %55 = arith.subf %53, %54 : vector<128x1xf32>
    %cst_25 = arith.constant 0.000000e+00 : f32
    %56 = vector.broadcast %cst_25 : f32 to vector<128x1xf32>
    %57 = arith.maximumf %55, %56 : vector<128x1xf32>
    %58 = vector.broadcast %48 : vector<128x1xf32> to vector<128x256xf32>
    %59 = arith.subf %44, %58 : vector<128x256xf32>
    %cst_26 = arith.constant 9.99999974E-6 : f32
    %60 = vector.broadcast %cst_26 : f32 to vector<128x1xf32>
    %61 = arith.addf %57, %60 : vector<128x1xf32>
    %62 = math.rsqrt %61 : vector<128x1xf32>
    %63 = vector.broadcast %62 : vector<128x1xf32> to vector<128x256xf32>
    %64 = arith.mulf %59, %63 : vector<128x256xf32>
    %65 = vector.broadcast %39 : vector<1x256xf32> to vector<128x256xf32>
    %66 = arith.mulf %64, %65 : vector<128x256xf32>
    %67 = vector.broadcast %40 : vector<1x256xf32> to vector<128x256xf32>
    %68 = arith.addf %66, %67 : vector<128x256xf32>
    %cst_27 = arith.constant 0.000000e+00 : f32
    %69 = vector.broadcast %cst_27 : f32 to vector<128x256xf32>
    %70 = arith.cmpf oge, %68, %69 : vector<128x256xf32>
    %cst_28 = arith.constant 0.00999999977 : f32
    %71 = vector.broadcast %cst_28 : f32 to vector<128x256xf32>
    %72 = arith.mulf %71, %68 : vector<128x256xf32>
    %73 = arith.select %70, %68, %72 : vector<128x256xi1>, vector<128x256xf32>
    %74 = arith.truncf %73 : vector<128x256xf32> to vector<128x256xbf16>
    %c6 = arith.constant 6 : index
    %c0_29 = arith.constant 0 : index
    %75 = vector.load %arg5[%c6, %c0_29] : memref<11x256xf32, #tpu.memory_space<vmem>>, vector<1x256xf32>
    %c7 = arith.constant 7 : index
    %c0_30 = arith.constant 0 : index
    %76 = vector.load %arg5[%c7, %c0_30] : memref<11x256xf32, #tpu.memory_space<vmem>>, vector<1x256xf32>
    %c8 = arith.constant 8 : index
    %c0_31 = arith.constant 0 : index
    %77 = vector.load %arg5[%c8, %c0_31] : memref<11x256xf32, #tpu.memory_space<vmem>>, vector<1x256xf32>
    %c0_32 = arith.constant 0 : index
    %c0_33 = arith.constant 0 : index
    %78 = vector.load %arg4[%c0_32, %c0_33] : memref<256x256xbf16, #tpu.memory_space<vmem>>, vector<256x256xbf16>
    %cst_34 = arith.constant dense<0.000000e+00> : vector<128x256xf32>
    %79 = tpu.matmul %74, %78, %cst_34 {dimension_numbers = #tpu.dot_dimension_numbers<[1], [0], [0], [1], [0, 0, 1, 1], [], []>} : vector<128x256xbf16>, vector<256x256xbf16>, vector<128x256xf32> -> vector<128x256xf32>
    %80 = vector.broadcast %75 : vector<1x256xf32> to vector<128x256xf32>
    %81 = arith.addf %79, %80 : vector<128x256xf32>
    %cst_35 = arith.constant dense<0.000000e+00> : vector<128xf32>
    %82 = vector.multi_reduction <add>, %81, %cst_35 [1] : vector<128x256xf32> to vector<128xf32>
    %83 = vector.shape_cast %82 : vector<128xf32> to vector<128x1xf32>
    %cst_36 = arith.constant 2.560000e+02 : f32
    %84 = vector.broadcast %cst_36 : f32 to vector<128x1xf32>
    %85 = arith.divf %83, %84 : vector<128x1xf32>
    %86 = arith.mulf %81, %81 : vector<128x256xf32>
    %cst_37 = arith.constant dense<0.000000e+00> : vector<128xf32>
    %87 = vector.multi_reduction <add>, %86, %cst_37 [1] : vector<128x256xf32> to vector<128xf32>
    %88 = vector.shape_cast %87 : vector<128xf32> to vector<128x1xf32>
    %cst_38 = arith.constant 2.560000e+02 : f32
    %89 = vector.broadcast %cst_38 : f32 to vector<128x1xf32>
    %90 = arith.divf %88, %89 : vector<128x1xf32>
    %91 = arith.mulf %85, %85 : vector<128x1xf32>
    %92 = arith.subf %90, %91 : vector<128x1xf32>
    %cst_39 = arith.constant 0.000000e+00 : f32
    %93 = vector.broadcast %cst_39 : f32 to vector<128x1xf32>
    %94 = arith.maximumf %92, %93 : vector<128x1xf32>
    %95 = vector.broadcast %85 : vector<128x1xf32> to vector<128x256xf32>
    %96 = arith.subf %81, %95 : vector<128x256xf32>
    %cst_40 = arith.constant 9.99999974E-6 : f32
    %97 = vector.broadcast %cst_40 : f32 to vector<128x1xf32>
    %98 = arith.addf %94, %97 : vector<128x1xf32>
    %99 = math.rsqrt %98 : vector<128x1xf32>
    %100 = vector.broadcast %99 : vector<128x1xf32> to vector<128x256xf32>
    %101 = arith.mulf %96, %100 : vector<128x256xf32>
    %102 = vector.broadcast %76 : vector<1x256xf32> to vector<128x256xf32>
    %103 = arith.mulf %101, %102 : vector<128x256xf32>
    %104 = vector.broadcast %77 : vector<1x256xf32> to vector<128x256xf32>
    %105 = arith.addf %103, %104 : vector<128x256xf32>
    %cst_41 = arith.constant 0.000000e+00 : f32
    %106 = vector.broadcast %cst_41 : f32 to vector<128x256xf32>
    %107 = arith.cmpf oge, %105, %106 : vector<128x256xf32>
    %cst_42 = arith.constant 0.00999999977 : f32
    %108 = vector.broadcast %cst_42 : f32 to vector<128x256xf32>
    %109 = arith.mulf %108, %105 : vector<128x256xf32>
    %110 = arith.select %107, %105, %109 : vector<128x256xi1>, vector<128x256xf32>
    %111 = arith.truncf %110 : vector<128x256xf32> to vector<128x256xbf16>
    %c9 = arith.constant 9 : index
    %c0_43 = arith.constant 0 : index
    %112 = vector.load %arg5[%c9, %c0_43] : memref<11x256xf32, #tpu.memory_space<vmem>>, vector<1x256xf32>
    %113 = arith.truncf %112 : vector<1x256xf32> to vector<1x256xbf16>
    %cst_44 = arith.constant dense<0.000000e+00> : vector<1x128xf32>
    %114 = tpu.matmul %113, %111, %cst_44 {dimension_numbers = #tpu.dot_dimension_numbers<[1], [1], [0], [0], [0, 0, 1, 0], [], []>} : vector<1x256xbf16>, vector<128x256xbf16>, vector<1x128xf32> -> vector<1x128xf32>
    %c10 = arith.constant 10 : index
    %c0_45 = arith.constant 0 : index
    %115 = vector.load %arg5[%c10, %c0_45] : memref<11x256xf32, #tpu.memory_space<vmem>>, vector<1x1xf32>
    %116 = vector.broadcast %115 : vector<1x1xf32> to vector<1x128xf32>
    %117 = arith.addf %114, %116 : vector<1x128xf32>
    %c0_46 = arith.constant 0 : index
    %c0_47 = arith.constant 0 : index
    %118 = vector.load %arg6[%c0_46, %c0_47] : memref<1x128xf32, #tpu.memory_space<vmem>>, vector<1x128xf32>
    tpu.vector_store %arg6[%c0_46, %c0_47], %117 {strides = array<i32>} : memref<1x128xf32, #tpu.memory_space<vmem>>, vector<1x128xf32>,
    return
  }
  func.func @transform_0(%arg0: i32) -> (i32, i32) {
    %c0_i32 = arith.constant 0 : i32
    %c0_i32_0 = arith.constant 0 : i32
    return %arg0, %c0_i32 : i32, i32
  }
  func.func @transform_1(%arg0: i32) -> (i32, i32) {
    %c0_i32 = arith.constant 0 : i32
    %c0_i32_0 = arith.constant 0 : i32
    %c0_i32_1 = arith.constant 0 : i32
    return %c0_i32, %c0_i32_0 : i32, i32
  }
  func.func @transform_2(%arg0: i32) -> (i32, i32) {
    %c0_i32 = arith.constant 0 : i32
    %c0_i32_0 = arith.constant 0 : i32
    %c0_i32_1 = arith.constant 0 : i32
    return %c0_i32, %c0_i32_0 : i32, i32
  }
  func.func @transform_3(%arg0: i32) -> (i32, i32) {
    %c0_i32 = arith.constant 0 : i32
    %c0_i32_0 = arith.constant 0 : i32
    %c0_i32_1 = arith.constant 0 : i32
    return %c0_i32, %c0_i32_0 : i32, i32
  }
  func.func @transform_4(%arg0: i32) -> (i32, i32) {
    %c0_i32 = arith.constant 0 : i32
    %c0_i32_0 = arith.constant 0 : i32
    %c0_i32_1 = arith.constant 0 : i32
    return %c0_i32, %c0_i32_0 : i32, i32
  }
  func.func @transform_5(%arg0: i32) -> (i32, i32) {
    %c0_i32 = arith.constant 0 : i32
    %c0_i32_0 = arith.constant 0 : i32
    return %c0_i32, %arg0 : i32, i32
  }
}

module attributes {stable_mosaic.version = 11 : i64} {
  func.func @mlp_kernel(%arg0: i32, %arg1: memref<128x256xbf16, #tpu.memory_space<vmem>>, %arg2: memref<256x256xbf16, #tpu.memory_space<vmem>>, %arg3: memref<256x256xbf16, #tpu.memory_space<vmem>>, %arg4: memref<256x256xbf16, #tpu.memory_space<vmem>>, %arg5: memref<11x256xf32, #tpu.memory_space<vmem>>, %arg6: memref<1x128xf32, #tpu.memory_space<vmem>>) attributes {dimension_semantics = [#tpu.dimension_semantics<arbitrary>], iteration_bounds = array<i64: 2>, scalar_prefetch = 0 : i64, scratch_operands = 0 : i64, tpu.core_type = #tpu.core_type<tc>, window_params = [{transform_indices = @transform_0, window_bounds = array<i64: 128, 256>}, {pipeline_mode = #tpu.pipeline_mode<synchronous>, transform_indices = @transform_1, window_bounds = array<i64: 256, 256>}, {pipeline_mode = #tpu.pipeline_mode<synchronous>, transform_indices = @transform_2, window_bounds = array<i64: 256, 256>}, {pipeline_mode = #tpu.pipeline_mode<synchronous>, transform_indices = @transform_3, window_bounds = array<i64: 256, 256>}, {pipeline_mode = #tpu.pipeline_mode<synchronous>, transform_indices = @transform_4, window_bounds = array<i64: 11, 256>}, {transform_indices = @transform_5, window_bounds = array<i64: 1, 128>}]} {
    %c0 = arith.constant 0 : index
    %c0_0 = arith.constant 0 : index
    %0 = vector.load %arg1[%c0, %c0_0] : memref<128x256xbf16, #tpu.memory_space<vmem>>, vector<128x256xbf16>
    %c0_1 = arith.constant 0 : index
    %c0_2 = arith.constant 0 : index
    %1 = vector.load %arg5[%c0_1, %c0_2] : memref<11x256xf32, #tpu.memory_space<vmem>>, vector<1x256xf32>
    %c1 = arith.constant 1 : index
    %c0_3 = arith.constant 0 : index
    %2 = vector.load %arg5[%c1, %c0_3] : memref<11x256xf32, #tpu.memory_space<vmem>>, vector<1x256xf32>
    %c2 = arith.constant 2 : index
    %c0_4 = arith.constant 0 : index
    %3 = vector.load %arg5[%c2, %c0_4] : memref<11x256xf32, #tpu.memory_space<vmem>>, vector<1x256xf32>
    %c0_5 = arith.constant 0 : index
    %c0_6 = arith.constant 0 : index
    %4 = vector.load %arg2[%c0_5, %c0_6] : memref<256x256xbf16, #tpu.memory_space<vmem>>, vector<256x256xbf16>
    %cst = arith.constant dense<0.000000e+00> : vector<128x256xf32>
    %5 = tpu.matmul %0, %4, %cst {dimension_numbers = #tpu.dot_dimension_numbers<[1], [0], [0], [1], [0, 0, 1, 1], [], []>} : vector<128x256xbf16>, vector<256x256xbf16>, vector<128x256xf32> -> vector<128x256xf32>
    %6 = vector.broadcast %1 : vector<1x256xf32> to vector<128x256xf32>
    %7 = arith.addf %5, %6 : vector<128x256xf32>
    %cst_7 = arith.constant dense<0.000000e+00> : vector<128xf32>
    %8 = vector.multi_reduction <add>, %7, %cst_7 [1] : vector<128x256xf32> to vector<128xf32>
    %9 = vector.shape_cast %8 : vector<128xf32> to vector<128x1xf32>
    %cst_8 = arith.constant 2.560000e+02 : f32
    %10 = vector.broadcast %cst_8 : f32 to vector<128x1xf32>
    %11 = arith.divf %9, %10 : vector<128x1xf32>
    %12 = arith.mulf %7, %7 : vector<128x256xf32>
    %cst_9 = arith.constant dense<0.000000e+00> : vector<128xf32>
    %13 = vector.multi_reduction <add>, %12, %cst_9 [1] : vector<128x256xf32> to vector<128xf32>
    %14 = vector.shape_cast %13 : vector<128xf32> to vector<128x1xf32>
    %cst_10 = arith.constant 2.560000e+02 : f32
    %15 = vector.broadcast %cst_10 : f32 to vector<128x1xf32>
    %16 = arith.divf %14, %15 : vector<128x1xf32>
    %17 = arith.mulf %11, %11 : vector<128x1xf32>
    %18 = arith.subf %16, %17 : vector<128x1xf32>
    %cst_11 = arith.constant 0.000000e+00 : f32
    %19 = vector.broadcast %cst_11 : f32 to vector<128x1xf32>
    %20 = arith.maximumf %18, %19 : vector<128x1xf32>
    %21 = vector.broadcast %11 : vector<128x1xf32> to vector<128x256xf32>
    %22 = arith.subf %7, %21 : vector<128x256xf32>
    %cst_12 = arith.constant 9.99999974E-6 : f32
    %23 = vector.broadcast %cst_12 : f32 to vector<128x1xf32>
    %24 = arith.addf %20, %23 : vector<128x1xf32>
    %25 = math.rsqrt %24 : vector<128x1xf32>
    %26 = vector.broadcast %25 : vector<128x1xf32> to vector<128x256xf32>
    %27 = arith.mulf %22, %26 : vector<128x256xf32>
    %28 = vector.broadcast %2 : vector<1x256xf32> to vector<128x256xf32>
    %29 = arith.mulf %27, %28 : vector<128x256xf32>
    %30 = vector.broadcast %3 : vector<1x256xf32> to vector<128x256xf32>
    %31 = arith.addf %29, %30 : vector<128x256xf32>
    %cst_13 = arith.constant 0.000000e+00 : f32
    %32 = vector.broadcast %cst_13 : f32 to vector<128x256xf32>
    %33 = arith.cmpf oge, %31, %32 : vector<128x256xf32>
    %cst_14 = arith.constant 0.00999999977 : f32
    %34 = vector.broadcast %cst_14 : f32 to vector<128x256xf32>
    %35 = arith.mulf %34, %31 : vector<128x256xf32>
    %36 = arith.select %33, %31, %35 : vector<128x256xi1>, vector<128x256xf32>
    %37 = arith.truncf %36 : vector<128x256xf32> to vector<128x256xbf16>
    %c3 = arith.constant 3 : index
    %c0_15 = arith.constant 0 : index
    %38 = vector.load %arg5[%c3, %c0_15] : memref<11x256xf32, #tpu.memory_space<vmem>>, vector<1x256xf32>
    %c4 = arith.constant 4 : index
    %c0_16 = arith.constant 0 : index
    %39 = vector.load %arg5[%c4, %c0_16] : memref<11x256xf32, #tpu.memory_space<vmem>>, vector<1x256xf32>
    %c5 = arith.constant 5 : index
    %c0_17 = arith.constant 0 : index
    %40 = vector.load %arg5[%c5, %c0_17] : memref<11x256xf32, #tpu.memory_space<vmem>>, vector<1x256xf32>
    %c0_18 = arith.constant 0 : index
    %c0_19 = arith.constant 0 : index
    %41 = vector.load %arg3[%c0_18, %c0_19] : memref<256x256xbf16, #tpu.memory_space<vmem>>, vector<256x256xbf16>
    %cst_20 = arith.constant dense<0.000000e+00> : vector<128x256xf32>
    %42 = tpu.matmul %37, %41, %cst_20 {dimension_numbers = #tpu.dot_dimension_numbers<[1], [0], [0], [1], [0, 0, 1, 1], [], []>} : vector<128x256xbf16>, vector<256x256xbf16>, vector<128x256xf32> -> vector<128x256xf32>
    %43 = vector.broadcast %38 : vector<1x256xf32> to vector<128x256xf32>
    %44 = arith.addf %42, %43 : vector<128x256xf32>
    %cst_21 = arith.constant dense<0.000000e+00> : vector<128xf32>
    %45 = vector.multi_reduction <add>, %44, %cst_21 [1] : vector<128x256xf32> to vector<128xf32>
    %46 = vector.shape_cast %45 : vector<128xf32> to vector<128x1xf32>
    %cst_22 = arith.constant 2.560000e+02 : f32
    %47 = vector.broadcast %cst_22 : f32 to vector<128x1xf32>
    %48 = arith.divf %46, %47 : vector<128x1xf32>
    %49 = arith.mulf %44, %44 : vector<128x256xf32>
    %cst_23 = arith.constant dense<0.000000e+00> : vector<128xf32>
    %50 = vector.multi_reduction <add>, %49, %cst_23 [1] : vector<128x256xf32> to vector<128xf32>
    %51 = vector.shape_cast %50 : vector<128xf32> to vector<128x1xf32>
    %cst_24 = arith.constant 2.560000e+02 : f32
    %52 = vector.broadcast %cst_24 : f32 to vector<128x1xf32>
    %53 = arith.divf %51, %52 : vector<128x1xf32>
    %54 = arith.mulf %48, %48 : vector<128x1xf32>
    %55 = arith.subf %53, %54 : vector<128x1xf32>
    %cst_25 = arith.constant 0.000000e+00 : f32
    %56 = vector.broadcast %cst_25 : f32 to vector<128x1xf32>
    %57 = arith.maximumf %55, %56 : vector<128x1xf32>
    %58 = vector.broadcast %48 : vector<128x1xf32> to vector<128x256xf32>
    %59 = arith.subf %44, %58 : vector<128x256xf32>
    %cst_26 = arith.constant 9.99999974E-6 : f32
    %60 = vector.broadcast %cst_26 : f32 to vector<128x1xf32>
    %61 = arith.addf %57, %60 : vector<128x1xf32>
    %62 = math.rsqrt %61 : vector<128x1xf32>
    %63 = vector.broadcast %62 : vector<128x1xf32> to vector<128x256xf32>
    %64 = arith.mulf %59, %63 : vector<128x256xf32>
    %65 = vector.broadcast %39 : vector<1x256xf32> to vector<128x256xf32>
    %66 = arith.mulf %64, %65 : vector<128x256xf32>
    %67 = vector.broadcast %40 : vector<1x256xf32> to vector<128x256xf32>
    %68 = arith.addf %66, %67 : vector<128x256xf32>
    %cst_27 = arith.constant 0.000000e+00 : f32
    %69 = vector.broadcast %cst_27 : f32 to vector<128x256xf32>
    %70 = arith.cmpf oge, %68, %69 : vector<128x256xf32>
    %cst_28 = arith.constant 0.00999999977 : f32
    %71 = vector.broadcast %cst_28 : f32 to vector<128x256xf32>
    %72 = arith.mulf %71, %68 : vector<128x256xf32>
    %73 = arith.select %70, %68, %72 : vector<128x256xi1>, vector<128x256xf32>
    %74 = arith.truncf %73 : vector<128x256xf32> to vector<128x256xbf16>
    %c6 = arith.constant 6 : index
    %c0_29 = arith.constant 0 : index
    %75 = vector.load %arg5[%c6, %c0_29] : memref<11x256xf32, #tpu.memory_space<vmem>>, vector<1x256xf32>
    %c7 = arith.constant 7 : index
    %c0_30 = arith.constant 0 : index
    %76 = vector.load %arg5[%c7, %c0_30] : memref<11x256xf32, #tpu.memory_space<vmem>>, vector<1x256xf32>
    %c8 = arith.constant 8 : index
    %c0_31 = arith.constant 0 : index
    %77 = vector.load %arg5[%c8, %c0_31] : memref<11x256xf32, #tpu.memory_space<vmem>>, vector<1x256xf32>
    %c0_32 = arith.constant 0 : index
    %c0_33 = arith.constant 0 : index
    %78 = vector.load %arg4[%c0_32, %c0_33] : memref<256x256xbf16, #tpu.memory_space<vmem>>, vector<256x256xbf16>
    %cst_34 = arith.constant dense<0.000000e+00> : vector<128x256xf32>
    %79 = tpu.matmul %74, %78, %cst_34 {dimension_numbers = #tpu.dot_dimension_numbers<[1], [0], [0], [1], [0, 0, 1, 1], [], []>} : vector<128x256xbf16>, vector<256x256xbf16>, vector<128x256xf32> -> vector<128x256xf32>
    %80 = vector.broadcast %75 : vector<1x256xf32> to vector<128x256xf32>
    %81 = arith.addf %79, %80 : vector<128x256xf32>
    %cst_35 = arith.constant dense<0.000000e+00> : vector<128xf32>
    %82 = vector.multi_reduction <add>, %81, %cst_35 [1] : vector<128x256xf32> to vector<128xf32>
    %83 = vector.shape_cast %82 : vector<128xf32> to vector<128x1xf32>
    %cst_36 = arith.constant 2.560000e+02 : f32
    %84 = vector.broadcast %cst_36 : f32 to vector<128x1xf32>
    %85 = arith.divf %83, %84 : vector<128x1xf32>
    %86 = arith.mulf %81, %81 : vector<128x256xf32>
    %cst_37 = arith.constant dense<0.000000e+00> : vector<128xf32>
    %87 = vector.multi_reduction <add>, %86, %cst_37 [1] : vector<128x256xf32> to vector<128xf32>
    %88 = vector.shape_cast %87 : vector<128xf32> to vector<128x1xf32>
    %cst_38 = arith.constant 2.560000e+02 : f32
    %89 = vector.broadcast %cst_38 : f32 to vector<128x1xf32>
    %90 = arith.divf %88, %89 : vector<128x1xf32>
    %91 = arith.mulf %85, %85 : vector<128x1xf32>
    %92 = arith.subf %90, %91 : vector<128x1xf32>
    %cst_39 = arith.constant 0.000000e+00 : f32
    %93 = vector.broadcast %cst_39 : f32 to vector<128x1xf32>
    %94 = arith.maximumf %92, %93 : vector<128x1xf32>
    %95 = vector.broadcast %85 : vector<128x1xf32> to vector<128x256xf32>
    %96 = arith.subf %81, %95 : vector<128x256xf32>
    %cst_40 = arith.constant 9.99999974E-6 : f32
    %97 = vector.broadcast %cst_40 : f32 to vector<128x1xf32>
    %98 = arith.addf %94, %97 : vector<128x1xf32>
    %99 = math.rsqrt %98 : vector<128x1xf32>
    %100 = vector.broadcast %99 : vector<128x1xf32> to vector<128x256xf32>
    %101 = arith.mulf %96, %100 : vector<128x256xf32>
    %102 = vector.broadcast %76 : vector<1x256xf32> to vector<128x256xf32>
    %103 = arith.mulf %101, %102 : vector<128x256xf32>
    %104 = vector.broadcast %77 : vector<1x256xf32> to vector<128x256xf32>
    %105 = arith.addf %103, %104 : vector<128x256xf32>
    %cst_41 = arith.constant 0.000000e+00 : f32
    %106 = vector.broadcast %cst_41 : f32 to vector<128x256xf32>
    %107 = arith.cmpf oge, %105, %106 : vector<128x256xf32>
    %cst_42 = arith.constant 0.00999999977 : f32
    %108 = vector.broadcast %cst_42 : f32 to vector<128x256xf32>
    %109 = arith.mulf %108, %105 : vector<128x256xf32>
    %110 = arith.select %107, %105, %109 : vector<128x256xi1>, vector<128x256xf32>
    %111 = arith.truncf %110 : vector<128x256xf32> to vector<128x256xbf16>
    %c9 = arith.constant 9 : index
    %c0_43 = arith.constant 0 : index
    %112 = vector.load %arg5[%c9, %c0_43] : memref<11x256xf32, #tpu.memory_space<vmem>>, vector<1x256xf32>
    %113 = arith.truncf %112 : vector<1x256xf32> to vector<1x256xbf16>
    %cst_44 = arith.constant dense<0.000000e+00> : vector<1x128xf32>
    %114 = tpu.matmul %113, %111, %cst_44 {dimension_numbers = #tpu.dot_dimension_numbers<[1], [1], [0], [0], [0, 0, 1, 0], [], []>} : vector<1x256xbf16>, vector<128x256xbf16>, vector<1x128xf32> -> vector<1x128xf32>
    %c10 = arith.constant 10 : index
    %c0_45 = arith.constant 0 : index
    %115 = vector.load %arg5[%c10, %c0_45] : memref<11x256xf32, #tpu.memory_space<vmem>>, vector<1x1xf32>
    %116 = vector.broadcast %115 : vector<1x1xf32> to vector<1x128xf32>
    %117 = arith.addf %114, %116 : vector<1x128xf32>
    %c0_46 = arith.constant 0 : index
    %c0_47 = arith.constant 0 : index
    %118 = vector.load %arg6[%c0_46, %c0_47] : memref<1x128xf32, #tpu.memory_space<vmem>>, vector<1x128xf32>
    tpu.vector_store %arg6[%c0_46, %c0_47], %117 {strides = array<i32>} : memref<1x128xf32, #tpu.memory_space<vmem>>, vector<1x128xf32>,
    return
  }
  func.func @transform_0(%arg0: i32) -> (i32, i32) {
    %c0_i32 = arith.constant 0 : i32
    %c0_i32_0 = arith.constant 0 : i32
    return %arg0, %c0_i32 : i32, i32
  }
  func.func @transform_1(%arg0: i32) -> (i32, i32) {
    %c0_i32 = arith.constant 0 : i32
    %c0_i32_0 = arith.constant 0 : i32
    %c0_i32_1 = arith.constant 0 : i32
    return %c0_i32, %c0_i32_0 : i32, i32
  }
  func.func @transform_2(%arg0: i32) -> (i32, i32) {
    %c0_i32 = arith.constant 0 : i32
    %c0_i32_0 = arith.constant 0 : i32
    %c0_i32_1 = arith.constant 0 : i32
    return %c0_i32, %c0_i32_0 : i32, i32
  }
  func.func @transform_3(%arg0: i32) -> (i32, i32) {
    %c0_i32 = arith.constant 0 : i32
    %c0_i32_0 = arith.constant 0 : i32
    %c0_i32_1 = arith.constant 0 : i32
    return %c0_i32, %c0_i32_0 : i32, i32
  }
  func.func @transform_4(%arg0: i32) -> (i32, i32) {
    %c0_i32 = arith.constant 0 : i32
    %c0_i32_0 = arith.constant 0 : i32
    %c0_i32_1 = arith.constant 0 : i32
    return %c0_i32, %c0_i32_0 : i32, i32
  }
  func.func @transform_5(%arg0: i32) -> (i32, i32) {
    %c0_i32 = arith.constant 0 : i32
    %c0_i32_0 = arith.constant 0 : i32
    return %c0_i32, %arg0 : i32, i32
  }
}

</mosaic_0001>

<bundles_post_ra>
// kernel: tpu_custom_call.1
= control target key start
LH: loop header
LB: loop body
LE: loop exit
PB: predicated region body
PF: predicated region fallthrough
CT: control target
= control target key end

     0   :  { %10 = vsyncpa [#allocation3], 0  ;;  %s6690_s0 = inlined_call_operand.hbm [shape: bf16[256,256], index: 0, kind: input, shape index: {}]   ;;  %s6691_s1 = inlined_call_operand.hbm [shape: bf16[256,256], index: 1, kind: input, shape index: {}]   ;;  %s6692_s2 = inlined_call_operand.hbm [shape: bf16[256,256], index: 2, kind: input, shape index: {}]   ;;  %s6693_s3 = inlined_call_operand.hbm [shape: bf16[256,256], index: 3, kind: input, shape index: {}]   ;;  %s6694_s4 = inlined_call_operand.hbm [shape: f32[11,256], index: 4, kind: input, shape index: {}]   ;;  %s6695_s5 = inlined_call_operand.hbm [shape: f32[1,256], index: 5, kind: output, shape index: {}]  }
   0x1   :  { %12 = vsyncpa [#allocation3 + $0x1], 0 }
   0x2   :  { %13 = vsyncpa [#allocation6], 0 }
   0x3   :  { %14 = vsyncpa [#allocation9], 0 }
   0x4   :  { %15 = vsyncpa [#allocation4], 0 }
   0x5   :  { %17 = vsyncpa [#allocation4 + $0x1], 0  ;;  %s4711_s18 = smov 0   ;;  %s4713_s19 = smov 0  }
   0x6   :  { %s4715_s20 = smov 0   ;;  %s4717_s21 = smov 0  }
   0x7 LB: > { %s4732_s22 = sadd.s32 4294967295, %s4669_s21   ;;  %s3672_s23 = sadd.s32 4294967294, %s4669_s21   ;;  %s4669_s21 = sphi %s4717_s21, %s6746_s21   ;;  %s4665_s20 = sphi %s4715_s20, %s6745_s20   ;;  %s4661_s19 = sphi %s4713_s19, %s6744_s19   ;;  %s4657_s18 = sphi %s4711_s18, %s6743_s18  }
   0x8   : > { %p43_p0 = scmp.ne.s32.totalorder %s4661_s19, %s4657_s18  ;;  %p44_p1 = scmp.eq.s32.totalorder %s4732_s22, 0 }
   0x9   : > { %p151_p2 = scmp.eq.s32.totalorder %s4732_s22, 1  ;;  %p157_p3 = scmp.eq.s32.totalorder %s3672_s23, 1 }
   0xa   : > { %p4741_p4 = por %p44_p1, %p43_p0  ;;  %p3673_p5 = scmp.ge.s32.totalorder %s4669_s21, 1 }
   0xb   : > { %p4746_p6 = por %p157_p3, %p43_p0  ;;  %p164_p7 = scmp.lt.s32.totalorder %s4669_s21, 3 }
   0xc   : > { %s175_s28 = sshll.u32 %s6691_s1, 4  ;;  %s4671_s30 = smov [#allocation5]   ;;  %s176_s28 = int_to_ptr.hbm [resolvable:$true] %s175_s28 }
   0xd   : > { %p4754_p8 = pnand %p3673_p5, %p164_p7  ;;  %s177_s6 = sshll.u32 %s4671_s30, 4  ;;  %s178_s6 = int_to_ptr.vmem [resolvable:$true] %s177_s6 }
   0xe   : > { %s203_s10 = sshll.u32 %s6693_s3, 4  ;;  %s6696_s11 = smov 128   ;;  %s204_s10 = int_to_ptr.hbm [resolvable:$true] %s203_s10 }
   0xf   : > { %p4273_p9 = pneg %p4754_p8  ;;  %s4673_s12 = smov 8  }
  0x10   : > { %s4674_s13 = smov [#allocation8]   ;;  %s189_s17 = sshll.u32 %s6692_s2, 4  ;;  %s190_s17 = int_to_ptr.hbm [resolvable:$true] %s189_s17 }
  0x11   : > { %p4762_p10 = pnand %p4273_p9, %p44_p1  ;;  %s205_s14 = sshll.u32 %s4674_s13, 4  ;;  %s206_s14 = int_to_ptr.vmem [resolvable:$true] %s205_s14 }
  0x12   : > { %s217_s27 = sshll.u32 %s6694_s4, 4  ;;  %s4677_s9 = smov 256   ;;  %s218_s27 = int_to_ptr.hbm [resolvable:$true] %s217_s27 }
  0x13   : > { %4276 = dma.hbm_to_vmem [thread:$0]  (!%p4762_p10), %s176_s28, 4096, %s178_s6, [#allocation6], %s6696_s11, %s6696_s11, %s4673_s12  }
  0x14   : > { %4282 = dma.hbm_to_vmem [thread:$0]  (!%p4762_p10), %s204_s10, 4096, %s206_s14, [#allocation9], %s6696_s11, %s6696_s11, %s4673_s12  }
  0x15   : > { %s4675_s28 = smov [#allocation7]   ;;  %s4676_s6 = smov [#allocation10]  }
  0x16   : > { %s191_s30 = sshll.u32 %s4675_s28, 4  ;;  %s219_s8 = sshll.u32 %s4676_s6, 4  ;;  %s192_s30 = int_to_ptr.vmem [resolvable:$true] %s191_s30  ;;  %s220_s8 = int_to_ptr.vmem [resolvable:$true] %s219_s8 }
  0x17   : > { %4279 = dma.hbm_to_vmem [thread:$0]  (!%p4762_p10), %s190_s17, 4096, %s192_s30, [#allocation6], %s6696_s11, %s6696_s11, %s4673_s12  }
  0x18   : > { %s4678_s10 = smov 16   ;;  %s4794_s13 = sadd.s32 1, %s4669_s21  }
  0x19   : > { %4285 = dma.hbm_to_vmem [thread:$0]  (!%p4762_p10), %s218_s27, 512, %s220_s8, [#allocation9], %s4677_s9, %s4677_s9, %s4678_s10  }
  0x1a   : > { %s27_s14 = ssub.s32 %s4669_s21, %s4794_s13  ;;  %s30_s15 = sadd.s32 1, %s4665_s20 }
  0x1b   : > { %p28_p12 = scmp.eq.s32.totalorder %s27_s14, 0  ;;  %p37_p13 = scmp.ne.s32.totalorder %s4665_s20, %s4661_s19 }
  0x1c   : > { %p38_p0 = scmp.eq.s32.totalorder %s4669_s21, 0  ;;  %p4298_p7 = scmp.lt.s32.totalorder %s4669_s21, 2 }
  0x1d   : > { %s4803_s16 = scalar_select %p28_p12, %s4665_s20, %s30_s15  }
  0x1e   : > { %p39_p3 = por %p38_p0, %p37_p13  ;;  %p4807_p5 = por %p151_p2, %p37_p13 }
  0x1f   : > { %s233_s23 = sand.u32 1, %s4665_s20   ;;  %s4140_s26 = sshll.u32 %s4669_s21, 7 }
  0x20   : > { %s3679_s7 = sshll.u32 %s233_s23, 7  ;;  %s243_s30 = scalar_lea.hbm %s6690_s0, %s4140_s26 }
  0x21   : > { %s237_s6 = scalar_lea.vmem [#allocation2], %s3679_s7  ;;  %s244_s9 = sshll.u32 %s243_s30, 4  ;;  %s245_s9 = int_to_ptr.hbm [resolvable:$true] %s244_s9 }
  0x22   : > { %s246_s8 = sshll.u32 %s237_s6, 4  ;;  %p4817_p9 = pnand %p4298_p7, %p39_p3  ;;  %s247_s8 = int_to_ptr.vmem [resolvable:$true] %s246_s8 }
  0x23   : > { %s234_s14 = scalar_lea.sflag [#allocation3], %s233_s23  ;;  %s4565_s15 = sshra.s32 %s245_s9, 4  ;;  %s4566_s15 = int_to_ptr.hbm [resolvable:$true] %s4565_s15 }
  0x24   : > { %s4567_s11 = scalar_lea.hbm %s4566_s15, 128  ;;  %p4569_p10 = pneg %p4817_p9 }
  0x25   : > { %p4568_p2 = scmp.ne.s32.totalorder %s4566_s15, %s4567_s11  ;;  %s4572_s27 = scalar_lea.hbm %s6690_s0, 256 }
  0x26   : > { %p4573_p0 = scmp.lt.s32.totalorder %s4566_s15, %s6690_s0  ;;  %p4574_p3 = scmp.lt.s32.totalorder %s4572_s27, %s4567_s11 }
  0x27   : > { %p4570_p12 = pnand %p4569_p10, %p4568_p2 }
  0x28   : > { %p4575_p7 = por %p4574_p3, %p4573_p0 }
  0x29   : > { %p4571_p13 = pneg %p4570_p12 }
  0x2b   : > { %p4576_p11 = pnand %p4575_p7, %p4571_p13 }
  0x2d   : > { %4579 = shalt.err (!%p4576_p11)
}
  0x2e   : > { %s6712_s23 = smov 128   ;;  %258 = sbr.rel (%p4754_p8) target bundleno = 1339 (0x53b), region = 40 }
  0x2f   : > { %4289 = dma.hbm_to_vmem [thread:$0]  (!%p4817_p9), %s245_s9, 2048, %s247_s8, %s234_s14, %s6712_s23, %s6712_s23, %s4673_s12  }
  0x33   : > { %s4837_s6 = sand.u32 1, %s4661_s19  }
  0x34   : > { %s3684_s15 = sshll.u32 %s4837_s6, 7  ;;  %s261_s11 = scalar_lea.sflag [#allocation3], %s4837_s6 }
  0x35   : > { %s4841_s26 = scalar_lea.vmem [#allocation2], %s3684_s15 }
  0x36   : > { %4640 = dma.done.wait (%p4741_p4), %s261_s11, 2048  }
  0x37   : > { %4642 = vsyncadd (%p4741_p4), %s261_s11, 4294965248 }
  0x38   : > { %4644 = dma.done.wait (%p44_p1), [#allocation6], 8192  }
  0x39   : > { %4646 = vsyncadd (%p44_p1), [#allocation6], 4294959104 }
  0x3a   : > { %4648 = dma.done.wait (%p44_p1), [#allocation9], 4608  }
  0x3b   : > { %4650 = vsyncadd (%p44_p1), [#allocation9], 4294962688  ;;  %v3811_v0 = vld [vmem:[#allocation5 + $0x70] sm:$0xf]  ;;  %v4172_v1 = vld [vmem:[#allocation5 + $0x74] sm:$0xf0]  ;;  %s3564_s12 = scalar_lea.hbm %s6695_s5, %s4732_s22 }
  0x3c   : > { %v3875_v2 = vld [vmem:[#allocation5 + $0xf0] sm:$0xf]  ;;  %v3812_v3 = vor.u32 %v4172_v1, %v3811_v0  ;;  %v4188_v4 = vld [vmem:[#allocation5 + $0xf4] sm:$0xf0]  ;;  %v4171_v5 = vld [vmem:[#allocation5 + $0x74] sm:$0xf] }
  0x3d   : > { %v3813_v6 = vld [vmem:[#allocation5 + $0x78] sm:$0xf0]  ;;  %v3876_v7 = vor.u32 %v4188_v4, %v3875_v2  ;;  %v4187_v9 = vld [vmem:[#allocation5 + $0xf4] sm:$0xf]  ;;  %v3803_v11 = vld [vmem:[#allocation5 + $0x60] sm:$0xf] }
  0x3e   : > { %v3816_v8 = vor.u32 %v4171_v5, %v3813_v6  ;;  %v3877_v10 = vld [vmem:[#allocation5 + $0xf8] sm:$0xf0]  ;;  %610 = vmatpush.bf16.msra.mxu0 %v3812_v3  ;;  %v4170_v13 = vld [vmem:[#allocation5 + $0x64] sm:$0xf0]  ;;  %v3867_v14 = vld [vmem:[#allocation5 + $0xe0] sm:$0xf] }
  0x3f   : > { %v3880_v12 = vor.u32 %v4187_v9, %v3877_v10  ;;  %v4186_v15 = vld [vmem:[#allocation5 + $0xe4] sm:$0xf0]  ;;  %659 = vmatpush.bf16.msra.mxu1 %v3876_v7  ;;  %v3804_v16 = vor.u32 %v4170_v13, %v3803_v11  ;;  %v4169_v18 = vld [vmem:[#allocation5 + $0x64] sm:$0xf]  ;;  %v3805_v19 = vld [vmem:[#allocation5 + $0x68] sm:$0xf0] }
  0x40   : > { %708 = vmatpush.bf16.msra.mxu2 %v3816_v8  ;;  %v3868_v17 = vor.u32 %v4186_v15, %v3867_v14  ;;  %v4185_v20 = vld [vmem:[#allocation5 + $0xe4] sm:$0xf]  ;;  %v3808_v21 = vor.u32 %v4169_v18, %v3805_v19  ;;  %v3869_v22 = vld [vmem:[#allocation5 + $0xe8] sm:$0xf0]  ;;  %v3795_v23 = vld [vmem:[#allocation5 + $0x50] sm:$0xf] }
  0x41   : > { %757 = vmatpush.bf16.msra.mxu3 %v3880_v12  ;;  %v4168_v24 = vld [vmem:[#allocation5 + $0x54] sm:$0xf0]  ;;  %v3872_v25 = vor.u32 %v4185_v20, %v3869_v22  ;;  %v3859_v26 = vld [vmem:[#allocation5 + $0xd0] sm:$0xf]  ;;  %v4167_v28 = vld [vmem:[#allocation5 + $0x54] sm:$0xf] }
  0x42   : > { %v4184_v27 = vld [vmem:[#allocation5 + $0xd4] sm:$0xf0]  ;;  %611 = vmatpush.bf16.msra.mxu0 %v3804_v16  ;;  %v3796_v29 = vor.u32 %v4168_v24, %v3795_v23  ;;  %v3797_v30 = vld [vmem:[#allocation5 + $0x58] sm:$0xf0]  ;;  %v4183_v31 = vld [vmem:[#allocation5 + $0xd4] sm:$0xf] }
  0x43   : > { %v3861_v32 = vld [vmem:[#allocation5 + $0xd8] sm:$0xf0]  ;;  %660 = vmatpush.bf16.msra.mxu1 %v3868_v17  ;;  %v3860_v33 = vor.u32 %v4184_v27, %v3859_v26  ;;  %v3800_v34 = vor.u32 %v4167_v28, %v3797_v30  ;;  %v3787_v35 = vld [vmem:[#allocation5 + $0x40] sm:$0xf]  ;;  %v4166_v36 = vld [vmem:[#allocation5 + $0x44] sm:$0xf0] }
  0x44   : > { %709 = vmatpush.bf16.msra.mxu2 %v3808_v21  ;;  %v3851_v37 = vld [vmem:[#allocation5 + $0xc0] sm:$0xf]  ;;  %v3864_v38 = vor.u32 %v4183_v31, %v3861_v32  ;;  %v4182_v39 = vld [vmem:[#allocation5 + $0xc4] sm:$0xf0]  ;;  %v4165_v40 = vld [vmem:[#allocation5 + $0x44] sm:$0xf]  ;;  %v3788_v44 = vor.u32 %v4166_v36, %v3787_v35 }
  0x45   : > { %758 = vmatpush.bf16.msra.mxu3 %v3872_v25  ;;  %v3789_v41 = vld [vmem:[#allocation5 + $0x48] sm:$0xf0]  ;;  %v4181_v42 = vld [vmem:[#allocation5 + $0xc4] sm:$0xf]  ;;  %v3852_v45 = vor.u32 %v4182_v39, %v3851_v37  ;;  %v3779_v47 = vld [vmem:[#allocation5 + $0x30] sm:$0xf] }
  0x46   : > { %v3853_v43 = vld [vmem:[#allocation5 + $0xc8] sm:$0xf0]  ;;  %612 = vmatpush.bf16.msra.mxu0 %v3796_v29  ;;  %v3792_v46 = vor.u32 %v4165_v40, %v3789_v41  ;;  %v4164_v48 = vld [vmem:[#allocation5 + $0x34] sm:$0xf0]  ;;  %v3843_v49 = vld [vmem:[#allocation5 + $0xb0] sm:$0xf] }
  0x47   : > { %661 = vmatpush.bf16.msra.mxu1 %v3860_v33  ;;  %v3856_v50 = vor.u32 %v4181_v42, %v3853_v43  ;;  %v4180_v51 = vld [vmem:[#allocation5 + $0xb4] sm:$0xf0]  ;;  %v4163_v52 = vld [vmem:[#allocation5 + $0x34] sm:$0xf]  ;;  %v3781_v53 = vld [vmem:[#allocation5 + $0x38] sm:$0xf0]  ;;  %v3780_v56 = vor.u32 %v4164_v48, %v3779_v47 }
  0x48   : > { %710 = vmatpush.bf16.msra.mxu2 %v3800_v34  ;;  %v4179_v54 = vld [vmem:[#allocation5 + $0xb4] sm:$0xf]  ;;  %v3845_v55 = vld [vmem:[#allocation5 + $0xb8] sm:$0xf0]  ;;  %v3844_v57 = vor.u32 %v4180_v51, %v3843_v49  ;;  %v3784_v58 = vor.u32 %v4163_v52, %v3781_v53  ;;  %v3771_v59 = vld [vmem:[#allocation5 + $0x20] sm:$0xf] }
  0x49   : > { %759 = vmatpush.bf16.msra.mxu3 %v3864_v38  ;;  %v4162_v60 = vld [vmem:[#allocation5 + $0x24] sm:$0xf0]  ;;  %v3835_v61 = vld [vmem:[#allocation5 + $0xa0] sm:$0xf]  ;;  %v3848_v62 = vor.u32 %v4179_v54, %v3845_v55  ;;  %v4161_v0 = vld [vmem:[#allocation5 + $0x24] sm:$0xf] }
  0x4a   : > { %613 = vmatpush.bf16.msra.mxu0 %v3788_v44  ;;  %v4178_v63 = vld [vmem:[#allocation5 + $0xa4] sm:$0xf0]  ;;  %v3773_v1 = vld [vmem:[#allocation5 + $0x28] sm:$0xf0]  ;;  %v4177_v2 = vld [vmem:[#allocation5 + $0xa4] sm:$0xf]  ;;  %v3772_v4 = vor.u32 %v4162_v60, %v3771_v59 }
  0x4b   : > { %662 = vmatpush.bf16.msra.mxu1 %v3852_v45  ;;  %v3837_v3 = vld [vmem:[#allocation5 + $0xa8] sm:$0xf0]  ;;  %v3836_v5 = vor.u32 %v4178_v63, %v3835_v61  ;;  %v3776_v6 = vor.u32 %v4161_v0, %v3773_v1  ;;  %v3763_v7 = vld [vmem:[#allocation5 + $0x10] sm:$0xf]  ;;  %v4160_v8 = vld [vmem:[#allocation5 + $0x14] sm:$0xf0] }
  0x4c   : > { %711 = vmatpush.bf16.msra.mxu2 %v3792_v46  ;;  %v3827_v9 = vld [vmem:[#allocation5 + $0x90] sm:$0xf]  ;;  %v3840_v10 = vor.u32 %v4177_v2, %v3837_v3  ;;  %v4176_v11 = vld [vmem:[#allocation5 + $0x94] sm:$0xf0]  ;;  %v4159_v12 = vld [vmem:[#allocation5 + $0x14] sm:$0xf]  ;;  %v3764_v16 = vor.u32 %v4160_v8, %v3763_v7 }
  0x4d   : > { %760 = vmatpush.bf16.msra.mxu3 %v3856_v50  ;;  %v3765_v13 = vld [vmem:[#allocation5 + $0x18] sm:$0xf0]  ;;  %v4175_v14 = vld [vmem:[#allocation5 + $0x94] sm:$0xf]  ;;  %v3828_v17 = vor.u32 %v4176_v11, %v3827_v9  ;;  %v3755_v19 = vld [vmem:[#allocation5] sm:$0xf] }
  0x4e   : > { %614 = vmatpush.bf16.msra.mxu0 %v3780_v56  ;;  %v3829_v15 = vld [vmem:[#allocation5 + $0x98] sm:$0xf0]  ;;  %v3768_v18 = vor.u32 %v4159_v12, %v3765_v13  ;;  %v4158_v20 = vld [vmem:[#allocation5 + $0x4] sm:$0xf0]  ;;  %v3819_v21 = vld [vmem:[#allocation5 + $0x80] sm:$0xf] }
  0x4f   : > { %663 = vmatpush.bf16.msra.mxu1 %v3844_v57  ;;  %v3832_v22 = vor.u32 %v4175_v14, %v3829_v15  ;;  %v4174_v23 = vld [vmem:[#allocation5 + $0x84] sm:$0xf0]  ;;  %v4157_v24 = vld [vmem:[#allocation5 + $0x4] sm:$0xf]  ;;  %v3757_v25 = vld [vmem:[#allocation5 + $0x8] sm:$0xf0]  ;;  %v3756_v28 = vor.u32 %v4158_v20, %v3755_v19 }
  0x50   : > { %712 = vmatpush.bf16.msra.mxu2 %v3784_v58  ;;  %v4173_v26 = vld [vmem:[#allocation5 + $0x84] sm:$0xf]  ;;  %v3821_v27 = vld [vmem:[#allocation5 + $0x88] sm:$0xf0]  ;;  %v3691_v29 = vld [vmem:[%s4841_s26] sm:$0xf]  ;;  %v3820_v31 = vor.u32 %v4174_v23, %v3819_v21  ;;  %v3760_v32 = vor.u32 %v4157_v24, %v3757_v25 }
  0x51   : > { %761 = vmatpush.bf16.msra.mxu3 %v3848_v62  ;;  %v4142_v30 = vld [vmem:[%s4841_s26 + $0x4] sm:$0xf0]  ;;  %v4141_v33 = vld [vmem:[%s4841_s26 + $0x4] sm:$0xf]  ;;  %v3693_v34 = vld [vmem:[%s4841_s26 + $0x8] sm:$0xf0]  ;;  %v3824_v35 = vor.u32 %v4173_v26, %v3821_v27 }
  0x52   : > { %615 = vmatpush.bf16.msra.mxu0 %v3772_v4  ;;  %v3692_v36 = vor.u32 %v4142_v30, %v3691_v29  ;;  %v3696_v37 = vor.u32 %v4141_v33, %v3693_v34  ;;  %v3699_v38 = vld [vmem:[%s4841_s26 + $0x10] sm:$0xf]  ;;  %v4144_v39 = vld [vmem:[%s4841_s26 + $0x14] sm:$0xf0]  ;;  %v4143_v40 = vld [vmem:[%s4841_s26 + $0x14] sm:$0xf] }
  0x53   : > { %664 = vmatpush.bf16.msra.mxu1 %v3836_v5  ;;  %v3701_v41 = vld [vmem:[%s4841_s26 + $0x18] sm:$0xf0]  ;;  %v3700_v42 = vor.u32 %v4144_v39, %v3699_v38  ;;  %v3707_v44 = vld [vmem:[%s4841_s26 + $0x20] sm:$0xf]  ;;  %v4146_v45 = vld [vmem:[%s4841_s26 + $0x24] sm:$0xf0] }
  0x54   : > { %713 = vmatpush.bf16.msra.mxu2 %v3776_v6  ;;  %v3704_v43 = vor.u32 %v4143_v40, %v3701_v41  ;;  %v4145_v46 = vld [vmem:[%s4841_s26 + $0x24] sm:$0xf]  ;;  %v3709_v47 = vld [vmem:[%s4841_s26 + $0x28] sm:$0xf0]  ;;  %v3708_v48 = vor.u32 %v4146_v45, %v3707_v44  ;;  %v3715_v50 = vld [vmem:[%s4841_s26 + $0x30] sm:$0xf] }
  0x55   : > { %762 = vmatpush.bf16.msra.mxu3 %v3840_v10  ;;  %v3712_v49 = vor.u32 %v4145_v46, %v3709_v47  ;;  %v4148_v51 = vld [vmem:[%s4841_s26 + $0x34] sm:$0xf0]  ;;  %v4147_v52 = vld [vmem:[%s4841_s26 + $0x34] sm:$0xf]  ;;  %v3717_v53 = vld [vmem:[%s4841_s26 + $0x38] sm:$0xf0] }
  0x56   : > { %616 = vmatpush.bf16.msra.mxu0 %v3764_v16  ;;  %v3716_v54 = vor.u32 %v4148_v51, %v3715_v50  ;;  %v3720_v55 = vor.u32 %v4147_v52, %v3717_v53  ;;  %v3723_v56 = vld [vmem:[%s4841_s26 + $0x40] sm:$0xf]  ;;  %v4150_v57 = vld [vmem:[%s4841_s26 + $0x44] sm:$0xf0]  ;;  %v4149_v58 = vld [vmem:[%s4841_s26 + $0x44] sm:$0xf] }
  0x57   : > { %665 = vmatpush.bf16.msra.mxu1 %v3828_v17  ;;  %v3725_v59 = vld [vmem:[%s4841_s26 + $0x48] sm:$0xf0]  ;;  %v3724_v60 = vor.u32 %v4150_v57, %v3723_v56  ;;  %v3731_v62 = vld [vmem:[%s4841_s26 + $0x50] sm:$0xf]  ;;  %v4152_v63 = vld [vmem:[%s4841_s26 + $0x54] sm:$0xf0] }
  0x58   : > { %714 = vmatpush.bf16.msra.mxu2 %v3768_v18  ;;  %v3728_v61 = vor.u32 %v4149_v58, %v3725_v59  ;;  %v4151_v0 = vld [vmem:[%s4841_s26 + $0x54] sm:$0xf]  ;;  %v3733_v1 = vld [vmem:[%s4841_s26 + $0x58] sm:$0xf0]  ;;  %v3732_v2 = vor.u32 %v4152_v63, %v3731_v62  ;;  %v3739_v4 = vld [vmem:[%s4841_s26 + $0x60] sm:$0xf] }
  0x59   : > { %763 = vmatpush.bf16.msra.mxu3 %v3832_v22  ;;  %v3736_v3 = vor.u32 %v4151_v0, %v3733_v1  ;;  %v4154_v5 = vld [vmem:[%s4841_s26 + $0x64] sm:$0xf0]  ;;  %v4153_v6 = vld [vmem:[%s4841_s26 + $0x64] sm:$0xf]  ;;  %v3741_v7 = vld [vmem:[%s4841_s26 + $0x68] sm:$0xf0] }
  0x5a   : > { %617 = vmatpush.bf16.msra.mxu0 %v3756_v28  ;;  %v3740_v8 = vor.u32 %v4154_v5, %v3739_v4  ;;  %v3744_v9 = vor.u32 %v4153_v6, %v3741_v7  ;;  %v3747_v10 = vld [vmem:[%s4841_s26 + $0x70] sm:$0xf]  ;;  %v4156_v11 = vld [vmem:[%s4841_s26 + $0x74] sm:$0xf0]  ;;  %v4155_v12 = vld [vmem:[%s4841_s26 + $0x74] sm:$0xf] }
  0x5b   : > { %666 = vmatpush.bf16.msra.mxu1 %v3820_v31  ;;  %v3749_v13 = vld [vmem:[%s4841_s26 + $0x78] sm:$0xf0]  ;;  %v3748_v14 = vor.u32 %v4156_v11, %v3747_v10  ;;  %v328_v16 = vld [vmem:[#allocation10] ss:$8 sm:$0x3]  ;;  %s310_s8 = scalar_lea.vmem [#allocation11], %s4837_s6 }
  0x5c   : > { %715 = vmatpush.bf16.msra.mxu2 %v3760_v32  ;;  %v3752_v15 = vor.u32 %v4155_v12, %v3749_v13  ;;  %v4887_v17 = vperm.slane %v328_v16, 0  ;;  %v4890_v21 = vperm.slane %v328_v16, 1  ;;  %s3566_s9 = sshll.u32 %s310_s8, 4  ;;  %s3568_s10 = sshll.u32 %s3564_s12, 4  ;;  %s3567_s9 = int_to_ptr.vmem [resolvable:$true] %s3566_s9  ;;  %s3569_s10 = int_to_ptr.hbm [resolvable:$true] %s3568_s10 }
  0x5d   : > { %764 = vmatpush.bf16.msra.mxu3 %v3824_v35  ;;  %618 = vmatmul.bf16.vlgmr.msra.gmra.mxu0 %v3692_v36  ;;  %s3556_s14 = scalar_lea.sflag [#allocation4], %s4837_s6  ;;  %s4609_s7 = sshra.s32 %s3569_s10, 4  ;;  %s4610_s7 = int_to_ptr.hbm [resolvable:$true] %s4609_s7 }
  0x5e   : > { %667 = vmatmul.bf16.vlgmr.msra.gmra.mxu1 %v3696_v37  ;;  %s4611_s27 = scalar_lea.hbm %s4610_s7, 1  ;;  %s4615_s30 = scalar_lea.hbm %s6695_s5, 2 }
  0x5f   : > { %716 = vmatmul.bf16.vlgmr.msra.gmra.mxu2 %v3692_v36  ;;  %p4612_p1 = scmp.ne.s32.totalorder %s4610_s7, %s4611_s27  ;;  %p4616_p11 = scmp.lt.s32.totalorder %s4610_s7, %s6695_s5 }
  0x60   : > { %765 = vmatmul.bf16.vlgmr.msra.gmra.mxu3 %v3696_v37  ;;  %p4617_p9 = scmp.lt.s32.totalorder %s4615_s30, %s4611_s27 }
  0x61   : > { %p4613_p4 = pnand %p4612_p1, %p4807_p5 }
  0x62   : > { %p4618_p2 = por %p4617_p9, %p4616_p11 }
  0x63   : > { %p4614_p8 = pneg %p4613_p4 }
  0x65   : > { %p4619_p10 = pnand %p4618_p2, %p4614_p8 }
  0x6d   : > { %623 = vmatmul.bf16.gmra.mxu0 %v3700_v42 }
  0x6e   : > { %672 = vmatmul.bf16.gmra.mxu1 %v3704_v43 }
  0x6f   : > { %721 = vmatmul.bf16.gmra.mxu2 %v3700_v42 }
  0x70   : > { %770 = vmatmul.bf16.gmra.mxu3 %v3704_v43 }
  0x7d   : > { %628 = vmatmul.bf16.gmra.mxu0 %v3708_v48 }
  0x7e   : > { %677 = vmatmul.bf16.gmra.mxu1 %v3712_v49 }
  0x7f   : > { %726 = vmatmul.bf16.gmra.mxu2 %v3708_v48 }
  0x80   : > { %775 = vmatmul.bf16.gmra.mxu3 %v3712_v49 }
  0x8d   : > { %633 = vmatmul.bf16.gmra.mxu0 %v3716_v54 }
  0x8e   : > { %682 = vmatmul.bf16.gmra.mxu1 %v3720_v55 }
  0x8f   : > { %731 = vmatmul.bf16.gmra.mxu2 %v3716_v54 }
  0x90   : > { %780 = vmatmul.bf16.gmra.mxu3 %v3720_v55 }
  0x9d   : > { %638 = vmatmul.bf16.gmra.mxu0 %v3724_v60 }
  0x9e   : > { %687 = vmatmul.bf16.gmra.mxu1 %v3728_v61 }
  0x9f   : > { %736 = vmatmul.bf16.gmra.mxu2 %v3724_v60 }
  0xa0   : > { %785 = vmatmul.bf16.gmra.mxu3 %v3728_v61 }
  0xad   : > { %643 = vmatmul.bf16.gmra.mxu0 %v3732_v2 }
  0xae   : > { %692 = vmatmul.bf16.gmra.mxu1 %v3736_v3 }
  0xaf   : > { %741 = vmatmul.bf16.gmra.mxu2 %v3732_v2 }
  0xb0   : > { %790 = vmatmul.bf16.gmra.mxu3 %v3736_v3 }
  0xbd   : > { %648 = vmatmul.bf16.gmra.mxu0 %v3740_v8 }
  0xbe   : > { %697 = vmatmul.bf16.gmra.mxu1 %v3744_v9 }
  0xbf   : > { %746 = vmatmul.bf16.gmra.mxu2 %v3740_v8 }
  0xc0   : > { %795 = vmatmul.bf16.gmra.mxu3 %v3744_v9 }
  0xcd   : > { %653 = vmatmul.bf16.gmra.mxu0 %v3748_v14 }
  0xce   : > { %702 = vmatmul.bf16.gmra.mxu1 %v3752_v15 }
  0xcf   : > { %751 = vmatmul.bf16.gmra.mxu2 %v3748_v14 }
  0xd0   : > { %800 = vmatmul.bf16.gmra.mxu3 %v3752_v15 }
  0xda   : > { %v619_v18 = vpop.f32.mrf.mxu0 }
  0xdb   : > { %v668_v19 = vpop.f32.mrf.mxu1  ;;  %v620_v20 = vadd.f32 %v619_v18, %v4887_v17 }
  0xdd   : > { %v4892_v22 = vadd.f32 %v668_v19, %v620_v20 }
  0xdf   : > { %v877_v29 = vmul.f32 %v4892_v22, %v4892_v22 }
  0xe2   : > { %v717_v23 = vpop.f32.mrf.mxu2  ;;  %v621_v26 = vpop.f32.mrf.mxu0 }
  0xe3   : > { %v718_v24 = vadd.f32 %v717_v23, %v4890_v21  ;;  %v766_v25 = vpop.f32.mrf.mxu3  ;;  %v670_v27 = vpop.f32.mrf.mxu1  ;;  %v622_v30 = vadd.f32 %v621_v26, %v4887_v17 }
  0xe5   : > { %v4895_v28 = vadd.f32 %v766_v25, %v718_v24  ;;  %v4904_v35 = vadd.f32 %v670_v27, %v622_v30 }
  0xe7   : > { %v806_v31 = vadd.f32 %v4895_v28, %v4892_v22  ;;  %v878_v32 = vmul.f32 %v4895_v28, %v4895_v28  ;;  %v879_v43 = vmul.f32 %v4904_v35, %v4904_v35 }
  0xe9   : > { %807 = vadd.xlane.f32.xlu0 %v806_v31  ;;  %v909_v33 = vadd.f32 %v878_v32, %v877_v29 }
  0xea   : > { %v719_v34 = vpop.f32.mrf.mxu2  ;;  %v624_v38 = vpop.f32.mrf.mxu0 }
  0xeb   : > { %v720_v36 = vadd.f32 %v719_v34, %v4890_v21  ;;  %v768_v37 = vpop.f32.mrf.mxu3  ;;  %910 = vadd.xlane.f32.xlu1 %v909_v33  ;;  %v673_v39 = vpop.f32.mrf.mxu1  ;;  %v625_v41 = vadd.f32 %v624_v38, %v4887_v17 }
  0xed   : > { %v4907_v40 = vadd.f32 %v768_v37, %v720_v36  ;;  %v4916_v45 = vadd.f32 %v673_v39, %v625_v41 }
  0xef   : > { %v809_v42 = vadd.f32 %v4907_v40, %v4904_v35  ;;  %v880_v44 = vmul.f32 %v4907_v40, %v4907_v40  ;;  %v881_v53 = vmul.f32 %v4916_v45, %v4916_v45 }
  0xf1   : > { %810 = vadd.xlane.f32.xlu0 %v809_v42  ;;  %v912_v46 = vadd.f32 %v880_v44, %v879_v43 }
  0xf2   : > { %v722_v47 = vpop.f32.mrf.mxu2  ;;  %v626_v50 = vpop.f32.mrf.mxu0 }
  0xf3   : > { %v723_v48 = vadd.f32 %v722_v47, %v4890_v21  ;;  %v771_v49 = vpop.f32.mrf.mxu3  ;;  %913 = vadd.xlane.f32.xlu1 %v912_v46  ;;  %v675_v51 = vpop.f32.mrf.mxu1  ;;  %v627_v54 = vadd.f32 %v626_v50, %v4887_v17 }
  0xf5   : > { %v4919_v52 = vadd.f32 %v771_v49, %v723_v48  ;;  %v4928_v59 = vadd.f32 %v675_v51, %v627_v54 }
  0xf7   : > { %v812_v55 = vadd.f32 %v4919_v52, %v4916_v45  ;;  %v882_v56 = vmul.f32 %v4919_v52, %v4919_v52  ;;  %v883_v3 = vmul.f32 %v4928_v59, %v4928_v59 }
  0xf9   : > { %813 = vadd.xlane.f32.xlu2 %v812_v55  ;;  %v915_v57 = vadd.f32 %v882_v56, %v881_v53 }
  0xfa   : > { %v724_v58 = vpop.f32.mrf.mxu2  ;;  %v629_v62 = vpop.f32.mrf.mxu0 }
  0xfb   : > { %v725_v60 = vadd.f32 %v724_v58, %v4890_v21  ;;  %v773_v61 = vpop.f32.mrf.mxu3  ;;  %916 = vadd.xlane.f32.xlu0 %v915_v57  ;;  %v678_v63 = vpop.f32.mrf.mxu1  ;;  %v630_v1 = vadd.f32 %v629_v62, %v4887_v17 }
  0xfd   : > { %v4931_v0 = vadd.f32 %v773_v61, %v725_v60  ;;  %v4940_v5 = vadd.f32 %v678_v63, %v630_v1 }
  0xff   : > { %v815_v2 = vadd.f32 %v4931_v0, %v4928_v59  ;;  %v884_v4 = vmul.f32 %v4931_v0, %v4931_v0  ;;  %v885_v13 = vmul.f32 %v4940_v5, %v4940_v5 }
 0x101   : > { %816 = vadd.xlane.f32.xlu2 %v815_v2  ;;  %v918_v6 = vadd.f32 %v884_v4, %v883_v3 }
 0x102   : > { %v727_v7 = vpop.f32.mrf.mxu2  ;;  %v631_v10 = vpop.f32.mrf.mxu0 }
 0x103   : > { %v728_v8 = vadd.f32 %v727_v7, %v4890_v21  ;;  %v776_v9 = vpop.f32.mrf.mxu3  ;;  %919 = vadd.xlane.f32.xlu1 %v918_v6  ;;  %v680_v11 = vpop.f32.mrf.mxu1  ;;  %v632_v14 = vadd.f32 %v631_v10, %v4887_v17  ;;  %v3941_v10 = vld [vmem:[#allocation7 + $0x78] sm:$0xf0] }
 0x105   : > { %v4943_v12 = vadd.f32 %v776_v9, %v728_v8  ;;  %v4952_v20 = vadd.f32 %v680_v11, %v632_v14  ;;  %v4203_v9 = vld [vmem:[#allocation7 + $0x74] sm:$0xf] }
 0x106   : > { %v4219_v11 = vld [vmem:[#allocation7 + $0xf4] sm:$0xf] }
 0x107   : > { %v818_v15 = vadd.f32 %v4943_v12, %v4940_v5  ;;  %v886_v16 = vmul.f32 %v4943_v12, %v4943_v12  ;;  %v887_v31 = vmul.f32 %v4952_v20, %v4952_v20 }
 0x109   : > { %819 = vadd.xlane.f32.xlu2 %v818_v15  ;;  %v921_v18 = vadd.f32 %v886_v16, %v885_v13  ;;  %v3944_v16 = vor.u32 %v4203_v9, %v3941_v10 }
 0x10a   : > { %v729_v19 = vpop.f32.mrf.mxu2  ;;  %v634_v25 = vpop.f32.mrf.mxu0 }
 0x10b   : > { %v730_v23 = vadd.f32 %v729_v19, %v4890_v21  ;;  %v778_v24 = vpop.f32.mrf.mxu3  ;;  %922 = vadd.xlane.f32.xlu1 %v921_v18  ;;  %v683_v26 = vpop.f32.mrf.mxu1  ;;  %v635_v29 = vadd.f32 %v634_v25, %v4887_v17  ;;  %v4005_v18 = vld [vmem:[#allocation7 + $0xf8] sm:$0xf0]  ;;  %1748 = vmatpush.bf16.msrb.mxu2 %v3944_v16 }
 0x10c   : > { %v4008_v19 = vor.u32 %v4219_v11, %v4005_v18 }
 0x10d   : > { %v4955_v27 = vadd.f32 %v778_v24, %v730_v23  ;;  %v4964_v33 = vadd.f32 %v683_v26, %v635_v29 }
 0x10e   : > { %1797 = vmatpush.bf16.msrb.mxu3 %v4008_v19 }
 0x10f   : > { %v821_v30 = vadd.f32 %v4955_v27, %v4952_v20  ;;  %v888_v32 = vmul.f32 %v4955_v27, %v4955_v27  ;;  %v889_v43 = vmul.f32 %v4964_v33, %v4964_v33 }
 0x111   : > { %822 = vadd.xlane.f32.xlu0 %v821_v30  ;;  %v924_v34 = vadd.f32 %v888_v32, %v887_v31 }
 0x112   : > { %v732_v36 = vpop.f32.mrf.mxu2  ;;  %v636_v39 = vpop.f32.mrf.mxu0 }
 0x113   : > { %v733_v37 = vadd.f32 %v732_v36, %v4890_v21  ;;  %v781_v38 = vpop.f32.mrf.mxu3  ;;  %925 = vadd.xlane.f32.xlu2 %v924_v34  ;;  %v685_v41 = vpop.f32.mrf.mxu1  ;;  %v637_v44 = vadd.f32 %v636_v39, %v4887_v17  ;;  %v3939_v36 = vld [vmem:[#allocation7 + $0x70] sm:$0xf] }
 0x115   : > { %v4967_v42 = vadd.f32 %v781_v38, %v733_v37  ;;  %v4976_v50 = vadd.f32 %v685_v41, %v637_v44  ;;  %v4204_v37 = vld [vmem:[#allocation7 + $0x74] sm:$0xf0]  ;;  %v4003_v38 = vld [vmem:[#allocation7 + $0xf0] sm:$0xf] }
 0x116   : > { %v3940_v44 = vor.u32 %v4204_v37, %v3939_v36 }
 0x117   : > { %v824_v46 = vadd.f32 %v4967_v42, %v4964_v33  ;;  %v890_v47 = vmul.f32 %v4967_v42, %v4967_v42  ;;  %v891_v60 = vmul.f32 %v4976_v50, %v4976_v50 }
 0x118   : > { %1650 = vmatpush.bf16.msrb.mxu0 %v3940_v44 }
 0x119   : > { %825 = vadd.xlane.f32.xlu0 %v824_v46  ;;  %v927_v48 = vadd.f32 %v890_v47, %v889_v43  ;;  %v4220_v46 = vld [vmem:[#allocation7 + $0xf4] sm:$0xf0] }
 0x11a   : > { %v734_v49 = vpop.f32.mrf.mxu2  ;;  %v639_v54 = vpop.f32.mrf.mxu0  ;;  %v4004_v47 = vor.u32 %v4220_v46, %v4003_v38  ;;  %v4679_v38 = vmov 256.0  }
 0x11b   : > { %v735_v51 = vadd.f32 %v734_v49, %v4890_v21  ;;  %v783_v53 = vpop.f32.mrf.mxu3  ;;  %928 = vadd.xlane.f32.xlu2 %v927_v48  ;;  %v688_v55 = vpop.f32.mrf.mxu1  ;;  %v640_v57 = vadd.f32 %v639_v54, %v4887_v17  ;;  %4347 = vrcp.f32 %v4679_v38  ;;  %v4215_v38 = vld [vmem:[#allocation7 + $0xd4] sm:$0xf] }
 0x11c   : > { %1699 = vmatpush.bf16.msrb.mxu1 %v4004_v47 }
 0x11d   : > { %v4979_v56 = vadd.f32 %v783_v53, %v735_v51  ;;  %v4988_v62 = vadd.f32 %v688_v55, %v640_v57 }
 0x11f   : > { %v827_v58 = vadd.f32 %v4979_v56, %v4976_v50  ;;  %v892_v61 = vmul.f32 %v4979_v56, %v4979_v56  ;;  %v893_v8 = vmul.f32 %v4988_v62, %v4988_v62 }
 0x121   : > { %828 = vadd.xlane.f32.xlu1 %v827_v58  ;;  %v930_v63 = vadd.f32 %v892_v61, %v891_v60  ;;  %v4201_v61 = vld [vmem:[#allocation7 + $0x64] sm:$0xf] }
 0x122   : > { %v737_v1 = vpop.f32.mrf.mxu2  ;;  %v641_v4 = vpop.f32.mrf.mxu0 }
 0x123   : > { %v738_v2 = vadd.f32 %v737_v1, %v4890_v21  ;;  %v786_v3 = vpop.f32.mrf.mxu3  ;;  %931 = vadd.xlane.f32.xlu0 %v930_v63  ;;  %v690_v6 = vpop.f32.mrf.mxu1  ;;  %v642_v13 = vadd.f32 %v641_v4, %v4887_v17  ;;  %v3933_v63 = vld [vmem:[#allocation7 + $0x68] sm:$0xf0]  ;;  %v4217_v1 = vld [vmem:[#allocation7 + $0xe4] sm:$0xf] }
 0x125   : > { %v4991_v7 = vadd.f32 %v786_v3, %v738_v2  ;;  %v5000_v25 = vadd.f32 %v690_v6, %v642_v13  ;;  %v3936_v6 = vor.u32 %v4201_v61, %v3933_v63 }
 0x127   : > { %v830_v14 = vadd.f32 %v4991_v7, %v4988_v62  ;;  %v894_v15 = vmul.f32 %v4991_v7, %v4991_v7  ;;  %v895_v41 = vmul.f32 %v5000_v25, %v5000_v25  ;;  %1749 = vmatpush.bf16.msrb.mxu2 %v3936_v6 }
 0x129   : > { %831 = vadd.xlane.f32.xlu1 %v830_v14  ;;  %v933_v23 = vadd.f32 %v894_v15, %v893_v8  ;;  %v3997_v8 = vld [vmem:[#allocation7 + $0xe8] sm:$0xf0] }
 0x12a   : > { %v739_v24 = vpop.f32.mrf.mxu2  ;;  %v644_v30 = vpop.f32.mrf.mxu0  ;;  %v4000_v9 = vor.u32 %v4217_v1, %v3997_v8 }
 0x12b   : > { %v740_v26 = vadd.f32 %v739_v24, %v4890_v21  ;;  %v788_v29 = vpop.f32.mrf.mxu3  ;;  %934 = vadd.xlane.f32.xlu0 %v933_v23  ;;  %v693_v31 = vpop.f32.mrf.mxu1  ;;  %v645_v34 = vadd.f32 %v644_v30, %v4887_v17  ;;  %v3931_v30 = vld [vmem:[#allocation7 + $0x60] sm:$0xf] }
 0x12c   : > { %1798 = vmatpush.bf16.msrb.mxu3 %v4000_v9 }
 0x12d   : > { %v5003_v32 = vadd.f32 %v788_v29, %v740_v26  ;;  %v5012_v48 = vadd.f32 %v693_v31, %v645_v34  ;;  %v4202_v31 = vld [vmem:[#allocation7 + $0x64] sm:$0xf0] }
 0x12e   : > { %v3932_v34 = vor.u32 %v4202_v31, %v3931_v30 }
 0x12f   : > { %v833_v39 = vadd.f32 %v5003_v32, %v5000_v25  ;;  %v896_v43 = vmul.f32 %v5003_v32, %v5003_v32  ;;  %v897_v60 = vmul.f32 %v5012_v48, %v5012_v48 }
 0x130   : > { %1651 = vmatpush.bf16.msrb.mxu0 %v3932_v34  ;;  %v4199_v34 = vld [vmem:[#allocation7 + $0x54] sm:$0xf] }
 0x131   : > { %834 = vadd.xlane.f32.xlu2 %v833_v39  ;;  %v936_v49 = vadd.f32 %v896_v43, %v895_v41 }
 0x132   : > { %v742_v51 = vpop.f32.mrf.mxu2  ;;  %v646_v55 = vpop.f32.mrf.mxu0 }
 0x133   : > { %v743_v53 = vadd.f32 %v742_v51, %v4890_v21  ;;  %v791_v54 = vpop.f32.mrf.mxu3  ;;  %937 = vadd.xlane.f32.xlu1 %v936_v49  ;;  %v695_v57 = vpop.f32.mrf.mxu1  ;;  %v647_v2 = vadd.f32 %v646_v55, %v4887_v17 }
 0x134   : > { %v5043_v51 = vpop.eup %4347 }
 0x135   : > { %v5015_v58 = vadd.f32 %v791_v54, %v743_v53  ;;  %v5024_v13 = vadd.f32 %v695_v57, %v647_v2  ;;  %v855_v61 = vmul.f32 256.0, %v5043_v51  ;;  %vm859_vm0 = vweird.f32 %v5043_v51 }
 0x137   : > { %v836_v3 = vadd.f32 %v5015_v58, %v5012_v48  ;;  %v898_v4 = vmul.f32 %v5015_v58, %v5015_v58  ;;  %v899_v26 = vmul.f32 %v5024_v13, %v5024_v13  ;;  %v856_v8 = vsub.f32 1.0, %v855_v61 }
 0x139   : > { %837 = vadd.xlane.f32.xlu2 %v836_v3  ;;  %v939_v10 = vadd.f32 %v898_v4, %v897_v60 }
 0x13a   : > { %v744_v11 = vpop.f32.mrf.mxu2  ;;  %v649_v16 = vpop.f32.mrf.mxu0 }
 0x13b   : > { %v745_v14 = vadd.f32 %v744_v11, %v4890_v21  ;;  %v793_v15 = vpop.f32.mrf.mxu3  ;;  %940 = vadd.xlane.f32.xlu1 %v939_v10  ;;  %v698_v18 = vpop.f32.mrf.mxu1  ;;  %v650_v23 = vadd.f32 %v649_v16, %v4887_v17 }
 0x13d   : > { %v5027_v19 = vadd.f32 %v793_v15, %v745_v14  ;;  %v5036_v36 = vadd.f32 %v698_v18, %v650_v23  ;;  %v3995_v14 = vld [vmem:[#allocation7 + $0xe0] sm:$0xf]  ;;  %v4218_v15 = vld [vmem:[#allocation7 + $0xe4] sm:$0xf0] }
 0x13e   : > { %v3996_v18 = vor.u32 %v4218_v15, %v3995_v14  ;;  %v4198_v15 = vld [vmem:[#allocation7 + $0x44] sm:$0xf0] }
 0x13f   : > { %v839_v24 = vadd.f32 %v5027_v19, %v5024_v13  ;;  %v900_v29 = vmul.f32 %v5027_v19, %v5027_v19  ;;  %v901_v47 = vmul.f32 %v5036_v36, %v5036_v36 }
 0x140   : > { %1700 = vmatpush.bf16.msrb.mxu1 %v3996_v18 }
 0x141   : > { %840 = vadd.xlane.f32.xlu0 %v839_v24  ;;  %v942_v37 = vadd.f32 %v900_v29, %v899_v26  ;;  %v857_v29 = vmul.f32 %v5043_v51, %v856_v8  ;;  %v4197_v8 = vld [vmem:[#allocation7 + $0x44] sm:$0xf] }
 0x142   : > { %v747_v39 = vpop.f32.mrf.mxu2  ;;  %v651_v44 = vpop.f32.mrf.mxu0 }
 0x143   : > { %v748_v41 = vadd.f32 %v747_v39, %v4890_v21  ;;  %v796_v43 = vpop.f32.mrf.mxu3  ;;  %943 = vadd.xlane.f32.xlu2 %v942_v37  ;;  %v700_v49 = vpop.f32.mrf.mxu1  ;;  %v652_v53 = vadd.f32 %v651_v44, %v4887_v17  ;;  %v3925_v37 = vld [vmem:[#allocation7 + $0x58] sm:$0xf0]  ;;  %v3923_v44 = vld [vmem:[#allocation7 + $0x50] sm:$0xf]  ;;  %v858_v61 = vadd.f32 %v5043_v51, %v857_v29 }
 0x145   : > { %v5039_v46 = vadd.f32 %v796_v43, %v748_v41  ;;  %v5051_v63 = vadd.f32 %v700_v49, %v652_v53  ;;  %v3928_v41 = vor.u32 %v4199_v34, %v3925_v37  ;;  %v3989_v43 = vld [vmem:[#allocation7 + $0xd8] sm:$0xf0]  ;;  %v3981_v34 = vld [vmem:[#allocation7 + $0xc8] sm:$0xf0] }
 0x147   : > { %v842_v54 = vadd.f32 %v5039_v46, %v5036_v36  ;;  %v902_v55 = vmul.f32 %v5039_v46, %v5039_v46  ;;  %v903_v10 = vmul.f32 %v5051_v63, %v5051_v63  ;;  %1750 = vmatpush.bf16.msrb.mxu2 %v3928_v41 }
 0x149   : > { %843 = vadd.xlane.f32.xlu0 %v842_v54  ;;  %v945_v57 = vadd.f32 %v902_v55, %v901_v47  ;;  %v4200_v47 = vld [vmem:[#allocation7 + $0x54] sm:$0xf0]  ;;  %v3992_v54 = vor.u32 %v4215_v38, %v3989_v43 }
 0x14a   : > { %v749_v60 = vpop.f32.mrf.mxu2  ;;  %v654_v3 = vpop.f32.mrf.mxu0  ;;  %v3924_v55 = vor.u32 %v4200_v47, %v3923_v44  ;;  %v3907_v44 = vld [vmem:[#allocation7 + $0x30] sm:$0xf]  ;;  %v4196_v47 = vld [vmem:[#allocation7 + $0x34] sm:$0xf0] }
 0x14b   : > { %v750_v1 = vadd.f32 %v749_v60, %v4890_v21  ;;  %v798_v2 = vpop.f32.mrf.mxu3  ;;  %946 = vadd.xlane.f32.xlu2 %v945_v57  ;;  %v655_v6 = vadd.f32 %v654_v3, %v4887_v17  ;;  %v703_v16 = vpop.f32.mrf.mxu1  ;;  %v3987_v57 = vld [vmem:[#allocation7 + $0xd0] sm:$0xf]  ;;  %v4216_v60 = vld [vmem:[#allocation7 + $0xd4] sm:$0xf0]  ;;  %1799 = vmatpush.bf16.msrb.mxu3 %v3992_v54 }
 0x14c   : > { %1652 = vmatpush.bf16.msrb.mxu0 %v3924_v55  ;;  %v3908_v55 = vor.u32 %v4196_v47, %v3907_v44  ;;  %v3965_v44 = vld [vmem:[#allocation7 + $0xa8] sm:$0xf0] }
 0x14d   : > { %v5054_v4 = vadd.f32 %v798_v2, %v750_v1  ;;  %v5063_v23 = vadd.f32 %v703_v16, %v655_v6  ;;  %v3988_v1 = vor.u32 %v4216_v60, %v3987_v57  ;;  %v3979_v16 = vld [vmem:[#allocation7 + $0xc0] sm:$0xf]  ;;  %v4212_v57 = vld [vmem:[#allocation7 + $0xb4] sm:$0xf0]  ;;  %v4195_v60 = vld [vmem:[#allocation7 + $0x34] sm:$0xf] }
 0x14f   : > { %v845_v9 = vadd.f32 %v5054_v4, %v5051_v63  ;;  %v904_v11 = vmul.f32 %v5054_v4, %v5054_v4  ;;  %v905_v53 = vmul.f32 %v5063_v23, %v5063_v23  ;;  %1701 = vmatpush.bf16.msrb.mxu1 %v3988_v1 }
 0x151   : > { %846 = vadd.xlane.f32.xlu1 %v845_v9  ;;  %v948_v24 = vadd.f32 %v904_v11, %v903_v10  ;;  %v3917_v9 = vld [vmem:[#allocation7 + $0x48] sm:$0xf0]  ;;  %v3915_v10 = vld [vmem:[#allocation7 + $0x40] sm:$0xf] }
 0x152   : > { %v752_v26 = vpop.f32.mrf.mxu2  ;;  %v656_v39 = vpop.f32.mrf.mxu0  ;;  %v3920_v14 = vor.u32 %v4197_v8, %v3917_v9  ;;  %v3916_v29 = vor.u32 %v4198_v15, %v3915_v10 }
 0x153   : > { %v753_v30 = vadd.f32 %v752_v26, %v4890_v21  ;;  %v801_v31 = vpop.f32.mrf.mxu3  ;;  %949 = vadd.xlane.f32.xlu0 %v948_v24  ;;  %v657_v2 = vadd.f32 %v656_v39, %v4887_v17  ;;  %v4214_v17 = vld [vmem:[#allocation7 + $0xc4] sm:$0xf0]  ;;  %v705_v18 = vpop.f32.mrf.mxu1  ;;  %v5079_v26 = vsel %vm859_vm0, %v5043_v51, %v858_v61 }
 0x154   : > { %1751 = vmatpush.bf16.msrb.mxu2 %v3920_v14  ;;  %1653 = vmatpush.bf16.msrb.mxu0 %v3916_v29 }
 0x155   : > { %v5067_v49 = vadd.f32 %v801_v31, %v753_v30  ;;  %v3980_v30 = vor.u32 %v4214_v17, %v3979_v16  ;;  %v4213_v31 = vld [vmem:[#allocation7 + $0xc4] sm:$0xf]  ;;  %v5081_v37 = vadd.f32 %v705_v18, %v657_v2  ;;  %v3899_v16 = vld [vmem:[#allocation7 + $0x20] sm:$0xf]  ;;  %v4194_v17 = vld [vmem:[#allocation7 + $0x24] sm:$0xf0] }
 0x156   : > { %v3984_v39 = vor.u32 %v4213_v31, %v3981_v34  ;;  %v3963_v18 = vld [vmem:[#allocation7 + $0xa0] sm:$0xf]  ;;  %v3900_v29 = vor.u32 %v4194_v17, %v3899_v16  ;;  %v4193_v31 = vld [vmem:[#allocation7 + $0x24] sm:$0xf]  ;;  %v3901_v34 = vld [vmem:[#allocation7 + $0x28] sm:$0xf0] }
 0x157   : > { %v848_v3 = vadd.f32 %v5067_v49, %v5063_v23  ;;  %v906_v6 = vmul.f32 %v5067_v49, %v5067_v49  ;;  %1702 = vmatpush.bf16.msrb.mxu1 %v3980_v30  ;;  %v907_v10 = vmul.f32 %v5081_v37, %v5081_v37  ;;  %v4210_v30 = vld [vmem:[#allocation7 + $0xa4] sm:$0xf0] }
 0x158   : > { %1800 = vmatpush.bf16.msrb.mxu3 %v3984_v39  ;;  %1654 = vmatpush.bf16.msrb.mxu0 %v3908_v55  ;;  %v3964_v39 = vor.u32 %v4210_v30, %v3963_v18  ;;  %v3947_v30 = vld [vmem:[#allocation7 + $0x80] sm:$0xf] }
 0x159   : > { %849 = vadd.xlane.f32.xlu1 %v848_v3  ;;  %v951_v11 = vadd.f32 %v906_v6, %v905_v53  ;;  %v3971_v53 = vld [vmem:[#allocation7 + $0xb0] sm:$0xf]  ;;  %v4211_v3 = vld [vmem:[#allocation7 + $0xb4] sm:$0xf]  ;;  %v3973_v6 = vld [vmem:[#allocation7 + $0xb8] sm:$0xf0] }
 0x15a   : > { %v754_v24 = vpop.f32.mrf.mxu2  ;;  %v3972_v1 = vor.u32 %v4212_v57, %v3971_v53  ;;  %v3976_v15 = vor.u32 %v4211_v3, %v3973_v6  ;;  %v3891_v57 = vld [vmem:[#allocation7 + $0x10] sm:$0xf]  ;;  %v4208_v3 = vld [vmem:[#allocation7 + $0x94] sm:$0xf0]  ;;  %v4191_v6 = vld [vmem:[#allocation7 + $0x14] sm:$0xf] }
 0x15b   : > { %v755_v38 = vadd.f32 %v754_v24, %v4890_v21  ;;  %952 = vadd.xlane.f32.xlu0 %v951_v11  ;;  %v803_v41 = vpop.f32.mrf.mxu3  ;;  %v3909_v21 = vld [vmem:[#allocation7 + $0x38] sm:$0xf0] }
 0x15c   : > { %v808_v43 = vpop.xlane.xlu0 %807  ;;  %v3912_v2 = vor.u32 %v4195_v60, %v3909_v21  ;;  %1703 = vmatpush.bf16.msrb.mxu1 %v3972_v1  ;;  %1801 = vmatpush.bf16.msrb.mxu3 %v3976_v15  ;;  %v4192_v60 = vld [vmem:[#allocation7 + $0x14] sm:$0xf0]  ;;  %v3955_v21 = vld [vmem:[#allocation7 + $0x90] sm:$0xf] }
 0x15d   : > { %v5084_v51 = vadd.f32 %v803_v41, %v755_v38  ;;  %v5087_v54 = vmul.f32 %v5079_v26, %v808_v43  ;;  %v3904_v41 = vor.u32 %v4193_v31, %v3901_v34  ;;  %v4209_v43 = vld [vmem:[#allocation7 + $0xa4] sm:$0xf]  ;;  %1655 = vmatpush.bf16.msrb.mxu0 %v3900_v29  ;;  %v4190_v29 = vld [vmem:[#allocation7 + $0x4] sm:$0xf0] }
 0x15e   : > { %v911_v61 = vpop.xlane.xlu1 %910  ;;  %1752 = vmatpush.bf16.msrb.mxu2 %v3912_v2  ;;  %v3968_v53 = vor.u32 %v4209_v43, %v3965_v44  ;;  %v3892_v2 = vor.u32 %v4192_v60, %v3891_v57  ;;  %v4206_v34 = vld [vmem:[#allocation7 + $0x84] sm:$0xf0] }
 0x15f   : > { %6713 = vst [vmem:[#allocation16_spill] sm:$0xff] %v5084_v51  ;;  %v957_v8 = vmul.f32 %v911_v61, %v5079_v26  ;;  %v973_v9 = vmul.f32 %v5087_v54, %v5087_v54  ;;  %v851_v11 = vadd.f32 %v5084_v51, %v5081_v37  ;;  %v908_v14 = vmul.f32 %v5084_v51, %v5084_v51 }
 0x160   : > { %1704 = vmatpush.bf16.msrb.mxu1 %v3964_v39  ;;  %1802 = vmatpush.bf16.msrb.mxu3 %v3968_v53  ;;  %v3885_v39 = vld [vmem:[#allocation7 + $0x8] sm:$0xf0]  ;;  %v3948_v43 = vor.u32 %v4206_v34, %v3947_v30  ;;  %v330_v30 = vld [vmem:[#allocation10 + $0x1] ss:$8 sm:$0x3] }
 0x161   : > { %v989_v24 = vsub.f32 %v957_v8, %v973_v9  ;;  %852 = vadd.xlane.f32.xlu2 %v851_v11  ;;  %v954_v38 = vadd.f32 %v908_v14, %v907_v10  ;;  %v3956_v9 = vor.u32 %v4208_v3, %v3955_v21  ;;  %v3893_v10 = vld [vmem:[#allocation7 + $0x18] sm:$0xf0]  ;;  %v4207_v11 = vld [vmem:[#allocation7 + $0x94] sm:$0xf]  ;;  %1656 = vmatpush.bf16.msrb.mxu0 %v3892_v2  ;;  %v3949_v53 = vld [vmem:[#allocation7 + $0x88] sm:$0xf0] }
 0x162   : > { %1753 = vmatpush.bf16.msrb.mxu2 %v3904_v41  ;;  %v3957_v14 = vld [vmem:[#allocation7 + $0x98] sm:$0xf0]  ;;  %v3896_v17 = vor.u32 %v4191_v6, %v3893_v10 }
 0x163   : > { %v1005_v47 = vmax.f32 %v989_v24, 0.0  ;;  %955 = vadd.xlane.f32.xlu1 %v954_v38  ;;  %v3960_v18 = vor.u32 %v4207_v11, %v3957_v14  ;;  %v3883_v24 = vld [vmem:[#allocation7] sm:$0xf]  ;;  %v4189_v38 = vld [vmem:[#allocation7 + $0x4] sm:$0xf] }
 0x164   : > { %v811_v55 = vpop.xlane.xlu0 %810  ;;  %1705 = vmatpush.bf16.msrb.mxu1 %v3956_v9  ;;  %v3884_v31 = vor.u32 %v4190_v29, %v3883_v24  ;;  %v3888_v44 = vor.u32 %v4189_v38, %v3885_v39  ;;  %v1021_v39 = vsub.f32 %v4892_v22, %v5087_v54 }
 0x165   : > { %v5098_v61 = vadd.f32 1e-05, %v1005_v47  ;;  %v5101_v1 = vmul.f32 %v5079_v26, %v811_v55  ;;  %1803 = vmatpush.bf16.msrb.mxu3 %v3960_v18  ;;  %v4205_v47 = vld [vmem:[#allocation7 + $0x84] sm:$0xf] }
 0x166   : > { %v914_v8 = vpop.xlane.xlu1 %913  ;;  %1754 = vmatpush.bf16.msrb.mxu2 %v3896_v17  ;;  %v3952_v55 = vor.u32 %v4205_v47, %v3949_v53  ;;  %1657 = vmatpush.bf16.msrb.mxu0 %v3884_v31  ;;  %v5125_v47 = vperm.slane %v330_v30, 0  ;;  %v1022_v53 = vsub.f32 %v4895_v28, %v5087_v54 }
 0x167   : > { %4349 = vrsqrt.f32 %v5098_v61  ;;  %v958_v15 = vmul.f32 %v914_v8, %v5079_v26  ;;  %v974_v16 = vmul.f32 %v5101_v1, %v5101_v1  ;;  %vm1075_vm2 = vweird.f32 %v5098_v61 }
 0x168   : > { %1706 = vmatpush.bf16.msrb.mxu1 %v3948_v43  ;;  %v1023_v54 = vsub.f32 %v4904_v35, %v5101_v1 }
 0x169   : > { %v990_v41 = vsub.f32 %v958_v15, %v974_v16  ;;  %1804 = vmatpush.bf16.msrb.mxu3 %v3952_v55 }
 0x16a   : > { %1755 = vmatpush.bf16.msrb.mxu2 %v3888_v44 }
 0x16b   : > { %v1006_v57 = vmax.f32 %v990_v41, 0.0 }
 0x16c   : > { %v814_v60 = vpop.xlane.xlu2 %813 }
 0x16d   : > { %v4350_v21 = vpop.eup %4349  ;;  %v5108_v2 = vmul.f32 %v5079_v26, %v814_v60  ;;  %v1054_v6 = vadd.f32 1e-05, %v1006_v57  ;;  %v332_v60 = vld [vmem:[#allocation10 + $0x2] ss:$8 sm:$0x3] }
 0x16e   : > { %v1070_v3 = vmul.f32 %v4350_v21, %v5098_v61  ;;  %v917_v8 = vpop.xlane.xlu0 %916  ;;  %vm1076_vm1 = vweird.f32 %v4350_v21 }
 0x16f   : > { %v975_v9 = vmul.f32 %v5108_v2, %v5108_v2  ;;  %v959_v10 = vmul.f32 %v917_v8, %v5079_v26  ;;  %4351 = vrsqrt.f32 %v1054_v6  ;;  %vm1077_vm3 = vmor %vm1075_vm2, %vm1076_vm1  ;;  %vm1085_vm5 = vweird.f32 %v1054_v6 }
 0x170   : > { %v1071_v11 = vmul.f32 %v4350_v21, %v1070_v3 }
 0x171   : > { %v991_v14 = vsub.f32 %v959_v10, %v975_v9  ;;  %v5130_v9 = vperm.slane %v330_v30, 1  ;;  %v5132_v10 = vperm.slane %v332_v60, 0  ;;  %v5141_v30 = vperm.slane %v332_v60, 1 }
 0x172   : > { %v1072_v15 = vmul.f32 0.5, %v1071_v11 }
 0x173   : > { %v1007_v16 = vmax.f32 %v991_v14, 0.0 }
 0x174   : > { %v1073_v17 = vsub.f32 1.5, %v1072_v15  ;;  %v817_v18 = vpop.xlane.xlu2 %816 }
 0x175   : > { %v5114_v24 = vadd.f32 1e-05, %v1007_v16  ;;  %v5117_v29 = vmul.f32 %v5079_v26, %v817_v18  ;;  %v4352_v31 = vpop.eup %4351 }
 0x176   : > { %v1074_v34 = vmul.f32 %v4350_v21, %v1073_v17  ;;  %v920_v38 = vpop.xlane.xlu1 %919  ;;  %v1080_v41 = vmul.f32 %v4352_v31, %v1054_v6  ;;  %vm1086_vm4 = vweird.f32 %v4352_v31 }
 0x177   : > { %4353 = vrsqrt.f32 %v5114_v24  ;;  %v976_v44 = vmul.f32 %v5117_v29, %v5117_v29  ;;  %v960_v61 = vmul.f32 %v920_v38, %v5079_v26  ;;  %vm1087_vm6 = vmor %vm1085_vm5, %vm1086_vm4  ;;  %vm1095_vm8 = vweird.f32 %v5114_v24 }
 0x178   : > { %v1078_v43 = vsel %vm1077_vm3, %v4350_v21, %v1074_v34  ;;  %v1081_v57 = vmul.f32 %v4352_v31, %v1080_v41  ;;  %v1024_v41 = vsub.f32 %v4907_v40, %v5101_v1  ;;  %v1025_v40 = vsub.f32 %v4916_v45, %v5108_v2 }
 0x179   : > { %v1229_v55 = vmul.f32 %v1078_v43, %v1021_v39  ;;  %v1230_v3 = vmul.f32 %v1078_v43, %v1022_v53  ;;  %v992_v8 = vsub.f32 %v960_v61, %v976_v44 }
 0x17a   : > { %v1082_v22 = vmul.f32 0.5, %v1081_v57 }
 0x17b   : > { %v1008_v15 = vmax.f32 %v992_v8, 0.0  ;;  %v1266_v28 = vmul.f32 %v5125_v47, %v1229_v55  ;;  %v1267_v39 = vmul.f32 %v5130_v9, %v1230_v3 }
 0x17c   : > { %v820_v21 = vpop.xlane.xlu2 %819  ;;  %v1083_v14 = vsub.f32 1.5, %v1082_v22 }
 0x17d   : > { %v4354_v11 = vpop.eup %4353  ;;  %v5135_v16 = vmul.f32 %v5079_v26, %v820_v21  ;;  %v5143_v38 = vadd.f32 1e-05, %v1008_v15  ;;  %v1303_v6 = vadd.f32 %v5132_v10, %v1266_v28  ;;  %v1304_v1 = vadd.f32 %v5141_v30, %v1267_v39 }
 0x17e   : > { %v1090_v17 = vmul.f32 %v4354_v11, %v5114_v24  ;;  %v923_v18 = vpop.xlane.xlu1 %922  ;;  %v1084_v34 = vmul.f32 %v4352_v31, %v1083_v14  ;;  %vm1096_vm7 = vweird.f32 %v4354_v11  ;;  %v1026_v39 = vsub.f32 %v4919_v52, %v5108_v2 }
 0x17f   : > { %v977_v35 = vmul.f32 %v5135_v16, %v5135_v16  ;;  %v961_v44 = vmul.f32 %v923_v18, %v5079_v26  ;;  %4355 = vrsqrt.f32 %v5143_v38  ;;  %vm1335_vm9 = vcmp.ge.f32.partialorder %v1303_v6, 0.0  ;;  %vm1097_vm10 = vmor %vm1095_vm8, %vm1096_vm7 }
 0x180   : > { %v1091_v43 = vmul.f32 %v4354_v11, %v1090_v17  ;;  %v1088_v53 = vsel %vm1087_vm6, %v4352_v31, %v1084_v34  ;;  %v1367_v15 = vmul.f32 0.01, %v1303_v6  ;;  %vm1336_vm11 = vcmp.ge.f32.partialorder %v1304_v1, 0.0 }
 0x181   : > { %v1231_v55 = vmul.f32 %v1088_v53, %v1023_v54  ;;  %v1232_v57 = vmul.f32 %v1088_v53, %v1024_v41  ;;  %v993_v60 = vsub.f32 %v961_v44, %v977_v35  ;;  %vm1105_vm15 = vweird.f32 %v5143_v38 }
 0x182   : > { %v1092_v61 = vmul.f32 0.5, %v1091_v43  ;;  %v1368_v43 = vmul.f32 0.01, %v1304_v1 }
 0x183   : > { %v1009_v22 = vmax.f32 %v993_v60, 0.0  ;;  %v1268_v21 = vmul.f32 %v5125_v47, %v1231_v55  ;;  %v1269_v31 = vmul.f32 %v5130_v9, %v1232_v57  ;;  %v1399_v57 = vsel %vm1335_vm9, %v1303_v6, %v1367_v15 }
 0x184   : > { %v1093_v3 = vsub.f32 1.5, %v1092_v61  ;;  %v823_v8 = vpop.xlane.xlu0 %822 }
 0x185   : > { %v5161_v14 = vmul.f32 %v5079_v26, %v823_v8  ;;  %v5163_v54 = vadd.f32 1e-05, %v1009_v22  ;;  %v1305_v17 = vadd.f32 %v5132_v10, %v1268_v21  ;;  %v1306_v18 = vadd.f32 %v5141_v30, %v1269_v31  ;;  %v4356_v34 = vpop.eup %4355 }
 0x186   : > { %v1094_v28 = vmul.f32 %v4354_v11, %v1093_v3  ;;  %v926_v45 = vpop.xlane.xlu2 %925  ;;  %v1100_v44 = vmul.f32 %v4356_v34, %v5143_v38  ;;  %v1400_v22 = vsel %vm1336_vm11, %v1304_v1, %v1368_v43  ;;  %vm1106_vm14 = vweird.f32 %v4356_v34 }
 0x187   : > { %v962_v24 = vmul.f32 %v926_v45, %v5079_v26  ;;  %v978_v41 = vmul.f32 %v5161_v14, %v5161_v14  ;;  %4357 = vrsqrt.f32 %v5163_v54  ;;  %vm1337_vm12 = vcmp.ge.f32.partialorder %v1305_v17, 0.0  ;;  %vm1107_vm0 = vmor %vm1105_vm15, %vm1106_vm14 }
 0x188   : > { %v1098_v35 = vsel %vm1097_vm10, %v4354_v11, %v1094_v28  ;;  %v1369_v55 = vmul.f32 0.01, %v1305_v17  ;;  %v1101_v52 = vmul.f32 %v4356_v34, %v1100_v44  ;;  %vm1338_vm13 = vcmp.ge.f32.partialorder %v1306_v18, 0.0 }
 0x189   : > { %v994_v53 = vsub.f32 %v962_v24, %v978_v41  ;;  %v1370_v2 = vmul.f32 0.01, %v1306_v18  ;;  %v1233_v61 = vmul.f32 %v1098_v35, %v1025_v40  ;;  %v1234_v8 = vmul.f32 %v1098_v35, %v1026_v39 }
 0x18a   : > { %v1401_v3 = vsel %vm1337_vm12, %v1305_v17, %v1369_v55  ;;  %v1102_v21 = vmul.f32 0.5, %v1101_v52  ;;  %v1027_v35 = vsub.f32 %v4928_v59, %v5117_v29  ;;  %v1028_v55 = vsub.f32 %v4931_v0, %v5117_v29 }
 0x18b   : > { %v1010_v60 = vmax.f32 %v994_v53, 0.0  ;;  %v1431_v11 = vpack.c.bf16 %v1401_v3, %v1399_v57  ;;  %v1402_v31 = vsel %vm1338_vm13, %v1306_v18, %v1370_v2  ;;  %v1270_v45 = vmul.f32 %v5125_v47, %v1233_v61 }
 0x18c   : > { %v826_v28 = vpop.xlane.xlu0 %825  ;;  %v1432_v24 = vpack.c.bf16 %v1402_v31, %v1400_v22  ;;  %v1103_v15 = vsub.f32 1.5, %v1102_v21  ;;  %v1271_v18 = vmul.f32 %v5130_v9, %v1234_v8  ;;  %v1029_v3 = vsub.f32 %v4940_v5, %v5135_v16 }
 0x18d   : > { %v5177_v51 = vadd.f32 1e-05, %v1010_v60  ;;  %v5180_v41 = vmul.f32 %v5079_v26, %v826_v28  ;;  %v4358_v6 = vpop.eup %4357  ;;  %1658 = vmatmul.bf16.vlgmr.msrb.gmra.mxu0 %v1431_v11  ;;  %1756 = vmatmul.bf16.vlgmr.msrb.gmra.mxu2 %v1431_v11  ;;  %v1307_v1 = vadd.f32 %v5132_v10, %v1270_v45  ;;  %v1030_v59 = vsub.f32 %v4943_v12, %v5135_v16 }
 0x18e   : > { %v929_v40 = vpop.xlane.xlu2 %928  ;;  %v1110_v17 = vmul.f32 %v4358_v6, %v5163_v54  ;;  %1707 = vmatmul.bf16.vlgmr.msrb.gmra.mxu1 %v1432_v24  ;;  %1805 = vmatmul.bf16.vlgmr.msrb.gmra.mxu3 %v1432_v24  ;;  %v1104_v39 = vmul.f32 %v4356_v34, %v1103_v15  ;;  %v1308_v38 = vadd.f32 %v5141_v30, %v1271_v18  ;;  %vm1116_vm2 = vweird.f32 %v4358_v6 }
 0x18f   : > { %4359 = vrsqrt.f32 %v5177_v51  ;;  %v963_v43 = vmul.f32 %v929_v40, %v5079_v26  ;;  %v979_v53 = vmul.f32 %v5180_v41, %v5180_v41  ;;  %vm1339_vm1 = vcmp.ge.f32.partialorder %v1307_v1, 0.0 }
 0x190   : > { %v1111_v44 = vmul.f32 %v4358_v6, %v1110_v17  ;;  %v1108_v57 = vsel %vm1107_vm0, %v4356_v34, %v1104_v39  ;;  %v1371_v52 = vmul.f32 0.01, %v1307_v1  ;;  %vm1115_vm3 = vweird.f32 %v5163_v54 }
 0x191   : > { %v995_v61 = vsub.f32 %v963_v43, %v979_v53  ;;  %v1235_v60 = vmul.f32 %v1108_v57, %v1027_v35  ;;  %v1236_v8 = vmul.f32 %v1108_v57, %v1028_v55  ;;  %vm1340_vm4 = vcmp.ge.f32.partialorder %v1308_v38, 0.0  ;;  %vm1117_vm5 = vmor %vm1115_vm3, %vm1116_vm2 }
 0x192   : > { %v1112_v2 = vmul.f32 0.5, %v1111_v44  ;;  %v1403_v5 = vsel %vm1339_vm1, %v1307_v1, %v1371_v52  ;;  %v1372_v24 = vmul.f32 0.01, %v1308_v38  ;;  %vm1125_vm9 = vweird.f32 %v5177_v51 }
 0x193   : > { %v1011_v0 = vmax.f32 %v995_v61, 0.0  ;;  %v1272_v34 = vmul.f32 %v5125_v47, %v1235_v60  ;;  %v1273_v12 = vmul.f32 %v5130_v9, %v1236_v8 }
 0x194   : > { %v829_v22 = vpop.xlane.xlu1 %828  ;;  %v1113_v11 = vsub.f32 1.5, %v1112_v2  ;;  %v1404_v60 = vsel %vm1340_vm4, %v1308_v38, %v1372_v24 }
 0x195   : > { %v4360_v21 = vpop.eup %4359  ;;  %v5200_v29 = vmul.f32 %v5079_v26, %v829_v22  ;;  %v5207_v45 = vadd.f32 1e-05, %v1011_v0  ;;  %v1309_v17 = vadd.f32 %v5132_v10, %v1272_v34  ;;  %v1310_v1 = vadd.f32 %v5141_v30, %v1273_v12 }
 0x196   : > { %v1120_v31 = vmul.f32 %v4360_v21, %v5177_v51  ;;  %v932_v28 = vpop.xlane.xlu0 %931  ;;  %v1114_v16 = vmul.f32 %v4358_v6, %v1113_v11  ;;  %vm1126_vm6 = vweird.f32 %v4360_v21  ;;  %v1032_v51 = vsub.f32 %v4955_v27, %v5161_v14 }
 0x197   : > { %v980_v40 = vmul.f32 %v5200_v29, %v5200_v29  ;;  %v964_v54 = vmul.f32 %v932_v28, %v5079_v26  ;;  %4361 = vrsqrt.f32 %v5207_v45  ;;  %vm1341_vm7 = vcmp.ge.f32.partialorder %v1309_v17, 0.0  ;;  %vm1127_vm10 = vmor %vm1125_vm9, %vm1126_vm6 }
 0x198   : > { %v1121_v15 = vmul.f32 %v4360_v21, %v1120_v31  ;;  %v1118_v18 = vsel %vm1117_vm5, %v4358_v6, %v1114_v16  ;;  %v1373_v35 = vmul.f32 0.01, %v1309_v17  ;;  %vm1342_vm8 = vcmp.ge.f32.partialorder %v1310_v1, 0.0 }
 0x199   : > { %v996_v43 = vsub.f32 %v964_v54, %v980_v40  ;;  %v1374_v44 = vmul.f32 0.01, %v1310_v1  ;;  %v1237_v53 = vmul.f32 %v1118_v18, %v1029_v3  ;;  %v1238_v55 = vmul.f32 %v1118_v18, %v1030_v59 }
 0x19a   : > { %v1122_v39 = vmul.f32 0.5, %v1121_v15  ;;  %v1405_v61 = vsel %vm1341_vm7, %v1309_v17, %v1373_v35  ;;  %v1031_v28 = vsub.f32 %v4952_v20, %v5161_v14  ;;  %v1033_v27 = vsub.f32 %v4964_v33, %v5180_v41 }
 0x19b   : > { %v1012_v52 = vmax.f32 %v996_v43, 0.0  ;;  %v1433_v22 = vpack.c.bf16 %v1405_v61, %v1403_v5  ;;  %v1406_v8 = vsel %vm1342_vm8, %v1310_v1, %v1374_v44  ;;  %v1274_v11 = vmul.f32 %v5125_v47, %v1237_v53 }
 0x19c   : > { %v1123_v57 = vsub.f32 1.5, %v1122_v39  ;;  %v832_v2 = vpop.xlane.xlu1 %831  ;;  %v1434_v3 = vpack.c.bf16 %v1406_v8, %v1404_v60  ;;  %v1275_v5 = vmul.f32 %v5130_v9, %v1238_v55  ;;  %v1034_v14 = vsub.f32 %v4967_v42, %v5180_v41 }
 0x19d   : > { %v5218_v6 = vmul.f32 %v5079_v26, %v832_v2  ;;  %v5222_v34 = vadd.f32 1e-05, %v1012_v52  ;;  %v4362_v31 = vpop.eup %4361  ;;  %1663 = vmatmul.bf16.gmra.mxu0 %v1433_v22  ;;  %1761 = vmatmul.bf16.gmra.mxu2 %v1433_v22  ;;  %v1311_v15 = vadd.f32 %v5132_v10, %v1274_v11  ;;  %vm1135_vm13 = vweird.f32 %v5207_v45 }
 0x19e   : > { %v1124_v0 = vmul.f32 %v4360_v21, %v1123_v57  ;;  %v935_v59 = vpop.xlane.xlu0 %934  ;;  %v1130_v16 = vmul.f32 %v4362_v31, %v5207_v45  ;;  %1712 = vmatmul.bf16.gmra.mxu1 %v1434_v3  ;;  %1810 = vmatmul.bf16.gmra.mxu3 %v1434_v3  ;;  %v1312_v1 = vadd.f32 %v5141_v30, %v1275_v5  ;;  %vm1136_vm11 = vweird.f32 %v4362_v31 }
 0x19f   : > { %v981_v38 = vmul.f32 %v5218_v6, %v5218_v6  ;;  %4363 = vrsqrt.f32 %v5222_v34  ;;  %v965_v20 = vmul.f32 %v935_v59, %v5079_v26  ;;  %v1375_v55 = vmul.f32 0.01, %v1311_v15  ;;  %vm1137_vm15 = vmor %vm1135_vm13, %vm1136_vm11 }
 0x1a0   : > { %v1128_v12 = vsel %vm1127_vm10, %v4360_v21, %v1124_v0  ;;  %v1131_v40 = vmul.f32 %v4362_v31, %v1130_v16  ;;  %vm1343_vm12 = vcmp.ge.f32.partialorder %v1311_v15, 0.0  ;;  %vm1344_vm14 = vcmp.ge.f32.partialorder %v1312_v1, 0.0 }
 0x1a1   : > { %v1239_v24 = vmul.f32 %v1128_v12, %v1031_v28  ;;  %v1240_v54 = vmul.f32 %v1128_v12, %v1032_v51  ;;  %v997_v17 = vsub.f32 %v965_v20, %v981_v38  ;;  %v1376_v8 = vmul.f32 0.01, %v1312_v1 }
 0x1a2   : > { %v1132_v21 = vmul.f32 0.5, %v1131_v40  ;;  %v1407_v0 = vsel %vm1343_vm12, %v1311_v15, %v1375_v55  ;;  %vm1145_vm3 = vweird.f32 %v5222_v34 }
 0x1a3   : > { %v1276_v18 = vmul.f32 %v5125_v47, %v1239_v24  ;;  %v1277_v43 = vmul.f32 %v5130_v9, %v1240_v54  ;;  %v1013_v35 = vmax.f32 %v997_v17, 0.0  ;;  %v1408_v24 = vsel %vm1344_vm14, %v1312_v1, %v1376_v8 }
 0x1a4   : > { %v835_v39 = vpop.xlane.xlu2 %834  ;;  %v1133_v52 = vsub.f32 1.5, %v1132_v21 }
 0x1a5   : > { %v5244_v44 = vmul.f32 %v5079_v26, %v835_v39  ;;  %v1313_v53 = vadd.f32 %v5132_v10, %v1276_v18  ;;  %v4364_v57 = vpop.eup %4363  ;;  %v1314_v33 = vadd.f32 %v5141_v30, %v1277_v43  ;;  %v5250_v41 = vadd.f32 1e-05, %v1013_v35 }
 0x1a6   : > { %v938_v2 = vpop.xlane.xlu1 %937  ;;  %v1140_v42 = vmul.f32 %v4364_v57, %v5222_v34  ;;  %v1134_v61 = vmul.f32 %v4362_v31, %v1133_v52  ;;  %vm1146_vm2 = vweird.f32 %v4364_v57  ;;  %v1035_v43 = vsub.f32 %v4976_v50, %v5200_v29 }
 0x1a7   : > { %v982_v60 = vmul.f32 %v5244_v44, %v5244_v44  ;;  %v966_v22 = vmul.f32 %v938_v2, %v5079_v26  ;;  %4365 = vrsqrt.f32 %v5250_v41  ;;  %vm1345_vm0 = vcmp.ge.f32.partialorder %v1313_v53, 0.0  ;;  %vm1147_vm4 = vmor %vm1145_vm3, %vm1146_vm2 }
 0x1a8   : > { %v1141_v11 = vmul.f32 %v4364_v57, %v1140_v42  ;;  %v1138_v3 = vsel %vm1137_vm15, %v4362_v31, %v1134_v61  ;;  %v1377_v59 = vmul.f32 0.01, %v1313_v53  ;;  %vm1346_vm1 = vcmp.ge.f32.partialorder %v1314_v33, 0.0 }
 0x1a9   : > { %v998_v45 = vsub.f32 %v966_v22, %v982_v60  ;;  %v1378_v38 = vmul.f32 0.01, %v1314_v33  ;;  %v1241_v5 = vmul.f32 %v1138_v3, %v1033_v27  ;;  %v1242_v51 = vmul.f32 %v1138_v3, %v1034_v14 }
 0x1aa   : > { %v1142_v28 = vmul.f32 0.5, %v1141_v11  ;;  %v1409_v20 = vsel %vm1345_vm0, %v1313_v53, %v1377_v59  ;;  %v1036_v35 = vsub.f32 %v4979_v56, %v5200_v29  ;;  %v1037_v56 = vsub.f32 %v4988_v62, %v5218_v6 }
 0x1ab   : > { %v1014_v12 = vmax.f32 %v998_v45, 0.0  ;;  %v1435_v17 = vpack.c.bf16 %v1409_v20, %v1407_v0  ;;  %v1410_v15 = vsel %vm1346_vm1, %v1314_v33, %v1378_v38  ;;  %v1278_v39 = vmul.f32 %v5125_v47, %v1241_v5 }
 0x1ac   : > { %v838_v16 = vpop.xlane.xlu2 %837  ;;  %v1143_v40 = vsub.f32 1.5, %v1142_v28  ;;  %v1436_v18 = vpack.c.bf16 %v1410_v15, %v1408_v24  ;;  %v1279_v1 = vmul.f32 %v5130_v9, %v1242_v51  ;;  %v1038_v60 = vsub.f32 %v4991_v7, %v5218_v6 }
 0x1ad   : > { %v5258_v54 = vmul.f32 %v5079_v26, %v838_v16  ;;  %v5260_v31 = vadd.f32 1e-05, %v1014_v12  ;;  %v4366_v27 = vpop.eup %4365  ;;  %1668 = vmatmul.bf16.gmra.mxu0 %v1435_v17  ;;  %1766 = vmatmul.bf16.gmra.mxu2 %v1435_v17  ;;  %v1315_v2 = vadd.f32 %v5132_v10, %v1278_v39  ;;  %vm1155_vm7 = vweird.f32 %v5250_v41 }
 0x1ae   : > { %v941_v21 = vpop.xlane.xlu1 %940  ;;  %v1144_v14 = vmul.f32 %v4364_v57, %v1143_v40  ;;  %v1150_v53 = vmul.f32 %v4366_v27, %v5250_v41  ;;  %1717 = vmatmul.bf16.gmra.mxu1 %v1436_v18  ;;  %1815 = vmatmul.bf16.gmra.mxu3 %v1436_v18  ;;  %v1316_v61 = vadd.f32 %v5141_v30, %v1279_v1  ;;  %vm1156_vm5 = vweird.f32 %v4366_v27 }
 0x1af   : > { %4367 = vrsqrt.f32 %v5260_v31  ;;  %v983_v34 = vmul.f32 %v5258_v54, %v5258_v54  ;;  %v967_v52 = vmul.f32 %v941_v21, %v5079_v26  ;;  %v1379_v45 = vmul.f32 0.01, %v1315_v2  ;;  %vm1157_vm9 = vmor %vm1155_vm7, %vm1156_vm5 }
 0x1b0   : > { %v1148_v55 = vsel %vm1147_vm4, %v4364_v57, %v1144_v14  ;;  %v1151_v50 = vmul.f32 %v4366_v27, %v1150_v53  ;;  %vm1347_vm6 = vcmp.ge.f32.partialorder %v1315_v2, 0.0  ;;  %vm1348_vm8 = vcmp.ge.f32.partialorder %v1316_v61, 0.0 }
 0x1b1   : > { %v1243_v33 = vmul.f32 %v1148_v55, %v1035_v43  ;;  %v1244_v42 = vmul.f32 %v1148_v55, %v1036_v35  ;;  %v999_v29 = vsub.f32 %v967_v52, %v983_v34  ;;  %v1380_v20 = vmul.f32 0.01, %v1316_v61 }
 0x1b2   : > { %v1152_v57 = vmul.f32 0.5, %v1151_v50  ;;  %v1411_v40 = vsel %vm1347_vm6, %v1315_v2, %v1379_v45  ;;  %vm1165_vm13 = vweird.f32 %v5260_v31 }
 0x1b3   : > { %v1280_v8 = vmul.f32 %v5125_v47, %v1243_v33  ;;  %v1281_v11 = vmul.f32 %v5130_v9, %v1244_v42  ;;  %v1015_v0 = vmax.f32 %v999_v29, 0.0  ;;  %v1412_v35 = vsel %vm1348_vm8, %v1316_v61, %v1380_v20 }
 0x1b4   : > { %v841_v22 = vpop.xlane.xlu0 %840  ;;  %v1153_v62 = vsub.f32 1.5, %v1152_v57  ;;  %v1040_v57 = vsub.f32 %v5003_v32, %v5244_v44  ;;  %v1041_v32 = vsub.f32 %v5012_v48, %v5258_v54 }
 0x1b5   : > { %v5284_v3 = vmul.f32 %v5079_v26, %v841_v22  ;;  %v4368_v59 = vpop.eup %4367  ;;  %v1317_v38 = vadd.f32 %v5132_v10, %v1280_v8  ;;  %v1318_v7 = vadd.f32 %v5141_v30, %v1281_v11  ;;  %v5290_v5 = vadd.f32 1e-05, %v1015_v0 }
 0x1b6   : > { %v944_v28 = vpop.xlane.xlu2 %943  ;;  %v1160_v6 = vmul.f32 %v4368_v59, %v5260_v31  ;;  %v1154_v51 = vmul.f32 %v4366_v27, %v1153_v62  ;;  %vm1166_vm12 = vweird.f32 %v4368_v59 }
 0x1b7   : > { %v968_v12 = vmul.f32 %v944_v28, %v5079_v26  ;;  %v984_v16 = vmul.f32 %v5284_v3, %v5284_v3  ;;  %4369 = vrsqrt.f32 %v5290_v5  ;;  %vm1349_vm10 = vcmp.ge.f32.partialorder %v1317_v38, 0.0  ;;  %vm1167_vm14 = vmor %vm1165_vm13, %vm1166_vm12 }
 0x1b8   : > { %v1161_v24 = vmul.f32 %v4368_v59, %v1160_v6  ;;  %v1158_v41 = vsel %vm1157_vm9, %v4366_v27, %v1154_v51  ;;  %v1381_v15 = vmul.f32 0.01, %v1317_v38  ;;  %vm1350_vm11 = vcmp.ge.f32.partialorder %v1318_v7, 0.0 }
 0x1b9   : > { %v1000_v17 = vsub.f32 %v968_v12, %v984_v16  ;;  %v1245_v18 = vmul.f32 %v1158_v41, %v1037_v56  ;;  %v1246_v21 = vmul.f32 %v1158_v41, %v1038_v60  ;;  %v1382_v14 = vmul.f32 0.01, %v1318_v7 }
 0x1ba   : > { %v1162_v39 = vmul.f32 0.5, %v1161_v24  ;;  %v1413_v43 = vsel %vm1349_vm10, %v1317_v38, %v1381_v15  ;;  %v1039_v60 = vsub.f32 %v5000_v25, %v5244_v44  ;;  %v1042_v38 = vsub.f32 %v5015_v58, %v5258_v54 }
 0x1bb   : > { %v1016_v1 = vmax.f32 %v1000_v17, 0.0  ;;  %v1437_v34 = vpack.c.bf16 %v1413_v43, %v1411_v40  ;;  %v1414_v52 = vsel %vm1350_vm11, %v1318_v7, %v1382_v14  ;;  %v1282_v42 = vmul.f32 %v5125_v47, %v1245_v18 }
 0x1bc   : > { %v844_v53 = vpop.xlane.xlu0 %843  ;;  %v1163_v55 = vsub.f32 1.5, %v1162_v39  ;;  %v1438_v2 = vpack.c.bf16 %v1414_v52, %v1412_v35  ;;  %v1283_v61 = vmul.f32 %v5130_v9, %v1246_v21  ;;  %vm1175_vm1 = vweird.f32 %v5290_v5 }
 0x1bd   : > { %v5299_v50 = vmul.f32 %v5079_v26, %v844_v53  ;;  %v5301_v27 = vadd.f32 1e-05, %v1016_v1  ;;  %v4370_v56 = vpop.eup %4369  ;;  %1673 = vmatmul.bf16.gmra.mxu0 %v1437_v34  ;;  %1771 = vmatmul.bf16.gmra.mxu2 %v1437_v34  ;;  %v1319_v0 = vadd.f32 %v5132_v10, %v1282_v42 }
 0x1be   : > { %v947_v33 = vpop.xlane.xlu2 %946  ;;  %v1164_v29 = vmul.f32 %v4368_v59, %v1163_v55  ;;  %v1170_v22 = vmul.f32 %v4370_v56, %v5290_v5  ;;  %1722 = vmatmul.bf16.gmra.mxu1 %v1438_v2  ;;  %1820 = vmatmul.bf16.gmra.mxu3 %v1438_v2  ;;  %v1320_v28 = vadd.f32 %v5141_v30, %v1283_v61  ;;  %vm1176_vm15 = vweird.f32 %v4370_v56 }
 0x1bf   : > { %4371 = vrsqrt.f32 %v5301_v27  ;;  %v969_v31 = vmul.f32 %v947_v33, %v5079_v26  ;;  %v985_v11 = vmul.f32 %v5299_v50, %v5299_v50  ;;  %v1383_v20 = vmul.f32 0.01, %v1319_v0  ;;  %vm1177_vm3 = vmor %vm1175_vm1, %vm1176_vm15 }
 0x1c0   : > { %v1168_v8 = vsel %vm1167_vm14, %v4368_v59, %v1164_v29  ;;  %v1171_v62 = vmul.f32 %v4370_v56, %v1170_v22  ;;  %vm1351_vm0 = vcmp.ge.f32.partialorder %v1319_v0, 0.0  ;;  %vm1352_vm2 = vcmp.ge.f32.partialorder %v1320_v28, 0.0 }
 0x1c1   : > { %v1247_v25 = vmul.f32 %v1168_v8, %v1039_v60  ;;  %v1248_v45 = vmul.f32 %v1168_v8, %v1040_v57  ;;  %v1001_v44 = vsub.f32 %v969_v31, %v985_v11  ;;  %v1384_v39 = vmul.f32 0.01, %v1320_v28 }
 0x1c2   : > { %v1172_v59 = vmul.f32 0.5, %v1171_v62  ;;  %v1415_v1 = vsel %vm1351_vm0, %v1319_v0, %v1383_v20  ;;  %v1043_v0 = vsub.f32 %v5024_v13, %v5284_v3  ;;  %vm1185_vm7 = vweird.f32 %v5301_v27 }
 0x1c3   : > { %v1284_v6 = vmul.f32 %v5125_v47, %v1247_v25  ;;  %v1285_v51 = vmul.f32 %v5130_v9, %v1248_v45  ;;  %v1017_v12 = vmax.f32 %v1001_v44, 0.0  ;;  %v1416_v29 = vsel %vm1352_vm2, %v1320_v28, %v1384_v39 }
 0x1c4   : > { %v847_v7 = vpop.xlane.xlu1 %846  ;;  %v1173_v48 = vsub.f32 1.5, %v1172_v59  ;;  %v1044_v45 = vsub.f32 %v5027_v19, %v5284_v3  ;;  %v1045_v20 = vsub.f32 %v5036_v36, %v5299_v50 }
 0x1c5   : > { %v5325_v16 = vmul.f32 %v5079_v26, %v847_v7  ;;  %v4372_v24 = vpop.eup %4371  ;;  %v1321_v41 = vadd.f32 %v5132_v10, %v1284_v6  ;;  %v1322_v58 = vadd.f32 %v5141_v30, %v1285_v51  ;;  %v5331_v17 = vadd.f32 1e-05, %v1017_v12 }
 0x1c6   : > { %v950_v40 = vpop.xlane.xlu0 %949  ;;  %v1180_v54 = vmul.f32 %v4372_v24, %v5301_v27  ;;  %v1174_v15 = vmul.f32 %v4370_v56, %v1173_v48  ;;  %vm1186_vm6 = vweird.f32 %v4372_v24 }
 0x1c7   : > { %v986_v18 = vmul.f32 %v5325_v16, %v5325_v16  ;;  %v970_v21 = vmul.f32 %v950_v40, %v5079_v26  ;;  %4373 = vrsqrt.f32 %v5331_v17  ;;  %vm1353_vm4 = vcmp.ge.f32.partialorder %v1321_v41, 0.0  ;;  %vm1187_vm8 = vmor %vm1185_vm7, %vm1186_vm6 }
 0x1c8   : > { %v1181_v14 = vmul.f32 %v4372_v24, %v1180_v54  ;;  %v1178_v5 = vsel %vm1177_vm3, %v4370_v56, %v1174_v15  ;;  %v1385_v35 = vmul.f32 0.01, %v1321_v41  ;;  %vm1354_vm5 = vcmp.ge.f32.partialorder %v1322_v58, 0.0 }
 0x1c9   : > { %v1002_v43 = vsub.f32 %v970_v21, %v986_v18  ;;  %v1249_v53 = vmul.f32 %v1178_v5, %v1041_v32  ;;  %v1386_v34 = vmul.f32 0.01, %v1322_v58  ;;  %v1250_v52 = vmul.f32 %v1178_v5, %v1042_v38 }
 0x1ca   : > { %v1182_v55 = vmul.f32 0.5, %v1181_v14  ;;  %v1417_v42 = vsel %vm1353_vm4, %v1321_v41, %v1385_v35  ;;  %vm1195_vm10 = vweird.f32 %v5331_v17 }
 0x1cb   : > { %v1018_v2 = vmax.f32 %v1002_v43, 0.0  ;;  %v1439_v57 = vpack.c.bf16 %v1417_v42, %v1415_v1  ;;  %v1418_v22 = vsel %vm1354_vm5, %v1322_v58, %v1386_v34  ;;  %v1286_v32 = vmul.f32 %v5125_v47, %v1249_v53 }
 0x1cc   : > { %v850_v33 = vpop.xlane.xlu1 %849  ;;  %v1183_v61 = vsub.f32 1.5, %v1182_v55  ;;  %v1440_v8 = vpack.c.bf16 %v1418_v22, %v1416_v29  ;;  %v1287_v28 = vmul.f32 %v5130_v9, %v1250_v52 }
 0x1cd   : > { %v5340_v60 = vmul.f32 %v5079_v26, %v850_v33  ;;  %v5342_v56 = vadd.f32 1e-05, %v1018_v2  ;;  %v4374_v11 = vpop.eup %4373  ;;  %1678 = vmatmul.bf16.gmra.mxu0 %v1439_v57  ;;  %1776 = vmatmul.bf16.gmra.mxu2 %v1439_v57  ;;  %v1323_v51 = vadd.f32 %v5132_v10, %v1286_v32  ;;  %v1047_v32 = vsub.f32 %v5051_v63, %v5325_v16 }
 0x1ce   : > { %v953_v31 = vpop.xlane.xlu0 %952  ;;  %v1184_v25 = vmul.f32 %v4372_v24, %v1183_v61  ;;  %v1190_v62 = vmul.f32 %v4374_v11, %v5331_v17  ;;  %1727 = vmatmul.bf16.gmra.mxu1 %v1440_v8  ;;  %1825 = vmatmul.bf16.gmra.mxu3 %v1440_v8  ;;  %v1324_v41 = vadd.f32 %v5141_v30, %v1287_v28  ;;  %vm1196_vm9 = vweird.f32 %v4374_v11 }
 0x1cf   : > { %4375 = vrsqrt.f32 %v5342_v56  ;;  %v987_v13 = vmul.f32 %v5340_v60, %v5340_v60  ;;  %v971_v27 = vmul.f32 %v953_v31, %v5079_v26  ;;  %vm1355_vm11 = vcmp.ge.f32.partialorder %v1323_v51, 0.0  ;;  %vm1197_vm12 = vmor %vm1195_vm10, %vm1196_vm9 }
 0x1d0   : > { %v1188_v44 = vsel %vm1187_vm8, %v4372_v24, %v1184_v25  ;;  %v1191_v3 = vmul.f32 %v4374_v11, %v1190_v62  ;;  %v1046_v24 = vsub.f32 %v5039_v46, %v5299_v50  ;;  %v1387_v1 = vmul.f32 0.01, %v1323_v51 }
 0x1d1   : > { %v1251_v38 = vmul.f32 %v1188_v44, %v1043_v0  ;;  %v1252_v19 = vmul.f32 %v1188_v44, %v1044_v45  ;;  %v1003_v59 = vsub.f32 %v971_v27, %v987_v13  ;;  %vm1356_vm13 = vcmp.ge.f32.partialorder %v1324_v41, 0.0 }
 0x1d2   : > { %v1192_v7 = vmul.f32 0.5, %v1191_v3  ;;  %v1388_v53 = vmul.f32 0.01, %v1324_v41  ;;  %v1419_v33 = vsel %vm1355_vm11, %v1323_v51, %v1387_v1  ;;  %vm1205_vm1 = vweird.f32 %v5342_v56 }
 0x1d3   : > { %v1288_v6 = vmul.f32 %v5125_v47, %v1251_v38  ;;  %v1289_v12 = vmul.f32 %v5130_v9, %v1252_v19  ;;  %v1019_v48 = vmax.f32 %v1003_v59, 0.0  ;;  %v1048_v44 = vsub.f32 %v5054_v4, %v5325_v16 }
 0x1d4   : > { %v853_v40 = vpop.xlane.xlu2 %852  ;;  %v1193_v54 = vsub.f32 1.5, %v1192_v7  ;;  %v1420_v8 = vsel %vm1356_vm13, %v1324_v41, %v1388_v53 }
 0x1d5   : > { %v4376_v58 = vpop.eup %4375  ;;  %v5366_v15 = vmul.f32 %v5079_v26, %v853_v40  ;;  %v1325_v18 = vadd.f32 %v5132_v10, %v1288_v6  ;;  %v5371_v36 = vadd.f32 1e-05, %v1019_v48  ;;  %v1326_v46 = vadd.f32 %v5141_v30, %v1289_v12 }
 0x1d6   : > { %v1200_v21 = vmul.f32 %v4376_v58, %v5342_v56  ;;  %v956_v39 = vpop.xlane.xlu1 %955  ;;  %v1194_v50 = vmul.f32 %v4374_v11, %v1193_v54  ;;  %vm1206_vm0 = vweird.f32 %v4376_v58 }
 0x1d7   : > { %v988_v14 = vmul.f32 %v5366_v15, %v5366_v15  ;;  %4377 = vrsqrt.f32 %v5371_v36  ;;  %v972_v43 = vmul.f32 %v956_v39, %v5079_v26  ;;  %vm1357_vm14 = vcmp.ge.f32.partialorder %v1325_v18, 0.0  ;;  %vm1207_vm2 = vmor %vm1205_vm1, %vm1206_vm0 }
 0x1d8   : > { %v1201_v5 = vmul.f32 %v4376_v58, %v1200_v21  ;;  %v1198_v17 = vsel %vm1197_vm12, %v4374_v11, %v1194_v50  ;;  %v1389_v35 = vmul.f32 0.01, %v1325_v18  ;;  %vm1358_vm15 = vcmp.ge.f32.partialorder %v1326_v46, 0.0 }
 0x1d9   : > { %v1253_v55 = vmul.f32 %v1198_v17, %v1045_v20  ;;  %v1004_v52 = vsub.f32 %v972_v43, %v988_v14  ;;  %v1254_v2 = vmul.f32 %v1198_v17, %v1046_v24  ;;  %v1390_v29 = vmul.f32 0.01, %v1326_v46 }
 0x1da   : > { %v1202_v34 = vmul.f32 0.5, %v1201_v5  ;;  %v1421_v42 = vsel %vm1357_vm14, %v1325_v18, %v1389_v35  ;;  %v1049_v20 = vsub.f32 %v5063_v23, %v5340_v60  ;;  %vm1215_vm4 = vweird.f32 %v5371_v36 }
 0x1db   : > { %v1020_v57 = vmax.f32 %v1004_v52, 0.0  ;;  %v1441_v22 = vpack.c.bf16 %v1421_v42, %v1419_v33  ;;  %v1422_v31 = vsel %vm1358_vm15, %v1326_v46, %v1390_v29  ;;  %v1290_v62 = vmul.f32 %v5125_v47, %v1253_v55 }
 0x1dc   : > { %v1203_v61 = vsub.f32 1.5, %v1202_v34  ;;  %v1442_v45 = vpack.c.bf16 %v1422_v31, %v1420_v8  ;;  %v1291_v13 = vmul.f32 %v5130_v9, %v1254_v2  ;;  %v1050_v18 = vsub.f32 %v5067_v49, %v5340_v60  ;;  %v6714_v34 = vld [vmem:[#allocation16_spill] sm:$0xff] }
 0x1dd   : > { %v4378_v11 = vpop.eup %4377  ;;  %v1068_v25 = vadd.f32 1e-05, %v1020_v57  ;;  %1683 = vmatmul.bf16.gmra.mxu0 %v1441_v22  ;;  %1781 = vmatmul.bf16.gmra.mxu2 %v1441_v22  ;;  %v1327_v3 = vadd.f32 %v5132_v10, %v1290_v62  ;;  %v1051_v60 = vsub.f32 %v5081_v37, %v5366_v15  ;;  %v1052_v52 = vsub.f32 %v6714_v34, %v5366_v15 }
 0x1de   : > { %v1204_v0 = vmul.f32 %v4376_v58, %v1203_v61  ;;  %v1210_v56 = vmul.f32 %v4378_v11, %v5371_v36  ;;  %1732 = vmatmul.bf16.gmra.mxu1 %v1442_v45  ;;  %1830 = vmatmul.bf16.gmra.mxu3 %v1442_v45  ;;  %v1328_v16 = vadd.f32 %v5141_v30, %v1291_v13  ;;  %vm1216_vm3 = vweird.f32 %v4378_v11 }
 0x1df   : > { %4379 = vrsqrt.f32 %v1068_v25  ;;  %vm1359_vm5 = vcmp.ge.f32.partialorder %v1327_v3, 0.0  ;;  %v1391_v24 = vmul.f32 0.01, %v1327_v3  ;;  %vm1217_vm7 = vmor %vm1215_vm4, %vm1216_vm3  ;;  %vm1225_vm11 = vweird.f32 %v1068_v25 }
 0x1e0   : > { %v1208_v27 = vsel %vm1207_vm2, %v4376_v58, %v1204_v0  ;;  %v1211_v19 = vmul.f32 %v4378_v11, %v1210_v56  ;;  %v1392_v41 = vmul.f32 0.01, %v1328_v16  ;;  %vm1360_vm8 = vcmp.ge.f32.partialorder %v1328_v16, 0.0 }
 0x1e1   : > { %v1255_v28 = vmul.f32 %v1208_v27, %v1047_v32  ;;  %v1256_v38 = vmul.f32 %v1208_v27, %v1048_v44  ;;  %v1423_v23 = vsel %vm1359_vm5, %v1327_v3, %v1391_v24 }
 0x1e2   : > { %v1212_v59 = vmul.f32 0.5, %v1211_v19  ;;  %v1424_v43 = vsel %vm1360_vm8, %v1328_v16, %v1392_v41 }
 0x1e3   : > { %v1292_v63 = vmul.f32 %v5125_v47, %v1255_v28  ;;  %v1293_v4 = vmul.f32 %v5130_v9, %v1256_v38 }
 0x1e4   : > { %v1213_v7 = vsub.f32 1.5, %v1212_v59 }
 0x1e5   : > { %v1329_v6 = vadd.f32 %v5132_v10, %v1292_v63  ;;  %v1330_v51 = vadd.f32 %v5141_v30, %v1293_v4  ;;  %v4380_v12 = vpop.eup %4379 }
 0x1e6   : > { %v1214_v48 = vmul.f32 %v4378_v11, %v1213_v7  ;;  %v1220_v40 = vmul.f32 %v4380_v12, %v1068_v25  ;;  %vm1226_vm10 = vweird.f32 %v4380_v12 }
 0x1e7   : > { %vm1361_vm6 = vcmp.ge.f32.partialorder %v1329_v6, 0.0  ;;  %v1393_v58 = vmul.f32 0.01, %v1329_v6  ;;  %vm1362_vm9 = vcmp.ge.f32.partialorder %v1330_v51, 0.0  ;;  %v1394_v54 = vmul.f32 0.01, %v1330_v51  ;;  %vm1227_vm12 = vmor %vm1225_vm11, %vm1226_vm10 }
 0x1e8   : > { %v1218_v21 = vsel %vm1217_vm7, %v4378_v11, %v1214_v48  ;;  %v1221_v39 = vmul.f32 %v4380_v12, %v1220_v40 }
 0x1e9   : > { %v1257_v46 = vmul.f32 %v1218_v21, %v1049_v20  ;;  %v1425_v50 = vsel %vm1361_vm6, %v1329_v6, %v1393_v58  ;;  %v1426_v36 = vsel %vm1362_vm9, %v1330_v51, %v1394_v54  ;;  %v1258_v14 = vmul.f32 %v1218_v21, %v1050_v18 }
 0x1ea   : > { %v1222_v1 = vmul.f32 0.5, %v1221_v39  ;;  %v1443_v5 = vpack.c.bf16 %v1425_v50, %v1423_v23  ;;  %v1444_v17 = vpack.c.bf16 %v1426_v36, %v1424_v43 }
 0x1eb   : > { %v1294_v53 = vmul.f32 %v5125_v47, %v1257_v46  ;;  %v1295_v49 = vmul.f32 %v5130_v9, %v1258_v14 }
 0x1ec   : > { %v1223_v35 = vsub.f32 1.5, %v1222_v1 }
 0x1ed   : > { %1688 = vmatmul.bf16.gmra.mxu0 %v1443_v5  ;;  %1786 = vmatmul.bf16.gmra.mxu2 %v1443_v5  ;;  %v1331_v29 = vadd.f32 %v5132_v10, %v1294_v53  ;;  %v1332_v61 = vadd.f32 %v5141_v30, %v1295_v49 }
 0x1ee   : > { %v1224_v55 = vmul.f32 %v4380_v12, %v1223_v35  ;;  %1737 = vmatmul.bf16.gmra.mxu1 %v1444_v17  ;;  %1835 = vmatmul.bf16.gmra.mxu3 %v1444_v17 }
 0x1ef   : > { %v1395_v37 = vmul.f32 0.01, %v1331_v29  ;;  %vm1363_vm13 = vcmp.ge.f32.partialorder %v1331_v29, 0.0  ;;  %vm1364_vm14 = vcmp.ge.f32.partialorder %v1332_v61, 0.0  ;;  %v1396_v15 = vmul.f32 0.01, %v1332_v61 }
 0x1f0   : > { %v1228_v2 = vsel %vm1227_vm12, %v4380_v12, %v1224_v55 }
 0x1f1   : > { %v1259_v33 = vmul.f32 %v1228_v2, %v1051_v60  ;;  %v1260_v42 = vmul.f32 %v1228_v2, %v1052_v52  ;;  %v1427_v25 = vsel %vm1363_vm13, %v1331_v29, %v1395_v37  ;;  %v1428_v44 = vsel %vm1364_vm14, %v1332_v61, %v1396_v15 }
 0x1f3   : > { %v1296_v57 = vmul.f32 %v5125_v47, %v1259_v33  ;;  %v1297_v22 = vmul.f32 %v5130_v9, %v1260_v42  ;;  %v1448_v9 = vld [vmem:[#allocation10 + $0x3] ss:$8 sm:$0x3] }
 0x1f4   : > { %v5415_v27 = vperm.slane %v1448_v9, 1 }
 0x1f5   : > { %v1333_v8 = vadd.f32 %v5132_v10, %v1296_v57  ;;  %v1334_v31 = vadd.f32 %v5141_v30, %v1297_v22  ;;  %v5412_v10 = vperm.slane %v1448_v9, 0 }
 0x1f7   : > { %vm1365_vm15 = vcmp.ge.f32.partialorder %v1333_v8, 0.0  ;;  %v1397_v11 = vmul.f32 0.01, %v1333_v8  ;;  %vm1366_vm0 = vcmp.ge.f32.partialorder %v1334_v31, 0.0  ;;  %v1398_v0 = vmul.f32 0.01, %v1334_v31 }
 0x1f9   : > { %v1429_v45 = vsel %vm1365_vm15, %v1333_v8, %v1397_v11  ;;  %v1430_v62 = vsel %vm1366_vm0, %v1334_v31, %v1398_v0 }
 0x1fa   : > { %v1445_v32 = vpack.c.bf16 %v1429_v45, %v1427_v25  ;;  %v1446_v47 = vpack.c.bf16 %v1430_v62, %v1428_v44 }
 0x1fd   : > { %1693 = vmatmul.bf16.gmra.mxu0 %v1445_v32  ;;  %1791 = vmatmul.bf16.gmra.mxu2 %v1445_v32 }
 0x1fe   : > { %1742 = vmatmul.bf16.gmra.mxu1 %v1446_v47  ;;  %1840 = vmatmul.bf16.gmra.mxu3 %v1446_v47 }
 0x20a   : > { %v1659_v30 = vpop.f32.mrf.mxu0 }
 0x20b   : > { %v1708_v56 = vpop.f32.mrf.mxu1  ;;  %v1660_v13 = vadd.f32 %v1659_v30, %v5412_v10 }
 0x20d   : > { %v5417_v38 = vadd.f32 %v1708_v56, %v1660_v13 }
 0x20f   : > { %v1910_v6 = vmul.f32 %v5417_v38, %v5417_v38 }
 0x210   : > { %v1757_v28 = vpop.f32.mrf.mxu2 }
 0x211   : > { %v1758_v19 = vadd.f32 %v1757_v28, %v5415_v27  ;;  %v1806_v3 = vpop.f32.mrf.mxu3 }
 0x212   : > { %v1661_v59 = vpop.f32.mrf.mxu0 }
 0x213   : > { %v5420_v63 = vadd.f32 %v1806_v3, %v1758_v19  ;;  %v1710_v4 = vpop.f32.mrf.mxu1  ;;  %v1662_v16 = vadd.f32 %v1661_v59, %v5412_v10 }
 0x215   : > { %v1846_v7 = vadd.f32 %v5420_v63, %v5417_v38  ;;  %v1911_v51 = vmul.f32 %v5420_v63, %v5420_v63  ;;  %v5429_v24 = vadd.f32 %v1710_v4, %v1662_v16 }
 0x217   : > { %1847 = vadd.xlane.f32.xlu2 %v1846_v7  ;;  %v1942_v12 = vadd.f32 %v1911_v51, %v1910_v6  ;;  %v1912_v21 = vmul.f32 %v5429_v24, %v5429_v24 }
 0x218   : > { %v1759_v20 = vpop.f32.mrf.mxu2 }
 0x219   : > { %v1760_v48 = vadd.f32 %v1759_v20, %v5415_v27  ;;  %v1808_v40 = vpop.f32.mrf.mxu3  ;;  %1943 = vadd.xlane.f32.xlu1 %v1942_v12 }
 0x21a   : > { %v1664_v58 = vpop.f32.mrf.mxu0 }
 0x21b   : > { %v5432_v41 = vadd.f32 %v1808_v40, %v1760_v48  ;;  %v1713_v54 = vpop.f32.mrf.mxu1  ;;  %v1665_v46 = vadd.f32 %v1664_v58, %v5412_v10 }
 0x21d   : > { %v1849_v18 = vadd.f32 %v5432_v41, %v5429_v24  ;;  %v1913_v39 = vmul.f32 %v5432_v41, %v5432_v41  ;;  %v5441_v36 = vadd.f32 %v1713_v54, %v1665_v46 }
 0x21f   : > { %1850 = vadd.xlane.f32.xlu0 %v1849_v18  ;;  %v1945_v23 = vadd.f32 %v1913_v39, %v1912_v21  ;;  %v1914_v55 = vmul.f32 %v5441_v36, %v5441_v36 }
 0x220   : > { %v1762_v50 = vpop.f32.mrf.mxu2 }
 0x221   : > { %1946 = vadd.xlane.f32.xlu2 %v1945_v23  ;;  %v1763_v14 = vadd.f32 %v1762_v50, %v5415_v27  ;;  %v1811_v1 = vpop.f32.mrf.mxu3 }
 0x222   : > { %v1666_v5 = vpop.f32.mrf.mxu0 }
 0x223   : > { %v5444_v43 = vadd.f32 %v1811_v1, %v1763_v14  ;;  %v1715_v17 = vpop.f32.mrf.mxu1  ;;  %v1667_v35 = vadd.f32 %v1666_v5, %v5412_v10 }
 0x225   : > { %v1852_v53 = vadd.f32 %v5444_v43, %v5441_v36  ;;  %v1915_v49 = vmul.f32 %v5444_v43, %v5444_v43  ;;  %v5453_v52 = vadd.f32 %v1715_v17, %v1667_v35 }
 0x227   : > { %1853 = vadd.xlane.f32.xlu0 %v1852_v53  ;;  %v1948_v60 = vadd.f32 %v1915_v49, %v1914_v55  ;;  %v1916_v8 = vmul.f32 %v5453_v52, %v5453_v52 }
 0x228   : > { %v1764_v34 = vpop.f32.mrf.mxu2 }
 0x229   : > { %v1765_v2 = vadd.f32 %v1764_v34, %v5415_v27  ;;  %v1813_v33 = vpop.f32.mrf.mxu3  ;;  %1949 = vadd.xlane.f32.xlu2 %v1948_v60 }
 0x22a   : > { %v1669_v42 = vpop.f32.mrf.mxu0 }
 0x22b   : > { %v5456_v29 = vadd.f32 %v1813_v33, %v1765_v2  ;;  %v1718_v61 = vpop.f32.mrf.mxu1  ;;  %v1670_v57 = vadd.f32 %v1669_v42, %v5412_v10 }
 0x22d   : > { %v1855_v22 = vadd.f32 %v5456_v29, %v5453_v52  ;;  %v1917_v37 = vmul.f32 %v5456_v29, %v5456_v29  ;;  %v5465_v11 = vadd.f32 %v1718_v61, %v1670_v57 }
 0x22f   : > { %1856 = vadd.xlane.f32.xlu1 %v1855_v22  ;;  %v1951_v31 = vadd.f32 %v1917_v37, %v1916_v8  ;;  %v1918_v9 = vmul.f32 %v5465_v11, %v5465_v11 }
 0x230   : > { %v1767_v15 = vpop.f32.mrf.mxu2 }
 0x231   : > { %v1768_v0 = vadd.f32 %v1767_v15, %v5415_v27  ;;  %v1816_v25 = vpop.f32.mrf.mxu3  ;;  %1952 = vadd.xlane.f32.xlu0 %v1951_v31 }
 0x232   : > { %v1671_v45 = vpop.f32.mrf.mxu0 }
 0x233   : > { %v5468_v62 = vadd.f32 %v1816_v25, %v1768_v0  ;;  %v1720_v32 = vpop.f32.mrf.mxu1  ;;  %v1672_v44 = vadd.f32 %v1671_v45, %v5412_v10 }
 0x235   : > { %v1858_v47 = vadd.f32 %v5468_v62, %v5465_v11  ;;  %v1919_v30 = vmul.f32 %v5468_v62, %v5468_v62  ;;  %v5477_v28 = vadd.f32 %v1720_v32, %v1672_v44 }
 0x237   : > { %1859 = vadd.xlane.f32.xlu1 %v1858_v47  ;;  %v1954_v56 = vadd.f32 %v1919_v30, %v1918_v9  ;;  %v1920_v51 = vmul.f32 %v5477_v28, %v5477_v28  ;;  %v4235_v47 = vld [vmem:[#allocation8 + $0x74] sm:$0xf]  ;;  %v4069_v9 = vld [vmem:[#allocation8 + $0x78] sm:$0xf0] }
 0x238   : > { %v1769_v13 = vpop.f32.mrf.mxu2  ;;  %v4251_v30 = vld [vmem:[#allocation8 + $0xf4] sm:$0xf] }
 0x239   : > { %v1770_v19 = vadd.f32 %v1769_v13, %v5415_v27  ;;  %v1818_v3 = vpop.f32.mrf.mxu3  ;;  %1955 = vadd.xlane.f32.xlu0 %v1954_v56  ;;  %v4072_v56 = vor.u32 %v4235_v47, %v4069_v9  ;;  %v4133_v13 = vld [vmem:[#allocation8 + $0xf8] sm:$0xf0] }
 0x23a   : > { %v1674_v59 = vpop.f32.mrf.mxu0 }
 0x23b   : > { %v5480_v4 = vadd.f32 %v1818_v3, %v1770_v19  ;;  %v1723_v16 = vpop.f32.mrf.mxu1  ;;  %v1675_v7 = vadd.f32 %v1674_v59, %v5412_v10  ;;  %v4136_v3 = vor.u32 %v4251_v30, %v4133_v13  ;;  %2781 = vmatpush.bf16.msra.mxu2 %v4072_v56 }
 0x23d   : > { %v1861_v6 = vadd.f32 %v5480_v4, %v5477_v28  ;;  %v1921_v12 = vmul.f32 %v5480_v4, %v5480_v4  ;;  %v5489_v40 = vadd.f32 %v1723_v16, %v1675_v7  ;;  %2830 = vmatpush.bf16.msra.mxu3 %v4136_v3 }
 0x23f   : > { %1862 = vadd.xlane.f32.xlu2 %v1861_v6  ;;  %v1957_v20 = vadd.f32 %v1921_v12, %v1920_v51  ;;  %v1922_v50 = vmul.f32 %v5489_v40, %v5489_v40 }
 0x240   : > { %v1772_v48 = vpop.f32.mrf.mxu2 }
 0x241   : > { %v1773_v58 = vadd.f32 %v1772_v48, %v5415_v27  ;;  %v1821_v54 = vpop.f32.mrf.mxu3  ;;  %1958 = vadd.xlane.f32.xlu1 %v1957_v20 }
 0x242   : > { %v1676_v18 = vpop.f32.mrf.mxu0 }
 0x243   : > { %v5492_v21 = vadd.f32 %v1821_v54, %v1773_v58  ;;  %v1725_v39 = vpop.f32.mrf.mxu1  ;;  %v1677_v46 = vadd.f32 %v1676_v18, %v5412_v10 }
 0x245   : > { %v1864_v23 = vadd.f32 %v5492_v21, %v5489_v40  ;;  %v1923_v14 = vmul.f32 %v5492_v21, %v5492_v21  ;;  %v5501_v17 = vadd.f32 %v1725_v39, %v1677_v46  ;;  %v4067_v39 = vld [vmem:[#allocation8 + $0x70] sm:$0xf]  ;;  %v4236_v46 = vld [vmem:[#allocation8 + $0x74] sm:$0xf0] }
 0x247   : > { %1865 = vadd.xlane.f32.xlu2 %v1864_v23  ;;  %v1960_v1 = vadd.f32 %v1923_v14, %v1922_v50  ;;  %v1924_v33 = vmul.f32 %v5501_v17, %v5501_v17  ;;  %v4131_v23 = vld [vmem:[#allocation8 + $0xf0] sm:$0xf]  ;;  %v4068_v50 = vor.u32 %v4236_v46, %v4067_v39  ;;  %v4252_v14 = vld [vmem:[#allocation8 + $0xf4] sm:$0xf0] }
 0x248   : > { %v1774_v5 = vpop.f32.mrf.mxu2 }
 0x249   : > { %v1775_v35 = vadd.f32 %v1774_v5, %v5415_v27  ;;  %v1823_v53 = vpop.f32.mrf.mxu3  ;;  %1961 = vadd.xlane.f32.xlu1 %v1960_v1  ;;  %v4132_v5 = vor.u32 %v4252_v14, %v4131_v23  ;;  %2683 = vmatpush.bf16.msra.mxu0 %v4068_v50 }
 0x24a   : > { %v1679_v55 = vpop.f32.mrf.mxu0 }
 0x24b   : > { %v5504_v49 = vadd.f32 %v1823_v53, %v1775_v35  ;;  %v1728_v60 = vpop.f32.mrf.mxu1  ;;  %v1680_v34 = vadd.f32 %v1679_v55, %v5412_v10  ;;  %2732 = vmatpush.bf16.msra.mxu1 %v4132_v5 }
 0x24d   : > { %v1867_v2 = vadd.f32 %v5504_v49, %v5501_v17  ;;  %v1925_v42 = vmul.f32 %v5504_v49, %v5504_v49  ;;  %v5513_v22 = vadd.f32 %v1728_v60, %v1680_v34 }
 0x24f   : > { %1868 = vadd.xlane.f32.xlu0 %v1867_v2  ;;  %v1963_v61 = vadd.f32 %v1925_v42, %v1924_v33  ;;  %v1926_v32 = vmul.f32 %v5513_v22, %v5513_v22 }
 0x250   : > { %v1777_v57 = vpop.f32.mrf.mxu2 }
 0x251   : > { %v1778_v8 = vadd.f32 %v1777_v57, %v5415_v27  ;;  %v1826_v37 = vpop.f32.mrf.mxu3  ;;  %1964 = vadd.xlane.f32.xlu2 %v1963_v61 }
 0x252   : > { %v1681_v31 = vpop.f32.mrf.mxu0 }
 0x253   : > { %v5516_v15 = vadd.f32 %v1826_v37, %v1778_v8  ;;  %v1730_v0 = vpop.f32.mrf.mxu1  ;;  %v1682_v25 = vadd.f32 %v1681_v31, %v5412_v10  ;;  %v4233_v37 = vld [vmem:[#allocation8 + $0x64] sm:$0xf]  ;;  %v4061_v31 = vld [vmem:[#allocation8 + $0x68] sm:$0xf0] }
 0x255   : > { %v1870_v45 = vadd.f32 %v5516_v15, %v5513_v22  ;;  %v1927_v44 = vmul.f32 %v5516_v15, %v5516_v15  ;;  %v5525_v16 = vadd.f32 %v1730_v0, %v1682_v25  ;;  %v4249_v0 = vld [vmem:[#allocation8 + $0xe4] sm:$0xf]  ;;  %v4064_v25 = vor.u32 %v4233_v37, %v4061_v31 }
 0x257   : > { %1871 = vadd.xlane.f32.xlu0 %v1870_v45  ;;  %v1966_v19 = vadd.f32 %v1927_v44, %v1926_v32  ;;  %v1928_v54 = vmul.f32 %v5525_v16, %v5525_v16  ;;  %v4125_v45 = vld [vmem:[#allocation8 + $0xe8] sm:$0xf0]  ;;  %2782 = vmatpush.bf16.msra.mxu2 %v4064_v25 }
 0x258   : > { %v1779_v59 = vpop.f32.mrf.mxu2  ;;  %v4128_v44 = vor.u32 %v4249_v0, %v4125_v45 }
 0x259   : > { %v1780_v7 = vadd.f32 %v1779_v59, %v5415_v27  ;;  %v1828_v6 = vpop.f32.mrf.mxu3  ;;  %1967 = vadd.xlane.f32.xlu2 %v1966_v19 }
 0x25a   : > { %v1684_v51 = vpop.f32.mrf.mxu0  ;;  %2831 = vmatpush.bf16.msra.mxu3 %v4128_v44 }
 0x25b   : > { %v5528_v12 = vadd.f32 %v1828_v6, %v1780_v7  ;;  %v1733_v20 = vpop.f32.mrf.mxu1  ;;  %v1685_v48 = vadd.f32 %v1684_v51, %v5412_v10  ;;  %v4059_v7 = vld [vmem:[#allocation8 + $0x60] sm:$0xf]  ;;  %v4234_v6 = vld [vmem:[#allocation8 + $0x64] sm:$0xf0] }
 0x25d   : > { %v1873_v58 = vadd.f32 %v5528_v12, %v5525_v16  ;;  %v1929_v18 = vmul.f32 %v5528_v12, %v5528_v12  ;;  %v5537_v53 = vadd.f32 %v1733_v20, %v1685_v48 }
 0x25f   : > { %1874 = vadd.xlane.f32.xlu1 %v1873_v58  ;;  %v1969_v1 = vadd.f32 %v1929_v18, %v1928_v54  ;;  %v1930_v57 = vmul.f32 %v5537_v53, %v5537_v53  ;;  %v4060_v58 = vor.u32 %v4234_v6, %v4059_v7  ;;  %v4123_v6 = vld [vmem:[#allocation8 + $0xe0] sm:$0xf] }
 0x260   : > { %v1782_v35 = vpop.f32.mrf.mxu2 }
 0x261   : > { %v1783_v55 = vadd.f32 %v1782_v35, %v5415_v27  ;;  %1970 = vadd.xlane.f32.xlu0 %v1969_v1  ;;  %v1831_v60 = vpop.f32.mrf.mxu3  ;;  %2684 = vmatpush.bf16.msra.mxu0 %v4060_v58 }
 0x262   : > { %v1686_v34 = vpop.f32.mrf.mxu0 }
 0x263   : > { %v5540_v2 = vadd.f32 %v1831_v60, %v1783_v55  ;;  %v1687_v33 = vadd.f32 %v1686_v34, %v5412_v10  ;;  %v1735_v42 = vpop.f32.mrf.mxu1 }
 0x265   : > { %v1876_v61 = vadd.f32 %v5540_v2, %v5537_v53  ;;  %v1931_v8 = vmul.f32 %v5540_v2, %v5540_v2  ;;  %v5549_v47 = vadd.f32 %v1735_v42, %v1687_v33 }
 0x267   : > { %1877 = vadd.xlane.f32.xlu1 %v1876_v61  ;;  %v1972_v32 = vadd.f32 %v1931_v8, %v1930_v57  ;;  %v1932_v59 = vmul.f32 %v5549_v47, %v5549_v47 }
 0x268   : > { %v1784_v9 = vpop.f32.mrf.mxu2 }
 0x269   : > { %v1785_v30 = vadd.f32 %v1784_v9, %v5415_v27  ;;  %1973 = vadd.xlane.f32.xlu0 %v1972_v32  ;;  %v1833_v56 = vpop.f32.mrf.mxu3 }
 0x26a   : > { %v1689_v13 = vpop.f32.mrf.mxu0 }
 0x26b   : > { %v5552_v19 = vadd.f32 %v1833_v56, %v1785_v30  ;;  %v1738_v3 = vpop.f32.mrf.mxu1  ;;  %v1690_v51 = vadd.f32 %v1689_v13, %v5412_v10 }
 0x26d   : > { %v1879_v20 = vadd.f32 %v5552_v19, %v5549_v47  ;;  %v1933_v48 = vmul.f32 %v5552_v19, %v5552_v19  ;;  %v5561_v39 = vadd.f32 %v1738_v3, %v1690_v51  ;;  %v4250_v51 = vld [vmem:[#allocation8 + $0xe4] sm:$0xf0] }
 0x26f   : > { %1880 = vadd.xlane.f32.xlu2 %v1879_v20  ;;  %v1975_v54 = vadd.f32 %v1933_v48, %v1932_v59  ;;  %v1934_v55 = vmul.f32 %v5561_v39, %v5561_v39 }
 0x270   : > { %v1787_v18 = vpop.f32.mrf.mxu2 }
 0x271   : > { %v1788_v46 = vadd.f32 %v1787_v18, %v5415_v27  ;;  %1976 = vadd.xlane.f32.xlu1 %v1975_v54  ;;  %v1836_v23 = vpop.f32.mrf.mxu3  ;;  %v4124_v54 = vor.u32 %v4250_v51, %v4123_v6  ;;  %v4043_v6 = vld [vmem:[#allocation8 + $0x40] sm:$0xf] }
 0x272   : > { %v1691_v50 = vpop.f32.mrf.mxu0 }
 0x273   : > { %v5564_v14 = vadd.f32 %v1836_v23, %v1788_v46  ;;  %v1740_v1 = vpop.f32.mrf.mxu1  ;;  %v1692_v5 = vadd.f32 %v1691_v50, %v5412_v10  ;;  %2733 = vmatpush.bf16.msra.mxu1 %v4124_v54  ;;  %v4107_v54 = vld [vmem:[#allocation8 + $0xc0] sm:$0xf] }
 0x275   : > { %v1882_v35 = vadd.f32 %v5564_v14, %v5561_v39  ;;  %v1935_v60 = vmul.f32 %v5564_v14, %v5564_v14  ;;  %v5573_v42 = vadd.f32 %v1740_v1, %v1692_v5  ;;  %v4053_v1 = vld [vmem:[#allocation8 + $0x58] sm:$0xf0]  ;;  %v4247_v5 = vld [vmem:[#allocation8 + $0xd4] sm:$0xf] }
 0x277   : > { %1883 = vadd.xlane.f32.xlu2 %v1882_v35  ;;  %v1978_v34 = vadd.f32 %v1935_v60, %v1934_v55  ;;  %v1936_v45 = vmul.f32 %v5573_v42, %v5573_v42 }
 0x278   : > { %v1789_v33 = vpop.f32.mrf.mxu2 }
 0x279   : > { %v1790_v61 = vadd.f32 %v1789_v33, %v5415_v27  ;;  %1979 = vadd.xlane.f32.xlu1 %v1978_v34  ;;  %v1838_v57 = vpop.f32.mrf.mxu3  ;;  %v4117_v34 = vld [vmem:[#allocation8 + $0xd8] sm:$0xf0]  ;;  %v4051_v33 = vld [vmem:[#allocation8 + $0x50] sm:$0xf] }
 0x27a   : > { %v1694_v8 = vpop.f32.mrf.mxu0 }
 0x27b   : > { %v5576_v37 = vadd.f32 %v1838_v57, %v1790_v61  ;;  %v1695_v31 = vadd.f32 %v1694_v8, %v5412_v10  ;;  %v1743_v0 = vpop.f32.mrf.mxu1  ;;  %v4232_v61 = vld [vmem:[#allocation8 + $0x54] sm:$0xf0] }
 0x27d   : > { %v1885_v25 = vadd.f32 %v5576_v37, %v5573_v42  ;;  %v1937_v32 = vmul.f32 %v5576_v37, %v5576_v37  ;;  %v5585_v30 = vadd.f32 %v1743_v0, %v1695_v31  ;;  %v4120_v31 = vor.u32 %v4247_v5, %v4117_v34  ;;  %v4109_v5 = vld [vmem:[#allocation8 + $0xc8] sm:$0xf0]  ;;  %v4035_v34 = vld [vmem:[#allocation8 + $0x30] sm:$0xf] }
 0x27e   : > { %v4052_v0 = vor.u32 %v4232_v61, %v4051_v33  ;;  %v4228_v33 = vld [vmem:[#allocation8 + $0x34] sm:$0xf0] }
 0x27f   : > { %1886 = vadd.xlane.f32.xlu0 %v1885_v25  ;;  %v1981_v44 = vadd.f32 %v1937_v32, %v1936_v45  ;;  %v1938_v48 = vmul.f32 %v5585_v30, %v5585_v30  ;;  %v4115_v25 = vld [vmem:[#allocation8 + $0xd0] sm:$0xf]  ;;  %v4248_v45 = vld [vmem:[#allocation8 + $0xd4] sm:$0xf0]  ;;  %2832 = vmatpush.bf16.msra.mxu3 %v4120_v31 }
 0x280   : > { %v1792_v9 = vpop.f32.mrf.mxu2  ;;  %2685 = vmatpush.bf16.msra.mxu0 %v4052_v0  ;;  %v4099_v31 = vld [vmem:[#allocation8 + $0xb0] sm:$0xf]  ;;  %v4244_v0 = vld [vmem:[#allocation8 + $0xb4] sm:$0xf0] }
 0x281   : > { %v1793_v56 = vadd.f32 %v1792_v9, %v5415_v27  ;;  %1982 = vadd.xlane.f32.xlu2 %v1981_v44  ;;  %v1841_v13 = vpop.f32.mrf.mxu3  ;;  %v4116_v9 = vor.u32 %v4248_v45, %v4115_v25  ;;  %v4227_v25 = vld [vmem:[#allocation8 + $0x34] sm:$0xf] }
 0x282   : > { %v1696_v3 = vpop.f32.mrf.mxu0 }
 0x283   : > { %v5588_v59 = vadd.f32 %v1841_v13, %v1793_v56  ;;  %v1697_v7 = vadd.f32 %v1696_v3, %v5412_v10  ;;  %v1745_v18 = vpop.f32.mrf.mxu1  ;;  %v4231_v10 = vld [vmem:[#allocation8 + $0x54] sm:$0xf]  ;;  %v4229_v3 = vld [vmem:[#allocation8 + $0x44] sm:$0xf]  ;;  %2734 = vmatpush.bf16.msra.mxu1 %v4116_v9  ;;  %v4100_v9 = vor.u32 %v4244_v0, %v4099_v31  ;;  %v4083_v31 = vld [vmem:[#allocation8 + $0x90] sm:$0xf] }
 0x284   : > { %v4056_v60 = vor.u32 %v4231_v10, %v4053_v1  ;;  %v4245_v1 = vld [vmem:[#allocation8 + $0xc4] sm:$0xf] }
 0x285   : > { %v1888_v20 = vadd.f32 %v5588_v59, %v5585_v30  ;;  %v1939_v58 = vmul.f32 %v5588_v59, %v5588_v59  ;;  %v5597_v23 = vadd.f32 %v1745_v18, %v1697_v7  ;;  %v4045_v7 = vld [vmem:[#allocation8 + $0x48] sm:$0xf0]  ;;  %v4246_v18 = vld [vmem:[#allocation8 + $0xc4] sm:$0xf0] }
 0x286   : > { %2783 = vmatpush.bf16.msra.mxu2 %v4056_v60  ;;  %v4108_v10 = vor.u32 %v4246_v18, %v4107_v54  ;;  %v4242_v18 = vld [vmem:[#allocation8 + $0xa4] sm:$0xf0] }
 0x287   : > { %1889 = vadd.xlane.f32.xlu0 %v1888_v20  ;;  %v1984_v46 = vadd.f32 %v1939_v58, %v1938_v48  ;;  %v1940_v13 = vmul.f32 %v5597_v23, %v5597_v23  ;;  %v4048_v48 = vor.u32 %v4229_v3, %v4045_v7  ;;  %v4230_v58 = vld [vmem:[#allocation8 + $0x44] sm:$0xf0]  ;;  %v4101_v7 = vld [vmem:[#allocation8 + $0xb8] sm:$0xf0] }
 0x288   : > { %v1794_v50 = vpop.f32.mrf.mxu2  ;;  %2735 = vmatpush.bf16.msra.mxu1 %v4108_v10 }
 0x289   : > { %v1795_v35 = vadd.f32 %v1794_v50, %v5415_v27  ;;  %1985 = vadd.xlane.f32.xlu2 %v1984_v46  ;;  %v1843_v57 = vpop.f32.mrf.mxu3  ;;  %v4044_v50 = vor.u32 %v4230_v58, %v4043_v6  ;;  %v4027_v6 = vld [vmem:[#allocation8 + $0x20] sm:$0xf] }
 0x28a   : > { %v1848_v55 = vpop.xlane.xlu2 %1847  ;;  %2784 = vmatpush.bf16.msra.mxu2 %v4048_v48 }
 0x28b   : > { %v5601_v8 = vmul.f32 %v1848_v55, %v5079_v26  ;;  %v5603_v32 = vadd.f32 %v1843_v57, %v1795_v35  ;;  %v4112_v55 = vor.u32 %v4245_v1, %v4109_v5  ;;  %2686 = vmatpush.bf16.msra.mxu0 %v4044_v50  ;;  %v4036_v57 = vor.u32 %v4228_v33, %v4035_v34  ;;  %v4029_v50 = vld [vmem:[#allocation8 + $0x28] sm:$0xf0]  ;;  %v4019_v33 = vld [vmem:[#allocation8 + $0x10] sm:$0xf] }
 0x28c   : > { %v1944_v44 = vpop.xlane.xlu1 %1943  ;;  %2736 = vmatpush.bf16.msra.mxu1 %v4100_v9 }
 0x28d   : > { %6715 = vst [vmem:[#allocation16_spill] sm:$0xff] %v5603_v32  ;;  %v1990_v27 = vmul.f32 %v1944_v44, %v5079_v26  ;;  %v2006_v56 = vmul.f32 %v5601_v8, %v5601_v8  ;;  %v1891_v51 = vadd.f32 %v5603_v32, %v5597_v23  ;;  %v1941_v20 = vmul.f32 %v5603_v32, %v5603_v32 }
 0x28e   : > { %2833 = vmatpush.bf16.msra.mxu3 %v4112_v55  ;;  %v4093_v55 = vld [vmem:[#allocation8 + $0xa8] sm:$0xf0] }
 0x28f   : > { %v2022_v46 = vsub.f32 %v1990_v27, %v2006_v56  ;;  %1892 = vadd.xlane.f32.xlu1 %v1891_v51  ;;  %v1987_v35 = vadd.f32 %v1941_v20, %v1940_v13  ;;  %v4037_v27 = vld [vmem:[#allocation8 + $0x38] sm:$0xf0]  ;;  %v4243_v56 = vld [vmem:[#allocation8 + $0xb4] sm:$0xf]  ;;  %v4226_v51 = vld [vmem:[#allocation8 + $0x24] sm:$0xf0]  ;;  %2687 = vmatpush.bf16.msra.mxu0 %v4036_v57 }
 0x290   : > { %v4040_v3 = vor.u32 %v4227_v25, %v4037_v27  ;;  %v4091_v20 = vld [vmem:[#allocation8 + $0xa0] sm:$0xf]  ;;  %v4104_v54 = vor.u32 %v4243_v56, %v4101_v7  ;;  %v4028_v10 = vor.u32 %v4226_v51, %v4027_v6  ;;  %v4240_v25 = vld [vmem:[#allocation8 + $0x94] sm:$0xf0]  ;;  %v4223_v27 = vld [vmem:[#allocation8 + $0x14] sm:$0xf] }
 0x291   : > { %v2038_v60 = vmax.f32 %v2022_v46, 0.0  ;;  %1988 = vadd.xlane.f32.xlu0 %v1987_v35  ;;  %v4225_v46 = vld [vmem:[#allocation8 + $0x24] sm:$0xf]  ;;  %v4092_v1 = vor.u32 %v4242_v18, %v4091_v20  ;;  %v4084_v9 = vor.u32 %v4240_v25, %v4083_v31  ;;  %v4239_v7 = vld [vmem:[#allocation8 + $0x94] sm:$0xf] }
 0x292   : > { %v1851_v61 = vpop.xlane.xlu0 %1850  ;;  %2785 = vmatpush.bf16.msra.mxu2 %v4040_v3  ;;  %v4032_v5 = vor.u32 %v4225_v46, %v4029_v50  ;;  %v4241_v35 = vld [vmem:[#allocation8 + $0xa4] sm:$0xf]  ;;  %2834 = vmatpush.bf16.msra.mxu3 %v4104_v54  ;;  %v4021_v3 = vld [vmem:[#allocation8 + $0x18] sm:$0xf0]  ;;  %v4011_v46 = vld [vmem:[#allocation8] sm:$0xf] }
 0x293   : > { %v5614_v45 = vadd.f32 1e-05, %v2038_v60  ;;  %v5617_v44 = vmul.f32 %v1851_v61, %v5079_v26  ;;  %v4096_v34 = vor.u32 %v4241_v35, %v4093_v55  ;;  %v4224_v61 = vld [vmem:[#allocation8 + $0x14] sm:$0xf0]  ;;  %2688 = vmatpush.bf16.msra.mxu0 %v4028_v10  ;;  %2737 = vmatpush.bf16.msra.mxu1 %v4092_v1  ;;  %v4085_v6 = vld [vmem:[#allocation8 + $0x98] sm:$0xf0]  ;;  %v4024_v54 = vor.u32 %v4223_v27, %v4021_v3 }
 0x294   : > { %v1947_v13 = vpop.xlane.xlu2 %1946  ;;  %v4020_v57 = vor.u32 %v4224_v61, %v4019_v33  ;;  %v4088_v18 = vor.u32 %v4239_v7, %v4085_v6  ;;  %v4222_v50 = vld [vmem:[#allocation8 + $0x4] sm:$0xf0]  ;;  %v4075_v1 = vld [vmem:[#allocation8 + $0x80] sm:$0xf]  ;;  %v4221_v35 = vld [vmem:[#allocation8 + $0x4] sm:$0xf] }
 0x295   : > { %4381 = vrsqrt.f32 %v5614_v45  ;;  %v1991_v48 = vmul.f32 %v1947_v13, %v5079_v26  ;;  %v2007_v58 = vmul.f32 %v5617_v44, %v5617_v44  ;;  %v4237_v33 = vld [vmem:[#allocation8 + $0x84] sm:$0xf]  ;;  %v4077_v61 = vld [vmem:[#allocation8 + $0x88] sm:$0xf0]  ;;  %vm2108_vm2 = vweird.f32 %v5614_v45 }
 0x296   : > { %2786 = vmatpush.bf16.msra.mxu2 %v4032_v5  ;;  %2835 = vmatpush.bf16.msra.mxu3 %v4096_v34  ;;  %v4238_v5 = vld [vmem:[#allocation8 + $0x84] sm:$0xf0]  ;;  %v4013_v34 = vld [vmem:[#allocation8 + $0x8] sm:$0xf0] }
 0x297   : > { %v2023_v60 = vsub.f32 %v1991_v48, %v2007_v58  ;;  %2689 = vmatpush.bf16.msra.mxu0 %v4020_v57  ;;  %2738 = vmatpush.bf16.msra.mxu1 %v4084_v9  ;;  %v4076_v25 = vor.u32 %v4238_v5, %v4075_v1  ;;  %v4016_v27 = vor.u32 %v4221_v35, %v4013_v34 }
 0x298   : > { %v4080_v57 = vor.u32 %v4237_v33, %v4077_v61  ;;  %v2054_v35 = vsub.f32 %v5417_v38, %v5601_v8 }
 0x299   : > { %v2039_v0 = vmax.f32 %v2023_v60, 0.0 }
 0x29a   : > { %v1854_v13 = vpop.xlane.xlu0 %1853  ;;  %2787 = vmatpush.bf16.msra.mxu2 %v4024_v54  ;;  %2836 = vmatpush.bf16.msra.mxu3 %v4088_v18 }
 0x29b   : > { %v4382_v56 = vpop.eup %4381  ;;  %v5624_v20 = vadd.f32 1e-05, %v2039_v0  ;;  %v5627_v48 = vmul.f32 %v1854_v13, %v5079_v26  ;;  %v4012_v0 = vor.u32 %v4222_v50, %v4011_v46  ;;  %2739 = vmatpush.bf16.msra.mxu1 %v4076_v25 }
 0x29c   : > { %v2103_v51 = vmul.f32 %v4382_v56, %v5614_v45  ;;  %v1950_v58 = vpop.xlane.xlu2 %1949  ;;  %vm2109_vm1 = vweird.f32 %v4382_v56  ;;  %v2055_v45 = vsub.f32 %v5420_v63, %v5601_v8  ;;  %v2056_v8 = vsub.f32 %v5429_v24, %v5617_v44 }
 0x29d   : > { %4383 = vrsqrt.f32 %v5624_v20  ;;  %v1992_v55 = vmul.f32 %v1950_v58, %v5079_v26  ;;  %v2008_v60 = vmul.f32 %v5627_v48, %v5627_v48  ;;  %2690 = vmatpush.bf16.msra.mxu0 %v4012_v0  ;;  %vm2110_vm3 = vmor %vm2108_vm2, %vm2109_vm1  ;;  %vm2118_vm5 = vweird.f32 %v5624_v20 }
 0x29e   : > { %v2104_v10 = vmul.f32 %v4382_v56, %v2103_v51  ;;  %2788 = vmatpush.bf16.msra.mxu2 %v4016_v27  ;;  %2837 = vmatpush.bf16.msra.mxu3 %v4080_v57 }
 0x29f   : > { %v2024_v13 = vsub.f32 %v1992_v55, %v2008_v60  ;;  %v1452_v60 = vld [vmem:[#allocation10 + $0x5] ss:$8 sm:$0x3] }
 0x2a0   : > { %v2105_v31 = vmul.f32 0.5, %v2104_v10  ;;  %v1450_v10 = vld [vmem:[#allocation10 + $0x4] ss:$8 sm:$0x3]  ;;  %v5657_v63 = vperm.slane %v1452_v60, 1 }
 0x2a1   : > { %v2040_v7 = vmax.f32 %v2024_v13, 0.0  ;;  %v5648_v33 = vperm.slane %v1450_v10, 0  ;;  %v5650_v0 = vperm.slane %v1450_v10, 1  ;;  %v5652_v13 = vperm.slane %v1452_v60, 0 }
 0x2a2   : > { %v2106_v3 = vsub.f32 1.5, %v2105_v31  ;;  %v1857_v6 = vpop.xlane.xlu1 %1856 }
 0x2a3   : > { %v4384_v51 = vpop.eup %4383  ;;  %v5634_v58 = vmul.f32 %v1857_v6, %v5079_v26  ;;  %v5638_v18 = vadd.f32 1e-05, %v2040_v7 }
 0x2a4   : > { %v2107_v9 = vmul.f32 %v4382_v56, %v2106_v3  ;;  %v2113_v54 = vmul.f32 %v4384_v51, %v5624_v20  ;;  %v1953_v46 = vpop.xlane.xlu0 %1952  ;;  %vm2119_vm4 = vweird.f32 %v4384_v51 }
 0x2a5   : > { %v2009_v50 = vmul.f32 %v5634_v58, %v5634_v58  ;;  %4385 = vrsqrt.f32 %v5638_v18  ;;  %v1993_v55 = vmul.f32 %v1953_v46, %v5079_v26  ;;  %vm2120_vm6 = vmor %vm2118_vm5, %vm2119_vm4  ;;  %vm2128_vm8 = vweird.f32 %v5638_v18 }
 0x2a6   : > { %v2111_v1 = vsel %vm2110_vm3, %v4382_v56, %v2107_v9  ;;  %v2114_v5 = vmul.f32 %v4384_v51, %v2113_v54  ;;  %v2057_v54 = vsub.f32 %v5432_v41, %v5617_v44 }
 0x2a7   : > { %v2262_v61 = vmul.f32 %v2111_v1, %v2054_v35  ;;  %v2025_v31 = vsub.f32 %v1993_v55, %v2009_v50  ;;  %v2263_v56 = vmul.f32 %v2111_v1, %v2055_v45 }
 0x2a8   : > { %v2115_v34 = vmul.f32 0.5, %v2114_v5 }
 0x2a9   : > { %v2041_v38 = vmax.f32 %v2025_v31, 0.0  ;;  %v2299_v9 = vmul.f32 %v5648_v33, %v2262_v61  ;;  %v2300_v10 = vmul.f32 %v5650_v0, %v2263_v56 }
 0x2aa   : > { %v2116_v25 = vsub.f32 1.5, %v2115_v34  ;;  %v1860_v27 = vpop.xlane.xlu1 %1859 }
 0x2ab   : > { %v5655_v57 = vmul.f32 %v1860_v27, %v5079_v26  ;;  %v4386_v3 = vpop.eup %4385  ;;  %v5666_v50 = vadd.f32 1e-05, %v2041_v38  ;;  %v2336_v41 = vadd.f32 %v5652_v13, %v2299_v9 }
 0x2ac   : > { %v2117_v7 = vmul.f32 %v4384_v51, %v2116_v25  ;;  %v1956_v6 = vpop.xlane.xlu0 %1955  ;;  %v2123_v46 = vmul.f32 %v4386_v3, %v5638_v18  ;;  %vm2129_vm7 = vweird.f32 %v4386_v3 }
 0x2ad   : > { %v2010_v24 = vmul.f32 %v5655_v57, %v5655_v57  ;;  %v1994_v5 = vmul.f32 %v1956_v6, %v5079_v26  ;;  %4387 = vrsqrt.f32 %v5666_v50  ;;  %vm2368_vm9 = vcmp.ge.f32.partialorder %v2336_v41, 0.0  ;;  %vm2130_vm10 = vmor %vm2128_vm8, %vm2129_vm7 }
 0x2ae   : > { %v2121_v1 = vsel %vm2120_vm6, %v4384_v51, %v2117_v7  ;;  %v2124_v55 = vmul.f32 %v4386_v3, %v2123_v46  ;;  %v2337_v51 = vadd.f32 %v5657_v63, %v2300_v10  ;;  %v2400_v10 = vmul.f32 0.01, %v2336_v41 }
 0x2af   : > { %v2264_v20 = vmul.f32 %v2121_v1, %v2056_v8  ;;  %v2265_v35 = vmul.f32 %v2121_v1, %v2057_v54  ;;  %v2026_v45 = vsub.f32 %v1994_v5, %v2010_v24  ;;  %v2058_v8 = vsub.f32 %v5441_v36, %v5627_v48 }
 0x2b0   : > { %v2125_v34 = vmul.f32 0.5, %v2124_v55  ;;  %vm2369_vm11 = vcmp.ge.f32.partialorder %v2337_v51, 0.0  ;;  %v2401_v24 = vmul.f32 0.01, %v2337_v51  ;;  %vm2138_vm15 = vweird.f32 %v5666_v50 }
 0x2b1   : > { %v2301_v44 = vmul.f32 %v5648_v33, %v2264_v20  ;;  %v2302_v60 = vmul.f32 %v5650_v0, %v2265_v35  ;;  %v2042_v61 = vmax.f32 %v2026_v45, 0.0  ;;  %v2432_v45 = vsel %vm2368_vm9, %v2336_v41, %v2400_v10 }
 0x2b2   : > { %v1863_v31 = vpop.xlane.xlu2 %1862  ;;  %v2126_v25 = vsub.f32 1.5, %v2125_v34  ;;  %v2059_v34 = vsub.f32 %v5444_v43, %v5627_v48  ;;  %v2433_v32 = vsel %vm2369_vm11, %v2337_v51, %v2401_v24  ;;  %v2060_v51 = vsub.f32 %v5453_v52, %v5634_v58 }
 0x2b3   : > { %v2338_v56 = vadd.f32 %v5652_v13, %v2301_v44  ;;  %v5679_v27 = vmul.f32 %v1863_v31, %v5079_v26  ;;  %v2339_v38 = vadd.f32 %v5657_v63, %v2302_v60  ;;  %v5685_v7 = vadd.f32 1e-05, %v2042_v61  ;;  %v4388_v9 = vpop.eup %4387 }
 0x2b4   : > { %v1959_v6 = vpop.xlane.xlu1 %1958  ;;  %v2127_v54 = vmul.f32 %v4386_v3, %v2126_v25  ;;  %v2133_v1 = vmul.f32 %v4388_v9, %v5666_v50  ;;  %vm2139_vm14 = vweird.f32 %v4388_v9 }
 0x2b5   : > { %v2011_v46 = vmul.f32 %v5679_v27, %v5679_v27  ;;  %4389 = vrsqrt.f32 %v5685_v7  ;;  %v1995_v18 = vmul.f32 %v1959_v6, %v5079_v26  ;;  %vm2370_vm12 = vcmp.ge.f32.partialorder %v2338_v56, 0.0  ;;  %vm2140_vm0 = vmor %vm2138_vm15, %vm2139_vm14 }
 0x2b6   : > { %v2131_v36 = vsel %vm2130_vm10, %v4386_v3, %v2127_v54  ;;  %v2402_v5 = vmul.f32 0.01, %v2338_v56  ;;  %v2134_v35 = vmul.f32 %v4388_v9, %v2133_v1  ;;  %vm2371_vm13 = vcmp.ge.f32.partialorder %v2339_v38, 0.0 }
 0x2b7   : > { %v2266_v20 = vmul.f32 %v2131_v36, %v2058_v8  ;;  %v2027_v55 = vsub.f32 %v1995_v18, %v2011_v46  ;;  %v2403_v60 = vmul.f32 0.01, %v2339_v38  ;;  %v2267_v1 = vmul.f32 %v2131_v36, %v2059_v34 }
 0x2b8   : > { %v2434_v44 = vsel %vm2370_vm12, %v2338_v56, %v2402_v5  ;;  %v2135_v61 = vmul.f32 0.5, %v2134_v35  ;;  %vm2148_vm2 = vweird.f32 %v5685_v7 }
 0x2b9   : > { %v2464_v25 = vpack.c.bf16 %v2434_v44, %v2432_v45  ;;  %v2043_v3 = vmax.f32 %v2027_v55, 0.0  ;;  %v2435_v8 = vsel %vm2371_vm13, %v2339_v38, %v2403_v60  ;;  %v2303_v43 = vmul.f32 %v5648_v33, %v2266_v20 }
 0x2ba   : > { %v1866_v31 = vpop.xlane.xlu2 %1865  ;;  %v2136_v46 = vsub.f32 1.5, %v2135_v61  ;;  %v2465_v41 = vpack.c.bf16 %v2435_v8, %v2433_v32  ;;  %v2061_v32 = vsub.f32 %v5456_v29, %v5634_v58  ;;  %v2304_v50 = vmul.f32 %v5650_v0, %v2267_v1 }
 0x2bb   : > { %v5696_v6 = vmul.f32 %v1866_v31, %v5079_v26  ;;  %v4390_v54 = vpop.eup %4389  ;;  %2691 = vmatmul.bf16.vlgmr.msra.gmra.mxu0 %v2464_v25  ;;  %2789 = vmatmul.bf16.vlgmr.msra.gmra.mxu2 %v2464_v25  ;;  %v5700_v10 = vadd.f32 1e-05, %v2043_v3  ;;  %v2340_v52 = vadd.f32 %v5652_v13, %v2303_v43 }
 0x2bc   : > { %v1962_v56 = vpop.xlane.xlu1 %1961  ;;  %v2143_v48 = vmul.f32 %v4390_v54, %v5685_v7  ;;  %v2137_v24 = vmul.f32 %v4388_v9, %v2136_v46  ;;  %2740 = vmatmul.bf16.vlgmr.msra.gmra.mxu1 %v2465_v41  ;;  %2838 = vmatmul.bf16.vlgmr.msra.gmra.mxu3 %v2465_v41  ;;  %vm2149_vm1 = vweird.f32 %v4390_v54  ;;  %v2341_v31 = vadd.f32 %v5657_v63, %v2304_v50 }
 0x2bd   : > { %v1996_v38 = vmul.f32 %v1962_v56, %v5079_v26  ;;  %4391 = vrsqrt.f32 %v5700_v10  ;;  %v2012_v18 = vmul.f32 %v5696_v6, %v5696_v6  ;;  %v2404_v1 = vmul.f32 0.01, %v2340_v52  ;;  %vm2150_vm3 = vmor %vm2148_vm2, %vm2149_vm1 }
 0x2be   : > { %v2144_v36 = vmul.f32 %v4390_v54, %v2143_v48  ;;  %v2141_v5 = vsel %vm2140_vm0, %v4388_v9, %v2137_v24  ;;  %v2062_v9 = vsub.f32 %v5465_v11, %v5655_v57  ;;  %vm2372_vm4 = vcmp.ge.f32.partialorder %v2340_v52, 0.0 }
 0x2bf   : > { %v2268_v20 = vmul.f32 %v2141_v5, %v2060_v51  ;;  %v2269_v35 = vmul.f32 %v2141_v5, %v2061_v32  ;;  %v2028_v45 = vsub.f32 %v1996_v38, %v2012_v18  ;;  %v2063_v7 = vsub.f32 %v5468_v62, %v5655_v57 }
 0x2c0   : > { %v2145_v55 = vmul.f32 0.5, %v2144_v36  ;;  %vm2373_vm5 = vcmp.ge.f32.partialorder %v2341_v31, 0.0  ;;  %v2405_v38 = vmul.f32 0.01, %v2341_v31  ;;  %v2436_v36 = vsel %vm2372_vm4, %v2340_v52, %v2404_v1 }
 0x2c1   : > { %v2044_v58 = vmax.f32 %v2028_v45, 0.0  ;;  %v2305_v34 = vmul.f32 %v5648_v33, %v2268_v20  ;;  %v2306_v46 = vmul.f32 %v5650_v0, %v2269_v35  ;;  %vm2158_vm9 = vweird.f32 %v5700_v10 }
 0x2c2   : > { %v1869_v44 = vpop.xlane.xlu0 %1868  ;;  %v2146_v29 = vsub.f32 1.5, %v2145_v55 }
 0x2c3   : > { %v5715_v60 = vmul.f32 %v1869_v44, %v5079_v26  ;;  %v4392_v25 = vpop.eup %4391  ;;  %v5722_v8 = vadd.f32 1e-05, %v2044_v58  ;;  %v2342_v48 = vadd.f32 %v5652_v13, %v2305_v34  ;;  %v2343_v18 = vadd.f32 %v5657_v63, %v2306_v46 }
 0x2c4   : > { %v1965_v61 = vpop.xlane.xlu2 %1964  ;;  %v2147_v3 = vmul.f32 %v4390_v54, %v2146_v29  ;;  %v2153_v41 = vmul.f32 %v4392_v25, %v5700_v10  ;;  %vm2159_vm7 = vweird.f32 %v4392_v25  ;;  %v2437_v34 = vsel %vm2373_vm5, %v2341_v31, %v2405_v38 }
 0x2c5   : > { %v1997_v56 = vmul.f32 %v1965_v61, %v5079_v26  ;;  %v2013_v11 = vmul.f32 %v5715_v60, %v5715_v60  ;;  %4393 = vrsqrt.f32 %v5722_v8  ;;  %vm2374_vm6 = vcmp.ge.f32.partialorder %v2342_v48, 0.0  ;;  %vm2160_vm10 = vmor %vm2158_vm9, %vm2159_vm7 }
 0x2c6   : > { %v2151_v43 = vsel %vm2150_vm3, %v4390_v54, %v2147_v3  ;;  %v2154_v51 = vmul.f32 %v4392_v25, %v2153_v41  ;;  %v2406_v32 = vmul.f32 0.01, %v2342_v48  ;;  %vm2375_vm8 = vcmp.ge.f32.partialorder %v2343_v18, 0.0 }
 0x2c7   : > { %v2029_v24 = vsub.f32 %v1997_v56, %v2013_v11  ;;  %v2270_v5 = vmul.f32 %v2151_v43, %v2062_v9  ;;  %v2407_v57 = vmul.f32 0.01, %v2343_v18  ;;  %v2271_v55 = vmul.f32 %v2151_v43, %v2063_v7 }
 0x2c8   : > { %v2155_v50 = vmul.f32 0.5, %v2154_v51  ;;  %v2438_v62 = vsel %vm2374_vm6, %v2342_v48, %v2406_v32  ;;  %v2064_v41 = vsub.f32 %v5477_v28, %v5679_v27  ;;  %v2065_v10 = vsub.f32 %v5480_v4, %v5679_v27 }
 0x2c9   : > { %v2045_v20 = vmax.f32 %v2029_v24, 0.0  ;;  %v2466_v29 = vpack.c.bf16 %v2438_v62, %v2436_v36  ;;  %v2439_v9 = vsel %vm2375_vm8, %v2343_v18, %v2407_v57  ;;  %v2307_v46 = vmul.f32 %v5648_v33, %v2270_v5 }
 0x2ca   : > { %v1872_v35 = vpop.xlane.xlu0 %1871  ;;  %v2156_v45 = vsub.f32 1.5, %v2155_v50  ;;  %v2467_v31 = vpack.c.bf16 %v2439_v9, %v2437_v34  ;;  %v2308_v43 = vmul.f32 %v5650_v0, %v2271_v55  ;;  %v2066_v28 = vsub.f32 %v5489_v40, %v5696_v6 }
 0x2cb   : > { %v5736_v54 = vmul.f32 %v1872_v35, %v5079_v26  ;;  %v5738_v44 = vadd.f32 1e-05, %v2045_v20  ;;  %v4394_v52 = vpop.eup %4393  ;;  %2696 = vmatmul.bf16.gmra.mxu0 %v2466_v29  ;;  %2794 = vmatmul.bf16.gmra.mxu2 %v2466_v29  ;;  %v2067_v4 = vsub.f32 %v5492_v21, %v5696_v6  ;;  %v2344_v32 = vadd.f32 %v5652_v13, %v2307_v46 }
 0x2cc   : > { %v1968_v58 = vpop.xlane.xlu2 %1967  ;;  %v2157_v3 = vmul.f32 %v4392_v25, %v2156_v45  ;;  %v2163_v1 = vmul.f32 %v4394_v52, %v5722_v8  ;;  %2745 = vmatmul.bf16.gmra.mxu1 %v2467_v31  ;;  %2843 = vmatmul.bf16.gmra.mxu3 %v2467_v31  ;;  %vm2169_vm11 = vweird.f32 %v4394_v52  ;;  %v2345_v21 = vadd.f32 %v5657_v63, %v2308_v43 }
 0x2cd   : > { %v1998_v61 = vmul.f32 %v1968_v58, %v5079_v26  ;;  %4395 = vrsqrt.f32 %v5738_v44  ;;  %v2014_v56 = vmul.f32 %v5736_v54, %v5736_v54  ;;  %vm2168_vm12 = vweird.f32 %v5722_v8 }
 0x2ce   : > { %v2161_v11 = vsel %vm2160_vm10, %v4392_v25, %v2157_v3  ;;  %v2164_v7 = vmul.f32 %v4394_v52, %v2163_v1  ;;  %v2068_v25 = vsub.f32 %v5501_v17, %v5715_v60  ;;  %v2069_v6 = vsub.f32 %v5504_v49, %v5715_v60  ;;  %vm2170_vm14 = vmor %vm2168_vm12, %vm2169_vm11 }
 0x2cf   : > { %v2272_v48 = vmul.f32 %v2161_v11, %v2064_v41  ;;  %v2273_v51 = vmul.f32 %v2161_v11, %v2065_v10  ;;  %v2030_v24 = vsub.f32 %v1998_v61, %v2014_v56  ;;  %vm2376_vm13 = vcmp.ge.f32.partialorder %v2344_v32, 0.0 }
 0x2d0   : > { %v2165_v27 = vmul.f32 0.5, %v2164_v7  ;;  %v2408_v58 = vmul.f32 0.01, %v2344_v32  ;;  %v2409_v9 = vmul.f32 0.01, %v2345_v21  ;;  %vm2377_vm2 = vcmp.ge.f32.partialorder %v2345_v21, 0.0 }
 0x2d1   : > { %v2046_v36 = vmax.f32 %v2030_v24, 0.0  ;;  %v2309_v5 = vmul.f32 %v5648_v33, %v2272_v48  ;;  %v2310_v35 = vmul.f32 %v5650_v0, %v2273_v51  ;;  %vm2178_vm3 = vweird.f32 %v5738_v44 }
 0x2d2   : > { %v1875_v38 = vpop.xlane.xlu1 %1874  ;;  %v2166_v20 = vsub.f32 1.5, %v2165_v27  ;;  %v2440_v7 = vsel %vm2376_vm13, %v2344_v32, %v2408_v58 }
 0x2d3   : > { %v5762_v18 = vmul.f32 %v1875_v38, %v5079_v26  ;;  %v4396_v50 = vpop.eup %4395  ;;  %v5771_v62 = vadd.f32 1e-05, %v2046_v36  ;;  %v2346_v8 = vadd.f32 %v5652_v13, %v2309_v5  ;;  %v2347_v60 = vadd.f32 %v5657_v63, %v2310_v35 }
 0x2d4   : > { %v1971_v40 = vpop.xlane.xlu0 %1970  ;;  %v2173_v17 = vmul.f32 %v4396_v50, %v5738_v44  ;;  %v2167_v57 = vmul.f32 %v4394_v52, %v2166_v20  ;;  %vm2179_vm1 = vweird.f32 %v4396_v50  ;;  %v2441_v36 = vsel %vm2377_vm2, %v2345_v21, %v2409_v9 }
 0x2d5   : > { %v2015_v55 = vmul.f32 %v5762_v18, %v5762_v18  ;;  %v1999_v45 = vmul.f32 %v1971_v40, %v5079_v26  ;;  %4397 = vrsqrt.f32 %v5771_v62  ;;  %vm2378_vm15 = vcmp.ge.f32.partialorder %v2346_v8, 0.0  ;;  %vm2180_vm4 = vmor %vm2178_vm3, %vm2179_vm1 }
 0x2d6   : > { %v2174_v29 = vmul.f32 %v4396_v50, %v2173_v17  ;;  %v2171_v34 = vsel %vm2170_vm14, %v4394_v52, %v2167_v57  ;;  %v2410_v10 = vmul.f32 0.01, %v2346_v8  ;;  %vm2379_vm0 = vcmp.ge.f32.partialorder %v2347_v60, 0.0 }
 0x2d7   : > { %v2031_v49 = vsub.f32 %v1999_v45, %v2015_v55  ;;  %v2274_v61 = vmul.f32 %v2171_v34, %v2066_v28  ;;  %v2275_v3 = vmul.f32 %v2171_v34, %v2067_v4  ;;  %v2411_v31 = vmul.f32 0.01, %v2347_v60 }
 0x2d8   : > { %v2175_v1 = vmul.f32 0.5, %v2174_v29  ;;  %v2442_v43 = vsel %vm2378_vm15, %v2346_v8, %v2410_v10  ;;  %v2070_v55 = vsub.f32 %v5513_v22, %v5736_v54  ;;  %vm2188_vm5 = vweird.f32 %v5771_v62 }
 0x2d9   : > { %v2047_v46 = vmax.f32 %v2031_v49, 0.0  ;;  %v2443_v48 = vsel %vm2379_vm0, %v2347_v60, %v2411_v31  ;;  %v2468_v28 = vpack.c.bf16 %v2442_v43, %v2440_v7  ;;  %v2311_v27 = vmul.f32 %v5648_v33, %v2274_v61 }
 0x2da   : > { %v1878_v41 = vpop.xlane.xlu1 %1877  ;;  %v2176_v56 = vsub.f32 1.5, %v2175_v1  ;;  %v2312_v5 = vmul.f32 %v5650_v0, %v2275_v3  ;;  %v2469_v32 = vpack.c.bf16 %v2443_v48, %v2441_v36 }
 0x2db   : > { %v5780_v11 = vmul.f32 %v1878_v41, %v5079_v26  ;;  %v5782_v52 = vadd.f32 1e-05, %v2047_v46  ;;  %v4398_v51 = vpop.eup %4397  ;;  %2701 = vmatmul.bf16.gmra.mxu0 %v2468_v28  ;;  %2799 = vmatmul.bf16.gmra.mxu2 %v2468_v28  ;;  %v2348_v21 = vadd.f32 %v5652_v13, %v2311_v27 }
 0x2dc   : > { %v2177_v24 = vmul.f32 %v4396_v50, %v2176_v56  ;;  %v1974_v4 = vpop.xlane.xlu0 %1973  ;;  %v2183_v38 = vmul.f32 %v4398_v51, %v5771_v62  ;;  %2750 = vmatmul.bf16.gmra.mxu1 %v2469_v32  ;;  %2848 = vmatmul.bf16.gmra.mxu3 %v2469_v32  ;;  %v2349_v22 = vadd.f32 %v5657_v63, %v2312_v5  ;;  %vm2189_vm6 = vweird.f32 %v4398_v51 }
 0x2dd   : > { %4399 = vrsqrt.f32 %v5782_v52  ;;  %v2016_v40 = vmul.f32 %v5780_v11, %v5780_v11  ;;  %v2000_v57 = vmul.f32 %v1974_v4, %v5079_v26  ;;  %vm2380_vm7 = vcmp.ge.f32.partialorder %v2348_v21, 0.0  ;;  %vm2190_vm8 = vmor %vm2188_vm5, %vm2189_vm6 }
 0x2de   : > { %v2181_v20 = vsel %vm2180_vm4, %v4396_v50, %v2177_v24  ;;  %v2184_v17 = vmul.f32 %v4398_v51, %v2183_v38  ;;  %v2412_v1 = vmul.f32 0.01, %v2348_v21  ;;  %vm2381_vm10 = vcmp.ge.f32.partialorder %v2349_v22, 0.0 }
 0x2df   : > { %v2276_v44 = vmul.f32 %v2181_v20, %v2068_v25  ;;  %v2277_v35 = vmul.f32 %v2181_v20, %v2069_v6  ;;  %v2032_v50 = vsub.f32 %v2000_v57, %v2016_v40  ;;  %v2071_v25 = vsub.f32 %v5516_v15, %v5736_v54 }
 0x2e0   : > { %v2185_v45 = vmul.f32 0.5, %v2184_v17  ;;  %v2444_v28 = vsel %vm2380_vm7, %v2348_v21, %v2412_v1  ;;  %v2413_v62 = vmul.f32 0.01, %v2349_v22  ;;  %v2072_v40 = vsub.f32 %v5525_v16, %v5762_v18 }
 0x2e1   : > { %v2313_v8 = vmul.f32 %v5648_v33, %v2276_v44  ;;  %v2314_v58 = vmul.f32 %v5650_v0, %v2277_v35  ;;  %v2048_v60 = vmax.f32 %v2032_v50, 0.0  ;;  %v2073_v44 = vsub.f32 %v5528_v12, %v5762_v18 }
 0x2e2   : > { %v1881_v29 = vpop.xlane.xlu2 %1880  ;;  %v2186_v49 = vsub.f32 1.5, %v2185_v45  ;;  %vm2198_vm13 = vweird.f32 %v5782_v52  ;;  %v2445_v21 = vsel %vm2381_vm10, %v2349_v22, %v2413_v62 }
 0x2e3   : > { %v5802_v6 = vmul.f32 %v1881_v29, %v5079_v26  ;;  %v4400_v34 = vpop.eup %4399  ;;  %v2350_v61 = vadd.f32 %v5652_v13, %v2313_v8  ;;  %v2351_v15 = vadd.f32 %v5657_v63, %v2314_v58  ;;  %v5808_v46 = vadd.f32 1e-05, %v2048_v60 }
 0x2e4   : > { %v1977_v9 = vpop.xlane.xlu1 %1976  ;;  %v2193_v3 = vmul.f32 %v4400_v34, %v5782_v52  ;;  %v2187_v54 = vmul.f32 %v4398_v51, %v2186_v49  ;;  %vm2199_vm11 = vweird.f32 %v4400_v34  ;;  %v2074_v49 = vsub.f32 %v5537_v53, %v5780_v11 }
 0x2e5   : > { %v2017_v41 = vmul.f32 %v5802_v6, %v5802_v6  ;;  %v2001_v10 = vmul.f32 %v1977_v9, %v5079_v26  ;;  %vm2382_vm9 = vcmp.ge.f32.partialorder %v2350_v61, 0.0  ;;  %v2414_v56 = vmul.f32 0.01, %v2350_v61  ;;  %vm2200_vm14 = vmor %vm2198_vm13, %vm2199_vm11 }
 0x2e6   : > { %v2194_v31 = vmul.f32 %v4400_v34, %v2193_v3  ;;  %v2191_v7 = vsel %vm2190_vm8, %v4398_v51, %v2187_v54  ;;  %4401 = vrsqrt.f32 %v5808_v46  ;;  %vm2383_vm12 = vcmp.ge.f32.partialorder %v2351_v15, 0.0 }
 0x2e7   : > { %v2033_v43 = vsub.f32 %v2001_v10, %v2017_v41  ;;  %v2278_v48 = vmul.f32 %v2191_v7, %v2070_v55  ;;  %v2446_v4 = vsel %vm2382_vm9, %v2350_v61, %v2414_v56  ;;  %v2279_v27 = vmul.f32 %v2191_v7, %v2071_v25 }
 0x2e8   : > { %v2195_v24 = vmul.f32 0.5, %v2194_v31  ;;  %v2470_v32 = vpack.c.bf16 %v2446_v4, %v2444_v28  ;;  %v2415_v51 = vmul.f32 0.01, %v2351_v15  ;;  %v2075_v53 = vsub.f32 %v5540_v2, %v5780_v11 }
 0x2e9   : > { %v2049_v38 = vmax.f32 %v2033_v43, 0.0  ;;  %v2315_v57 = vmul.f32 %v5648_v33, %v2278_v48  ;;  %v2316_v12 = vmul.f32 %v5650_v0, %v2279_v27  ;;  %vm2208_vm0 = vweird.f32 %v5808_v46 }
 0x2ea   : > { %v1884_v36 = vpop.xlane.xlu2 %1883  ;;  %v2196_v5 = vsub.f32 1.5, %v2195_v24  ;;  %v2447_v45 = vsel %vm2383_vm12, %v2351_v15, %v2415_v51 }
 0x2eb   : > { %v5818_v20 = vmul.f32 %v1884_v36, %v5079_v26  ;;  %v5824_v35 = vadd.f32 1e-05, %v2049_v38  ;;  %v2471_v16 = vpack.c.bf16 %v2447_v45, %v2445_v21  ;;  %2706 = vmatmul.bf16.gmra.mxu0 %v2470_v32  ;;  %2804 = vmatmul.bf16.gmra.mxu2 %v2470_v32  ;;  %v2352_v22 = vadd.f32 %v5652_v13, %v2315_v57 }
 0x2ec   : > { %v1980_v17 = vpop.xlane.xlu1 %1979  ;;  %v2197_v55 = vmul.f32 %v4400_v34, %v2196_v5  ;;  %v4402_v50 = vpop.eup %4401  ;;  %v2353_v15 = vadd.f32 %v5657_v63, %v2316_v12 }
 0x2ed   : > { %4403 = vrsqrt.f32 %v5824_v35  ;;  %v2002_v29 = vmul.f32 %v1980_v17, %v5079_v26  ;;  %v2203_v8 = vmul.f32 %v4402_v50, %v5808_v46  ;;  %v2018_v52 = vmul.f32 %v5818_v20, %v5818_v20  ;;  %2755 = vmatmul.bf16.gmra.mxu1 %v2471_v16  ;;  %2853 = vmatmul.bf16.gmra.mxu3 %v2471_v16 }
 0x2ee   : > { %v2201_v18 = vsel %vm2200_vm14, %v4400_v34, %v2197_v55  ;;  %v2416_v3 = vmul.f32 0.01, %v2352_v22  ;;  %vm2384_vm15 = vcmp.ge.f32.partialorder %v2352_v22, 0.0  ;;  %vm2209_vm1 = vweird.f32 %v4402_v50 }
 0x2ef   : > { %v2280_v58 = vmul.f32 %v2201_v18, %v2072_v40  ;;  %v2281_v25 = vmul.f32 %v2201_v18, %v2073_v44  ;;  %v2204_v60 = vmul.f32 %v4402_v50, %v2203_v8  ;;  %v2034_v9 = vsub.f32 %v2002_v29, %v2018_v52  ;;  %vm2210_vm3 = vmor %vm2208_vm0, %vm2209_vm1 }
 0x2f0   : > { %v2448_v38 = vsel %vm2384_vm15, %v2352_v22, %v2416_v3  ;;  %vm2385_vm2 = vcmp.ge.f32.partialorder %v2353_v15, 0.0  ;;  %v2417_v36 = vmul.f32 0.01, %v2353_v15  ;;  %vm2218_vm7 = vweird.f32 %v5824_v35 }
 0x2f1   : > { %v2317_v34 = vmul.f32 %v5648_v33, %v2280_v58  ;;  %v2318_v1 = vmul.f32 %v5650_v0, %v2281_v25  ;;  %v2205_v54 = vmul.f32 0.5, %v2204_v60  ;;  %v2050_v41 = vmax.f32 %v2034_v9, 0.0 }
 0x2f2   : > { %v1887_v61 = vpop.xlane.xlu0 %1886  ;;  %v2077_v60 = vsub.f32 %v5552_v19, %v5802_v6 }
 0x2f3   : > { %v5843_v10 = vmul.f32 %v1887_v61, %v5079_v26  ;;  %v4404_v31 = vpop.eup %4403  ;;  %v2354_v7 = vadd.f32 %v5652_v13, %v2317_v34  ;;  %v2355_v43 = vadd.f32 %v5657_v63, %v2318_v1  ;;  %v2206_v48 = vsub.f32 1.5, %v2205_v54 }
 0x2f4   : > { %v1983_v56 = vpop.xlane.xlu2 %1982  ;;  %v2213_v24 = vmul.f32 %v4404_v31, %v5824_v35  ;;  %v5851_v28 = vadd.f32 1e-05, %v2050_v41  ;;  %vm2219_vm6 = vweird.f32 %v4404_v31 }
 0x2f5   : > { %v2003_v4 = vmul.f32 %v1983_v56, %v5079_v26  ;;  %v2019_v27 = vmul.f32 %v5843_v10, %v5843_v10  ;;  %v2207_v2 = vmul.f32 %v4402_v50, %v2206_v48  ;;  %vm2386_vm4 = vcmp.ge.f32.partialorder %v2354_v7, 0.0  ;;  %vm2220_vm8 = vmor %vm2218_vm7, %vm2219_vm6 }
 0x2f6   : > { %v2214_v11 = vmul.f32 %v4404_v31, %v2213_v24  ;;  %4405 = vrsqrt.f32 %v5851_v28  ;;  %v2418_v5 = vmul.f32 0.01, %v2354_v7  ;;  %vm2387_vm5 = vcmp.ge.f32.partialorder %v2355_v43, 0.0 }
 0x2f7   : > { %v2035_v62 = vsub.f32 %v2003_v4, %v2019_v27  ;;  %v2211_v32 = vsel %vm2210_vm3, %v4402_v50, %v2207_v2  ;;  %v2419_v40 = vmul.f32 0.01, %v2355_v43  ;;  %v2449_v50 = vsel %vm2385_vm2, %v2353_v15, %v2417_v36 }
 0x2f8   : > { %v2215_v51 = vmul.f32 0.5, %v2214_v11  ;;  %v2282_v44 = vmul.f32 %v2211_v32, %v2074_v49  ;;  %v2283_v17 = vmul.f32 %v2211_v32, %v2075_v53  ;;  %v2450_v55 = vsel %vm2386_vm4, %v2354_v7, %v2418_v5 }
 0x2f9   : > { %v2051_v57 = vmax.f32 %v2035_v62, 0.0  ;;  %v2472_v16 = vpack.c.bf16 %v2450_v55, %v2448_v38  ;;  %v2451_v29 = vsel %vm2387_vm5, %v2355_v43, %v2419_v40  ;;  %v2076_v49 = vsub.f32 %v5549_v47, %v5802_v6 }
 0x2fa   : > { %v1890_v21 = vpop.xlane.xlu0 %1889  ;;  %v2216_v45 = vsub.f32 1.5, %v2215_v51  ;;  %v2473_v58 = vpack.c.bf16 %v2451_v29, %v2449_v50  ;;  %v2319_v22 = vmul.f32 %v5648_v33, %v2282_v44  ;;  %v2320_v34 = vmul.f32 %v5650_v0, %v2283_v17 }
 0x2fb   : > { %v5860_v12 = vmul.f32 %v1890_v21, %v5079_v26  ;;  %v5863_v46 = vadd.f32 1e-05, %v2051_v57  ;;  %2711 = vmatmul.bf16.gmra.mxu0 %v2472_v16  ;;  %2809 = vmatmul.bf16.gmra.mxu2 %v2472_v16  ;;  %v2078_v53 = vsub.f32 %v5561_v39, %v5818_v20  ;;  %vm2228_vm10 = vweird.f32 %v5851_v28 }
 0x2fc   : > { %v1986_v18 = vpop.xlane.xlu2 %1985  ;;  %v4406_v8 = vpop.eup %4405  ;;  %v2217_v52 = vmul.f32 %v4404_v31, %v2216_v45  ;;  %v2356_v6 = vadd.f32 %v5652_v13, %v2319_v22  ;;  %v2357_v43 = vadd.f32 %v5657_v63, %v2320_v34  ;;  %v2079_v17 = vsub.f32 %v5564_v14, %v5818_v20 }
 0x2fd   : > { %v2004_v25 = vmul.f32 %v1986_v18, %v5079_v26  ;;  %v2223_v35 = vmul.f32 %v4406_v8, %v5851_v28  ;;  %4407 = vrsqrt.f32 %v5863_v46  ;;  %v2020_v61 = vmul.f32 %v5860_v12, %v5860_v12  ;;  %2760 = vmatmul.bf16.gmra.mxu1 %v2473_v58  ;;  %2858 = vmatmul.bf16.gmra.mxu3 %v2473_v58 }
 0x2fe   : > { %v2221_v9 = vsel %vm2220_vm8, %v4404_v31, %v2217_v52  ;;  %vm2229_vm9 = vweird.f32 %v4406_v8  ;;  %vm2388_vm11 = vcmp.ge.f32.partialorder %v2356_v6, 0.0  ;;  %v2420_v5 = vmul.f32 0.01, %v2356_v6 }
 0x2ff   : > { %v2284_v3 = vmul.f32 %v2221_v9, %v2076_v49  ;;  %v2285_v1 = vmul.f32 %v2221_v9, %v2077_v60  ;;  %v2224_v47 = vmul.f32 %v4406_v8, %v2223_v35  ;;  %v2036_v19 = vsub.f32 %v2004_v25, %v2020_v61  ;;  %vm2230_vm12 = vmor %vm2228_vm10, %vm2229_vm9 }
 0x300   : > { %v2421_v51 = vmul.f32 0.01, %v2357_v43  ;;  %vm2389_vm15 = vcmp.ge.f32.partialorder %v2357_v43, 0.0  ;;  %v2452_v16 = vsel %vm2388_vm11, %v2356_v6, %v2420_v5  ;;  %v2080_v14 = vsub.f32 %v5573_v42, %v5843_v10 }
 0x301   : > { %v2225_v15 = vmul.f32 0.5, %v2224_v47  ;;  %v2321_v41 = vmul.f32 %v5648_v33, %v2284_v3  ;;  %v2322_v31 = vmul.f32 %v5650_v0, %v2285_v1  ;;  %v2052_v56 = vmax.f32 %v2036_v19, 0.0 }
 0x302   : > { %v1893_v54 = vpop.xlane.xlu1 %1892  ;;  %v2453_v25 = vsel %vm2389_vm15, %v2357_v43, %v2421_v51  ;;  %vm2238_vm1 = vweird.f32 %v5863_v46  ;;  %v2081_v60 = vsub.f32 %v5576_v37, %v5843_v10 }
 0x303   : > { %v5884_v7 = vmul.f32 %v1893_v54, %v5079_v26  ;;  %v4408_v48 = vpop.eup %4407  ;;  %v2226_v24 = vsub.f32 1.5, %v2225_v15  ;;  %v2358_v27 = vadd.f32 %v5652_v13, %v2321_v41  ;;  %v2359_v38 = vadd.f32 %v5657_v63, %v2322_v31 }
 0x304   : > { %v1989_v4 = vpop.xlane.xlu0 %1988  ;;  %v2233_v2 = vmul.f32 %v4408_v48, %v5863_v46  ;;  %v5891_v11 = vadd.f32 1e-05, %v2052_v56  ;;  %vm2239_vm0 = vweird.f32 %v4408_v48  ;;  %v2082_v31 = vsub.f32 %v5585_v30, %v5860_v12 }
 0x305   : > { %v2227_v39 = vmul.f32 %v4406_v8, %v2226_v24  ;;  %v2021_v36 = vmul.f32 %v5884_v7, %v5884_v7  ;;  %v2005_v62 = vmul.f32 %v1989_v4, %v5079_v26  ;;  %vm2390_vm13 = vcmp.ge.f32.partialorder %v2358_v27, 0.0  ;;  %vm2240_vm2 = vmor %vm2238_vm1, %vm2239_vm0 }
 0x306   : > { %v2234_v32 = vmul.f32 %v4408_v48, %v2233_v2  ;;  %4409 = vrsqrt.f32 %v5891_v11  ;;  %v2422_v44 = vmul.f32 0.01, %v2358_v27  ;;  %vm2391_vm14 = vcmp.ge.f32.partialorder %v2359_v38, 0.0 }
 0x307   : > { %v2231_v40 = vsel %vm2230_vm12, %v4406_v8, %v2227_v39  ;;  %v2037_v28 = vsub.f32 %v2005_v62, %v2021_v36  ;;  %v2423_v55 = vmul.f32 0.01, %v2359_v38  ;;  %vm2248_vm4 = vweird.f32 %v5891_v11 }
 0x308   : > { %v2235_v57 = vmul.f32 0.5, %v2234_v32  ;;  %v2286_v21 = vmul.f32 %v2231_v40, %v2078_v53  ;;  %v2454_v29 = vsel %vm2390_vm13, %v2358_v27, %v2422_v44  ;;  %v2287_v58 = vmul.f32 %v2231_v40, %v2079_v17 }
 0x309   : > { %v2053_v45 = vmax.f32 %v2037_v28, 0.0  ;;  %v2474_v18 = vpack.c.bf16 %v2454_v29, %v2452_v16  ;;  %v2455_v52 = vsel %vm2391_vm14, %v2359_v38, %v2423_v55  ;;  %v2083_v30 = vsub.f32 %v5588_v59, %v5860_v12  ;;  %v6716_v55 = vld [vmem:[#allocation16_spill] sm:$0xff] }
 0x30a   : > { %v2236_v50 = vsub.f32 1.5, %v2235_v57  ;;  %v2475_v49 = vpack.c.bf16 %v2455_v52, %v2453_v25  ;;  %v2323_v9 = vmul.f32 %v5648_v33, %v2286_v21  ;;  %v2324_v1 = vmul.f32 %v5650_v0, %v2287_v58 }
 0x30b   : > { %v5900_v8 = vadd.f32 1e-05, %v2053_v45  ;;  %2716 = vmatmul.bf16.gmra.mxu0 %v2474_v18  ;;  %2814 = vmatmul.bf16.gmra.mxu2 %v2474_v18  ;;  %v2084_v57 = vsub.f32 %v5597_v23, %v5884_v7  ;;  %v2085_v21 = vsub.f32 %v6716_v55, %v5884_v7 }
 0x30c   : > { %v4410_v22 = vpop.eup %4409  ;;  %v2237_v20 = vmul.f32 %v4408_v48, %v2236_v50  ;;  %v2360_v10 = vadd.f32 %v5652_v13, %v2323_v9  ;;  %v2361_v54 = vadd.f32 %v5657_v63, %v2324_v1 }
 0x30d   : > { %v2243_v35 = vmul.f32 %v4410_v22, %v5891_v11  ;;  %4411 = vrsqrt.f32 %v5900_v8  ;;  %2765 = vmatmul.bf16.gmra.mxu1 %v2475_v49  ;;  %2863 = vmatmul.bf16.gmra.mxu3 %v2475_v49  ;;  %vm2249_vm3 = vweird.f32 %v4410_v22  ;;  %vm2258_vm11 = vweird.f32 %v5900_v8 }
 0x30e   : > { %v2241_v61 = vsel %vm2240_vm2, %v4408_v48, %v2237_v20  ;;  %v2424_v43 = vmul.f32 0.01, %v2360_v10  ;;  %vm2250_vm6 = vmor %vm2248_vm4, %vm2249_vm3  ;;  %vm2392_vm7 = vcmp.ge.f32.partialorder %v2360_v10, 0.0  ;;  %v2425_v2 = vmul.f32 0.01, %v2361_v54 }
 0x30f   : > { %v2288_v34 = vmul.f32 %v2241_v61, %v2080_v14  ;;  %v2289_v3 = vmul.f32 %v2241_v61, %v2081_v60  ;;  %v2244_v42 = vmul.f32 %v4410_v22, %v2243_v35  ;;  %vm2393_vm9 = vcmp.ge.f32.partialorder %v2361_v54, 0.0 }
 0x310   : > { %v2456_v11 = vsel %vm2392_vm7, %v2360_v10, %v2424_v43  ;;  %v2457_v40 = vsel %vm2393_vm9, %v2361_v54, %v2425_v2 }
 0x311   : > { %v2245_v46 = vmul.f32 0.5, %v2244_v42  ;;  %v2325_v37 = vmul.f32 %v5648_v33, %v2288_v34  ;;  %v2326_v47 = vmul.f32 %v5650_v0, %v2289_v3 }
 0x313   : > { %v4412_v19 = vpop.eup %4411  ;;  %v2246_v6 = vsub.f32 1.5, %v2245_v46  ;;  %v2362_v15 = vadd.f32 %v5652_v13, %v2325_v37  ;;  %v2363_v41 = vadd.f32 %v5657_v63, %v2326_v47 }
 0x314   : > { %v2253_v53 = vmul.f32 %v4412_v19, %v5900_v8  ;;  %vm2259_vm10 = vweird.f32 %v4412_v19 }
 0x315   : > { %v2247_v56 = vmul.f32 %v4410_v22, %v2246_v6  ;;  %vm2394_vm5 = vcmp.ge.f32.partialorder %v2362_v15, 0.0  ;;  %v2426_v48 = vmul.f32 0.01, %v2362_v15  ;;  %vm2395_vm8 = vcmp.ge.f32.partialorder %v2363_v41, 0.0  ;;  %vm2260_vm12 = vmor %vm2258_vm11, %vm2259_vm10 }
 0x316   : > { %v2254_v24 = vmul.f32 %v4412_v19, %v2253_v53  ;;  %v2427_v4 = vmul.f32 0.01, %v2363_v41 }
 0x317   : > { %v2251_v27 = vsel %vm2250_vm6, %v4410_v22, %v2247_v56  ;;  %v2458_v38 = vsel %vm2394_vm5, %v2362_v15, %v2426_v48 }
 0x318   : > { %v2290_v39 = vmul.f32 %v2251_v27, %v2082_v31  ;;  %v2255_v36 = vmul.f32 0.5, %v2254_v24  ;;  %v2459_v62 = vsel %vm2395_vm8, %v2363_v41, %v2427_v4  ;;  %v2476_v32 = vpack.c.bf16 %v2458_v38, %v2456_v11 }
 0x319   : > { %v2291_v51 = vmul.f32 %v2251_v27, %v2083_v30  ;;  %v2477_v44 = vpack.c.bf16 %v2459_v62, %v2457_v40 }
 0x31a   : > { %v2256_v5 = vsub.f32 1.5, %v2255_v36  ;;  %v2327_v17 = vmul.f32 %v5648_v33, %v2290_v39 }
 0x31b   : > { %2721 = vmatmul.bf16.gmra.mxu0 %v2476_v32  ;;  %2819 = vmatmul.bf16.gmra.mxu2 %v2476_v32  ;;  %v2328_v16 = vmul.f32 %v5650_v0, %v2291_v51 }
 0x31c   : > { %v2257_v28 = vmul.f32 %v4412_v19, %v2256_v5  ;;  %v2364_v29 = vadd.f32 %v5652_v13, %v2327_v17 }
 0x31d   : > { %2770 = vmatmul.bf16.gmra.mxu1 %v2477_v44  ;;  %2868 = vmatmul.bf16.gmra.mxu3 %v2477_v44  ;;  %v2365_v7 = vadd.f32 %v5657_v63, %v2328_v16 }
 0x31e   : > { %v2261_v59 = vsel %vm2260_vm12, %v4412_v19, %v2257_v28  ;;  %v2428_v58 = vmul.f32 0.01, %v2364_v29  ;;  %vm2396_vm14 = vcmp.ge.f32.partialorder %v2364_v29, 0.0 }
 0x31f   : > { %v2292_v12 = vmul.f32 %v2261_v59, %v2084_v57  ;;  %v2293_v45 = vmul.f32 %v2261_v59, %v2085_v21  ;;  %v2429_v14 = vmul.f32 0.01, %v2365_v7  ;;  %vm2397_vm0 = vcmp.ge.f32.partialorder %v2365_v7, 0.0 }
 0x320   : > { %v2460_v20 = vsel %vm2396_vm14, %v2364_v29, %v2428_v58 }
 0x321   : > { %v2329_v50 = vmul.f32 %v5648_v33, %v2292_v12  ;;  %v2330_v18 = vmul.f32 %v5650_v0, %v2293_v45  ;;  %v2461_v60 = vsel %vm2397_vm0, %v2365_v7, %v2429_v14 }
 0x323   : > { %v2366_v23 = vadd.f32 %v5652_v13, %v2329_v50  ;;  %v2367_v52 = vadd.f32 %v5657_v63, %v2330_v18  ;;  %v2481_v13 = vld [vmem:[#allocation10 + $0x6] ss:$8 sm:$0x3] }
 0x324   : > { %v5936_v63 = vperm.slane %v2481_v13, 0  ;;  %v5941_v3 = vperm.slane %v2481_v13, 1 }
 0x325   : > { %vm2398_vm13 = vcmp.ge.f32.partialorder %v2366_v23, 0.0  ;;  %v2430_v8 = vmul.f32 0.01, %v2366_v23  ;;  %v2431_v25 = vmul.f32 0.01, %v2367_v52  ;;  %vm2399_vm15 = vcmp.ge.f32.partialorder %v2367_v52, 0.0 }
 0x327   : > { %v2462_v22 = vsel %vm2398_vm13, %v2366_v23, %v2430_v8  ;;  %v2463_v49 = vsel %vm2399_vm15, %v2367_v52, %v2431_v25 }
 0x328   : > { %v2478_v33 = vpack.c.bf16 %v2462_v22, %v2460_v20  ;;  %v2479_v0 = vpack.c.bf16 %v2463_v49, %v2461_v60 }
 0x32b   : > { %2726 = vmatmul.bf16.gmra.mxu0 %v2478_v33  ;;  %2824 = vmatmul.bf16.gmra.mxu2 %v2478_v33 }
 0x32d   : > { %2775 = vmatmul.bf16.gmra.mxu1 %v2479_v0  ;;  %2873 = vmatmul.bf16.gmra.mxu3 %v2479_v0 }
 0x338   : > { %v2692_v35 = vpop.f32.mrf.mxu0 }
 0x339   : > { %v2693_v9 = vadd.f32 %v2692_v35, %v5936_v63  ;;  %v2741_v61 = vpop.f32.mrf.mxu1 }
 0x33b   : > { %v5939_v34 = vadd.f32 %v2741_v61, %v2693_v9 }
 0x33d   : > { %6717 = vst [vmem:[#allocation16_spill] sm:$0xff] %v5939_v34 }
 0x33e   : > { %v2790_v42 = vpop.f32.mrf.mxu2 }
 0x33f   : > { %v2791_v1 = vadd.f32 %v2790_v42, %v5941_v3  ;;  %v2839_v46 = vpop.f32.mrf.mxu3 }
 0x340   : > { %v2694_v37 = vpop.f32.mrf.mxu0 }
 0x341   : > { %v5944_v10 = vadd.f32 %v2839_v46, %v2791_v1  ;;  %v2695_v47 = vadd.f32 %v2694_v37, %v5936_v63  ;;  %v2743_v19 = vpop.f32.mrf.mxu1 }
 0x343   : > { %6718 = vst [vmem:[#allocation17_spill] sm:$0xff] %v5944_v10  ;;  %v5947_v6 = vadd.f32 %v2743_v19, %v2695_v47 }
 0x346   : > { %v2792_v15 = vpop.f32.mrf.mxu2 }
 0x347   : > { %v2793_v54 = vadd.f32 %v2792_v15, %v5941_v3  ;;  %v2841_v41 = vpop.f32.mrf.mxu3 }
 0x348   : > { %v2697_v53 = vpop.f32.mrf.mxu0 }
 0x349   : > { %v5950_v31 = vadd.f32 %v2841_v41, %v2793_v54  ;;  %v2698_v56 = vadd.f32 %v2697_v53, %v5936_v63  ;;  %v2746_v43 = vpop.f32.mrf.mxu1 }
 0x34b   : > { %6719 = vst [vmem:[#allocation18_spill] sm:$0xff] %v5950_v31  ;;  %v5953_v48 = vadd.f32 %v2746_v43, %v2698_v56 }
 0x34e   : > { %v2795_v24 = vpop.f32.mrf.mxu2 }
 0x34f   : > { %v2796_v4 = vadd.f32 %v2795_v24, %v5941_v3  ;;  %v2844_v38 = vpop.f32.mrf.mxu3 }
 0x350   : > { %v2699_v27 = vpop.f32.mrf.mxu0 }
 0x351   : > { %v2700_v2 = vadd.f32 %v2699_v27, %v5936_v63  ;;  %v5957_v39 = vadd.f32 %v2844_v38, %v2796_v4  ;;  %v2748_v36 = vpop.f32.mrf.mxu1 }
 0x353   : > { %v5959_v30 = vadd.f32 %v2748_v36, %v2700_v2 }
 0x356   : > { %v2797_v11 = vpop.f32.mrf.mxu2 }
 0x357   : > { %v2798_v62 = vadd.f32 %v2797_v11, %v5941_v3  ;;  %v2846_v5 = vpop.f32.mrf.mxu3 }
 0x358   : > { %v2702_v32 = vpop.f32.mrf.mxu0 }
 0x359   : > { %v5962_v51 = vadd.f32 %v2846_v5, %v2798_v62  ;;  %v2703_v40 = vadd.f32 %v2702_v32, %v5936_v63  ;;  %v2751_v28 = vpop.f32.mrf.mxu1 }
 0x35b   : > { %v5965_v44 = vadd.f32 %v2751_v28, %v2703_v40 }
 0x35d   : > { %6720 = vst [vmem:[#allocation19_spill] sm:$0xff] %v5965_v44 }
 0x35e   : > { %v2800_v17 = vpop.f32.mrf.mxu2 }
 0x35f   : > { %v2801_v57 = vadd.f32 %v2800_v17, %v5941_v3  ;;  %v2849_v55 = vpop.f32.mrf.mxu3 }
 0x360   : > { %v2704_v21 = vpop.f32.mrf.mxu0 }
 0x361   : > { %v5968_v59 = vadd.f32 %v2849_v55, %v2801_v57  ;;  %v2705_v12 = vadd.f32 %v2704_v21, %v5936_v63  ;;  %v2753_v45 = vpop.f32.mrf.mxu1 }
 0x363   : > { %v5971_v16 = vadd.f32 %v2753_v45, %v2705_v12 }
 0x366   : > { %v2802_v29 = vpop.f32.mrf.mxu2 }
 0x367   : > { %v2803_v50 = vadd.f32 %v2802_v29, %v5941_v3  ;;  %v2851_v18 = vpop.f32.mrf.mxu3 }
 0x368   : > { %v2707_v23 = vpop.f32.mrf.mxu0 }
 0x369   : > { %v5974_v7 = vadd.f32 %v2851_v18, %v2803_v50  ;;  %v2708_v52 = vadd.f32 %v2707_v23, %v5936_v63 }
 0x36a   : > { %v2756_v58 = vpop.f32.mrf.mxu1 }
 0x36b   : > { %v5977_v8 = vadd.f32 %v2756_v58, %v2708_v52 }
 0x36e   : > { %v2805_v25 = vpop.f32.mrf.mxu2 }
 0x36f   : > { %v2806_v22 = vadd.f32 %v2805_v25, %v5941_v3 }
 0x370   : > { %v2854_v14 = vpop.f32.mrf.mxu3  ;;  %v2709_v20 = vpop.f32.mrf.mxu0 }
 0x371   : > { %v5980_v49 = vadd.f32 %v2854_v14, %v2806_v22  ;;  %v2710_v33 = vadd.f32 %v2709_v20, %v5936_v63 }
 0x372   : > { %v2758_v60 = vpop.f32.mrf.mxu1 }
 0x373   : > { %v5983_v0 = vadd.f32 %v2758_v60, %v2710_v33 }
 0x376   : > { %v2807_v13 = vpop.f32.mrf.mxu2 }
 0x377   : > { %v2808_v35 = vadd.f32 %v2807_v13, %v5941_v3 }
 0x378   : > { %v2856_v9 = vpop.f32.mrf.mxu3  ;;  %v2712_v61 = vpop.f32.mrf.mxu0 }
 0x379   : > { %v5986_v42 = vadd.f32 %v2856_v9, %v2808_v35  ;;  %v2713_v1 = vadd.f32 %v2712_v61, %v5936_v63 }
 0x37a   : > { %v2761_v46 = vpop.f32.mrf.mxu1 }
 0x37b   : > { %v5989_v37 = vadd.f32 %v2761_v46, %v2713_v1 }
 0x37e   : > { %v2810_v47 = vpop.f32.mrf.mxu2 }
 0x37f   : > { %v2811_v19 = vadd.f32 %v2810_v47, %v5941_v3 }
 0x380   : > { %v2859_v15 = vpop.f32.mrf.mxu3  ;;  %v2714_v54 = vpop.f32.mrf.mxu0 }
 0x381   : > { %v5992_v41 = vadd.f32 %v2859_v15, %v2811_v19  ;;  %v2715_v53 = vadd.f32 %v2714_v54, %v5936_v63 }
 0x382   : > { %v2763_v56 = vpop.f32.mrf.mxu1 }
 0x383   : > { %v5995_v43 = vadd.f32 %v2763_v56, %v2715_v53 }
 0x386   : > { %v2812_v24 = vpop.f32.mrf.mxu2 }
 0x387   : > { %v2813_v4 = vadd.f32 %v2812_v24, %v5941_v3 }
 0x388   : > { %v2861_v27 = vpop.f32.mrf.mxu3  ;;  %v2717_v38 = vpop.f32.mrf.mxu0 }
 0x389   : > { %v5998_v2 = vadd.f32 %v2861_v27, %v2813_v4  ;;  %v2718_v11 = vadd.f32 %v2717_v38, %v5936_v63 }
 0x38a   : > { %v2766_v36 = vpop.f32.mrf.mxu1 }
 0x38b   : > { %v6002_v28 = vadd.f32 %v2766_v36, %v2718_v11 }
 0x38e   : > { %v2815_v62 = vpop.f32.mrf.mxu2 }
 0x38f   : > { %v2816_v5 = vadd.f32 %v2815_v62, %v5941_v3 }
 0x390   : > { %v2864_v32 = vpop.f32.mrf.mxu3  ;;  %v2719_v40 = vpop.f32.mrf.mxu0 }
 0x391   : > { %v6004_v17 = vadd.f32 %v2864_v32, %v2816_v5  ;;  %v2720_v21 = vadd.f32 %v2719_v40, %v5936_v63 }
 0x392   : > { %v2768_v57 = vpop.f32.mrf.mxu1 }
 0x393   : > { %v2909_v55 = vadd.f32 %v6004_v17, %v6002_v28  ;;  %v6010_v18 = vadd.f32 %v2768_v57, %v2720_v21 }
 0x395   : > { %2910 = vadd.xlane.f32.xlu0 %v2909_v55 }
 0x396   : > { %v2817_v12 = vpop.f32.mrf.mxu2 }
 0x397   : > { %v2818_v45 = vadd.f32 %v2817_v12, %v5941_v3 }
 0x398   : > { %v2866_v29 = vpop.f32.mrf.mxu3  ;;  %v2722_v50 = vpop.f32.mrf.mxu0 }
 0x399   : > { %v6012_v23 = vadd.f32 %v2866_v29, %v2818_v45  ;;  %v2723_v58 = vadd.f32 %v2722_v50, %v5936_v63 }
 0x39a   : > { %v2771_v52 = vpop.f32.mrf.mxu1 }
 0x39b   : > { %v2912_v25 = vadd.f32 %v6012_v23, %v6010_v18  ;;  %v6017_v14 = vadd.f32 %v2771_v52, %v2723_v58 }
 0x39d   : > { %2913 = vadd.xlane.f32.xlu1 %v2912_v25  ;;  %v2967_v1 = vmul.f32 %v6017_v14, %v6017_v14 }
 0x39e   : > { %v2820_v22 = vpop.f32.mrf.mxu2 }
 0x39f   : > { %v2821_v20 = vadd.f32 %v2820_v22, %v5941_v3 }
 0x3a0   : > { %v2869_v33 = vpop.f32.mrf.mxu3  ;;  %v2724_v60 = vpop.f32.mrf.mxu0 }
 0x3a1   : > { %v6020_v13 = vadd.f32 %v2869_v33, %v2821_v20  ;;  %v2725_v9 = vadd.f32 %v2724_v60, %v5936_v63  ;;  %v2966_v60 = vmul.f32 %v6012_v23, %v6012_v23 }
 0x3a2   : > { %v2773_v35 = vpop.f32.mrf.mxu1 }
 0x3a3   : > { %v2915_v61 = vadd.f32 %v6020_v13, %v6017_v14  ;;  %v2968_v46 = vmul.f32 %v6020_v13, %v6020_v13  ;;  %v6029_v15 = vadd.f32 %v2773_v35, %v2725_v9  ;;  %v2965_v9 = vmul.f32 %v6010_v18, %v6010_v18 }
 0x3a5   : > { %2916 = vadd.xlane.f32.xlu2 %v2915_v61  ;;  %v3011_v47 = vadd.f32 %v2968_v46, %v2967_v1  ;;  %v2969_v38 = vmul.f32 %v6029_v15, %v6029_v15 }
 0x3a6   : > { %v2822_v19 = vpop.f32.mrf.mxu2 }
 0x3a7   : > { %v2823_v54 = vadd.f32 %v2822_v19, %v5941_v3  ;;  %3012 = vadd.xlane.f32.xlu1 %v3011_v47  ;;  %v2964_v47 = vmul.f32 %v6004_v17, %v6004_v17  ;;  %v2963_v19 = vmul.f32 %v6002_v28, %v6002_v28 }
 0x3a8   : > { %v2871_v53 = vpop.f32.mrf.mxu3  ;;  %v2727_v56 = vpop.f32.mrf.mxu0 }
 0x3a9   : > { %v6032_v24 = vadd.f32 %v2871_v53, %v2823_v54  ;;  %v2728_v4 = vadd.f32 %v2727_v56, %v5936_v63  ;;  %v2960_v54 = vmul.f32 %v5992_v41, %v5992_v41  ;;  %v3005_v53 = vadd.f32 %v2964_v47, %v2963_v19 }
 0x3aa   : > { %v2776_v11 = vpop.f32.mrf.mxu1  ;;  %v2959_v56 = vmul.f32 %v5989_v37, %v5989_v37  ;;  %v2950_v47 = vmul.f32 %v5962_v51, %v5962_v51  ;;  %v2888_v19 = vadd.f32 %v5962_v51, %v5959_v30 }
 0x3ab   : > { %v2918_v27 = vadd.f32 %v6032_v24, %v6029_v15  ;;  %v2970_v36 = vmul.f32 %v6032_v24, %v6032_v24  ;;  %v6041_v32 = vadd.f32 %v2776_v11, %v2728_v4  ;;  %v2961_v11 = vmul.f32 %v5995_v43, %v5995_v43 }
 0x3ac   : > { %v2999_v4 = vadd.f32 %v2960_v54, %v2959_v56  ;;  %v2949_v54 = vmul.f32 %v5959_v30, %v5959_v30 }
 0x3ad   : > { %2919 = vadd.xlane.f32.xlu0 %v2918_v27  ;;  %v3014_v62 = vadd.f32 %v2970_v36, %v2969_v38  ;;  %v2971_v29 = vmul.f32 %v6041_v32, %v6041_v32  ;;  %v2903_v27 = vadd.f32 %v5992_v41, %v5989_v37  ;;  %v2962_v38 = vmul.f32 %v5998_v2, %v5998_v2 }
 0x3ae   : > { %v2825_v5 = vpop.f32.mrf.mxu2  ;;  %v2906_v36 = vadd.f32 %v5998_v2, %v5995_v43  ;;  %v2984_v56 = vadd.f32 %v2950_v47, %v2949_v54 }
 0x3af   : > { %v2826_v40 = vadd.f32 %v2825_v5, %v5941_v3  ;;  %3015 = vadd.xlane.f32.xlu2 %v3014_v62  ;;  %v2900_v62 = vadd.f32 %v5986_v42, %v5983_v0  ;;  %v3002_v5 = vadd.f32 %v2962_v38, %v2961_v11  ;;  %v2943_v38 = vmul.f32 %v5939_v34, %v5939_v34 }
 0x3b0   : > { %v2874_v57 = vpop.f32.mrf.mxu3  ;;  %v2729_v55 = vpop.f32.mrf.mxu0  ;;  %v2946_v11 = vmul.f32 %v5950_v31, %v5950_v31 }
 0x3b1   : > { %v6044_v21 = vadd.f32 %v2874_v57, %v2826_v40  ;;  %v2730_v12 = vadd.f32 %v2729_v55, %v5936_v63  ;;  %v2956_v40 = vmul.f32 %v5980_v49, %v5980_v49  ;;  %v2897_v57 = vadd.f32 %v5980_v49, %v5977_v8 }
 0x3b2   : > { %v2778_v58 = vpop.f32.mrf.mxu1  ;;  %v2955_v55 = vmul.f32 %v5977_v8, %v5977_v8 }
 0x3b3   : > { %v2921_v45 = vadd.f32 %v6044_v21, %v6041_v32  ;;  %v2972_v50 = vmul.f32 %v6044_v21, %v6044_v21  ;;  %v6053_v22 = vadd.f32 %v2778_v58, %v2730_v12  ;;  %v2891_v12 = vadd.f32 %v5968_v59, %v5965_v44 }
 0x3b5   : > { %2922 = vadd.xlane.f32.xlu1 %v2921_v45  ;;  %v3017_v52 = vadd.f32 %v2972_v50, %v2971_v29  ;;  %v2973_v61 = vmul.f32 %v6053_v22, %v6053_v22  ;;  %v2993_v45 = vadd.f32 %v2956_v40, %v2955_v55  ;;  %v2958_v29 = vmul.f32 %v5986_v42, %v5986_v42 }
 0x3b6   : > { %v2827_v25 = vpop.f32.mrf.mxu2  ;;  %v2957_v50 = vmul.f32 %v5983_v0, %v5983_v0 }
 0x3b7   : > { %v2828_v20 = vadd.f32 %v2827_v25, %v5941_v3  ;;  %3018 = vadd.xlane.f32.xlu0 %v3017_v52  ;;  %v3008_v3 = vadd.f32 %v2966_v60, %v2965_v9  ;;  %v2954_v52 = vmul.f32 %v5974_v7, %v5974_v7  ;;  %v2953_v25 = vmul.f32 %v5971_v16, %v5971_v16 }
 0x3b8   : > { %v2876_v33 = vpop.f32.mrf.mxu3  ;;  %v2996_v58 = vadd.f32 %v2958_v29, %v2957_v50  ;;  %v2952_v60 = vmul.f32 %v5968_v59, %v5968_v59  ;;  %v2948_v9 = vmul.f32 %v5957_v39, %v5957_v39 }
 0x3b9   : > { %v6056_v63 = vadd.f32 %v2876_v33, %v2828_v20  ;;  %v2990_v20 = vadd.f32 %v2954_v52, %v2953_v25  ;;  %v2894_v33 = vadd.f32 %v5974_v7, %v5971_v16 }
 0x3bb   : > { %v2924_v35 = vadd.f32 %v6056_v63, %v6053_v22  ;;  %v2974_v1 = vmul.f32 %v6056_v63, %v6056_v63 }
 0x3bd   : > { %2925 = vadd.xlane.f32.xlu2 %v2924_v35  ;;  %v3020_v46 = vadd.f32 %v2974_v1, %v2973_v61  ;;  %v2951_v35 = vmul.f32 %v5965_v44, %v5965_v44  ;;  %v2947_v1 = vmul.f32 %v5953_v48, %v5953_v48 }
 0x3bf   : > { %3009 = vadd.xlane.f32.xlu0 %v3008_v3  ;;  %3021 = vadd.xlane.f32.xlu1 %v3020_v46  ;;  %v2987_v61 = vadd.f32 %v2952_v60, %v2951_v35  ;;  %v2981_v3 = vadd.f32 %v2948_v9, %v2947_v1  ;;  %v2885_v46 = vadd.f32 %v5957_v39, %v5953_v48 }
 0x3c5   : > { %3006 = vadd.xlane.f32.xlu2 %v3005_v53  ;;  %v2882_v53 = vadd.f32 %v5950_v31, %v5947_v6 }
 0x3c7   : > { %3000 = vadd.xlane.f32.xlu0 %v2999_v4  ;;  %2904 = vadd.xlane.f32.xlu1 %v2903_v27  ;;  %v2944_v4 = vmul.f32 %v5944_v10, %v5944_v10  ;;  %v2879_v27 = vadd.f32 %v5944_v10, %v5939_v34 }
 0x3cd   : > { %2907 = vadd.xlane.f32.xlu2 %v2906_v36  ;;  %v2975_v36 = vadd.f32 %v2944_v4, %v2943_v38 }
 0x3cf   : > { %2901 = vadd.xlane.f32.xlu0 %v2900_v62  ;;  %3003 = vadd.xlane.f32.xlu1 %v3002_v5  ;;  %v2945_v62 = vmul.f32 %v5947_v6, %v5947_v6 }
 0x3d1   : > { %v2978_v5 = vadd.f32 %v2946_v11, %v2945_v62 }
 0x3d5   : > { %2898 = vadd.xlane.f32.xlu2 %v2897_v57 }
 0x3d7   : > { %2892 = vadd.xlane.f32.xlu0 %v2891_v12  ;;  %2994 = vadd.xlane.f32.xlu1 %v2993_v45 }
 0x3dd   : > { %2997 = vadd.xlane.f32.xlu2 %v2996_v58 }
 0x3df   : > { %2991 = vadd.xlane.f32.xlu0 %v2990_v20  ;;  %2895 = vadd.xlane.f32.xlu1 %v2894_v33 }
 0x3e5   : > { %2988 = vadd.xlane.f32.xlu2 %v2987_v61 }
 0x3e7   : > { %2982 = vadd.xlane.f32.xlu0 %v2981_v3  ;;  %2886 = vadd.xlane.f32.xlu1 %v2885_v46 }
 0x3ed   : > { %2889 = vadd.xlane.f32.xlu2 %v2888_v19 }
 0x3ef   : > { %2883 = vadd.xlane.f32.xlu0 %v2882_v53  ;;  %2985 = vadd.xlane.f32.xlu1 %v2984_v56 }
 0x3f5   : > { %2880 = vadd.xlane.f32.xlu2 %v2879_v27 }
 0x3f7   : > { %2976 = vadd.xlane.f32.xlu1 %v2975_v36 }
 0x3fd   : > { %2979 = vadd.xlane.f32.xlu2 %v2978_v5 }
 0x408   : > { %v2911_v57 = vpop.xlane.xlu0 %2910 }
 0x409   : > { %v6154_v11 = vmul.f32 %v2911_v57, %v5079_v26 }
 0x410   : > { %v2914_v40 = vpop.xlane.xlu1 %2913 }
 0x418   : > { %v2917_v55 = vpop.xlane.xlu2 %2916 }
 0x419   : > { %v6133_v12 = vmul.f32 %v2917_v55, %v5079_v26 }
 0x41a   : > { %v3013_v45 = vpop.xlane.xlu1 %3012 }
 0x41b   : > { %v3035_v29 = vmul.f32 %v3013_v45, %v5079_v26  ;;  %v3051_v50 = vmul.f32 %v6133_v12, %v6133_v12  ;;  %v6157_v45 = vmul.f32 %v2914_v40, %v5079_v26 }
 0x41d   : > { %v3067_v52 = vsub.f32 %v3035_v29, %v3051_v50 }
 0x41f   : > { %v3083_v58 = vmax.f32 %v3067_v52, 0.0 }
 0x420   : > { %v2920_v25 = vpop.xlane.xlu0 %2919 }
 0x421   : > { %v3131_v20 = vadd.f32 1e-05, %v3083_v58  ;;  %v6139_v33 = vmul.f32 %v2920_v25, %v5079_v26 }
 0x422   : > { %v3016_v60 = vpop.xlane.xlu2 %3015 }
 0x423   : > { %4413 = vrsqrt.f32 %v3131_v20  ;;  %v3036_v35 = vmul.f32 %v3016_v60, %v5079_v26  ;;  %v3052_v9 = vmul.f32 %v6139_v33, %v6139_v33  ;;  %vm3261_vm2 = vweird.f32 %v3131_v20 }
 0x425   : > { %v3068_v61 = vsub.f32 %v3036_v35, %v3052_v9 }
 0x427   : > { %v3084_v1 = vmax.f32 %v3068_v61, 0.0  ;;  %v2483_v61 = vld [vmem:[#allocation10 + $0x7] ss:$8 sm:$0x3] }
 0x428   : > { %v2923_v3 = vpop.xlane.xlu1 %2922 }
 0x429   : > { %v4414_v46 = vpop.eup %4413  ;;  %v6145_v47 = vmul.f32 %v2923_v3, %v5079_v26  ;;  %v6147_v54 = vadd.f32 1e-05, %v3084_v1 }
 0x42a   : > { %v3256_v19 = vmul.f32 %v4414_v46, %v3131_v20  ;;  %v3019_v53 = vpop.xlane.xlu0 %3018  ;;  %vm3262_vm1 = vweird.f32 %v4414_v46  ;;  %v3049_v20 = vmul.f32 %v6154_v11, %v6154_v11 }
 0x42b   : > { %v3053_v56 = vmul.f32 %v6145_v47, %v6145_v47  ;;  %v3037_v4 = vmul.f32 %v3019_v53, %v5079_v26  ;;  %4415 = vrsqrt.f32 %v6147_v54  ;;  %vm3263_vm3 = vmor %vm3261_vm2, %vm3262_vm1  ;;  %vm3271_vm5 = vweird.f32 %v6147_v54 }
 0x42c   : > { %v3257_v27 = vmul.f32 %v4414_v46, %v3256_v19  ;;  %v3111_v19 = vsub.f32 %v6017_v14, %v6133_v12  ;;  %v2485_v14 = vld [vmem:[#allocation10 + $0x10] ss:$8 sm:$0x3] }
 0x42d   : > { %v3069_v38 = vsub.f32 %v3037_v4, %v3053_v56  ;;  %v6197_v4 = vperm.slane %v2485_v14, 0 }
 0x42e   : > { %v3258_v36 = vmul.f32 0.5, %v3257_v27  ;;  %v3050_v27 = vmul.f32 %v6157_v45, %v6157_v45 }
 0x42f   : > { %v3085_v62 = vmax.f32 %v3069_v38, 0.0 }
 0x430   : > { %v3259_v5 = vsub.f32 1.5, %v3258_v36  ;;  %v2926_v55 = vpop.xlane.xlu2 %2925 }
 0x431   : > { %v6159_v29 = vadd.f32 1e-05, %v3085_v62  ;;  %v6162_v50 = vmul.f32 %v2926_v55, %v5079_v26  ;;  %v4416_v52 = vpop.eup %4415 }
 0x432   : > { %v3260_v58 = vmul.f32 %v4414_v46, %v3259_v5  ;;  %v3022_v25 = vpop.xlane.xlu1 %3021  ;;  %v3010_v60 = vpop.xlane.xlu0 %3009  ;;  %v3266_v35 = vmul.f32 %v4416_v52, %v6147_v54  ;;  %v6186_v5 = vperm.slane %v2483_v61, 0  ;;  %vm3272_vm4 = vweird.f32 %v4416_v52 }
 0x433   : > { %4417 = vrsqrt.f32 %v6159_v29  ;;  %v3054_v1 = vmul.f32 %v6162_v50, %v6162_v50  ;;  %v3038_v56 = vmul.f32 %v3022_v25, %v5079_v26  ;;  %v3034_v38 = vmul.f32 %v3010_v60, %v5079_v26  ;;  %vm3273_vm6 = vmor %vm3271_vm5, %vm3272_vm4 }
 0x434   : > { %v3264_v9 = vsel %vm3263_vm3, %v4414_v46, %v3260_v58  ;;  %v3267_v53 = vmul.f32 %v4416_v52, %v3266_v35  ;;  %v3112_v46 = vsub.f32 %v6020_v13, %v6133_v12  ;;  %v3113_v58 = vsub.f32 %v6029_v15, %v6139_v33 }
 0x435   : > { %v3319_v36 = vmul.f32 %v3264_v9, %v3111_v19  ;;  %v3070_v55 = vsub.f32 %v3038_v56, %v3054_v1  ;;  %v3114_v25 = vsub.f32 %v6032_v24, %v6139_v33  ;;  %v6192_v35 = vperm.slane %v2483_v61, 1 }
 0x436   : > { %v3268_v62 = vmul.f32 0.5, %v3267_v53  ;;  %v3066_v13 = vsub.f32 %v3034_v38, %v3050_v27  ;;  %v6207_v54 = vperm.slane %v2485_v14, 1  ;;  %vm3281_vm7 = vweird.f32 %v6159_v29 }
 0x437   : > { %v3086_v60 = vmax.f32 %v3070_v55, 0.0  ;;  %v3356_v27 = vmul.f32 %v6186_v5, %v3319_v36 }
 0x438   : > { %v3007_v12 = vpop.xlane.xlu2 %3006  ;;  %v3269_v57 = vsub.f32 1.5, %v3268_v62  ;;  %v3082_v53 = vmax.f32 %v3066_v13, 0.0 }
 0x439   : > { %v4418_v40 = vpop.eup %4417  ;;  %v3033_v19 = vmul.f32 %v3007_v12, %v5079_v26  ;;  %v6199_v33 = vadd.f32 1e-05, %v3086_v60  ;;  %v3115_v12 = vsub.f32 %v6041_v32, %v6145_v47  ;;  %v3320_v60 = vmul.f32 %v3264_v9, %v3112_v46 }
 0x43a   : > { %v3276_v1 = vmul.f32 %v4418_v40, %v6159_v29  ;;  %v2905_v56 = vpop.xlane.xlu1 %2904  ;;  %v3001_v15 = vpop.xlane.xlu0 %3000  ;;  %v3270_v24 = vmul.f32 %v4416_v52, %v3269_v57  ;;  %v6202_v62 = vadd.f32 1e-05, %v3082_v53  ;;  %vm3282_vm8 = vweird.f32 %v4418_v40 }
 0x43b   : > { %v3065_v61 = vsub.f32 %v3033_v19, %v3049_v20  ;;  %v6205_v55 = vmul.f32 %v2905_v56, %v5079_v26  ;;  %4419 = vrsqrt.f32 %v6199_v33  ;;  %v3116_v20 = vsub.f32 %v6044_v21, %v6145_v47  ;;  %vm3283_vm9 = vmor %vm3281_vm7, %vm3282_vm8 }
 0x43c   : > { %v3277_v38 = vmul.f32 %v4418_v40, %v3276_v1  ;;  %v3274_v13 = vsel %vm3273_vm6, %v4416_v52, %v3270_v24  ;;  %4421 = vrsqrt.f32 %v6202_v62  ;;  %v3393_v52 = vadd.f32 %v6197_v4, %v3356_v27 }
 0x43d   : > { %v3081_v57 = vmax.f32 %v3065_v61, 0.0  ;;  %v3321_v19 = vmul.f32 %v3274_v13, %v3113_v58  ;;  %v3047_v9 = vmul.f32 %v6205_v55, %v6205_v55  ;;  %v3031_v46 = vmul.f32 %v3001_v15, %v5079_v26 }
 0x43e   : > { %v3278_v36 = vmul.f32 0.5, %v3277_v38  ;;  %v3322_v53 = vmul.f32 %v3274_v13, %v3114_v25  ;;  %v6231_v38 = vmul.f32 %v6192_v35, %v3320_v60  ;;  %v3457_v47 = vmul.f32 0.01, %v3393_v52 }
 0x43f   : > { %v6216_v1 = vadd.f32 1e-05, %v3081_v57  ;;  %v3063_v24 = vsub.f32 %v3031_v46, %v3047_v9  ;;  %v3358_v3 = vmul.f32 %v6186_v5, %v3321_v19  ;;  %vm3291_vm10 = vweird.f32 %v6199_v33 }
 0x440   : > { %v3279_v14 = vsub.f32 1.5, %v3278_v36  ;;  %v2908_v21 = vpop.xlane.xlu2 %2907  ;;  %vm3425_vm11 = vcmp.ge.f32.partialorder %v3393_v52, 0.0  ;;  %vm3251_vm12 = vweird.f32 %v6202_v62 }
 0x441   : > { %4423 = vrsqrt.f32 %v6216_v1  ;;  %v6228_v58 = vmul.f32 %v2908_v21, %v5079_v26  ;;  %v4420_v57 = vpop.eup %4419  ;;  %v3079_v13 = vmax.f32 %v3063_v24, 0.0  ;;  %v6258_v10 = vadd.f32 %v6197_v4, %v3358_v3 }
 0x442   : > { %v3280_v56 = vmul.f32 %v4418_v40, %v3279_v14  ;;  %v3004_v61 = vpop.xlane.xlu1 %3003  ;;  %v2902_v27 = vpop.xlane.xlu0 %2901  ;;  %v3286_v25 = vmul.f32 %v4420_v57, %v6199_v33  ;;  %v6260_v19 = vsel %vm3425_vm11, %v3393_v52, %v3457_v47  ;;  %vm3292_vm13 = vweird.f32 %v4420_v57 }
 0x443   : > { %v3048_v15 = vmul.f32 %v6228_v58, %v6228_v58  ;;  %v3032_v36 = vmul.f32 %v3004_v61, %v5079_v26  ;;  %v4422_v32 = vpop.eup %4421  ;;  %v6248_v29 = vadd.f32 1e-05, %v3079_v13  ;;  %v6251_v61 = vmul.f32 %v6192_v35, %v3322_v53  ;;  %vm3293_vm0 = vmor %vm3291_vm10, %vm3292_vm13 }
 0x444   : > { %v3284_v60 = vsel %vm3283_vm9, %v4418_v40, %v3280_v56  ;;  %v3246_v14 = vmul.f32 %v4422_v32, %v6202_v62  ;;  %v3287_v46 = vmul.f32 %v4420_v57, %v3286_v25  ;;  %vm3252_vm14 = vweird.f32 %v4422_v32 }
 0x445   : > { %v3064_v21 = vsub.f32 %v3032_v36, %v3048_v15  ;;  %v3323_v34 = vmul.f32 %v3284_v60, %v3115_v12  ;;  %4425 = vrsqrt.f32 %v6248_v29  ;;  %vm3241_vm15 = vweird.f32 %v6216_v1  ;;  %vm3253_vm1 = vmor %vm3251_vm12, %vm3252_vm14 }
 0x446   : > { %v3247_v40 = vmul.f32 %v4422_v32, %v3246_v14  ;;  %v3288_v9 = vmul.f32 0.5, %v3287_v46  ;;  %v3324_v14 = vmul.f32 %v3284_v60, %v3116_v20  ;;  %vm3221_vm3 = vweird.f32 %v6248_v29 }
 0x447   : > { %v6253_v24 = vpop.eup %4423  ;;  %v3080_v13 = vmax.f32 %v3064_v21, 0.0  ;;  %v3360_v21 = vmul.f32 %v6186_v5, %v3323_v34  ;;  %vm3427_vm11 = vcmp.ge.f32.partialorder %v6258_v10, 0.0 }
 0x448   : > { %v3236_v25 = vmul.f32 %v6253_v24, %v6216_v1  ;;  %v2899_v53 = vpop.xlane.xlu2 %2898  ;;  %v3248_v15 = vmul.f32 0.5, %v3247_v40  ;;  %v3289_v56 = vsub.f32 1.5, %v3288_v9  ;;  %v6275_v40 = vmul.f32 %v2902_v27, %v5079_v26 }
 0x449   : > { %v6269_v52 = vmul.f32 %v2899_v53, %v5079_v26  ;;  %v6272_v31 = vadd.f32 1e-05, %v3080_v13  ;;  %v6289_v34 = vmul.f32 %v6192_v35, %v3324_v14  ;;  %vm3242_vm2 = vweird.f32 %v6253_v24 }
 0x44a   : > { %v3237_v3 = vmul.f32 %v6253_v24, %v3236_v25  ;;  %v2995_v12 = vpop.xlane.xlu1 %2994  ;;  %v2893_v47 = vpop.xlane.xlu0 %2892  ;;  %v3249_v46 = vsub.f32 1.5, %v3248_v15  ;;  %v3290_v20 = vmul.f32 %v4420_v57, %v3289_v56  ;;  %v6721_v14 = vsub.f32 %v6053_v22, %v6162_v50  ;;  %vm3243_vm5 = vmor %vm3241_vm15, %vm3242_vm2 }
 0x44b   : > { %v6279_v9 = vmul.f32 %v2893_v47, %v5079_v26  ;;  %4427 = vrsqrt.f32 %v6272_v31  ;;  %v3045_v53 = vmul.f32 %v6269_v52, %v6269_v52  ;;  %v3029_v27 = vmul.f32 %v2995_v12, %v5079_v26  ;;  %v4426_v15 = vpop.eup %4425 }
 0x44c   : > { %v3238_v60 = vmul.f32 0.5, %v3237_v3  ;;  %v3250_v25 = vmul.f32 %v4422_v32, %v3249_v46  ;;  %v3294_v56 = vsel %vm3293_vm0, %v4420_v57, %v3290_v20  ;;  %v3216_v3 = vmul.f32 %v4426_v15, %v6248_v29 }
 0x44d   : > { %v3325_v57 = vmul.f32 %v3294_v56, %v6721_v14  ;;  %v3061_v14 = vsub.f32 %v3029_v27, %v3045_v53  ;;  %v6723_v47 = vsub.f32 %v6010_v18, %v6157_v45  ;;  %v3046_v46 = vmul.f32 %v6275_v40, %v6275_v40 }
 0x44e   : > { %v3239_v13 = vsub.f32 1.5, %v3238_v60  ;;  %v3254_v33 = vsel %vm3253_vm1, %v4422_v32, %v3250_v25  ;;  %v6722_v60 = vsub.f32 %v6056_v63, %v6162_v50  ;;  %v3217_v22 = vmul.f32 %v4426_v15, %v3216_v3 }
 0x44f   : > { %v6317_v36 = vmul.f32 %v3254_v33, %v6723_v47  ;;  %v6724_v50 = vsub.f32 %v6012_v23, %v6157_v45  ;;  %vm3222_vm4 = vweird.f32 %v4426_v15  ;;  %v3077_v18 = vmax.f32 %v3061_v14, 0.0 }
 0x450   : > { %v2998_v20 = vpop.xlane.xlu2 %2997  ;;  %v3326_v25 = vmul.f32 %v3294_v56, %v6722_v60  ;;  %v3240_v12 = vmul.f32 %v6253_v24, %v3239_v13  ;;  %v3218_v53 = vmul.f32 0.5, %v3217_v22  ;;  %v3362_v13 = vmul.f32 %v6186_v5, %v3325_v57  ;;  %vm3223_vm7 = vmor %vm3221_vm3, %vm3222_vm4 }
 0x451   : > { %v3030_v62 = vmul.f32 %v2998_v20, %v5079_v26  ;;  %v4428_v63 = vpop.eup %4427  ;;  %v6327_v56 = vmul.f32 %v3254_v33, %v6724_v50  ;;  %vm3231_vm6 = vweird.f32 %v6272_v31  ;;  %v6341_v60 = vadd.f32 1e-05, %v3077_v18 }
 0x452   : > { %v2896_v44 = vpop.xlane.xlu1 %2895  ;;  %v2992_v27 = vpop.xlane.xlu0 %2991  ;;  %v3226_v3 = vmul.f32 %v4428_v63, %v6272_v31  ;;  %v3363_v23 = vmul.f32 %v6192_v35, %v3326_v25  ;;  %v3244_v45 = vsel %vm3243_vm5, %v6253_v24, %v3240_v12  ;;  %v3219_v33 = vsub.f32 1.5, %v3218_v53 }
 0x453   : > { %v3062_v47 = vsub.f32 %v3030_v62, %v3046_v46  ;;  %v6336_v20 = vmul.f32 %v2896_v44, %v5079_v26  ;;  %v3028_v1 = vmul.f32 %v2992_v27, %v5079_v26  ;;  %v3043_v14 = vmul.f32 %v6279_v9, %v6279_v9 }
 0x454   : > { %v3227_v57 = vmul.f32 %v4428_v63, %v3226_v3  ;;  %v3220_v62 = vmul.f32 %v4426_v15, %v3219_v33  ;;  %4429 = vrsqrt.f32 %v6341_v60  ;;  %v3397_v24 = vadd.f32 %v6197_v4, %v3360_v21 }
 0x455   : > { %v3078_v22 = vmax.f32 %v3062_v47, 0.0  ;;  %v3044_v44 = vmul.f32 %v6336_v20, %v6336_v20  ;;  %v6725_v12 = vsub.f32 %v6002_v28, %v6154_v11  ;;  %v3399_v18 = vadd.f32 %v6197_v4, %v3362_v13 }
 0x456   : > { %v3228_v25 = vmul.f32 0.5, %v3227_v57  ;;  %v6726_v27 = vsub.f32 %v6004_v17, %v6154_v11  ;;  %vm3232_vm8 = vweird.f32 %v4428_v63  ;;  %v3224_v47 = vsel %vm3223_vm7, %v4426_v15, %v3220_v62 }
 0x457   : > { %v6353_v46 = vmul.f32 %v3244_v45, %v6725_v12  ;;  %v6355_v50 = vadd.f32 1e-05, %v3078_v22  ;;  %v3060_v21 = vsub.f32 %v3028_v1, %v3044_v44  ;;  %v3097_v13 = vsub.f32 %v5971_v16, %v6336_v20  ;;  %vm3233_vm12 = vmor %vm3231_vm6, %vm3232_vm8  ;;  %v6735_v16 = vld [vmem:[#allocation18_spill] sm:$0xff] }
 0x458   : > { %v2989_v53 = vpop.xlane.xlu2 %2988  ;;  %v6361_v3 = vmul.f32 %v3244_v45, %v6726_v27  ;;  %v3229_v33 = vsub.f32 1.5, %v3228_v25  ;;  %vm3431_vm9 = vcmp.ge.f32.partialorder %v3399_v18, 0.0  ;;  %v3461_v17 = vmul.f32 0.01, %v3397_v24 }
 0x459   : > { %v3027_v28 = vmul.f32 %v2989_v53, %v5079_v26  ;;  %4431 = vrsqrt.f32 %v6355_v50  ;;  %v3076_v57 = vmax.f32 %v3060_v21, 0.0  ;;  %vm3429_vm10 = vcmp.ge.f32.partialorder %v3397_v24, 0.0 }
 0x45a   : > { %v3230_v11 = vmul.f32 %v4428_v63, %v3229_v33  ;;  %v3463_v45 = vmul.f32 0.01, %v3399_v18  ;;  %v3398_v29 = vadd.f32 %v6207_v54, %v6289_v34  ;;  %v2887_v1 = vpop.xlane.xlu1 %2886  ;;  %v4430_v15 = vpop.eup %4429  ;;  %v3098_v62 = vsub.f32 %v5974_v7, %v6336_v20  ;;  %v6736_v7 = vld [vmem:[#allocation16_spill] sm:$0xff] }
 0x45b   : > { %v3059_v22 = vsub.f32 %v3027_v28, %v3043_v14  ;;  %v6375_v44 = vadd.f32 1e-05, %v3076_v57  ;;  %v3400_v14 = vadd.f32 %v6207_v54, %v3363_v23  ;;  %v6727_v25 = vsub.f32 %v5989_v37, %v6205_v55 }
 0x45c   : > { %v3196_v34 = vmul.f32 %v4430_v15, %v6341_v60  ;;  %vm3201_vm13 = vweird.f32 %v6341_v60  ;;  %v3495_v27 = vsel %vm3431_vm9, %v3399_v18, %v3463_v45  ;;  %v3234_v21 = vsel %vm3233_vm12, %v4428_v63, %v3230_v11  ;;  %v2983_v18 = vpop.xlane.xlu0 %2982 }
 0x45d   : > { %v3075_v12 = vmax.f32 %v3059_v22, 0.0  ;;  %v6381_v53 = vmul.f32 %v3224_v47, %v6727_v25  ;;  %4433 = vrsqrt.f32 %v6375_v44  ;;  %v3493_v23 = vsel %vm3429_vm10, %v3397_v24, %v3461_v17 }
 0x45e   : > { %v6392_v28 = vmul.f32 %v2887_v1, %v5079_v26  ;;  %v3197_v33 = vmul.f32 %v4430_v15, %v3196_v34  ;;  %v3511_v31 = vpack.c.bf16 %v3495_v27, %v3493_v23  ;;  %vm3430_vm14 = vcmp.ge.f32.partialorder %v3398_v29, 0.0 }
 0x45f   : > { %v6394_v37 = vpop.eup %4431  ;;  %v6396_v57 = vadd.f32 1e-05, %v3075_v12  ;;  %v6728_v22 = vsub.f32 %v5992_v41, %v6205_v55  ;;  %vm3432_vm15 = vcmp.ge.f32.partialorder %v3400_v14, 0.0  ;;  %v3462_v24 = vmul.f32 0.01, %v3398_v29 }
 0x460   : > { %v3206_v63 = vmul.f32 %v6394_v37, %v6355_v50  ;;  %v3198_v17 = vmul.f32 0.5, %v3197_v33  ;;  %vm3202_vm0 = vweird.f32 %v4430_v15  ;;  %vm3211_vm1 = vweird.f32 %v6355_v50  ;;  %3528 = vmatpush.bf16.xpose.msrb.mxu0 %v3511_v31  ;;  %v2890_v45 = vpop.xlane.xlu2 %2889 }
 0x461   : > { %v6401_v25 = vmul.f32 %v3224_v47, %v6728_v22  ;;  %4435 = vrsqrt.f32 %v6396_v57  ;;  %v3464_v11 = vmul.f32 0.01, %v3400_v14  ;;  %v6729_v41 = vsub.f32 %v5995_v43, %v6228_v58  ;;  %vm3203_vm4 = vmor %vm3201_vm13, %vm3202_vm0 }
 0x462   : > { %v6730_v47 = vsub.f32 %v5998_v2, %v6228_v58  ;;  %v3207_v12 = vmul.f32 %v6394_v37, %v3206_v63  ;;  %v3494_v34 = vsel %vm3430_vm14, %v3398_v29, %v3462_v24  ;;  %v3199_v27 = vsub.f32 1.5, %v3198_v17 }
 0x463   : > { %v6410_v55 = vmul.f32 %v3234_v21, %v6729_v41  ;;  %v3496_v23 = vsel %vm3432_vm15, %v3400_v14, %v3464_v11  ;;  %v3041_v33 = vmul.f32 %v6392_v28, %v6392_v28  ;;  %v3025_v31 = vmul.f32 %v2983_v18, %v5079_v26  ;;  %v4434_v22 = vpop.eup %4433 }
 0x464   : > { %v6415_v1 = vmul.f32 %v3234_v21, %v6730_v47  ;;  %v3208_v43 = vmul.f32 0.5, %v3207_v12  ;;  %v3512_v41 = vpack.c.bf16 %v3496_v23, %v3494_v34  ;;  %v6423_v32 = vmul.f32 %v2890_v45, %v5079_v26 }
 0x465   : > { %v3459_v2 = vmul.f32 0.01, %v6258_v10  ;;  %v3200_v58 = vmul.f32 %v4430_v15, %v3199_v27  ;;  %vm3212_vm2 = vweird.f32 %v6394_v37  ;;  %v3186_v29 = vmul.f32 %v4434_v22, %v6375_v44 }
 0x466   : > { %vm3191_vm3 = vweird.f32 %v6375_v44  ;;  %v3057_v14 = vsub.f32 %v3025_v31, %v3041_v33  ;;  %v3209_v21 = vsub.f32 1.5, %v3208_v43  ;;  %3541 = vmatpush.bf16.xpose.msrb.mxu1 %v3512_v41  ;;  %v3091_v63 = vsub.f32 %v5953_v48, %v6392_v28  ;;  %vm3213_vm7 = vmor %vm3211_vm1, %vm3212_vm2 }
 0x467   : > { %v3092_v24 = vsub.f32 %v5957_v39, %v6392_v28  ;;  %v3491_v18 = vsel %vm3427_vm11, %v6258_v10, %v3459_v2  ;;  %v4436_v17 = vpop.eup %4435  ;;  %v3204_v11 = vsel %vm3203_vm4, %v4430_v15, %v3200_v58  ;;  %v3187_v45 = vmul.f32 %v4434_v22, %v3186_v29 }
 0x468   : > { %v3073_v47 = vmax.f32 %v3057_v14, 0.0  ;;  %v3509_v12 = vpack.c.bf16 %v3491_v18, %v6260_v19  ;;  %v3210_v60 = vmul.f32 %v6394_v37, %v3209_v21  ;;  %vm3192_vm5 = vweird.f32 %v4434_v22  ;;  %v2881_v14 = vpop.xlane.xlu2 %2880 }
 0x469   : > { %v3176_v34 = vmul.f32 %v4436_v17, %v6396_v57  ;;  %vm3181_vm6 = vweird.f32 %v6396_v57  ;;  %v3093_v27 = vsub.f32 %v5959_v30, %v6423_v32  ;;  %v3188_v23 = vmul.f32 0.5, %v3187_v45  ;;  %vm3193_vm11 = vmor %vm3191_vm3, %vm3192_vm5  ;;  %v6737_v57 = vld [vmem:[#allocation17_spill] sm:$0xff] }
 0x46a   : > { %v6445_v33 = vadd.f32 1e-05, %v3073_v47  ;;  %v3094_v10 = vsub.f32 %v5962_v51, %v6423_v32  ;;  %3529 = vmatpush.bf16.xpose.msrb.mxu0 %v3509_v12  ;;  %v3394_v19 = vadd.f32 %v6207_v54, %v6231_v38  ;;  %v6731_v15 = vsub.f32 %v5977_v8, %v6269_v52  ;;  %v2986_v38 = vpop.xlane.xlu1 %2985 }
 0x46b   : > { %v6732_v43 = vsub.f32 %v5980_v49, %v6269_v52  ;;  %v3177_v2 = vmul.f32 %v4436_v17, %v3176_v34  ;;  %v3396_v58 = vadd.f32 %v6207_v54, %v6251_v61  ;;  %v3214_v29 = vsel %vm3213_vm7, %v6394_v37, %v3210_v60  ;;  %v2884_v52 = vpop.xlane.xlu0 %2883 }
 0x46c   : > { %v6454_v31 = vmul.f32 %v3204_v11, %v6731_v15  ;;  %v3189_v8 = vsub.f32 1.5, %v3188_v23  ;;  %4437 = vrsqrt.f32 %v6445_v33  ;;  %v3042_v49 = vmul.f32 %v6423_v32, %v6423_v32 }
 0x46d   : > { %v6459_v41 = vmul.f32 %v3204_v11, %v6732_v43  ;;  %v3178_v21 = vmul.f32 0.5, %v3177_v2  ;;  %vm3182_vm8 = vweird.f32 %v4436_v17  ;;  %vm3426_vm9 = vcmp.ge.f32.partialorder %v3394_v19, 0.0 }
 0x46e   : > { %vm3428_vm10 = vcmp.ge.f32.partialorder %v3396_v58, 0.0  ;;  %v3190_v50 = vmul.f32 %v4434_v22, %v3189_v8  ;;  %v3458_v18 = vmul.f32 0.01, %v3394_v19  ;;  %v3460_v11 = vmul.f32 0.01, %v3396_v58  ;;  %vm3183_vm12 = vmor %vm3181_vm6, %vm3182_vm8 }
 0x46f   : > { %v3026_v61 = vmul.f32 %v2986_v38, %v5079_v26  ;;  %v6733_v37 = vsub.f32 %v5983_v0, %v6275_v40  ;;  %v3179_v47 = vsub.f32 1.5, %v3178_v21  ;;  %v6481_v12 = vmul.f32 %v2884_v52, %v5079_v26 }
 0x470   : > { %v6484_v60 = vmul.f32 %v2881_v14, %v5079_v26  ;;  %v3194_v34 = vsel %vm3193_vm11, %v4434_v22, %v3190_v50  ;;  %v3490_v23 = vsel %vm3426_vm9, %v3394_v19, %v3458_v18  ;;  %v3492_v15 = vsel %vm3428_vm10, %v3396_v58, %v3460_v11  ;;  %v6738_v11 = vld [vmem:[#allocation19_spill] sm:$0xff] }
 0x471   : > { %v6475_v45 = vmul.f32 %v3214_v29, %v6733_v37  ;;  %v3058_v43 = vsub.f32 %v3026_v61, %v3042_v49  ;;  %v6734_v0 = vsub.f32 %v5986_v42, %v6275_v40  ;;  %v3180_v38 = vmul.f32 %v4436_v17, %v3179_v47 }
 0x472   : > { %v3510_v8 = vpack.c.bf16 %v3492_v15, %v3490_v23  ;;  %v3352_v44 = vmul.f32 %v6186_v5, %v6353_v46  ;;  %v4438_v21 = vpop.eup %4437  ;;  %v6496_v52 = vmul.f32 %v3194_v34, %v3097_v13  ;;  %v6501_v22 = vmul.f32 %v3194_v34, %v3098_v62  ;;  %v2977_v18 = vpop.xlane.xlu1 %2976 }
 0x473   : > { %v6489_v2 = vmul.f32 %v3214_v29, %v6734_v0  ;;  %v3074_v42 = vmax.f32 %v3058_v43, 0.0  ;;  %v3089_v40 = vsub.f32 %v5947_v6, %v6481_v12  ;;  %v3184_v46 = vsel %vm3183_vm12, %v4436_v17, %v3180_v38  ;;  %v2980_v0 = vpop.xlane.xlu2 %2979 }
 0x474   : > { %v3156_v19 = vmul.f32 %v4438_v21, %v6445_v33  ;;  %vm3161_vm13 = vweird.f32 %v6445_v33  ;;  %3542 = vmatpush.bf16.xpose.msrb.mxu1 %v3510_v8  ;;  %v3087_v20 = vsub.f32 %v6736_v7, %v6484_v60  ;;  %vm3162_vm14 = vweird.f32 %v4438_v21 }
 0x475   : > { %v6514_v62 = vadd.f32 1e-05, %v3074_v42  ;;  %v3088_v58 = vsub.f32 %v6737_v57, %v6484_v60  ;;  %v3354_v17 = vmul.f32 %v6186_v5, %v6317_v36  ;;  %v3389_v49 = vadd.f32 %v6197_v4, %v3352_v44  ;;  %vm3163_vm3 = vmor %vm3161_vm13, %vm3162_vm14 }
 0x476   : > { %v3157_v29 = vmul.f32 %v4438_v21, %v3156_v19  ;;  %v3353_v14 = vmul.f32 %v6192_v35, %v6361_v3  ;;  %v3355_v50 = vmul.f32 %v6192_v35, %v6327_v56  ;;  %v6739_v61 = vsub.f32 %v6738_v11, %v6279_v9 }
 0x477   : > { %4439 = vrsqrt.f32 %v6514_v62  ;;  %v3391_v47 = vadd.f32 %v6197_v4, %v3354_v17  ;;  %v3039_v36 = vmul.f32 %v6484_v60, %v6484_v60  ;;  %vm3421_vm15 = vcmp.ge.f32.partialorder %v3389_v49, 0.0 }
 0x478   : > { %v6528_v37 = vmul.f32 %v3184_v46, %v6739_v61  ;;  %v3158_v34 = vmul.f32 0.5, %v3157_v29  ;;  %v3453_v23 = vmul.f32 0.01, %v3389_v49  ;;  %v3390_v3 = vadd.f32 %v6207_v54, %v3353_v14 }
 0x479   : > { %vm3423_vm0 = vcmp.ge.f32.partialorder %v3391_v47, 0.0  ;;  %v3455_v56 = vmul.f32 0.01, %v3391_v47  ;;  %v3392_v15 = vadd.f32 %v6207_v54, %v3355_v50  ;;  %v3023_v43 = vmul.f32 %v2977_v18, %v5079_v26 }
 0x47a   : > { %v3159_v38 = vsub.f32 1.5, %v3158_v34  ;;  %v3485_v8 = vsel %vm3421_vm15, %v3389_v49, %v3453_v23  ;;  %vm3422_vm1 = vcmp.ge.f32.partialorder %v3390_v3, 0.0  ;;  %v3454_v44 = vmul.f32 0.01, %v3390_v3 }
 0x47b   : > { %v3487_v42 = vsel %vm3423_vm0, %v3391_v47, %v3455_v56  ;;  %vm3424_vm2 = vcmp.ge.f32.partialorder %v3392_v15, 0.0  ;;  %v3456_v19 = vmul.f32 0.01, %v3392_v15  ;;  %v3055_v17 = vsub.f32 %v3023_v43, %v3039_v36 }
 0x47c   : > { %v3160_v29 = vmul.f32 %v4438_v21, %v3159_v38  ;;  %v3507_v11 = vpack.c.bf16 %v3487_v42, %v3485_v8  ;;  %v3486_v61 = vsel %vm3422_vm1, %v3390_v3, %v3454_v44  ;;  %v3024_v14 = vmul.f32 %v2980_v0, %v5079_v26 }
 0x47d   : > { %v4440_v13 = vpop.eup %4439  ;;  %v3488_v50 = vsel %vm3424_vm2, %v3392_v15, %v3456_v19  ;;  %v3071_v18 = vmax.f32 %v3055_v17, 0.0  ;;  %v3040_v49 = vmul.f32 %v6481_v12, %v6481_v12  ;;  %v3348_v47 = vmul.f32 %v6186_v5, %v6381_v53 }
 0x47e   : > { %v6740_v36 = vsub.f32 %v5968_v59, %v6279_v9  ;;  %v3164_v23 = vsel %vm3163_vm3, %v4438_v21, %v3160_v29  ;;  %v3166_v26 = vmul.f32 %v4440_v13, %v6514_v62  ;;  %3530 = vmatpush.bf16.xpose.msrb.mxu0 %v3507_v11  ;;  %v3508_v3 = vpack.c.bf16 %v3488_v50, %v3486_v61 }
 0x47f   : > { %vm3171_vm4 = vweird.f32 %v6514_v62  ;;  %vm3172_vm5 = vweird.f32 %v4440_v13  ;;  %v6552_v33 = vadd.f32 1e-05, %v3071_v18  ;;  %v3056_v56 = vsub.f32 %v3024_v14, %v3040_v49 }
 0x480   : > { %v6548_v34 = vmul.f32 %v3184_v46, %v6740_v36  ;;  %v3167_v15 = vmul.f32 %v4440_v13, %v3166_v26  ;;  %3543 = vmatpush.bf16.xpose.msrb.mxu1 %v3508_v3  ;;  %v3350_v53 = vmul.f32 %v6186_v5, %v6410_v55  ;;  %v3385_v59 = vadd.f32 %v6197_v4, %v3348_v47  ;;  %vm3173_vm10 = vmor %vm3171_vm4, %vm3172_vm5 }
 0x481   : > { %v3349_v9 = vmul.f32 %v6192_v35, %v6401_v25  ;;  %v6562_v21 = vmul.f32 %v3164_v23, %v3091_v63  ;;  %4441 = vrsqrt.f32 %v6552_v33  ;;  %v3072_v46 = vmax.f32 %v3056_v56, 0.0 }
 0x482   : > { %v3351_v43 = vmul.f32 %v6192_v35, %v6415_v1  ;;  %v3168_v0 = vmul.f32 0.5, %v3167_v15  ;;  %v3387_v38 = vadd.f32 %v6197_v4, %v3350_v53  ;;  %vm3417_vm6 = vcmp.ge.f32.partialorder %v3385_v59, 0.0 }
 0x483   : > { %v3449_v55 = vmul.f32 0.01, %v3385_v59  ;;  %v6568_v8 = vadd.f32 1e-05, %v3072_v46  ;;  %v3386_v25 = vadd.f32 %v6207_v54, %v3349_v9  ;;  %v3344_v48 = vmul.f32 %v6186_v5, %v6454_v31 }
 0x484   : > { %v3388_v44 = vadd.f32 %v6207_v54, %v3351_v43  ;;  %v6577_v63 = vmul.f32 %v3164_v23, %v3092_v24  ;;  %v3169_v1 = vsub.f32 1.5, %v3168_v0  ;;  %vm3419_vm7 = vcmp.ge.f32.partialorder %v3387_v38, 0.0 }
 0x485   : > { %v3451_v42 = vmul.f32 0.01, %v3387_v38  ;;  %4443 = vrsqrt.f32 %v6568_v8  ;;  %v3481_v19 = vsel %vm3417_vm6, %v3385_v59, %v3449_v55  ;;  %vm3418_vm8 = vcmp.ge.f32.partialorder %v3386_v25, 0.0 }
 0x486   : > { %vm3420_vm9 = vcmp.ge.f32.partialorder %v3388_v44, 0.0  ;;  %v3170_v17 = vmul.f32 %v4440_v13, %v3169_v1  ;;  %v3450_v11 = vmul.f32 0.01, %v3386_v25  ;;  %v3452_v61 = vmul.f32 0.01, %v3388_v44 }
 0x487   : > { %v3483_v29 = vsel %vm3419_vm7, %v3387_v38, %v3451_v42  ;;  %v4442_v14 = vpop.eup %4441  ;;  %v3346_v28 = vmul.f32 %v6186_v5, %v6475_v45  ;;  %v3381_v24 = vadd.f32 %v6197_v4, %v3344_v48  ;;  %v3345_v31 = vmul.f32 %v6192_v35, %v6459_v41 }
 0x488   : > { %v3505_v39 = vpack.c.bf16 %v3483_v29, %v3481_v19  ;;  %v3174_v50 = vsel %vm3173_vm10, %v4440_v13, %v3170_v17  ;;  %v3136_v18 = vmul.f32 %v4442_v14, %v6552_v33  ;;  %vm3141_vm11 = vweird.f32 %v6552_v33 }
 0x489   : > { %vm3142_vm12 = vweird.f32 %v4442_v14  ;;  %v3482_v49 = vsel %vm3418_vm8, %v3386_v25, %v3450_v11  ;;  %v3301_v62 = vmul.f32 %v3174_v50, %v3093_v27  ;;  %v6597_v45 = vmul.f32 %v3174_v50, %v3094_v10 }
 0x48a   : > { %3531 = vmatpush.bf16.xpose.msrb.mxu0 %v3505_v39  ;;  %v3484_v41 = vsel %vm3420_vm9, %v3388_v44, %v3452_v61  ;;  %v3383_v13 = vadd.f32 %v6197_v4, %v3346_v28  ;;  %v3137_v47 = vmul.f32 %v4442_v14, %v3136_v18  ;;  %vm3413_vm13 = vcmp.ge.f32.partialorder %v3381_v24, 0.0  ;;  %vm3143_vm3 = vmor %vm3141_vm11, %vm3142_vm12 }
 0x48b   : > { %v3506_v36 = vpack.c.bf16 %v3484_v41, %v3482_v49  ;;  %v3445_v23 = vmul.f32 0.01, %v3381_v24  ;;  %v4444_v26 = vpop.eup %4443  ;;  %v3347_v30 = vmul.f32 %v6192_v35, %v6489_v2  ;;  %v3382_v27 = vadd.f32 %v6207_v54, %v3345_v31 }
 0x48c   : > { %vm3415_vm14 = vcmp.ge.f32.partialorder %v3383_v13, 0.0  ;;  %v3447_v3 = vmul.f32 0.01, %v3383_v13  ;;  %v3138_v51 = vmul.f32 0.5, %v3137_v47  ;;  %v3146_v32 = vmul.f32 %v4444_v26, %v6568_v8 }
 0x48d   : > { %vm3151_vm15 = vweird.f32 %v6568_v8  ;;  %vm3152_vm0 = vweird.f32 %v4444_v26  ;;  %3544 = vmatpush.bf16.xpose.msrb.mxu1 %v3506_v36  ;;  %v3477_v10 = vsel %vm3413_vm13, %v3381_v24, %v3445_v23  ;;  %v3384_v15 = vadd.f32 %v6207_v54, %v3347_v30 }
 0x48e   : > { %v3479_v56 = vsel %vm3415_vm14, %v3383_v13, %v3447_v3  ;;  %vm3414_vm1 = vcmp.ge.f32.partialorder %v3382_v27, 0.0  ;;  %v3446_v53 = vmul.f32 0.01, %v3382_v27  ;;  %v3139_v59 = vsub.f32 1.5, %v3138_v51  ;;  %vm3153_vm6 = vmor %vm3151_vm15, %vm3152_vm0 }
 0x48f   : > { %v3147_v9 = vmul.f32 %v4444_v26, %v3146_v32  ;;  %v3503_v46 = vpack.c.bf16 %v3479_v56, %v3477_v10  ;;  %v3340_v2 = vmul.f32 %v6186_v5, %v6528_v37  ;;  %vm3416_vm2 = vcmp.ge.f32.partialorder %v3384_v15, 0.0 }
 0x490   : > { %v3448_v43 = vmul.f32 0.01, %v3384_v15  ;;  %v3478_v0 = vsel %vm3414_vm1, %v3382_v27, %v3446_v53  ;;  %v3342_v38 = vmul.f32 %v6186_v5, %v6496_v52  ;;  %v3140_v55 = vmul.f32 %v4442_v14, %v3139_v59 }
 0x491   : > { %v3148_v25 = vmul.f32 0.5, %v3147_v9  ;;  %v3377_v44 = vadd.f32 %v6197_v4, %v3340_v2  ;;  %v3341_v48 = vmul.f32 %v6192_v35, %v6548_v34  ;;  %v3343_v42 = vmul.f32 %v6192_v35, %v6501_v22  ;;  %v3522_v2 = vld [vmem:[#allocation10 + $0x12] ss:$0 sm:$0xff] }
 0x492   : > { %3532 = vmatpush.bf16.xpose.msrb.mxu0 %v3503_v46  ;;  %v3480_v1 = vsel %vm3416_vm2, %v3384_v15, %v3448_v43  ;;  %v3379_v37 = vadd.f32 %v6197_v4, %v3342_v38  ;;  %v3336_v52 = vmul.f32 %v6186_v5, %v6562_v21  ;;  %v3144_v19 = vsel %vm3143_vm3, %v4442_v14, %v3140_v55 }
 0x493   : > { %v3149_v17 = vsub.f32 1.5, %v3148_v25  ;;  %v3504_v29 = vpack.c.bf16 %v3480_v1, %v3478_v0  ;;  %vm3409_vm4 = vcmp.ge.f32.partialorder %v3377_v44, 0.0  ;;  %v3295_v34 = vmul.f32 %v3144_v19, %v3087_v20  ;;  %v3514_v25 = vld [vmem:[#allocation10 + $0x11] ss:$8 sm:$0x3] }
 0x494   : > { %v3296_v33 = vmul.f32 %v3144_v19, %v3088_v58  ;;  %vm3411_vm5 = vcmp.ge.f32.partialorder %v3379_v37, 0.0  ;;  %v3441_v11 = vmul.f32 0.01, %v3377_v44  ;;  %v3443_v22 = vmul.f32 0.01, %v3379_v37 }
 0x495   : > { %v3150_v61 = vmul.f32 %v4444_v26, %v3149_v17  ;;  %3545 = vmatpush.bf16.xpose.msrb.mxu1 %v3504_v29  ;;  %v3378_v39 = vadd.f32 %v6207_v54, %v3341_v48  ;;  %v3380_v21 = vadd.f32 %v6207_v54, %v3343_v42  ;;  %v3338_v7 = vmul.f32 %v6186_v5, %v3301_v62 }
 0x496   : > { %v3473_v14 = vsel %vm3409_vm4, %v3377_v44, %v3441_v11  ;;  %v3373_v20 = vadd.f32 %v6197_v4, %v3336_v52  ;;  %v3337_v60 = vmul.f32 %v6192_v35, %v6577_v63  ;;  %v3475_v58 = vsel %vm3411_vm5, %v3379_v37, %v3443_v22 }
 0x497   : > { %v3154_v57 = vsel %vm3153_vm6, %v4444_v26, %v3150_v61  ;;  %vm3410_vm7 = vcmp.ge.f32.partialorder %v3378_v39, 0.0  ;;  %vm3412_vm8 = vcmp.ge.f32.partialorder %v3380_v21, 0.0  ;;  %v6741_v8 = vsub.f32 %v6735_v16, %v6481_v12 }
 0x498   : > { %v3297_v28 = vmul.f32 %v3154_v57, %v3089_v40  ;;  %v3501_v31 = vpack.c.bf16 %v3475_v58, %v3473_v14  ;;  %v3442_v50 = vmul.f32 0.01, %v3378_v39  ;;  %v3444_v18 = vmul.f32 0.01, %v3380_v21 }
 0x499   : > { %v3298_v24 = vmul.f32 %v3154_v57, %v6741_v8  ;;  %v3375_v49 = vadd.f32 %v6197_v4, %v3338_v7  ;;  %vm3405_vm9 = vcmp.ge.f32.partialorder %v3373_v20, 0.0  ;;  %v3437_v62 = vmul.f32 0.01, %v3373_v20 }
 0x49a   : > { %3533 = vmatpush.bf16.xpose.msrb.mxu0 %v3501_v31  ;;  %v3474_v63 = vsel %vm3410_vm7, %v3378_v39, %v3442_v50  ;;  %v3339_v41 = vmul.f32 %v6192_v35, %v6597_v45  ;;  %v3374_v13 = vadd.f32 %v6207_v54, %v3337_v60  ;;  %v3332_v6 = vmul.f32 %v6186_v5, %v3295_v34 }
 0x49b   : > { %v3476_v40 = vsel %vm3412_vm8, %v3380_v21, %v3444_v18  ;;  %vm3407_vm10 = vcmp.ge.f32.partialorder %v3375_v49, 0.0  ;;  %v3439_v12 = vmul.f32 0.01, %v3375_v49  ;;  %v3469_v16 = vsel %vm3405_vm9, %v3373_v20, %v3437_v62 }
 0x49c   : > { %v3502_v47 = vpack.c.bf16 %v3476_v40, %v3474_v63  ;;  %v3376_v36 = vadd.f32 %v6207_v54, %v3339_v41  ;;  %vm3406_vm11 = vcmp.ge.f32.partialorder %v3374_v13, 0.0  ;;  %v3438_v23 = vmul.f32 0.01, %v3374_v13 }
 0x49d   : > { %v3471_v26 = vsel %vm3407_vm10, %v3375_v49, %v3439_v12  ;;  %v3334_v3 = vmul.f32 %v6186_v5, %v3297_v28  ;;  %v3369_v30 = vadd.f32 %v6197_v4, %v3332_v6  ;;  %v3333_v45 = vmul.f32 %v6192_v35, %v3296_v33 }
 0x49e   : > { %3546 = vmatpush.bf16.xpose.msrb.mxu1 %v3502_v47  ;;  %v3499_v27 = vpack.c.bf16 %v3471_v26, %v3469_v16  ;;  %vm3408_vm12 = vcmp.ge.f32.partialorder %v3376_v36, 0.0  ;;  %v3440_v51 = vmul.f32 0.01, %v3376_v36  ;;  %v3335_v10 = vmul.f32 %v6192_v35, %v3298_v24 }
 0x49f   : > { %v3371_v32 = vadd.f32 %v6197_v4, %v3334_v3  ;;  %v3470_v56 = vsel %vm3406_vm11, %v3374_v13, %v3438_v23  ;;  %v3433_v53 = vmul.f32 0.01, %v3369_v30  ;;  %v3370_v9 = vadd.f32 %v6207_v54, %v3333_v45 }
 0x4a0   : > { %v3472_v15 = vsel %vm3408_vm12, %v3376_v36, %v3440_v51  ;;  %vm3401_vm14 = vcmp.ge.f32.partialorder %v3369_v30, 0.0  ;;  %v3372_v46 = vadd.f32 %v6207_v54, %v3335_v10  ;;  %v4680_v38 = vmov 0  }
 0x4a1   : > { %vm3403_vm13 = vcmp.ge.f32.partialorder %v3371_v32, 0.0  ;;  %v3435_v59 = vmul.f32 0.01, %v3371_v32  ;;  %v3500_v5 = vpack.c.bf16 %v3472_v15, %v3470_v56  ;;  %4346 = vset.pattern.permute.xlu0 %v4680_v38  ;;  %v3465_v4 = vsel %vm3401_vm14, %v3369_v30, %v3433_v53 }
 0x4a2   : > { %3534 = vmatpush.bf16.xpose.msrb.mxu0 %v3499_v27  ;;  %vm3404_vm15 = vcmp.ge.f32.partialorder %v3372_v46, 0.0  ;;  %v3436_v0 = vmul.f32 0.01, %v3372_v46  ;;  %v3434_v35 = vmul.f32 0.01, %v3370_v9  ;;  %3525 = vperm.xlu0 %4346, %v3522_v2   ;;  %vm3402_vm0 = vcmp.ge.f32.partialorder %v3370_v9, 0.0 }
 0x4a3   : > { %v3467_v43 = vsel %vm3403_vm13, %v3371_v32, %v3435_v59  ;;  %v3516_v1 = vperm.slane %v3514_v25, 0  ;;  %v3517_v42 = vperm.slane %v3514_v25, 1 }
 0x4a4   : > { %v3497_v55 = vpack.c.bf16 %v3467_v43, %v3465_v4  ;;  %v3468_v44 = vsel %vm3404_vm15, %v3372_v46, %v3436_v0  ;;  %v3466_v48 = vsel %vm3402_vm0, %v3370_v9, %v3434_v35 }
 0x4a5   : > { %v3498_v54 = vpack.c.bf16 %v3468_v44, %v3466_v48  ;;  %v3520_v37 = vpack.c.bf16 %v3516_v1, %v3516_v1  ;;  %v3521_v52 = vpack.c.bf16 %v3517_v42, %v3517_v42 }
 0x4a6   : > { %3547 = vmatpush.bf16.xpose.msrb.mxu1 %v3500_v5 }
 0x4aa   : > { %3535 = vmatpush.bf16.xpose.msrb.mxu0 %v3497_v55 }
 0x4ae   : > { %3548 = vmatpush.bf16.xpose.msrb.mxu1 %v3498_v54 }
 0x4b1   : > { %3536 = vmatmul.bf16.vlgmr.msrb.gmra.mxu0 %v3520_v37 }
 0x4b5   : > { %3549 = vmatmul.bf16.vlgmr.msrb.gmra.mxu1 %v3521_v52 }
 0x514   : > { %v3526_v19 = vpop.permute.xlu0 %3525 }
 0x52e   : > { %v3537_v17 = vpop.f32.mrf.mxu0 }
 0x52f   : > { %v3538_v29 = vadd.f32 %v3537_v17, %v3526_v19 }
 0x532   : > { %v3550_v34 = vpop.f32.mrf.mxu1 }
 0x533   : > { %v3551_v33 = vadd.f32 %v3550_v34, %v3538_v29 }
 0x535   : > { %3554 = vst [vmem:[%s310_s8] sm:$0x1] %v3551_v33 }
 0x536   : > { %v3539_v11 = vpop.f32.mrf.mxu0 }
 0x537   : > { %4622 = shalt.err (!%p4619_p10)
}
 0x538   : > { %4271 = dma.vmem_to_hbm [thread:$0]  (%p4807_p5), %s3567_s9, 16, %s3569_s10, %s3556_s14  }
 0x53a   : > { %v3552_v61 = vpop.f32.mrf.mxu1 }
 0x53b PF: > { %s3580_s6 = sand.u32 1, %s4657_s18   ;;  %p6742_p12 = scmp.ge.s32.totalorder %s4669_s21, 2 }
 0x53c   : > { %s3581_s11 = scalar_lea.sflag [#allocation4], %s3580_s6 }
 0x53d   : > { %p4291_p13 = pnand %p6742_p12, %p4746_p6 }
 0x53f   : > { %p4292_p0 = pneg %p4291_p13 }
 0x541   : > { %4652 = dma.done.wait (%p4292_p0), %s3581_s11, 16  }
 0x542   : > { %4654 = vsyncadd (%p4292_p0), %s3581_s11, 4294967280  ;;  %p20_p3 = scmp.ge.s32.totalorder %s4794_s13, 4   ;;  %s6743_s18 = smov %s4661_s19 }
 0x543   : > { %s6744_s19 = smov %s4665_s20  ;;  %s6745_s20 = smov %s4803_s16 }
 0x544   : > { %s6746_s21 = smov %s4794_s13  ;;  %22 = sbr.rel (!%p20_p3) target bundleno = 7 (0x7), region = 110 }
 0x549   :  { %3586 = vsyncpa [#allocation3], 1 }
 0x54a   :  { %3588 = vsyncpa [#allocation3 + $0x1], 1 }
 0x54b   :  { %3589 = vsyncpa [#allocation6], 1 }
 0x54c   :  { %3590 = vsyncpa [#allocation9], 1 }
 0x54d   :  { %3591 = vsyncpa [#allocation4], 1 }
 0x54e   :  { %3593 = vsyncpa [#allocation4 + $0x1], 1 }

// kernel: tpu_custom_call.1
= control target key start
LH: loop header
LB: loop body
LE: loop exit
PB: predicated region body
PF: predicated region fallthrough
CT: control target
= control target key end

     0   :  { %10 = vsyncpa [#allocation3], 0  ;;  %s6690_s0 = inlined_call_operand.hbm [shape: bf16[256,256], index: 0, kind: input, shape index: {}]   ;;  %s6691_s1 = inlined_call_operand.hbm [shape: bf16[256,256], index: 1, kind: input, shape index: {}]   ;;  %s6692_s2 = inlined_call_operand.hbm [shape: bf16[256,256], index: 2, kind: input, shape index: {}]   ;;  %s6693_s3 = inlined_call_operand.hbm [shape: bf16[256,256], index: 3, kind: input, shape index: {}]   ;;  %s6694_s4 = inlined_call_operand.hbm [shape: f32[11,256], index: 4, kind: input, shape index: {}]   ;;  %s6695_s5 = inlined_call_operand.hbm [shape: f32[1,256], index: 5, kind: output, shape index: {}]  }
   0x1   :  { %12 = vsyncpa [#allocation3 + $0x1], 0 }
   0x2   :  { %13 = vsyncpa [#allocation6], 0 }
   0x3   :  { %14 = vsyncpa [#allocation9], 0 }
   0x4   :  { %15 = vsyncpa [#allocation4], 0 }
   0x5   :  { %17 = vsyncpa [#allocation4 + $0x1], 0  ;;  %s4711_s18 = smov 0   ;;  %s4713_s19 = smov 0  }
   0x6   :  { %s4715_s20 = smov 0   ;;  %s4717_s21 = smov 0  }
   0x7 LB: > { %s4732_s22 = sadd.s32 4294967295, %s4669_s21   ;;  %s3672_s23 = sadd.s32 4294967294, %s4669_s21   ;;  %s4669_s21 = sphi %s4717_s21, %s6746_s21   ;;  %s4665_s20 = sphi %s4715_s20, %s6745_s20   ;;  %s4661_s19 = sphi %s4713_s19, %s6744_s19   ;;  %s4657_s18 = sphi %s4711_s18, %s6743_s18  }
   0x8   : > { %p43_p0 = scmp.ne.s32.totalorder %s4661_s19, %s4657_s18  ;;  %p44_p1 = scmp.eq.s32.totalorder %s4732_s22, 0 }
   0x9   : > { %p151_p2 = scmp.eq.s32.totalorder %s4732_s22, 1  ;;  %p157_p3 = scmp.eq.s32.totalorder %s3672_s23, 1 }
   0xa   : > { %p4741_p4 = por %p44_p1, %p43_p0  ;;  %p3673_p5 = scmp.ge.s32.totalorder %s4669_s21, 1 }
   0xb   : > { %p4746_p6 = por %p157_p3, %p43_p0  ;;  %p164_p7 = scmp.lt.s32.totalorder %s4669_s21, 3 }
   0xc   : > { %s175_s28 = sshll.u32 %s6691_s1, 4  ;;  %s4671_s30 = smov [#allocation5]   ;;  %s176_s28 = int_to_ptr.hbm [resolvable:$true] %s175_s28 }
   0xd   : > { %p4754_p8 = pnand %p3673_p5, %p164_p7  ;;  %s177_s6 = sshll.u32 %s4671_s30, 4  ;;  %s178_s6 = int_to_ptr.vmem [resolvable:$true] %s177_s6 }
   0xe   : > { %s203_s10 = sshll.u32 %s6693_s3, 4  ;;  %s6696_s11 = smov 128   ;;  %s204_s10 = int_to_ptr.hbm [resolvable:$true] %s203_s10 }
   0xf   : > { %p4273_p9 = pneg %p4754_p8  ;;  %s4673_s12 = smov 8  }
  0x10   : > { %s4674_s13 = smov [#allocation8]   ;;  %s189_s17 = sshll.u32 %s6692_s2, 4  ;;  %s190_s17 = int_to_ptr.hbm [resolvable:$true] %s189_s17 }
  0x11   : > { %p4762_p10 = pnand %p4273_p9, %p44_p1  ;;  %s205_s14 = sshll.u32 %s4674_s13, 4  ;;  %s206_s14 = int_to_ptr.vmem [resolvable:$true] %s205_s14 }
  0x12   : > { %s217_s27 = sshll.u32 %s6694_s4, 4  ;;  %s4677_s9 = smov 256   ;;  %s218_s27 = int_to_ptr.hbm [resolvable:$true] %s217_s27 }
  0x13   : > { %4276 = dma.hbm_to_vmem [thread:$0]  (!%p4762_p10), %s176_s28, 4096, %s178_s6, [#allocation6], %s6696_s11, %s6696_s11, %s4673_s12  }
  0x14   : > { %4282 = dma.hbm_to_vmem [thread:$0]  (!%p4762_p10), %s204_s10, 4096, %s206_s14, [#allocation9], %s6696_s11, %s6696_s11, %s4673_s12  }
  0x15   : > { %s4675_s28 = smov [#allocation7]   ;;  %s4676_s6 = smov [#allocation10]  }
  0x16   : > { %s191_s30 = sshll.u32 %s4675_s28, 4  ;;  %s219_s8 = sshll.u32 %s4676_s6, 4  ;;  %s192_s30 = int_to_ptr.vmem [resolvable:$true] %s191_s30  ;;  %s220_s8 = int_to_ptr.vmem [resolvable:$true] %s219_s8 }
  0x17   : > { %4279 = dma.hbm_to_vmem [thread:$0]  (!%p4762_p10), %s190_s17, 4096, %s192_s30, [#allocation6], %s6696_s11, %s6696_s11, %s4673_s12  }
  0x18   : > { %s4678_s10 = smov 16   ;;  %s4794_s13 = sadd.s32 1, %s4669_s21  }
  0x19   : > { %4285 = dma.hbm_to_vmem [thread:$0]  (!%p4762_p10), %s218_s27, 512, %s220_s8, [#allocation9], %s4677_s9, %s4677_s9, %s4678_s10  }
  0x1a   : > { %s27_s14 = ssub.s32 %s4669_s21, %s4794_s13  ;;  %s30_s15 = sadd.s32 1, %s4665_s20 }
  0x1b   : > { %p28_p12 = scmp.eq.s32.totalorder %s27_s14, 0  ;;  %p37_p13 = scmp.ne.s32.totalorder %s4665_s20, %s4661_s19 }
  0x1c   : > { %p38_p0 = scmp.eq.s32.totalorder %s4669_s21, 0  ;;  %p4298_p7 = scmp.lt.s32.totalorder %s4669_s21, 2 }
  0x1d   : > { %s4803_s16 = scalar_select %p28_p12, %s4665_s20, %s30_s15  }
  0x1e   : > { %p39_p3 = por %p38_p0, %p37_p13  ;;  %p4807_p5 = por %p151_p2, %p37_p13 }
  0x1f   : > { %s233_s23 = sand.u32 1, %s4665_s20   ;;  %s4140_s26 = sshll.u32 %s4669_s21, 7 }
  0x20   : > { %s3679_s7 = sshll.u32 %s233_s23, 7  ;;  %s243_s30 = scalar_lea.hbm %s6690_s0, %s4140_s26 }
  0x21   : > { %s237_s6 = scalar_lea.vmem [#allocation2], %s3679_s7  ;;  %s244_s9 = sshll.u32 %s243_s30, 4  ;;  %s245_s9 = int_to_ptr.hbm [resolvable:$true] %s244_s9 }
  0x22   : > { %s246_s8 = sshll.u32 %s237_s6, 4  ;;  %p4817_p9 = pnand %p4298_p7, %p39_p3  ;;  %s247_s8 = int_to_ptr.vmem [resolvable:$true] %s246_s8 }
  0x23   : > { %s234_s14 = scalar_lea.sflag [#allocation3], %s233_s23  ;;  %s4565_s15 = sshra.s32 %s245_s9, 4  ;;  %s4566_s15 = int_to_ptr.hbm [resolvable:$true] %s4565_s15 }
  0x24   : > { %s4567_s11 = scalar_lea.hbm %s4566_s15, 128  ;;  %p4569_p10 = pneg %p4817_p9 }
  0x25   : > { %p4568_p2 = scmp.ne.s32.totalorder %s4566_s15, %s4567_s11  ;;  %s4572_s27 = scalar_lea.hbm %s6690_s0, 256 }
  0x26   : > { %p4573_p0 = scmp.lt.s32.totalorder %s4566_s15, %s6690_s0  ;;  %p4574_p3 = scmp.lt.s32.totalorder %s4572_s27, %s4567_s11 }
  0x27   : > { %p4570_p12 = pnand %p4569_p10, %p4568_p2 }
  0x28   : > { %p4575_p7 = por %p4574_p3, %p4573_p0 }
  0x29   : > { %p4571_p13 = pneg %p4570_p12 }
  0x2b   : > { %p4576_p11 = pnand %p4575_p7, %p4571_p13 }
  0x2d   : > { %4579 = shalt.err (!%p4576_p11)
}
  0x2e   : > { %s6712_s23 = smov 128   ;;  %258 = sbr.rel (%p4754_p8) target bundleno = 1339 (0x53b), region = 40 }
  0x2f   : > { %4289 = dma.hbm_to_vmem [thread:$0]  (!%p4817_p9), %s245_s9, 2048, %s247_s8, %s234_s14, %s6712_s23, %s6712_s23, %s4673_s12  }
  0x33   : > { %s4837_s6 = sand.u32 1, %s4661_s19  }
  0x34   : > { %s3684_s15 = sshll.u32 %s4837_s6, 7  ;;  %s261_s11 = scalar_lea.sflag [#allocation3], %s4837_s6 }
  0x35   : > { %s4841_s26 = scalar_lea.vmem [#allocation2], %s3684_s15 }
  0x36   : > { %4640 = dma.done.wait (%p4741_p4), %s261_s11, 2048  }
  0x37   : > { %4642 = vsyncadd (%p4741_p4), %s261_s11, 4294965248 }
  0x38   : > { %4644 = dma.done.wait (%p44_p1), [#allocation6], 8192  }
  0x39   : > { %4646 = vsyncadd (%p44_p1), [#allocation6], 4294959104 }
  0x3a   : > { %4648 = dma.done.wait (%p44_p1), [#allocation9], 4608  }
  0x3b   : > { %4650 = vsyncadd (%p44_p1), [#allocation9], 4294962688  ;;  %v3811_v0 = vld [vmem:[#allocation5 + $0x70] sm:$0xf]  ;;  %v4172_v1 = vld [vmem:[#allocation5 + $0x74] sm:$0xf0]  ;;  %s3564_s12 = scalar_lea.hbm %s6695_s5, %s4732_s22 }
  0x3c   : > { %v3875_v2 = vld [vmem:[#allocation5 + $0xf0] sm:$0xf]  ;;  %v3812_v3 = vor.u32 %v4172_v1, %v3811_v0  ;;  %v4188_v4 = vld [vmem:[#allocation5 + $0xf4] sm:$0xf0]  ;;  %v4171_v5 = vld [vmem:[#allocation5 + $0x74] sm:$0xf] }
  0x3d   : > { %v3813_v6 = vld [vmem:[#allocation5 + $0x78] sm:$0xf0]  ;;  %v3876_v7 = vor.u32 %v4188_v4, %v3875_v2  ;;  %v4187_v9 = vld [vmem:[#allocation5 + $0xf4] sm:$0xf]  ;;  %v3803_v11 = vld [vmem:[#allocation5 + $0x60] sm:$0xf] }
  0x3e   : > { %v3816_v8 = vor.u32 %v4171_v5, %v3813_v6  ;;  %v3877_v10 = vld [vmem:[#allocation5 + $0xf8] sm:$0xf0]  ;;  %610 = vmatpush.bf16.msra.mxu0 %v3812_v3  ;;  %v4170_v13 = vld [vmem:[#allocation5 + $0x64] sm:$0xf0]  ;;  %v3867_v14 = vld [vmem:[#allocation5 + $0xe0] sm:$0xf] }
  0x3f   : > { %v3880_v12 = vor.u32 %v4187_v9, %v3877_v10  ;;  %v4186_v15 = vld [vmem:[#allocation5 + $0xe4] sm:$0xf0]  ;;  %659 = vmatpush.bf16.msra.mxu1 %v3876_v7  ;;  %v3804_v16 = vor.u32 %v4170_v13, %v3803_v11  ;;  %v4169_v18 = vld [vmem:[#allocation5 + $0x64] sm:$0xf]  ;;  %v3805_v19 = vld [vmem:[#allocation5 + $0x68] sm:$0xf0] }
  0x40   : > { %708 = vmatpush.bf16.msra.mxu2 %v3816_v8  ;;  %v3868_v17 = vor.u32 %v4186_v15, %v3867_v14  ;;  %v4185_v20 = vld [vmem:[#allocation5 + $0xe4] sm:$0xf]  ;;  %v3808_v21 = vor.u32 %v4169_v18, %v3805_v19  ;;  %v3869_v22 = vld [vmem:[#allocation5 + $0xe8] sm:$0xf0]  ;;  %v3795_v23 = vld [vmem:[#allocation5 + $0x50] sm:$0xf] }
  0x41   : > { %757 = vmatpush.bf16.msra.mxu3 %v3880_v12  ;;  %v4168_v24 = vld [vmem:[#allocation5 + $0x54] sm:$0xf0]  ;;  %v3872_v25 = vor.u32 %v4185_v20, %v3869_v22  ;;  %v3859_v26 = vld [vmem:[#allocation5 + $0xd0] sm:$0xf]  ;;  %v4167_v28 = vld [vmem:[#allocation5 + $0x54] sm:$0xf] }
  0x42   : > { %v4184_v27 = vld [vmem:[#allocation5 + $0xd4] sm:$0xf0]  ;;  %611 = vmatpush.bf16.msra.mxu0 %v3804_v16  ;;  %v3796_v29 = vor.u32 %v4168_v24, %v3795_v23  ;;  %v3797_v30 = vld [vmem:[#allocation5 + $0x58] sm:$0xf0]  ;;  %v4183_v31 = vld [vmem:[#allocation5 + $0xd4] sm:$0xf] }
  0x43   : > { %v3861_v32 = vld [vmem:[#allocation5 + $0xd8] sm:$0xf0]  ;;  %660 = vmatpush.bf16.msra.mxu1 %v3868_v17  ;;  %v3860_v33 = vor.u32 %v4184_v27, %v3859_v26  ;;  %v3800_v34 = vor.u32 %v4167_v28, %v3797_v30  ;;  %v3787_v35 = vld [vmem:[#allocation5 + $0x40] sm:$0xf]  ;;  %v4166_v36 = vld [vmem:[#allocation5 + $0x44] sm:$0xf0] }
  0x44   : > { %709 = vmatpush.bf16.msra.mxu2 %v3808_v21  ;;  %v3851_v37 = vld [vmem:[#allocation5 + $0xc0] sm:$0xf]  ;;  %v3864_v38 = vor.u32 %v4183_v31, %v3861_v32  ;;  %v4182_v39 = vld [vmem:[#allocation5 + $0xc4] sm:$0xf0]  ;;  %v4165_v40 = vld [vmem:[#allocation5 + $0x44] sm:$0xf]  ;;  %v3788_v44 = vor.u32 %v4166_v36, %v3787_v35 }
  0x45   : > { %758 = vmatpush.bf16.msra.mxu3 %v3872_v25  ;;  %v3789_v41 = vld [vmem:[#allocation5 + $0x48] sm:$0xf0]  ;;  %v4181_v42 = vld [vmem:[#allocation5 + $0xc4] sm:$0xf]  ;;  %v3852_v45 = vor.u32 %v4182_v39, %v3851_v37  ;;  %v3779_v47 = vld [vmem:[#allocation5 + $0x30] sm:$0xf] }
  0x46   : > { %v3853_v43 = vld [vmem:[#allocation5 + $0xc8] sm:$0xf0]  ;;  %612 = vmatpush.bf16.msra.mxu0 %v3796_v29  ;;  %v3792_v46 = vor.u32 %v4165_v40, %v3789_v41  ;;  %v4164_v48 = vld [vmem:[#allocation5 + $0x34] sm:$0xf0]  ;;  %v3843_v49 = vld [vmem:[#allocation5 + $0xb0] sm:$0xf] }
  0x47   : > { %661 = vmatpush.bf16.msra.mxu1 %v3860_v33  ;;  %v3856_v50 = vor.u32 %v4181_v42, %v3853_v43  ;;  %v4180_v51 = vld [vmem:[#allocation5 + $0xb4] sm:$0xf0]  ;;  %v4163_v52 = vld [vmem:[#allocation5 + $0x34] sm:$0xf]  ;;  %v3781_v53 = vld [vmem:[#allocation5 + $0x38] sm:$0xf0]  ;;  %v3780_v56 = vor.u32 %v4164_v48, %v3779_v47 }
  0x48   : > { %710 = vmatpush.bf16.msra.mxu2 %v3800_v34  ;;  %v4179_v54 = vld [vmem:[#allocation5 + $0xb4] sm:$0xf]  ;;  %v3845_v55 = vld [vmem:[#allocation5 + $0xb8] sm:$0xf0]  ;;  %v3844_v57 = vor.u32 %v4180_v51, %v3843_v49  ;;  %v3784_v58 = vor.u32 %v4163_v52, %v3781_v53  ;;  %v3771_v59 = vld [vmem:[#allocation5 + $0x20] sm:$0xf] }
  0x49   : > { %759 = vmatpush.bf16.msra.mxu3 %v3864_v38  ;;  %v4162_v60 = vld [vmem:[#allocation5 + $0x24] sm:$0xf0]  ;;  %v3835_v61 = vld [vmem:[#allocation5 + $0xa0] sm:$0xf]  ;;  %v3848_v62 = vor.u32 %v4179_v54, %v3845_v55  ;;  %v4161_v0 = vld [vmem:[#allocation5 + $0x24] sm:$0xf] }
  0x4a   : > { %613 = vmatpush.bf16.msra.mxu0 %v3788_v44  ;;  %v4178_v63 = vld [vmem:[#allocation5 + $0xa4] sm:$0xf0]  ;;  %v3773_v1 = vld [vmem:[#allocation5 + $0x28] sm:$0xf0]  ;;  %v4177_v2 = vld [vmem:[#allocation5 + $0xa4] sm:$0xf]  ;;  %v3772_v4 = vor.u32 %v4162_v60, %v3771_v59 }
  0x4b   : > { %662 = vmatpush.bf16.msra.mxu1 %v3852_v45  ;;  %v3837_v3 = vld [vmem:[#allocation5 + $0xa8] sm:$0xf0]  ;;  %v3836_v5 = vor.u32 %v4178_v63, %v3835_v61  ;;  %v3776_v6 = vor.u32 %v4161_v0, %v3773_v1  ;;  %v3763_v7 = vld [vmem:[#allocation5 + $0x10] sm:$0xf]  ;;  %v4160_v8 = vld [vmem:[#allocation5 + $0x14] sm:$0xf0] }
  0x4c   : > { %711 = vmatpush.bf16.msra.mxu2 %v3792_v46  ;;  %v3827_v9 = vld [vmem:[#allocation5 + $0x90] sm:$0xf]  ;;  %v3840_v10 = vor.u32 %v4177_v2, %v3837_v3  ;;  %v4176_v11 = vld [vmem:[#allocation5 + $0x94] sm:$0xf0]  ;;  %v4159_v12 = vld [vmem:[#allocation5 + $0x14] sm:$0xf]  ;;  %v3764_v16 = vor.u32 %v4160_v8, %v3763_v7 }
  0x4d   : > { %760 = vmatpush.bf16.msra.mxu3 %v3856_v50  ;;  %v3765_v13 = vld [vmem:[#allocation5 + $0x18] sm:$0xf0]  ;;  %v4175_v14 = vld [vmem:[#allocation5 + $0x94] sm:$0xf]  ;;  %v3828_v17 = vor.u32 %v4176_v11, %v3827_v9  ;;  %v3755_v19 = vld [vmem:[#allocation5] sm:$0xf] }
  0x4e   : > { %614 = vmatpush.bf16.msra.mxu0 %v3780_v56  ;;  %v3829_v15 = vld [vmem:[#allocation5 + $0x98] sm:$0xf0]  ;;  %v3768_v18 = vor.u32 %v4159_v12, %v3765_v13  ;;  %v4158_v20 = vld [vmem:[#allocation5 + $0x4] sm:$0xf0]  ;;  %v3819_v21 = vld [vmem:[#allocation5 + $0x80] sm:$0xf] }
  0x4f   : > { %663 = vmatpush.bf16.msra.mxu1 %v3844_v57  ;;  %v3832_v22 = vor.u32 %v4175_v14, %v3829_v15  ;;  %v4174_v23 = vld [vmem:[#allocation5 + $0x84] sm:$0xf0]  ;;  %v4157_v24 = vld [vmem:[#allocation5 + $0x4] sm:$0xf]  ;;  %v3757_v25 = vld [vmem:[#allocation5 + $0x8] sm:$0xf0]  ;;  %v3756_v28 = vor.u32 %v4158_v20, %v3755_v19 }
  0x50   : > { %712 = vmatpush.bf16.msra.mxu2 %v3784_v58  ;;  %v4173_v26 = vld [vmem:[#allocation5 + $0x84] sm:$0xf]  ;;  %v3821_v27 = vld [vmem:[#allocation5 + $0x88] sm:$0xf0]  ;;  %v3691_v29 = vld [vmem:[%s4841_s26] sm:$0xf]  ;;  %v3820_v31 = vor.u32 %v4174_v23, %v3819_v21  ;;  %v3760_v32 = vor.u32 %v4157_v24, %v3757_v25 }
  0x51   : > { %761 = vmatpush.bf16.msra.mxu3 %v3848_v62  ;;  %v4142_v30 = vld [vmem:[%s4841_s26 + $0x4] sm:$0xf0]  ;;  %v4141_v33 = vld [vmem:[%s4841_s26 + $0x4] sm:$0xf]  ;;  %v3693_v34 = vld [vmem:[%s4841_s26 + $0x8] sm:$0xf0]  ;;  %v3824_v35 = vor.u32 %v4173_v26, %v3821_v27 }
  0x52   : > { %615 = vmatpush.bf16.msra.mxu0 %v3772_v4  ;;  %v3692_v36 = vor.u32 %v4142_v30, %v3691_v29  ;;  %v3696_v37 = vor.u32 %v4141_v33, %v3693_v34  ;;  %v3699_v38 = vld [vmem:[%s4841_s26 + $0x10] sm:$0xf]  ;;  %v4144_v39 = vld [vmem:[%s4841_s26 + $0x14] sm:$0xf0]  ;;  %v4143_v40 = vld [vmem:[%s4841_s26 + $0x14] sm:$0xf] }
  0x53   : > { %664 = vmatpush.bf16.msra.mxu1 %v3836_v5  ;;  %v3701_v41 = vld [vmem:[%s4841_s26 + $0x18] sm:$0xf0]  ;;  %v3700_v42 = vor.u32 %v4144_v39, %v3699_v38  ;;  %v3707_v44 = vld [vmem:[%s4841_s26 + $0x20] sm:$0xf]  ;;  %v4146_v45 = vld [vmem:[%s4841_s26 + $0x24] sm:$0xf0] }
  0x54   : > { %713 = vmatpush.bf16.msra.mxu2 %v3776_v6  ;;  %v3704_v43 = vor.u32 %v4143_v40, %v3701_v41  ;;  %v4145_v46 = vld [vmem:[%s4841_s26 + $0x24] sm:$0xf]  ;;  %v3709_v47 = vld [vmem:[%s4841_s26 + $0x28] sm:$0xf0]  ;;  %v3708_v48 = vor.u32 %v4146_v45, %v3707_v44  ;;  %v3715_v50 = vld [vmem:[%s4841_s26 + $0x30] sm:$0xf] }
  0x55   : > { %762 = vmatpush.bf16.msra.mxu3 %v3840_v10  ;;  %v3712_v49 = vor.u32 %v4145_v46, %v3709_v47  ;;  %v4148_v51 = vld [vmem:[%s4841_s26 + $0x34] sm:$0xf0]  ;;  %v4147_v52 = vld [vmem:[%s4841_s26 + $0x34] sm:$0xf]  ;;  %v3717_v53 = vld [vmem:[%s4841_s26 + $0x38] sm:$0xf0] }
  0x56   : > { %616 = vmatpush.bf16.msra.mxu0 %v3764_v16  ;;  %v3716_v54 = vor.u32 %v4148_v51, %v3715_v50  ;;  %v3720_v55 = vor.u32 %v4147_v52, %v3717_v53  ;;  %v3723_v56 = vld [vmem:[%s4841_s26 + $0x40] sm:$0xf]  ;;  %v4150_v57 = vld [vmem:[%s4841_s26 + $0x44] sm:$0xf0]  ;;  %v4149_v58 = vld [vmem:[%s4841_s26 + $0x44] sm:$0xf] }
  0x57   : > { %665 = vmatpush.bf16.msra.mxu1 %v3828_v17  ;;  %v3725_v59 = vld [vmem:[%s4841_s26 + $0x48] sm:$0xf0]  ;;  %v3724_v60 = vor.u32 %v4150_v57, %v3723_v56  ;;  %v3731_v62 = vld [vmem:[%s4841_s26 + $0x50] sm:$0xf]  ;;  %v4152_v63 = vld [vmem:[%s4841_s26 + $0x54] sm:$0xf0] }
  0x58   : > { %714 = vmatpush.bf16.msra.mxu2 %v3768_v18  ;;  %v3728_v61 = vor.u32 %v4149_v58, %v3725_v59  ;;  %v4151_v0 = vld [vmem:[%s4841_s26 + $0x54] sm:$0xf]  ;;  %v3733_v1 = vld [vmem:[%s4841_s26 + $0x58] sm:$0xf0]  ;;  %v3732_v2 = vor.u32 %v4152_v63, %v3731_v62  ;;  %v3739_v4 = vld [vmem:[%s4841_s26 + $0x60] sm:$0xf] }
  0x59   : > { %763 = vmatpush.bf16.msra.mxu3 %v3832_v22  ;;  %v3736_v3 = vor.u32 %v4151_v0, %v3733_v1  ;;  %v4154_v5 = vld [vmem:[%s4841_s26 + $0x64] sm:$0xf0]  ;;  %v4153_v6 = vld [vmem:[%s4841_s26 + $0x64] sm:$0xf]  ;;  %v3741_v7 = vld [vmem:[%s4841_s26 + $0x68] sm:$0xf0] }
  0x5a   : > { %617 = vmatpush.bf16.msra.mxu0 %v3756_v28  ;;  %v3740_v8 = vor.u32 %v4154_v5, %v3739_v4  ;;  %v3744_v9 = vor.u32 %v4153_v6, %v3741_v7  ;;  %v3747_v10 = vld [vmem:[%s4841_s26 + $0x70] sm:$0xf]  ;;  %v4156_v11 = vld [vmem:[%s4841_s26 + $0x74] sm:$0xf0]  ;;  %v4155_v12 = vld [vmem:[%s4841_s26 + $0x74] sm:$0xf] }
  0x5b   : > { %666 = vmatpush.bf16.msra.mxu1 %v3820_v31  ;;  %v3749_v13 = vld [vmem:[%s4841_s26 + $0x78] sm:$0xf0]  ;;  %v3748_v14 = vor.u32 %v4156_v11, %v3747_v10  ;;  %v328_v16 = vld [vmem:[#allocation10] ss:$8 sm:$0x3]  ;;  %s310_s8 = scalar_lea.vmem [#allocation11], %s4837_s6 }
  0x5c   : > { %715 = vmatpush.bf16.msra.mxu2 %v3760_v32  ;;  %v3752_v15 = vor.u32 %v4155_v12, %v3749_v13  ;;  %v4887_v17 = vperm.slane %v328_v16, 0  ;;  %v4890_v21 = vperm.slane %v328_v16, 1  ;;  %s3566_s9 = sshll.u32 %s310_s8, 4  ;;  %s3568_s10 = sshll.u32 %s3564_s12, 4  ;;  %s3567_s9 = int_to_ptr.vmem [resolvable:$true] %s3566_s9  ;;  %s3569_s10 = int_to_ptr.hbm [resolvable:$true] %s3568_s10 }
  0x5d   : > { %764 = vmatpush.bf16.msra.mxu3 %v3824_v35  ;;  %618 = vmatmul.bf16.vlgmr.msra.gmra.mxu0 %v3692_v36  ;;  %s3556_s14 = scalar_lea.sflag [#allocation4], %s4837_s6  ;;  %s4609_s7 = sshra.s32 %s3569_s10, 4  ;;  %s4610_s7 = int_to_ptr.hbm [resolvable:$true] %s4609_s7 }
  0x5e   : > { %667 = vmatmul.bf16.vlgmr.msra.gmra.mxu1 %v3696_v37  ;;  %s4611_s27 = scalar_lea.hbm %s4610_s7, 1  ;;  %s4615_s30 = scalar_lea.hbm %s6695_s5, 2 }
  0x5f   : > { %716 = vmatmul.bf16.vlgmr.msra.gmra.mxu2 %v3692_v36  ;;  %p4612_p1 = scmp.ne.s32.totalorder %s4610_s7, %s4611_s27  ;;  %p4616_p11 = scmp.lt.s32.totalorder %s4610_s7, %s6695_s5 }
  0x60   : > { %765 = vmatmul.bf16.vlgmr.msra.gmra.mxu3 %v3696_v37  ;;  %p4617_p9 = scmp.lt.s32.totalorder %s4615_s30, %s4611_s27 }
  0x61   : > { %p4613_p4 = pnand %p4612_p1, %p4807_p5 }
  0x62   : > { %p4618_p2 = por %p4617_p9, %p4616_p11 }
  0x63   : > { %p4614_p8 = pneg %p4613_p4 }
  0x65   : > { %p4619_p10 = pnand %p4618_p2, %p4614_p8 }
  0x6d   : > { %623 = vmatmul.bf16.gmra.mxu0 %v3700_v42 }
  0x6e   : > { %672 = vmatmul.bf16.gmra.mxu1 %v3704_v43 }
  0x6f   : > { %721 = vmatmul.bf16.gmra.mxu2 %v3700_v42 }
  0x70   : > { %770 = vmatmul.bf16.gmra.mxu3 %v3704_v43 }
  0x7d   : > { %628 = vmatmul.bf16.gmra.mxu0 %v3708_v48 }
  0x7e   : > { %677 = vmatmul.bf16.gmra.mxu1 %v3712_v49 }
  0x7f   : > { %726 = vmatmul.bf16.gmra.mxu2 %v3708_v48 }
  0x80   : > { %775 = vmatmul.bf16.gmra.mxu3 %v3712_v49 }
  0x8d   : > { %633 = vmatmul.bf16.gmra.mxu0 %v3716_v54 }
  0x8e   : > { %682 = vmatmul.bf16.gmra.mxu1 %v3720_v55 }
  0x8f   : > { %731 = vmatmul.bf16.gmra.mxu2 %v3716_v54 }
  0x90   : > { %780 = vmatmul.bf16.gmra.mxu3 %v3720_v55 }
  0x9d   : > { %638 = vmatmul.bf16.gmra.mxu0 %v3724_v60 }
  0x9e   : > { %687 = vmatmul.bf16.gmra.mxu1 %v3728_v61 }
  0x9f   : > { %736 = vmatmul.bf16.gmra.mxu2 %v3724_v60 }
  0xa0   : > { %785 = vmatmul.bf16.gmra.mxu3 %v3728_v61 }
  0xad   : > { %643 = vmatmul.bf16.gmra.mxu0 %v3732_v2 }
  0xae   : > { %692 = vmatmul.bf16.gmra.mxu1 %v3736_v3 }
  0xaf   : > { %741 = vmatmul.bf16.gmra.mxu2 %v3732_v2 }
  0xb0   : > { %790 = vmatmul.bf16.gmra.mxu3 %v3736_v3 }
  0xbd   : > { %648 = vmatmul.bf16.gmra.mxu0 %v3740_v8 }
  0xbe   : > { %697 = vmatmul.bf16.gmra.mxu1 %v3744_v9 }
  0xbf   : > { %746 = vmatmul.bf16.gmra.mxu2 %v3740_v8 }
  0xc0   : > { %795 = vmatmul.bf16.gmra.mxu3 %v3744_v9 }
  0xcd   : > { %653 = vmatmul.bf16.gmra.mxu0 %v3748_v14 }
  0xce   : > { %702 = vmatmul.bf16.gmra.mxu1 %v3752_v15 }
  0xcf   : > { %751 = vmatmul.bf16.gmra.mxu2 %v3748_v14 }
  0xd0   : > { %800 = vmatmul.bf16.gmra.mxu3 %v3752_v15 }
  0xda   : > { %v619_v18 = vpop.f32.mrf.mxu0 }
  0xdb   : > { %v668_v19 = vpop.f32.mrf.mxu1  ;;  %v620_v20 = vadd.f32 %v619_v18, %v4887_v17 }
  0xdd   : > { %v4892_v22 = vadd.f32 %v668_v19, %v620_v20 }
  0xdf   : > { %v877_v29 = vmul.f32 %v4892_v22, %v4892_v22 }
  0xe2   : > { %v717_v23 = vpop.f32.mrf.mxu2  ;;  %v621_v26 = vpop.f32.mrf.mxu0 }
  0xe3   : > { %v718_v24 = vadd.f32 %v717_v23, %v4890_v21  ;;  %v766_v25 = vpop.f32.mrf.mxu3  ;;  %v670_v27 = vpop.f32.mrf.mxu1  ;;  %v622_v30 = vadd.f32 %v621_v26, %v4887_v17 }
  0xe5   : > { %v4895_v28 = vadd.f32 %v766_v25, %v718_v24  ;;  %v4904_v35 = vadd.f32 %v670_v27, %v622_v30 }
  0xe7   : > { %v806_v31 = vadd.f32 %v4895_v28, %v4892_v22  ;;  %v878_v32 = vmul.f32 %v4895_v28, %v4895_v28  ;;  %v879_v43 = vmul.f32 %v4904_v35, %v4904_v35 }
  0xe9   : > { %807 = vadd.xlane.f32.xlu0 %v806_v31  ;;  %v909_v33 = vadd.f32 %v878_v32, %v877_v29 }
  0xea   : > { %v719_v34 = vpop.f32.mrf.mxu2  ;;  %v624_v38 = vpop.f32.mrf.mxu0 }
  0xeb   : > { %v720_v36 = vadd.f32 %v719_v34, %v4890_v21  ;;  %v768_v37 = vpop.f32.mrf.mxu3  ;;  %910 = vadd.xlane.f32.xlu1 %v909_v33  ;;  %v673_v39 = vpop.f32.mrf.mxu1  ;;  %v625_v41 = vadd.f32 %v624_v38, %v4887_v17 }
  0xed   : > { %v4907_v40 = vadd.f32 %v768_v37, %v720_v36  ;;  %v4916_v45 = vadd.f32 %v673_v39, %v625_v41 }
  0xef   : > { %v809_v42 = vadd.f32 %v4907_v40, %v4904_v35  ;;  %v880_v44 = vmul.f32 %v4907_v40, %v4907_v40  ;;  %v881_v53 = vmul.f32 %v4916_v45, %v4916_v45 }
  0xf1   : > { %810 = vadd.xlane.f32.xlu0 %v809_v42  ;;  %v912_v46 = vadd.f32 %v880_v44, %v879_v43 }
  0xf2   : > { %v722_v47 = vpop.f32.mrf.mxu2  ;;  %v626_v50 = vpop.f32.mrf.mxu0 }
  0xf3   : > { %v723_v48 = vadd.f32 %v722_v47, %v4890_v21  ;;  %v771_v49 = vpop.f32.mrf.mxu3  ;;  %913 = vadd.xlane.f32.xlu1 %v912_v46  ;;  %v675_v51 = vpop.f32.mrf.mxu1  ;;  %v627_v54 = vadd.f32 %v626_v50, %v4887_v17 }
  0xf5   : > { %v4919_v52 = vadd.f32 %v771_v49, %v723_v48  ;;  %v4928_v59 = vadd.f32 %v675_v51, %v627_v54 }
  0xf7   : > { %v812_v55 = vadd.f32 %v4919_v52, %v4916_v45  ;;  %v882_v56 = vmul.f32 %v4919_v52, %v4919_v52  ;;  %v883_v3 = vmul.f32 %v4928_v59, %v4928_v59 }
  0xf9   : > { %813 = vadd.xlane.f32.xlu2 %v812_v55  ;;  %v915_v57 = vadd.f32 %v882_v56, %v881_v53 }
  0xfa   : > { %v724_v58 = vpop.f32.mrf.mxu2  ;;  %v629_v62 = vpop.f32.mrf.mxu0 }
  0xfb   : > { %v725_v60 = vadd.f32 %v724_v58, %v4890_v21  ;;  %v773_v61 = vpop.f32.mrf.mxu3  ;;  %916 = vadd.xlane.f32.xlu0 %v915_v57  ;;  %v678_v63 = vpop.f32.mrf.mxu1  ;;  %v630_v1 = vadd.f32 %v629_v62, %v4887_v17 }
  0xfd   : > { %v4931_v0 = vadd.f32 %v773_v61, %v725_v60  ;;  %v4940_v5 = vadd.f32 %v678_v63, %v630_v1 }
  0xff   : > { %v815_v2 = vadd.f32 %v4931_v0, %v4928_v59  ;;  %v884_v4 = vmul.f32 %v4931_v0, %v4931_v0  ;;  %v885_v13 = vmul.f32 %v4940_v5, %v4940_v5 }
 0x101   : > { %816 = vadd.xlane.f32.xlu2 %v815_v2  ;;  %v918_v6 = vadd.f32 %v884_v4, %v883_v3 }
 0x102   : > { %v727_v7 = vpop.f32.mrf.mxu2  ;;  %v631_v10 = vpop.f32.mrf.mxu0 }
 0x103   : > { %v728_v8 = vadd.f32 %v727_v7, %v4890_v21  ;;  %v776_v9 = vpop.f32.mrf.mxu3  ;;  %919 = vadd.xlane.f32.xlu1 %v918_v6  ;;  %v680_v11 = vpop.f32.mrf.mxu1  ;;  %v632_v14 = vadd.f32 %v631_v10, %v4887_v17  ;;  %v3941_v10 = vld [vmem:[#allocation7 + $0x78] sm:$0xf0] }
 0x105   : > { %v4943_v12 = vadd.f32 %v776_v9, %v728_v8  ;;  %v4952_v20 = vadd.f32 %v680_v11, %v632_v14  ;;  %v4203_v9 = vld [vmem:[#allocation7 + $0x74] sm:$0xf] }
 0x106   : > { %v4219_v11 = vld [vmem:[#allocation7 + $0xf4] sm:$0xf] }
 0x107   : > { %v818_v15 = vadd.f32 %v4943_v12, %v4940_v5  ;;  %v886_v16 = vmul.f32 %v4943_v12, %v4943_v12  ;;  %v887_v31 = vmul.f32 %v4952_v20, %v4952_v20 }
 0x109   : > { %819 = vadd.xlane.f32.xlu2 %v818_v15  ;;  %v921_v18 = vadd.f32 %v886_v16, %v885_v13  ;;  %v3944_v16 = vor.u32 %v4203_v9, %v3941_v10 }
 0x10a   : > { %v729_v19 = vpop.f32.mrf.mxu2  ;;  %v634_v25 = vpop.f32.mrf.mxu0 }
 0x10b   : > { %v730_v23 = vadd.f32 %v729_v19, %v4890_v21  ;;  %v778_v24 = vpop.f32.mrf.mxu3  ;;  %922 = vadd.xlane.f32.xlu1 %v921_v18  ;;  %v683_v26 = vpop.f32.mrf.mxu1  ;;  %v635_v29 = vadd.f32 %v634_v25, %v4887_v17  ;;  %v4005_v18 = vld [vmem:[#allocation7 + $0xf8] sm:$0xf0]  ;;  %1748 = vmatpush.bf16.msrb.mxu2 %v3944_v16 }
 0x10c   : > { %v4008_v19 = vor.u32 %v4219_v11, %v4005_v18 }
 0x10d   : > { %v4955_v27 = vadd.f32 %v778_v24, %v730_v23  ;;  %v4964_v33 = vadd.f32 %v683_v26, %v635_v29 }
 0x10e   : > { %1797 = vmatpush.bf16.msrb.mxu3 %v4008_v19 }
 0x10f   : > { %v821_v30 = vadd.f32 %v4955_v27, %v4952_v20  ;;  %v888_v32 = vmul.f32 %v4955_v27, %v4955_v27  ;;  %v889_v43 = vmul.f32 %v4964_v33, %v4964_v33 }
 0x111   : > { %822 = vadd.xlane.f32.xlu0 %v821_v30  ;;  %v924_v34 = vadd.f32 %v888_v32, %v887_v31 }
 0x112   : > { %v732_v36 = vpop.f32.mrf.mxu2  ;;  %v636_v39 = vpop.f32.mrf.mxu0 }
 0x113   : > { %v733_v37 = vadd.f32 %v732_v36, %v4890_v21  ;;  %v781_v38 = vpop.f32.mrf.mxu3  ;;  %925 = vadd.xlane.f32.xlu2 %v924_v34  ;;  %v685_v41 = vpop.f32.mrf.mxu1  ;;  %v637_v44 = vadd.f32 %v636_v39, %v4887_v17  ;;  %v3939_v36 = vld [vmem:[#allocation7 + $0x70] sm:$0xf] }
 0x115   : > { %v4967_v42 = vadd.f32 %v781_v38, %v733_v37  ;;  %v4976_v50 = vadd.f32 %v685_v41, %v637_v44  ;;  %v4204_v37 = vld [vmem:[#allocation7 + $0x74] sm:$0xf0]  ;;  %v4003_v38 = vld [vmem:[#allocation7 + $0xf0] sm:$0xf] }
 0x116   : > { %v3940_v44 = vor.u32 %v4204_v37, %v3939_v36 }
 0x117   : > { %v824_v46 = vadd.f32 %v4967_v42, %v4964_v33  ;;  %v890_v47 = vmul.f32 %v4967_v42, %v4967_v42  ;;  %v891_v60 = vmul.f32 %v4976_v50, %v4976_v50 }
 0x118   : > { %1650 = vmatpush.bf16.msrb.mxu0 %v3940_v44 }
 0x119   : > { %825 = vadd.xlane.f32.xlu0 %v824_v46  ;;  %v927_v48 = vadd.f32 %v890_v47, %v889_v43  ;;  %v4220_v46 = vld [vmem:[#allocation7 + $0xf4] sm:$0xf0] }
 0x11a   : > { %v734_v49 = vpop.f32.mrf.mxu2  ;;  %v639_v54 = vpop.f32.mrf.mxu0  ;;  %v4004_v47 = vor.u32 %v4220_v46, %v4003_v38  ;;  %v4679_v38 = vmov 256.0  }
 0x11b   : > { %v735_v51 = vadd.f32 %v734_v49, %v4890_v21  ;;  %v783_v53 = vpop.f32.mrf.mxu3  ;;  %928 = vadd.xlane.f32.xlu2 %v927_v48  ;;  %v688_v55 = vpop.f32.mrf.mxu1  ;;  %v640_v57 = vadd.f32 %v639_v54, %v4887_v17  ;;  %4347 = vrcp.f32 %v4679_v38  ;;  %v4215_v38 = vld [vmem:[#allocation7 + $0xd4] sm:$0xf] }
 0x11c   : > { %1699 = vmatpush.bf16.msrb.mxu1 %v4004_v47 }
 0x11d   : > { %v4979_v56 = vadd.f32 %v783_v53, %v735_v51  ;;  %v4988_v62 = vadd.f32 %v688_v55, %v640_v57 }
 0x11f   : > { %v827_v58 = vadd.f32 %v4979_v56, %v4976_v50  ;;  %v892_v61 = vmul.f32 %v4979_v56, %v4979_v56  ;;  %v893_v8 = vmul.f32 %v4988_v62, %v4988_v62 }
 0x121   : > { %828 = vadd.xlane.f32.xlu1 %v827_v58  ;;  %v930_v63 = vadd.f32 %v892_v61, %v891_v60  ;;  %v4201_v61 = vld [vmem:[#allocation7 + $0x64] sm:$0xf] }
 0x122   : > { %v737_v1 = vpop.f32.mrf.mxu2  ;;  %v641_v4 = vpop.f32.mrf.mxu0 }
 0x123   : > { %v738_v2 = vadd.f32 %v737_v1, %v4890_v21  ;;  %v786_v3 = vpop.f32.mrf.mxu3  ;;  %931 = vadd.xlane.f32.xlu0 %v930_v63  ;;  %v690_v6 = vpop.f32.mrf.mxu1  ;;  %v642_v13 = vadd.f32 %v641_v4, %v4887_v17  ;;  %v3933_v63 = vld [vmem:[#allocation7 + $0x68] sm:$0xf0]  ;;  %v4217_v1 = vld [vmem:[#allocation7 + $0xe4] sm:$0xf] }
 0x125   : > { %v4991_v7 = vadd.f32 %v786_v3, %v738_v2  ;;  %v5000_v25 = vadd.f32 %v690_v6, %v642_v13  ;;  %v3936_v6 = vor.u32 %v4201_v61, %v3933_v63 }
 0x127   : > { %v830_v14 = vadd.f32 %v4991_v7, %v4988_v62  ;;  %v894_v15 = vmul.f32 %v4991_v7, %v4991_v7  ;;  %v895_v41 = vmul.f32 %v5000_v25, %v5000_v25  ;;  %1749 = vmatpush.bf16.msrb.mxu2 %v3936_v6 }
 0x129   : > { %831 = vadd.xlane.f32.xlu1 %v830_v14  ;;  %v933_v23 = vadd.f32 %v894_v15, %v893_v8  ;;  %v3997_v8 = vld [vmem:[#allocation7 + $0xe8] sm:$0xf0] }
 0x12a   : > { %v739_v24 = vpop.f32.mrf.mxu2  ;;  %v644_v30 = vpop.f32.mrf.mxu0  ;;  %v4000_v9 = vor.u32 %v4217_v1, %v3997_v8 }
 0x12b   : > { %v740_v26 = vadd.f32 %v739_v24, %v4890_v21  ;;  %v788_v29 = vpop.f32.mrf.mxu3  ;;  %934 = vadd.xlane.f32.xlu0 %v933_v23  ;;  %v693_v31 = vpop.f32.mrf.mxu1  ;;  %v645_v34 = vadd.f32 %v644_v30, %v4887_v17  ;;  %v3931_v30 = vld [vmem:[#allocation7 + $0x60] sm:$0xf] }
 0x12c   : > { %1798 = vmatpush.bf16.msrb.mxu3 %v4000_v9 }
 0x12d   : > { %v5003_v32 = vadd.f32 %v788_v29, %v740_v26  ;;  %v5012_v48 = vadd.f32 %v693_v31, %v645_v34  ;;  %v4202_v31 = vld [vmem:[#allocation7 + $0x64] sm:$0xf0] }
 0x12e   : > { %v3932_v34 = vor.u32 %v4202_v31, %v3931_v30 }
 0x12f   : > { %v833_v39 = vadd.f32 %v5003_v32, %v5000_v25  ;;  %v896_v43 = vmul.f32 %v5003_v32, %v5003_v32  ;;  %v897_v60 = vmul.f32 %v5012_v48, %v5012_v48 }
 0x130   : > { %1651 = vmatpush.bf16.msrb.mxu0 %v3932_v34  ;;  %v4199_v34 = vld [vmem:[#allocation7 + $0x54] sm:$0xf] }
 0x131   : > { %834 = vadd.xlane.f32.xlu2 %v833_v39  ;;  %v936_v49 = vadd.f32 %v896_v43, %v895_v41 }
 0x132   : > { %v742_v51 = vpop.f32.mrf.mxu2  ;;  %v646_v55 = vpop.f32.mrf.mxu0 }
 0x133   : > { %v743_v53 = vadd.f32 %v742_v51, %v4890_v21  ;;  %v791_v54 = vpop.f32.mrf.mxu3  ;;  %937 = vadd.xlane.f32.xlu1 %v936_v49  ;;  %v695_v57 = vpop.f32.mrf.mxu1  ;;  %v647_v2 = vadd.f32 %v646_v55, %v4887_v17 }
 0x134   : > { %v5043_v51 = vpop.eup %4347 }
 0x135   : > { %v5015_v58 = vadd.f32 %v791_v54, %v743_v53  ;;  %v5024_v13 = vadd.f32 %v695_v57, %v647_v2  ;;  %v855_v61 = vmul.f32 256.0, %v5043_v51  ;;  %vm859_vm0 = vweird.f32 %v5043_v51 }
 0x137   : > { %v836_v3 = vadd.f32 %v5015_v58, %v5012_v48  ;;  %v898_v4 = vmul.f32 %v5015_v58, %v5015_v58  ;;  %v899_v26 = vmul.f32 %v5024_v13, %v5024_v13  ;;  %v856_v8 = vsub.f32 1.0, %v855_v61 }
 0x139   : > { %837 = vadd.xlane.f32.xlu2 %v836_v3  ;;  %v939_v10 = vadd.f32 %v898_v4, %v897_v60 }
 0x13a   : > { %v744_v11 = vpop.f32.mrf.mxu2  ;;  %v649_v16 = vpop.f32.mrf.mxu0 }
 0x13b   : > { %v745_v14 = vadd.f32 %v744_v11, %v4890_v21  ;;  %v793_v15 = vpop.f32.mrf.mxu3  ;;  %940 = vadd.xlane.f32.xlu1 %v939_v10  ;;  %v698_v18 = vpop.f32.mrf.mxu1  ;;  %v650_v23 = vadd.f32 %v649_v16, %v4887_v17 }
 0x13d   : > { %v5027_v19 = vadd.f32 %v793_v15, %v745_v14  ;;  %v5036_v36 = vadd.f32 %v698_v18, %v650_v23  ;;  %v3995_v14 = vld [vmem:[#allocation7 + $0xe0] sm:$0xf]  ;;  %v4218_v15 = vld [vmem:[#allocation7 + $0xe4] sm:$0xf0] }
 0x13e   : > { %v3996_v18 = vor.u32 %v4218_v15, %v3995_v14  ;;  %v4198_v15 = vld [vmem:[#allocation7 + $0x44] sm:$0xf0] }
 0x13f   : > { %v839_v24 = vadd.f32 %v5027_v19, %v5024_v13  ;;  %v900_v29 = vmul.f32 %v5027_v19, %v5027_v19  ;;  %v901_v47 = vmul.f32 %v5036_v36, %v5036_v36 }
 0x140   : > { %1700 = vmatpush.bf16.msrb.mxu1 %v3996_v18 }
 0x141   : > { %840 = vadd.xlane.f32.xlu0 %v839_v24  ;;  %v942_v37 = vadd.f32 %v900_v29, %v899_v26  ;;  %v857_v29 = vmul.f32 %v5043_v51, %v856_v8  ;;  %v4197_v8 = vld [vmem:[#allocation7 + $0x44] sm:$0xf] }
 0x142   : > { %v747_v39 = vpop.f32.mrf.mxu2  ;;  %v651_v44 = vpop.f32.mrf.mxu0 }
 0x143   : > { %v748_v41 = vadd.f32 %v747_v39, %v4890_v21  ;;  %v796_v43 = vpop.f32.mrf.mxu3  ;;  %943 = vadd.xlane.f32.xlu2 %v942_v37  ;;  %v700_v49 = vpop.f32.mrf.mxu1  ;;  %v652_v53 = vadd.f32 %v651_v44, %v4887_v17  ;;  %v3925_v37 = vld [vmem:[#allocation7 + $0x58] sm:$0xf0]  ;;  %v3923_v44 = vld [vmem:[#allocation7 + $0x50] sm:$0xf]  ;;  %v858_v61 = vadd.f32 %v5043_v51, %v857_v29 }
 0x145   : > { %v5039_v46 = vadd.f32 %v796_v43, %v748_v41  ;;  %v5051_v63 = vadd.f32 %v700_v49, %v652_v53  ;;  %v3928_v41 = vor.u32 %v4199_v34, %v3925_v37  ;;  %v3989_v43 = vld [vmem:[#allocation7 + $0xd8] sm:$0xf0]  ;;  %v3981_v34 = vld [vmem:[#allocation7 + $0xc8] sm:$0xf0] }
 0x147   : > { %v842_v54 = vadd.f32 %v5039_v46, %v5036_v36  ;;  %v902_v55 = vmul.f32 %v5039_v46, %v5039_v46  ;;  %v903_v10 = vmul.f32 %v5051_v63, %v5051_v63  ;;  %1750 = vmatpush.bf16.msrb.mxu2 %v3928_v41 }
 0x149   : > { %843 = vadd.xlane.f32.xlu0 %v842_v54  ;;  %v945_v57 = vadd.f32 %v902_v55, %v901_v47  ;;  %v4200_v47 = vld [vmem:[#allocation7 + $0x54] sm:$0xf0]  ;;  %v3992_v54 = vor.u32 %v4215_v38, %v3989_v43 }
 0x14a   : > { %v749_v60 = vpop.f32.mrf.mxu2  ;;  %v654_v3 = vpop.f32.mrf.mxu0  ;;  %v3924_v55 = vor.u32 %v4200_v47, %v3923_v44  ;;  %v3907_v44 = vld [vmem:[#allocation7 + $0x30] sm:$0xf]  ;;  %v4196_v47 = vld [vmem:[#allocation7 + $0x34] sm:$0xf0] }
 0x14b   : > { %v750_v1 = vadd.f32 %v749_v60, %v4890_v21  ;;  %v798_v2 = vpop.f32.mrf.mxu3  ;;  %946 = vadd.xlane.f32.xlu2 %v945_v57  ;;  %v655_v6 = vadd.f32 %v654_v3, %v4887_v17  ;;  %v703_v16 = vpop.f32.mrf.mxu1  ;;  %v3987_v57 = vld [vmem:[#allocation7 + $0xd0] sm:$0xf]  ;;  %v4216_v60 = vld [vmem:[#allocation7 + $0xd4] sm:$0xf0]  ;;  %1799 = vmatpush.bf16.msrb.mxu3 %v3992_v54 }
 0x14c   : > { %1652 = vmatpush.bf16.msrb.mxu0 %v3924_v55  ;;  %v3908_v55 = vor.u32 %v4196_v47, %v3907_v44  ;;  %v3965_v44 = vld [vmem:[#allocation7 + $0xa8] sm:$0xf0] }
 0x14d   : > { %v5054_v4 = vadd.f32 %v798_v2, %v750_v1  ;;  %v5063_v23 = vadd.f32 %v703_v16, %v655_v6  ;;  %v3988_v1 = vor.u32 %v4216_v60, %v3987_v57  ;;  %v3979_v16 = vld [vmem:[#allocation7 + $0xc0] sm:$0xf]  ;;  %v4212_v57 = vld [vmem:[#allocation7 + $0xb4] sm:$0xf0]  ;;  %v4195_v60 = vld [vmem:[#allocation7 + $0x34] sm:$0xf] }
 0x14f   : > { %v845_v9 = vadd.f32 %v5054_v4, %v5051_v63  ;;  %v904_v11 = vmul.f32 %v5054_v4, %v5054_v4  ;;  %v905_v53 = vmul.f32 %v5063_v23, %v5063_v23  ;;  %1701 = vmatpush.bf16.msrb.mxu1 %v3988_v1 }
 0x151   : > { %846 = vadd.xlane.f32.xlu1 %v845_v9  ;;  %v948_v24 = vadd.f32 %v904_v11, %v903_v10  ;;  %v3917_v9 = vld [vmem:[#allocation7 + $0x48] sm:$0xf0]  ;;  %v3915_v10 = vld [vmem:[#allocation7 + $0x40] sm:$0xf] }
 0x152   : > { %v752_v26 = vpop.f32.mrf.mxu2  ;;  %v656_v39 = vpop.f32.mrf.mxu0  ;;  %v3920_v14 = vor.u32 %v4197_v8, %v3917_v9  ;;  %v3916_v29 = vor.u32 %v4198_v15, %v3915_v10 }
 0x153   : > { %v753_v30 = vadd.f32 %v752_v26, %v4890_v21  ;;  %v801_v31 = vpop.f32.mrf.mxu3  ;;  %949 = vadd.xlane.f32.xlu0 %v948_v24  ;;  %v657_v2 = vadd.f32 %v656_v39, %v4887_v17  ;;  %v4214_v17 = vld [vmem:[#allocation7 + $0xc4] sm:$0xf0]  ;;  %v705_v18 = vpop.f32.mrf.mxu1  ;;  %v5079_v26 = vsel %vm859_vm0, %v5043_v51, %v858_v61 }
 0x154   : > { %1751 = vmatpush.bf16.msrb.mxu2 %v3920_v14  ;;  %1653 = vmatpush.bf16.msrb.mxu0 %v3916_v29 }
 0x155   : > { %v5067_v49 = vadd.f32 %v801_v31, %v753_v30  ;;  %v3980_v30 = vor.u32 %v4214_v17, %v3979_v16  ;;  %v4213_v31 = vld [vmem:[#allocation7 + $0xc4] sm:$0xf]  ;;  %v5081_v37 = vadd.f32 %v705_v18, %v657_v2  ;;  %v3899_v16 = vld [vmem:[#allocation7 + $0x20] sm:$0xf]  ;;  %v4194_v17 = vld [vmem:[#allocation7 + $0x24] sm:$0xf0] }
 0x156   : > { %v3984_v39 = vor.u32 %v4213_v31, %v3981_v34  ;;  %v3963_v18 = vld [vmem:[#allocation7 + $0xa0] sm:$0xf]  ;;  %v3900_v29 = vor.u32 %v4194_v17, %v3899_v16  ;;  %v4193_v31 = vld [vmem:[#allocation7 + $0x24] sm:$0xf]  ;;  %v3901_v34 = vld [vmem:[#allocation7 + $0x28] sm:$0xf0] }
 0x157   : > { %v848_v3 = vadd.f32 %v5067_v49, %v5063_v23  ;;  %v906_v6 = vmul.f32 %v5067_v49, %v5067_v49  ;;  %1702 = vmatpush.bf16.msrb.mxu1 %v3980_v30  ;;  %v907_v10 = vmul.f32 %v5081_v37, %v5081_v37  ;;  %v4210_v30 = vld [vmem:[#allocation7 + $0xa4] sm:$0xf0] }
 0x158   : > { %1800 = vmatpush.bf16.msrb.mxu3 %v3984_v39  ;;  %1654 = vmatpush.bf16.msrb.mxu0 %v3908_v55  ;;  %v3964_v39 = vor.u32 %v4210_v30, %v3963_v18  ;;  %v3947_v30 = vld [vmem:[#allocation7 + $0x80] sm:$0xf] }
 0x159   : > { %849 = vadd.xlane.f32.xlu1 %v848_v3  ;;  %v951_v11 = vadd.f32 %v906_v6, %v905_v53  ;;  %v3971_v53 = vld [vmem:[#allocation7 + $0xb0] sm:$0xf]  ;;  %v4211_v3 = vld [vmem:[#allocation7 + $0xb4] sm:$0xf]  ;;  %v3973_v6 = vld [vmem:[#allocation7 + $0xb8] sm:$0xf0] }
 0x15a   : > { %v754_v24 = vpop.f32.mrf.mxu2  ;;  %v3972_v1 = vor.u32 %v4212_v57, %v3971_v53  ;;  %v3976_v15 = vor.u32 %v4211_v3, %v3973_v6  ;;  %v3891_v57 = vld [vmem:[#allocation7 + $0x10] sm:$0xf]  ;;  %v4208_v3 = vld [vmem:[#allocation7 + $0x94] sm:$0xf0]  ;;  %v4191_v6 = vld [vmem:[#allocation7 + $0x14] sm:$0xf] }
 0x15b   : > { %v755_v38 = vadd.f32 %v754_v24, %v4890_v21  ;;  %952 = vadd.xlane.f32.xlu0 %v951_v11  ;;  %v803_v41 = vpop.f32.mrf.mxu3  ;;  %v3909_v21 = vld [vmem:[#allocation7 + $0x38] sm:$0xf0] }
 0x15c   : > { %v808_v43 = vpop.xlane.xlu0 %807  ;;  %v3912_v2 = vor.u32 %v4195_v60, %v3909_v21  ;;  %1703 = vmatpush.bf16.msrb.mxu1 %v3972_v1  ;;  %1801 = vmatpush.bf16.msrb.mxu3 %v3976_v15  ;;  %v4192_v60 = vld [vmem:[#allocation7 + $0x14] sm:$0xf0]  ;;  %v3955_v21 = vld [vmem:[#allocation7 + $0x90] sm:$0xf] }
 0x15d   : > { %v5084_v51 = vadd.f32 %v803_v41, %v755_v38  ;;  %v5087_v54 = vmul.f32 %v5079_v26, %v808_v43  ;;  %v3904_v41 = vor.u32 %v4193_v31, %v3901_v34  ;;  %v4209_v43 = vld [vmem:[#allocation7 + $0xa4] sm:$0xf]  ;;  %1655 = vmatpush.bf16.msrb.mxu0 %v3900_v29  ;;  %v4190_v29 = vld [vmem:[#allocation7 + $0x4] sm:$0xf0] }
 0x15e   : > { %v911_v61 = vpop.xlane.xlu1 %910  ;;  %1752 = vmatpush.bf16.msrb.mxu2 %v3912_v2  ;;  %v3968_v53 = vor.u32 %v4209_v43, %v3965_v44  ;;  %v3892_v2 = vor.u32 %v4192_v60, %v3891_v57  ;;  %v4206_v34 = vld [vmem:[#allocation7 + $0x84] sm:$0xf0] }
 0x15f   : > { %6713 = vst [vmem:[#allocation16_spill] sm:$0xff] %v5084_v51  ;;  %v957_v8 = vmul.f32 %v911_v61, %v5079_v26  ;;  %v973_v9 = vmul.f32 %v5087_v54, %v5087_v54  ;;  %v851_v11 = vadd.f32 %v5084_v51, %v5081_v37  ;;  %v908_v14 = vmul.f32 %v5084_v51, %v5084_v51 }
 0x160   : > { %1704 = vmatpush.bf16.msrb.mxu1 %v3964_v39  ;;  %1802 = vmatpush.bf16.msrb.mxu3 %v3968_v53  ;;  %v3885_v39 = vld [vmem:[#allocation7 + $0x8] sm:$0xf0]  ;;  %v3948_v43 = vor.u32 %v4206_v34, %v3947_v30  ;;  %v330_v30 = vld [vmem:[#allocation10 + $0x1] ss:$8 sm:$0x3] }
 0x161   : > { %v989_v24 = vsub.f32 %v957_v8, %v973_v9  ;;  %852 = vadd.xlane.f32.xlu2 %v851_v11  ;;  %v954_v38 = vadd.f32 %v908_v14, %v907_v10  ;;  %v3956_v9 = vor.u32 %v4208_v3, %v3955_v21  ;;  %v3893_v10 = vld [vmem:[#allocation7 + $0x18] sm:$0xf0]  ;;  %v4207_v11 = vld [vmem:[#allocation7 + $0x94] sm:$0xf]  ;;  %1656 = vmatpush.bf16.msrb.mxu0 %v3892_v2  ;;  %v3949_v53 = vld [vmem:[#allocation7 + $0x88] sm:$0xf0] }
 0x162   : > { %1753 = vmatpush.bf16.msrb.mxu2 %v3904_v41  ;;  %v3957_v14 = vld [vmem:[#allocation7 + $0x98] sm:$0xf0]  ;;  %v3896_v17 = vor.u32 %v4191_v6, %v3893_v10 }
 0x163   : > { %v1005_v47 = vmax.f32 %v989_v24, 0.0  ;;  %955 = vadd.xlane.f32.xlu1 %v954_v38  ;;  %v3960_v18 = vor.u32 %v4207_v11, %v3957_v14  ;;  %v3883_v24 = vld [vmem:[#allocation7] sm:$0xf]  ;;  %v4189_v38 = vld [vmem:[#allocation7 + $0x4] sm:$0xf] }
 0x164   : > { %v811_v55 = vpop.xlane.xlu0 %810  ;;  %1705 = vmatpush.bf16.msrb.mxu1 %v3956_v9  ;;  %v3884_v31 = vor.u32 %v4190_v29, %v3883_v24  ;;  %v3888_v44 = vor.u32 %v4189_v38, %v3885_v39  ;;  %v1021_v39 = vsub.f32 %v4892_v22, %v5087_v54 }
 0x165   : > { %v5098_v61 = vadd.f32 1e-05, %v1005_v47  ;;  %v5101_v1 = vmul.f32 %v5079_v26, %v811_v55  ;;  %1803 = vmatpush.bf16.msrb.mxu3 %v3960_v18  ;;  %v4205_v47 = vld [vmem:[#allocation7 + $0x84] sm:$0xf] }
 0x166   : > { %v914_v8 = vpop.xlane.xlu1 %913  ;;  %1754 = vmatpush.bf16.msrb.mxu2 %v3896_v17  ;;  %v3952_v55 = vor.u32 %v4205_v47, %v3949_v53  ;;  %1657 = vmatpush.bf16.msrb.mxu0 %v3884_v31  ;;  %v5125_v47 = vperm.slane %v330_v30, 0  ;;  %v1022_v53 = vsub.f32 %v4895_v28, %v5087_v54 }
 0x167   : > { %4349 = vrsqrt.f32 %v5098_v61  ;;  %v958_v15 = vmul.f32 %v914_v8, %v5079_v26  ;;  %v974_v16 = vmul.f32 %v5101_v1, %v5101_v1  ;;  %vm1075_vm2 = vweird.f32 %v5098_v61 }
 0x168   : > { %1706 = vmatpush.bf16.msrb.mxu1 %v3948_v43  ;;  %v1023_v54 = vsub.f32 %v4904_v35, %v5101_v1 }
 0x169   : > { %v990_v41 = vsub.f32 %v958_v15, %v974_v16  ;;  %1804 = vmatpush.bf16.msrb.mxu3 %v3952_v55 }
 0x16a   : > { %1755 = vmatpush.bf16.msrb.mxu2 %v3888_v44 }
 0x16b   : > { %v1006_v57 = vmax.f32 %v990_v41, 0.0 }
 0x16c   : > { %v814_v60 = vpop.xlane.xlu2 %813 }
 0x16d   : > { %v4350_v21 = vpop.eup %4349  ;;  %v5108_v2 = vmul.f32 %v5079_v26, %v814_v60  ;;  %v1054_v6 = vadd.f32 1e-05, %v1006_v57  ;;  %v332_v60 = vld [vmem:[#allocation10 + $0x2] ss:$8 sm:$0x3] }
 0x16e   : > { %v1070_v3 = vmul.f32 %v4350_v21, %v5098_v61  ;;  %v917_v8 = vpop.xlane.xlu0 %916  ;;  %vm1076_vm1 = vweird.f32 %v4350_v21 }
 0x16f   : > { %v975_v9 = vmul.f32 %v5108_v2, %v5108_v2  ;;  %v959_v10 = vmul.f32 %v917_v8, %v5079_v26  ;;  %4351 = vrsqrt.f32 %v1054_v6  ;;  %vm1077_vm3 = vmor %vm1075_vm2, %vm1076_vm1  ;;  %vm1085_vm5 = vweird.f32 %v1054_v6 }
 0x170   : > { %v1071_v11 = vmul.f32 %v4350_v21, %v1070_v3 }
 0x171   : > { %v991_v14 = vsub.f32 %v959_v10, %v975_v9  ;;  %v5130_v9 = vperm.slane %v330_v30, 1  ;;  %v5132_v10 = vperm.slane %v332_v60, 0  ;;  %v5141_v30 = vperm.slane %v332_v60, 1 }
 0x172   : > { %v1072_v15 = vmul.f32 0.5, %v1071_v11 }
 0x173   : > { %v1007_v16 = vmax.f32 %v991_v14, 0.0 }
 0x174   : > { %v1073_v17 = vsub.f32 1.5, %v1072_v15  ;;  %v817_v18 = vpop.xlane.xlu2 %816 }
 0x175   : > { %v5114_v24 = vadd.f32 1e-05, %v1007_v16  ;;  %v5117_v29 = vmul.f32 %v5079_v26, %v817_v18  ;;  %v4352_v31 = vpop.eup %4351 }
 0x176   : > { %v1074_v34 = vmul.f32 %v4350_v21, %v1073_v17  ;;  %v920_v38 = vpop.xlane.xlu1 %919  ;;  %v1080_v41 = vmul.f32 %v4352_v31, %v1054_v6  ;;  %vm1086_vm4 = vweird.f32 %v4352_v31 }
 0x177   : > { %4353 = vrsqrt.f32 %v5114_v24  ;;  %v976_v44 = vmul.f32 %v5117_v29, %v5117_v29  ;;  %v960_v61 = vmul.f32 %v920_v38, %v5079_v26  ;;  %vm1087_vm6 = vmor %vm1085_vm5, %vm1086_vm4  ;;  %vm1095_vm8 = vweird.f32 %v5114_v24 }
 0x178   : > { %v1078_v43 = vsel %vm1077_vm3, %v4350_v21, %v1074_v34  ;;  %v1081_v57 = vmul.f32 %v4352_v31, %v1080_v41  ;;  %v1024_v41 = vsub.f32 %v4907_v40, %v5101_v1  ;;  %v1025_v40 = vsub.f32 %v4916_v45, %v5108_v2 }
 0x179   : > { %v1229_v55 = vmul.f32 %v1078_v43, %v1021_v39  ;;  %v1230_v3 = vmul.f32 %v1078_v43, %v1022_v53  ;;  %v992_v8 = vsub.f32 %v960_v61, %v976_v44 }
 0x17a   : > { %v1082_v22 = vmul.f32 0.5, %v1081_v57 }
 0x17b   : > { %v1008_v15 = vmax.f32 %v992_v8, 0.0  ;;  %v1266_v28 = vmul.f32 %v5125_v47, %v1229_v55  ;;  %v1267_v39 = vmul.f32 %v5130_v9, %v1230_v3 }
 0x17c   : > { %v820_v21 = vpop.xlane.xlu2 %819  ;;  %v1083_v14 = vsub.f32 1.5, %v1082_v22 }
 0x17d   : > { %v4354_v11 = vpop.eup %4353  ;;  %v5135_v16 = vmul.f32 %v5079_v26, %v820_v21  ;;  %v5143_v38 = vadd.f32 1e-05, %v1008_v15  ;;  %v1303_v6 = vadd.f32 %v5132_v10, %v1266_v28  ;;  %v1304_v1 = vadd.f32 %v5141_v30, %v1267_v39 }
 0x17e   : > { %v1090_v17 = vmul.f32 %v4354_v11, %v5114_v24  ;;  %v923_v18 = vpop.xlane.xlu1 %922  ;;  %v1084_v34 = vmul.f32 %v4352_v31, %v1083_v14  ;;  %vm1096_vm7 = vweird.f32 %v4354_v11  ;;  %v1026_v39 = vsub.f32 %v4919_v52, %v5108_v2 }
 0x17f   : > { %v977_v35 = vmul.f32 %v5135_v16, %v5135_v16  ;;  %v961_v44 = vmul.f32 %v923_v18, %v5079_v26  ;;  %4355 = vrsqrt.f32 %v5143_v38  ;;  %vm1335_vm9 = vcmp.ge.f32.partialorder %v1303_v6, 0.0  ;;  %vm1097_vm10 = vmor %vm1095_vm8, %vm1096_vm7 }
 0x180   : > { %v1091_v43 = vmul.f32 %v4354_v11, %v1090_v17  ;;  %v1088_v53 = vsel %vm1087_vm6, %v4352_v31, %v1084_v34  ;;  %v1367_v15 = vmul.f32 0.01, %v1303_v6  ;;  %vm1336_vm11 = vcmp.ge.f32.partialorder %v1304_v1, 0.0 }
 0x181   : > { %v1231_v55 = vmul.f32 %v1088_v53, %v1023_v54  ;;  %v1232_v57 = vmul.f32 %v1088_v53, %v1024_v41  ;;  %v993_v60 = vsub.f32 %v961_v44, %v977_v35  ;;  %vm1105_vm15 = vweird.f32 %v5143_v38 }
 0x182   : > { %v1092_v61 = vmul.f32 0.5, %v1091_v43  ;;  %v1368_v43 = vmul.f32 0.01, %v1304_v1 }
 0x183   : > { %v1009_v22 = vmax.f32 %v993_v60, 0.0  ;;  %v1268_v21 = vmul.f32 %v5125_v47, %v1231_v55  ;;  %v1269_v31 = vmul.f32 %v5130_v9, %v1232_v57  ;;  %v1399_v57 = vsel %vm1335_vm9, %v1303_v6, %v1367_v15 }
 0x184   : > { %v1093_v3 = vsub.f32 1.5, %v1092_v61  ;;  %v823_v8 = vpop.xlane.xlu0 %822 }
 0x185   : > { %v5161_v14 = vmul.f32 %v5079_v26, %v823_v8  ;;  %v5163_v54 = vadd.f32 1e-05, %v1009_v22  ;;  %v1305_v17 = vadd.f32 %v5132_v10, %v1268_v21  ;;  %v1306_v18 = vadd.f32 %v5141_v30, %v1269_v31  ;;  %v4356_v34 = vpop.eup %4355 }
 0x186   : > { %v1094_v28 = vmul.f32 %v4354_v11, %v1093_v3  ;;  %v926_v45 = vpop.xlane.xlu2 %925  ;;  %v1100_v44 = vmul.f32 %v4356_v34, %v5143_v38  ;;  %v1400_v22 = vsel %vm1336_vm11, %v1304_v1, %v1368_v43  ;;  %vm1106_vm14 = vweird.f32 %v4356_v34 }
 0x187   : > { %v962_v24 = vmul.f32 %v926_v45, %v5079_v26  ;;  %v978_v41 = vmul.f32 %v5161_v14, %v5161_v14  ;;  %4357 = vrsqrt.f32 %v5163_v54  ;;  %vm1337_vm12 = vcmp.ge.f32.partialorder %v1305_v17, 0.0  ;;  %vm1107_vm0 = vmor %vm1105_vm15, %vm1106_vm14 }
 0x188   : > { %v1098_v35 = vsel %vm1097_vm10, %v4354_v11, %v1094_v28  ;;  %v1369_v55 = vmul.f32 0.01, %v1305_v17  ;;  %v1101_v52 = vmul.f32 %v4356_v34, %v1100_v44  ;;  %vm1338_vm13 = vcmp.ge.f32.partialorder %v1306_v18, 0.0 }
 0x189   : > { %v994_v53 = vsub.f32 %v962_v24, %v978_v41  ;;  %v1370_v2 = vmul.f32 0.01, %v1306_v18  ;;  %v1233_v61 = vmul.f32 %v1098_v35, %v1025_v40  ;;  %v1234_v8 = vmul.f32 %v1098_v35, %v1026_v39 }
 0x18a   : > { %v1401_v3 = vsel %vm1337_vm12, %v1305_v17, %v1369_v55  ;;  %v1102_v21 = vmul.f32 0.5, %v1101_v52  ;;  %v1027_v35 = vsub.f32 %v4928_v59, %v5117_v29  ;;  %v1028_v55 = vsub.f32 %v4931_v0, %v5117_v29 }
 0x18b   : > { %v1010_v60 = vmax.f32 %v994_v53, 0.0  ;;  %v1431_v11 = vpack.c.bf16 %v1401_v3, %v1399_v57  ;;  %v1402_v31 = vsel %vm1338_vm13, %v1306_v18, %v1370_v2  ;;  %v1270_v45 = vmul.f32 %v5125_v47, %v1233_v61 }
 0x18c   : > { %v826_v28 = vpop.xlane.xlu0 %825  ;;  %v1432_v24 = vpack.c.bf16 %v1402_v31, %v1400_v22  ;;  %v1103_v15 = vsub.f32 1.5, %v1102_v21  ;;  %v1271_v18 = vmul.f32 %v5130_v9, %v1234_v8  ;;  %v1029_v3 = vsub.f32 %v4940_v5, %v5135_v16 }
 0x18d   : > { %v5177_v51 = vadd.f32 1e-05, %v1010_v60  ;;  %v5180_v41 = vmul.f32 %v5079_v26, %v826_v28  ;;  %v4358_v6 = vpop.eup %4357  ;;  %1658 = vmatmul.bf16.vlgmr.msrb.gmra.mxu0 %v1431_v11  ;;  %1756 = vmatmul.bf16.vlgmr.msrb.gmra.mxu2 %v1431_v11  ;;  %v1307_v1 = vadd.f32 %v5132_v10, %v1270_v45  ;;  %v1030_v59 = vsub.f32 %v4943_v12, %v5135_v16 }
 0x18e   : > { %v929_v40 = vpop.xlane.xlu2 %928  ;;  %v1110_v17 = vmul.f32 %v4358_v6, %v5163_v54  ;;  %1707 = vmatmul.bf16.vlgmr.msrb.gmra.mxu1 %v1432_v24  ;;  %1805 = vmatmul.bf16.vlgmr.msrb.gmra.mxu3 %v1432_v24  ;;  %v1104_v39 = vmul.f32 %v4356_v34, %v1103_v15  ;;  %v1308_v38 = vadd.f32 %v5141_v30, %v1271_v18  ;;  %vm1116_vm2 = vweird.f32 %v4358_v6 }
 0x18f   : > { %4359 = vrsqrt.f32 %v5177_v51  ;;  %v963_v43 = vmul.f32 %v929_v40, %v5079_v26  ;;  %v979_v53 = vmul.f32 %v5180_v41, %v5180_v41  ;;  %vm1339_vm1 = vcmp.ge.f32.partialorder %v1307_v1, 0.0 }
 0x190   : > { %v1111_v44 = vmul.f32 %v4358_v6, %v1110_v17  ;;  %v1108_v57 = vsel %vm1107_vm0, %v4356_v34, %v1104_v39  ;;  %v1371_v52 = vmul.f32 0.01, %v1307_v1  ;;  %vm1115_vm3 = vweird.f32 %v5163_v54 }
 0x191   : > { %v995_v61 = vsub.f32 %v963_v43, %v979_v53  ;;  %v1235_v60 = vmul.f32 %v1108_v57, %v1027_v35  ;;  %v1236_v8 = vmul.f32 %v1108_v57, %v1028_v55  ;;  %vm1340_vm4 = vcmp.ge.f32.partialorder %v1308_v38, 0.0  ;;  %vm1117_vm5 = vmor %vm1115_vm3, %vm1116_vm2 }
 0x192   : > { %v1112_v2 = vmul.f32 0.5, %v1111_v44  ;;  %v1403_v5 = vsel %vm1339_vm1, %v1307_v1, %v1371_v52  ;;  %v1372_v24 = vmul.f32 0.01, %v1308_v38  ;;  %vm1125_vm9 = vweird.f32 %v5177_v51 }
 0x193   : > { %v1011_v0 = vmax.f32 %v995_v61, 0.0  ;;  %v1272_v34 = vmul.f32 %v5125_v47, %v1235_v60  ;;  %v1273_v12 = vmul.f32 %v5130_v9, %v1236_v8 }
 0x194   : > { %v829_v22 = vpop.xlane.xlu1 %828  ;;  %v1113_v11 = vsub.f32 1.5, %v1112_v2  ;;  %v1404_v60 = vsel %vm1340_vm4, %v1308_v38, %v1372_v24 }
 0x195   : > { %v4360_v21 = vpop.eup %4359  ;;  %v5200_v29 = vmul.f32 %v5079_v26, %v829_v22  ;;  %v5207_v45 = vadd.f32 1e-05, %v1011_v0  ;;  %v1309_v17 = vadd.f32 %v5132_v10, %v1272_v34  ;;  %v1310_v1 = vadd.f32 %v5141_v30, %v1273_v12 }
 0x196   : > { %v1120_v31 = vmul.f32 %v4360_v21, %v5177_v51  ;;  %v932_v28 = vpop.xlane.xlu0 %931  ;;  %v1114_v16 = vmul.f32 %v4358_v6, %v1113_v11  ;;  %vm1126_vm6 = vweird.f32 %v4360_v21  ;;  %v1032_v51 = vsub.f32 %v4955_v27, %v5161_v14 }
 0x197   : > { %v980_v40 = vmul.f32 %v5200_v29, %v5200_v29  ;;  %v964_v54 = vmul.f32 %v932_v28, %v5079_v26  ;;  %4361 = vrsqrt.f32 %v5207_v45  ;;  %vm1341_vm7 = vcmp.ge.f32.partialorder %v1309_v17, 0.0  ;;  %vm1127_vm10 = vmor %vm1125_vm9, %vm1126_vm6 }
 0x198   : > { %v1121_v15 = vmul.f32 %v4360_v21, %v1120_v31  ;;  %v1118_v18 = vsel %vm1117_vm5, %v4358_v6, %v1114_v16  ;;  %v1373_v35 = vmul.f32 0.01, %v1309_v17  ;;  %vm1342_vm8 = vcmp.ge.f32.partialorder %v1310_v1, 0.0 }
 0x199   : > { %v996_v43 = vsub.f32 %v964_v54, %v980_v40  ;;  %v1374_v44 = vmul.f32 0.01, %v1310_v1  ;;  %v1237_v53 = vmul.f32 %v1118_v18, %v1029_v3  ;;  %v1238_v55 = vmul.f32 %v1118_v18, %v1030_v59 }
 0x19a   : > { %v1122_v39 = vmul.f32 0.5, %v1121_v15  ;;  %v1405_v61 = vsel %vm1341_vm7, %v1309_v17, %v1373_v35  ;;  %v1031_v28 = vsub.f32 %v4952_v20, %v5161_v14  ;;  %v1033_v27 = vsub.f32 %v4964_v33, %v5180_v41 }
 0x19b   : > { %v1012_v52 = vmax.f32 %v996_v43, 0.0  ;;  %v1433_v22 = vpack.c.bf16 %v1405_v61, %v1403_v5  ;;  %v1406_v8 = vsel %vm1342_vm8, %v1310_v1, %v1374_v44  ;;  %v1274_v11 = vmul.f32 %v5125_v47, %v1237_v53 }
 0x19c   : > { %v1123_v57 = vsub.f32 1.5, %v1122_v39  ;;  %v832_v2 = vpop.xlane.xlu1 %831  ;;  %v1434_v3 = vpack.c.bf16 %v1406_v8, %v1404_v60  ;;  %v1275_v5 = vmul.f32 %v5130_v9, %v1238_v55  ;;  %v1034_v14 = vsub.f32 %v4967_v42, %v5180_v41 }
 0x19d   : > { %v5218_v6 = vmul.f32 %v5079_v26, %v832_v2  ;;  %v5222_v34 = vadd.f32 1e-05, %v1012_v52  ;;  %v4362_v31 = vpop.eup %4361  ;;  %1663 = vmatmul.bf16.gmra.mxu0 %v1433_v22  ;;  %1761 = vmatmul.bf16.gmra.mxu2 %v1433_v22  ;;  %v1311_v15 = vadd.f32 %v5132_v10, %v1274_v11  ;;  %vm1135_vm13 = vweird.f32 %v5207_v45 }
 0x19e   : > { %v1124_v0 = vmul.f32 %v4360_v21, %v1123_v57  ;;  %v935_v59 = vpop.xlane.xlu0 %934  ;;  %v1130_v16 = vmul.f32 %v4362_v31, %v5207_v45  ;;  %1712 = vmatmul.bf16.gmra.mxu1 %v1434_v3  ;;  %1810 = vmatmul.bf16.gmra.mxu3 %v1434_v3  ;;  %v1312_v1 = vadd.f32 %v5141_v30, %v1275_v5  ;;  %vm1136_vm11 = vweird.f32 %v4362_v31 }
 0x19f   : > { %v981_v38 = vmul.f32 %v5218_v6, %v5218_v6  ;;  %4363 = vrsqrt.f32 %v5222_v34  ;;  %v965_v20 = vmul.f32 %v935_v59, %v5079_v26  ;;  %v1375_v55 = vmul.f32 0.01, %v1311_v15  ;;  %vm1137_vm15 = vmor %vm1135_vm13, %vm1136_vm11 }
 0x1a0   : > { %v1128_v12 = vsel %vm1127_vm10, %v4360_v21, %v1124_v0  ;;  %v1131_v40 = vmul.f32 %v4362_v31, %v1130_v16  ;;  %vm1343_vm12 = vcmp.ge.f32.partialorder %v1311_v15, 0.0  ;;  %vm1344_vm14 = vcmp.ge.f32.partialorder %v1312_v1, 0.0 }
 0x1a1   : > { %v1239_v24 = vmul.f32 %v1128_v12, %v1031_v28  ;;  %v1240_v54 = vmul.f32 %v1128_v12, %v1032_v51  ;;  %v997_v17 = vsub.f32 %v965_v20, %v981_v38  ;;  %v1376_v8 = vmul.f32 0.01, %v1312_v1 }
 0x1a2   : > { %v1132_v21 = vmul.f32 0.5, %v1131_v40  ;;  %v1407_v0 = vsel %vm1343_vm12, %v1311_v15, %v1375_v55  ;;  %vm1145_vm3 = vweird.f32 %v5222_v34 }
 0x1a3   : > { %v1276_v18 = vmul.f32 %v5125_v47, %v1239_v24  ;;  %v1277_v43 = vmul.f32 %v5130_v9, %v1240_v54  ;;  %v1013_v35 = vmax.f32 %v997_v17, 0.0  ;;  %v1408_v24 = vsel %vm1344_vm14, %v1312_v1, %v1376_v8 }
 0x1a4   : > { %v835_v39 = vpop.xlane.xlu2 %834  ;;  %v1133_v52 = vsub.f32 1.5, %v1132_v21 }
 0x1a5   : > { %v5244_v44 = vmul.f32 %v5079_v26, %v835_v39  ;;  %v1313_v53 = vadd.f32 %v5132_v10, %v1276_v18  ;;  %v4364_v57 = vpop.eup %4363  ;;  %v1314_v33 = vadd.f32 %v5141_v30, %v1277_v43  ;;  %v5250_v41 = vadd.f32 1e-05, %v1013_v35 }
 0x1a6   : > { %v938_v2 = vpop.xlane.xlu1 %937  ;;  %v1140_v42 = vmul.f32 %v4364_v57, %v5222_v34  ;;  %v1134_v61 = vmul.f32 %v4362_v31, %v1133_v52  ;;  %vm1146_vm2 = vweird.f32 %v4364_v57  ;;  %v1035_v43 = vsub.f32 %v4976_v50, %v5200_v29 }
 0x1a7   : > { %v982_v60 = vmul.f32 %v5244_v44, %v5244_v44  ;;  %v966_v22 = vmul.f32 %v938_v2, %v5079_v26  ;;  %4365 = vrsqrt.f32 %v5250_v41  ;;  %vm1345_vm0 = vcmp.ge.f32.partialorder %v1313_v53, 0.0  ;;  %vm1147_vm4 = vmor %vm1145_vm3, %vm1146_vm2 }
 0x1a8   : > { %v1141_v11 = vmul.f32 %v4364_v57, %v1140_v42  ;;  %v1138_v3 = vsel %vm1137_vm15, %v4362_v31, %v1134_v61  ;;  %v1377_v59 = vmul.f32 0.01, %v1313_v53  ;;  %vm1346_vm1 = vcmp.ge.f32.partialorder %v1314_v33, 0.0 }
 0x1a9   : > { %v998_v45 = vsub.f32 %v966_v22, %v982_v60  ;;  %v1378_v38 = vmul.f32 0.01, %v1314_v33  ;;  %v1241_v5 = vmul.f32 %v1138_v3, %v1033_v27  ;;  %v1242_v51 = vmul.f32 %v1138_v3, %v1034_v14 }
 0x1aa   : > { %v1142_v28 = vmul.f32 0.5, %v1141_v11  ;;  %v1409_v20 = vsel %vm1345_vm0, %v1313_v53, %v1377_v59  ;;  %v1036_v35 = vsub.f32 %v4979_v56, %v5200_v29  ;;  %v1037_v56 = vsub.f32 %v4988_v62, %v5218_v6 }
 0x1ab   : > { %v1014_v12 = vmax.f32 %v998_v45, 0.0  ;;  %v1435_v17 = vpack.c.bf16 %v1409_v20, %v1407_v0  ;;  %v1410_v15 = vsel %vm1346_vm1, %v1314_v33, %v1378_v38  ;;  %v1278_v39 = vmul.f32 %v5125_v47, %v1241_v5 }
 0x1ac   : > { %v838_v16 = vpop.xlane.xlu2 %837  ;;  %v1143_v40 = vsub.f32 1.5, %v1142_v28  ;;  %v1436_v18 = vpack.c.bf16 %v1410_v15, %v1408_v24  ;;  %v1279_v1 = vmul.f32 %v5130_v9, %v1242_v51  ;;  %v1038_v60 = vsub.f32 %v4991_v7, %v5218_v6 }
 0x1ad   : > { %v5258_v54 = vmul.f32 %v5079_v26, %v838_v16  ;;  %v5260_v31 = vadd.f32 1e-05, %v1014_v12  ;;  %v4366_v27 = vpop.eup %4365  ;;  %1668 = vmatmul.bf16.gmra.mxu0 %v1435_v17  ;;  %1766 = vmatmul.bf16.gmra.mxu2 %v1435_v17  ;;  %v1315_v2 = vadd.f32 %v5132_v10, %v1278_v39  ;;  %vm1155_vm7 = vweird.f32 %v5250_v41 }
 0x1ae   : > { %v941_v21 = vpop.xlane.xlu1 %940  ;;  %v1144_v14 = vmul.f32 %v4364_v57, %v1143_v40  ;;  %v1150_v53 = vmul.f32 %v4366_v27, %v5250_v41  ;;  %1717 = vmatmul.bf16.gmra.mxu1 %v1436_v18  ;;  %1815 = vmatmul.bf16.gmra.mxu3 %v1436_v18  ;;  %v1316_v61 = vadd.f32 %v5141_v30, %v1279_v1  ;;  %vm1156_vm5 = vweird.f32 %v4366_v27 }
 0x1af   : > { %4367 = vrsqrt.f32 %v5260_v31  ;;  %v983_v34 = vmul.f32 %v5258_v54, %v5258_v54  ;;  %v967_v52 = vmul.f32 %v941_v21, %v5079_v26  ;;  %v1379_v45 = vmul.f32 0.01, %v1315_v2  ;;  %vm1157_vm9 = vmor %vm1155_vm7, %vm1156_vm5 }
 0x1b0   : > { %v1148_v55 = vsel %vm1147_vm4, %v4364_v57, %v1144_v14  ;;  %v1151_v50 = vmul.f32 %v4366_v27, %v1150_v53  ;;  %vm1347_vm6 = vcmp.ge.f32.partialorder %v1315_v2, 0.0  ;;  %vm1348_vm8 = vcmp.ge.f32.partialorder %v1316_v61, 0.0 }
 0x1b1   : > { %v1243_v33 = vmul.f32 %v1148_v55, %v1035_v43  ;;  %v1244_v42 = vmul.f32 %v1148_v55, %v1036_v35  ;;  %v999_v29 = vsub.f32 %v967_v52, %v983_v34  ;;  %v1380_v20 = vmul.f32 0.01, %v1316_v61 }
 0x1b2   : > { %v1152_v57 = vmul.f32 0.5, %v1151_v50  ;;  %v1411_v40 = vsel %vm1347_vm6, %v1315_v2, %v1379_v45  ;;  %vm1165_vm13 = vweird.f32 %v5260_v31 }
 0x1b3   : > { %v1280_v8 = vmul.f32 %v5125_v47, %v1243_v33  ;;  %v1281_v11 = vmul.f32 %v5130_v9, %v1244_v42  ;;  %v1015_v0 = vmax.f32 %v999_v29, 0.0  ;;  %v1412_v35 = vsel %vm1348_vm8, %v1316_v61, %v1380_v20 }
 0x1b4   : > { %v841_v22 = vpop.xlane.xlu0 %840  ;;  %v1153_v62 = vsub.f32 1.5, %v1152_v57  ;;  %v1040_v57 = vsub.f32 %v5003_v32, %v5244_v44  ;;  %v1041_v32 = vsub.f32 %v5012_v48, %v5258_v54 }
 0x1b5   : > { %v5284_v3 = vmul.f32 %v5079_v26, %v841_v22  ;;  %v4368_v59 = vpop.eup %4367  ;;  %v1317_v38 = vadd.f32 %v5132_v10, %v1280_v8  ;;  %v1318_v7 = vadd.f32 %v5141_v30, %v1281_v11  ;;  %v5290_v5 = vadd.f32 1e-05, %v1015_v0 }
 0x1b6   : > { %v944_v28 = vpop.xlane.xlu2 %943  ;;  %v1160_v6 = vmul.f32 %v4368_v59, %v5260_v31  ;;  %v1154_v51 = vmul.f32 %v4366_v27, %v1153_v62  ;;  %vm1166_vm12 = vweird.f32 %v4368_v59 }
 0x1b7   : > { %v968_v12 = vmul.f32 %v944_v28, %v5079_v26  ;;  %v984_v16 = vmul.f32 %v5284_v3, %v5284_v3  ;;  %4369 = vrsqrt.f32 %v5290_v5  ;;  %vm1349_vm10 = vcmp.ge.f32.partialorder %v1317_v38, 0.0  ;;  %vm1167_vm14 = vmor %vm1165_vm13, %vm1166_vm12 }
 0x1b8   : > { %v1161_v24 = vmul.f32 %v4368_v59, %v1160_v6  ;;  %v1158_v41 = vsel %vm1157_vm9, %v4366_v27, %v1154_v51  ;;  %v1381_v15 = vmul.f32 0.01, %v1317_v38  ;;  %vm1350_vm11 = vcmp.ge.f32.partialorder %v1318_v7, 0.0 }
 0x1b9   : > { %v1000_v17 = vsub.f32 %v968_v12, %v984_v16  ;;  %v1245_v18 = vmul.f32 %v1158_v41, %v1037_v56  ;;  %v1246_v21 = vmul.f32 %v1158_v41, %v1038_v60  ;;  %v1382_v14 = vmul.f32 0.01, %v1318_v7 }
 0x1ba   : > { %v1162_v39 = vmul.f32 0.5, %v1161_v24  ;;  %v1413_v43 = vsel %vm1349_vm10, %v1317_v38, %v1381_v15  ;;  %v1039_v60 = vsub.f32 %v5000_v25, %v5244_v44  ;;  %v1042_v38 = vsub.f32 %v5015_v58, %v5258_v54 }
 0x1bb   : > { %v1016_v1 = vmax.f32 %v1000_v17, 0.0  ;;  %v1437_v34 = vpack.c.bf16 %v1413_v43, %v1411_v40  ;;  %v1414_v52 = vsel %vm1350_vm11, %v1318_v7, %v1382_v14  ;;  %v1282_v42 = vmul.f32 %v5125_v47, %v1245_v18 }
 0x1bc   : > { %v844_v53 = vpop.xlane.xlu0 %843  ;;  %v1163_v55 = vsub.f32 1.5, %v1162_v39  ;;  %v1438_v2 = vpack.c.bf16 %v1414_v52, %v1412_v35  ;;  %v1283_v61 = vmul.f32 %v5130_v9, %v1246_v21  ;;  %vm1175_vm1 = vweird.f32 %v5290_v5 }
 0x1bd   : > { %v5299_v50 = vmul.f32 %v5079_v26, %v844_v53  ;;  %v5301_v27 = vadd.f32 1e-05, %v1016_v1  ;;  %v4370_v56 = vpop.eup %4369  ;;  %1673 = vmatmul.bf16.gmra.mxu0 %v1437_v34  ;;  %1771 = vmatmul.bf16.gmra.mxu2 %v1437_v34  ;;  %v1319_v0 = vadd.f32 %v5132_v10, %v1282_v42 }
 0x1be   : > { %v947_v33 = vpop.xlane.xlu2 %946  ;;  %v1164_v29 = vmul.f32 %v4368_v59, %v1163_v55  ;;  %v1170_v22 = vmul.f32 %v4370_v56, %v5290_v5  ;;  %1722 = vmatmul.bf16.gmra.mxu1 %v1438_v2  ;;  %1820 = vmatmul.bf16.gmra.mxu3 %v1438_v2  ;;  %v1320_v28 = vadd.f32 %v5141_v30, %v1283_v61  ;;  %vm1176_vm15 = vweird.f32 %v4370_v56 }
 0x1bf   : > { %4371 = vrsqrt.f32 %v5301_v27  ;;  %v969_v31 = vmul.f32 %v947_v33, %v5079_v26  ;;  %v985_v11 = vmul.f32 %v5299_v50, %v5299_v50  ;;  %v1383_v20 = vmul.f32 0.01, %v1319_v0  ;;  %vm1177_vm3 = vmor %vm1175_vm1, %vm1176_vm15 }
 0x1c0   : > { %v1168_v8 = vsel %vm1167_vm14, %v4368_v59, %v1164_v29  ;;  %v1171_v62 = vmul.f32 %v4370_v56, %v1170_v22  ;;  %vm1351_vm0 = vcmp.ge.f32.partialorder %v1319_v0, 0.0  ;;  %vm1352_vm2 = vcmp.ge.f32.partialorder %v1320_v28, 0.0 }
 0x1c1   : > { %v1247_v25 = vmul.f32 %v1168_v8, %v1039_v60  ;;  %v1248_v45 = vmul.f32 %v1168_v8, %v1040_v57  ;;  %v1001_v44 = vsub.f32 %v969_v31, %v985_v11  ;;  %v1384_v39 = vmul.f32 0.01, %v1320_v28 }
 0x1c2   : > { %v1172_v59 = vmul.f32 0.5, %v1171_v62  ;;  %v1415_v1 = vsel %vm1351_vm0, %v1319_v0, %v1383_v20  ;;  %v1043_v0 = vsub.f32 %v5024_v13, %v5284_v3  ;;  %vm1185_vm7 = vweird.f32 %v5301_v27 }
 0x1c3   : > { %v1284_v6 = vmul.f32 %v5125_v47, %v1247_v25  ;;  %v1285_v51 = vmul.f32 %v5130_v9, %v1248_v45  ;;  %v1017_v12 = vmax.f32 %v1001_v44, 0.0  ;;  %v1416_v29 = vsel %vm1352_vm2, %v1320_v28, %v1384_v39 }
 0x1c4   : > { %v847_v7 = vpop.xlane.xlu1 %846  ;;  %v1173_v48 = vsub.f32 1.5, %v1172_v59  ;;  %v1044_v45 = vsub.f32 %v5027_v19, %v5284_v3  ;;  %v1045_v20 = vsub.f32 %v5036_v36, %v5299_v50 }
 0x1c5   : > { %v5325_v16 = vmul.f32 %v5079_v26, %v847_v7  ;;  %v4372_v24 = vpop.eup %4371  ;;  %v1321_v41 = vadd.f32 %v5132_v10, %v1284_v6  ;;  %v1322_v58 = vadd.f32 %v5141_v30, %v1285_v51  ;;  %v5331_v17 = vadd.f32 1e-05, %v1017_v12 }
 0x1c6   : > { %v950_v40 = vpop.xlane.xlu0 %949  ;;  %v1180_v54 = vmul.f32 %v4372_v24, %v5301_v27  ;;  %v1174_v15 = vmul.f32 %v4370_v56, %v1173_v48  ;;  %vm1186_vm6 = vweird.f32 %v4372_v24 }
 0x1c7   : > { %v986_v18 = vmul.f32 %v5325_v16, %v5325_v16  ;;  %v970_v21 = vmul.f32 %v950_v40, %v5079_v26  ;;  %4373 = vrsqrt.f32 %v5331_v17  ;;  %vm1353_vm4 = vcmp.ge.f32.partialorder %v1321_v41, 0.0  ;;  %vm1187_vm8 = vmor %vm1185_vm7, %vm1186_vm6 }
 0x1c8   : > { %v1181_v14 = vmul.f32 %v4372_v24, %v1180_v54  ;;  %v1178_v5 = vsel %vm1177_vm3, %v4370_v56, %v1174_v15  ;;  %v1385_v35 = vmul.f32 0.01, %v1321_v41  ;;  %vm1354_vm5 = vcmp.ge.f32.partialorder %v1322_v58, 0.0 }
 0x1c9   : > { %v1002_v43 = vsub.f32 %v970_v21, %v986_v18  ;;  %v1249_v53 = vmul.f32 %v1178_v5, %v1041_v32  ;;  %v1386_v34 = vmul.f32 0.01, %v1322_v58  ;;  %v1250_v52 = vmul.f32 %v1178_v5, %v1042_v38 }
 0x1ca   : > { %v1182_v55 = vmul.f32 0.5, %v1181_v14  ;;  %v1417_v42 = vsel %vm1353_vm4, %v1321_v41, %v1385_v35  ;;  %vm1195_vm10 = vweird.f32 %v5331_v17 }
 0x1cb   : > { %v1018_v2 = vmax.f32 %v1002_v43, 0.0  ;;  %v1439_v57 = vpack.c.bf16 %v1417_v42, %v1415_v1  ;;  %v1418_v22 = vsel %vm1354_vm5, %v1322_v58, %v1386_v34  ;;  %v1286_v32 = vmul.f32 %v5125_v47, %v1249_v53 }
 0x1cc   : > { %v850_v33 = vpop.xlane.xlu1 %849  ;;  %v1183_v61 = vsub.f32 1.5, %v1182_v55  ;;  %v1440_v8 = vpack.c.bf16 %v1418_v22, %v1416_v29  ;;  %v1287_v28 = vmul.f32 %v5130_v9, %v1250_v52 }
 0x1cd   : > { %v5340_v60 = vmul.f32 %v5079_v26, %v850_v33  ;;  %v5342_v56 = vadd.f32 1e-05, %v1018_v2  ;;  %v4374_v11 = vpop.eup %4373  ;;  %1678 = vmatmul.bf16.gmra.mxu0 %v1439_v57  ;;  %1776 = vmatmul.bf16.gmra.mxu2 %v1439_v57  ;;  %v1323_v51 = vadd.f32 %v5132_v10, %v1286_v32  ;;  %v1047_v32 = vsub.f32 %v5051_v63, %v5325_v16 }
 0x1ce   : > { %v953_v31 = vpop.xlane.xlu0 %952  ;;  %v1184_v25 = vmul.f32 %v4372_v24, %v1183_v61  ;;  %v1190_v62 = vmul.f32 %v4374_v11, %v5331_v17  ;;  %1727 = vmatmul.bf16.gmra.mxu1 %v1440_v8  ;;  %1825 = vmatmul.bf16.gmra.mxu3 %v1440_v8  ;;  %v1324_v41 = vadd.f32 %v5141_v30, %v1287_v28  ;;  %vm1196_vm9 = vweird.f32 %v4374_v11 }
 0x1cf   : > { %4375 = vrsqrt.f32 %v5342_v56  ;;  %v987_v13 = vmul.f32 %v5340_v60, %v5340_v60  ;;  %v971_v27 = vmul.f32 %v953_v31, %v5079_v26  ;;  %vm1355_vm11 = vcmp.ge.f32.partialorder %v1323_v51, 0.0  ;;  %vm1197_vm12 = vmor %vm1195_vm10, %vm1196_vm9 }
 0x1d0   : > { %v1188_v44 = vsel %vm1187_vm8, %v4372_v24, %v1184_v25  ;;  %v1191_v3 = vmul.f32 %v4374_v11, %v1190_v62  ;;  %v1046_v24 = vsub.f32 %v5039_v46, %v5299_v50  ;;  %v1387_v1 = vmul.f32 0.01, %v1323_v51 }
 0x1d1   : > { %v1251_v38 = vmul.f32 %v1188_v44, %v1043_v0  ;;  %v1252_v19 = vmul.f32 %v1188_v44, %v1044_v45  ;;  %v1003_v59 = vsub.f32 %v971_v27, %v987_v13  ;;  %vm1356_vm13 = vcmp.ge.f32.partialorder %v1324_v41, 0.0 }
 0x1d2   : > { %v1192_v7 = vmul.f32 0.5, %v1191_v3  ;;  %v1388_v53 = vmul.f32 0.01, %v1324_v41  ;;  %v1419_v33 = vsel %vm1355_vm11, %v1323_v51, %v1387_v1  ;;  %vm1205_vm1 = vweird.f32 %v5342_v56 }
 0x1d3   : > { %v1288_v6 = vmul.f32 %v5125_v47, %v1251_v38  ;;  %v1289_v12 = vmul.f32 %v5130_v9, %v1252_v19  ;;  %v1019_v48 = vmax.f32 %v1003_v59, 0.0  ;;  %v1048_v44 = vsub.f32 %v5054_v4, %v5325_v16 }
 0x1d4   : > { %v853_v40 = vpop.xlane.xlu2 %852  ;;  %v1193_v54 = vsub.f32 1.5, %v1192_v7  ;;  %v1420_v8 = vsel %vm1356_vm13, %v1324_v41, %v1388_v53 }
 0x1d5   : > { %v4376_v58 = vpop.eup %4375  ;;  %v5366_v15 = vmul.f32 %v5079_v26, %v853_v40  ;;  %v1325_v18 = vadd.f32 %v5132_v10, %v1288_v6  ;;  %v5371_v36 = vadd.f32 1e-05, %v1019_v48  ;;  %v1326_v46 = vadd.f32 %v5141_v30, %v1289_v12 }
 0x1d6   : > { %v1200_v21 = vmul.f32 %v4376_v58, %v5342_v56  ;;  %v956_v39 = vpop.xlane.xlu1 %955  ;;  %v1194_v50 = vmul.f32 %v4374_v11, %v1193_v54  ;;  %vm1206_vm0 = vweird.f32 %v4376_v58 }
 0x1d7   : > { %v988_v14 = vmul.f32 %v5366_v15, %v5366_v15  ;;  %4377 = vrsqrt.f32 %v5371_v36  ;;  %v972_v43 = vmul.f32 %v956_v39, %v5079_v26  ;;  %vm1357_vm14 = vcmp.ge.f32.partialorder %v1325_v18, 0.0  ;;  %vm1207_vm2 = vmor %vm1205_vm1, %vm1206_vm0 }
 0x1d8   : > { %v1201_v5 = vmul.f32 %v4376_v58, %v1200_v21  ;;  %v1198_v17 = vsel %vm1197_vm12, %v4374_v11, %v1194_v50  ;;  %v1389_v35 = vmul.f32 0.01, %v1325_v18  ;;  %vm1358_vm15 = vcmp.ge.f32.partialorder %v1326_v46, 0.0 }
 0x1d9   : > { %v1253_v55 = vmul.f32 %v1198_v17, %v1045_v20  ;;  %v1004_v52 = vsub.f32 %v972_v43, %v988_v14  ;;  %v1254_v2 = vmul.f32 %v1198_v17, %v1046_v24  ;;  %v1390_v29 = vmul.f32 0.01, %v1326_v46 }
 0x1da   : > { %v1202_v34 = vmul.f32 0.5, %v1201_v5  ;;  %v1421_v42 = vsel %vm1357_vm14, %v1325_v18, %v1389_v35  ;;  %v1049_v20 = vsub.f32 %v5063_v23, %v5340_v60  ;;  %vm1215_vm4 = vweird.f32 %v5371_v36 }
 0x1db   : > { %v1020_v57 = vmax.f32 %v1004_v52, 0.0  ;;  %v1441_v22 = vpack.c.bf16 %v1421_v42, %v1419_v33  ;;  %v1422_v31 = vsel %vm1358_vm15, %v1326_v46, %v1390_v29  ;;  %v1290_v62 = vmul.f32 %v5125_v47, %v1253_v55 }
 0x1dc   : > { %v1203_v61 = vsub.f32 1.5, %v1202_v34  ;;  %v1442_v45 = vpack.c.bf16 %v1422_v31, %v1420_v8  ;;  %v1291_v13 = vmul.f32 %v5130_v9, %v1254_v2  ;;  %v1050_v18 = vsub.f32 %v5067_v49, %v5340_v60  ;;  %v6714_v34 = vld [vmem:[#allocation16_spill] sm:$0xff] }
 0x1dd   : > { %v4378_v11 = vpop.eup %4377  ;;  %v1068_v25 = vadd.f32 1e-05, %v1020_v57  ;;  %1683 = vmatmul.bf16.gmra.mxu0 %v1441_v22  ;;  %1781 = vmatmul.bf16.gmra.mxu2 %v1441_v22  ;;  %v1327_v3 = vadd.f32 %v5132_v10, %v1290_v62  ;;  %v1051_v60 = vsub.f32 %v5081_v37, %v5366_v15  ;;  %v1052_v52 = vsub.f32 %v6714_v34, %v5366_v15 }
 0x1de   : > { %v1204_v0 = vmul.f32 %v4376_v58, %v1203_v61  ;;  %v1210_v56 = vmul.f32 %v4378_v11, %v5371_v36  ;;  %1732 = vmatmul.bf16.gmra.mxu1 %v1442_v45  ;;  %1830 = vmatmul.bf16.gmra.mxu3 %v1442_v45  ;;  %v1328_v16 = vadd.f32 %v5141_v30, %v1291_v13  ;;  %vm1216_vm3 = vweird.f32 %v4378_v11 }
 0x1df   : > { %4379 = vrsqrt.f32 %v1068_v25  ;;  %vm1359_vm5 = vcmp.ge.f32.partialorder %v1327_v3, 0.0  ;;  %v1391_v24 = vmul.f32 0.01, %v1327_v3  ;;  %vm1217_vm7 = vmor %vm1215_vm4, %vm1216_vm3  ;;  %vm1225_vm11 = vweird.f32 %v1068_v25 }
 0x1e0   : > { %v1208_v27 = vsel %vm1207_vm2, %v4376_v58, %v1204_v0  ;;  %v1211_v19 = vmul.f32 %v4378_v11, %v1210_v56  ;;  %v1392_v41 = vmul.f32 0.01, %v1328_v16  ;;  %vm1360_vm8 = vcmp.ge.f32.partialorder %v1328_v16, 0.0 }
 0x1e1   : > { %v1255_v28 = vmul.f32 %v1208_v27, %v1047_v32  ;;  %v1256_v38 = vmul.f32 %v1208_v27, %v1048_v44  ;;  %v1423_v23 = vsel %vm1359_vm5, %v1327_v3, %v1391_v24 }
 0x1e2   : > { %v1212_v59 = vmul.f32 0.5, %v1211_v19  ;;  %v1424_v43 = vsel %vm1360_vm8, %v1328_v16, %v1392_v41 }
 0x1e3   : > { %v1292_v63 = vmul.f32 %v5125_v47, %v1255_v28  ;;  %v1293_v4 = vmul.f32 %v5130_v9, %v1256_v38 }
 0x1e4   : > { %v1213_v7 = vsub.f32 1.5, %v1212_v59 }
 0x1e5   : > { %v1329_v6 = vadd.f32 %v5132_v10, %v1292_v63  ;;  %v1330_v51 = vadd.f32 %v5141_v30, %v1293_v4  ;;  %v4380_v12 = vpop.eup %4379 }
 0x1e6   : > { %v1214_v48 = vmul.f32 %v4378_v11, %v1213_v7  ;;  %v1220_v40 = vmul.f32 %v4380_v12, %v1068_v25  ;;  %vm1226_vm10 = vweird.f32 %v4380_v12 }
 0x1e7   : > { %vm1361_vm6 = vcmp.ge.f32.partialorder %v1329_v6, 0.0  ;;  %v1393_v58 = vmul.f32 0.01, %v1329_v6  ;;  %vm1362_vm9 = vcmp.ge.f32.partialorder %v1330_v51, 0.0  ;;  %v1394_v54 = vmul.f32 0.01, %v1330_v51  ;;  %vm1227_vm12 = vmor %vm1225_vm11, %vm1226_vm10 }
 0x1e8   : > { %v1218_v21 = vsel %vm1217_vm7, %v4378_v11, %v1214_v48  ;;  %v1221_v39 = vmul.f32 %v4380_v12, %v1220_v40 }
 0x1e9   : > { %v1257_v46 = vmul.f32 %v1218_v21, %v1049_v20  ;;  %v1425_v50 = vsel %vm1361_vm6, %v1329_v6, %v1393_v58  ;;  %v1426_v36 = vsel %vm1362_vm9, %v1330_v51, %v1394_v54  ;;  %v1258_v14 = vmul.f32 %v1218_v21, %v1050_v18 }
 0x1ea   : > { %v1222_v1 = vmul.f32 0.5, %v1221_v39  ;;  %v1443_v5 = vpack.c.bf16 %v1425_v50, %v1423_v23  ;;  %v1444_v17 = vpack.c.bf16 %v1426_v36, %v1424_v43 }
 0x1eb   : > { %v1294_v53 = vmul.f32 %v5125_v47, %v1257_v46  ;;  %v1295_v49 = vmul.f32 %v5130_v9, %v1258_v14 }
 0x1ec   : > { %v1223_v35 = vsub.f32 1.5, %v1222_v1 }
 0x1ed   : > { %1688 = vmatmul.bf16.gmra.mxu0 %v1443_v5  ;;  %1786 = vmatmul.bf16.gmra.mxu2 %v1443_v5  ;;  %v1331_v29 = vadd.f32 %v5132_v10, %v1294_v53  ;;  %v1332_v61 = vadd.f32 %v5141_v30, %v1295_v49 }
 0x1ee   : > { %v1224_v55 = vmul.f32 %v4380_v12, %v1223_v35  ;;  %1737 = vmatmul.bf16.gmra.mxu1 %v1444_v17  ;;  %1835 = vmatmul.bf16.gmra.mxu3 %v1444_v17 }
 0x1ef   : > { %v1395_v37 = vmul.f32 0.01, %v1331_v29  ;;  %vm1363_vm13 = vcmp.ge.f32.partialorder %v1331_v29, 0.0  ;;  %vm1364_vm14 = vcmp.ge.f32.partialorder %v1332_v61, 0.0  ;;  %v1396_v15 = vmul.f32 0.01, %v1332_v61 }
 0x1f0   : > { %v1228_v2 = vsel %vm1227_vm12, %v4380_v12, %v1224_v55 }
 0x1f1   : > { %v1259_v33 = vmul.f32 %v1228_v2, %v1051_v60  ;;  %v1260_v42 = vmul.f32 %v1228_v2, %v1052_v52  ;;  %v1427_v25 = vsel %vm1363_vm13, %v1331_v29, %v1395_v37  ;;  %v1428_v44 = vsel %vm1364_vm14, %v1332_v61, %v1396_v15 }
 0x1f3   : > { %v1296_v57 = vmul.f32 %v5125_v47, %v1259_v33  ;;  %v1297_v22 = vmul.f32 %v5130_v9, %v1260_v42  ;;  %v1448_v9 = vld [vmem:[#allocation10 + $0x3] ss:$8 sm:$0x3] }
 0x1f4   : > { %v5415_v27 = vperm.slane %v1448_v9, 1 }
 0x1f5   : > { %v1333_v8 = vadd.f32 %v5132_v10, %v1296_v57  ;;  %v1334_v31 = vadd.f32 %v5141_v30, %v1297_v22  ;;  %v5412_v10 = vperm.slane %v1448_v9, 0 }
 0x1f7   : > { %vm1365_vm15 = vcmp.ge.f32.partialorder %v1333_v8, 0.0  ;;  %v1397_v11 = vmul.f32 0.01, %v1333_v8  ;;  %vm1366_vm0 = vcmp.ge.f32.partialorder %v1334_v31, 0.0  ;;  %v1398_v0 = vmul.f32 0.01, %v1334_v31 }
 0x1f9   : > { %v1429_v45 = vsel %vm1365_vm15, %v1333_v8, %v1397_v11  ;;  %v1430_v62 = vsel %vm1366_vm0, %v1334_v31, %v1398_v0 }
 0x1fa   : > { %v1445_v32 = vpack.c.bf16 %v1429_v45, %v1427_v25  ;;  %v1446_v47 = vpack.c.bf16 %v1430_v62, %v1428_v44 }
 0x1fd   : > { %1693 = vmatmul.bf16.gmra.mxu0 %v1445_v32  ;;  %1791 = vmatmul.bf16.gmra.mxu2 %v1445_v32 }
 0x1fe   : > { %1742 = vmatmul.bf16.gmra.mxu1 %v1446_v47  ;;  %1840 = vmatmul.bf16.gmra.mxu3 %v1446_v47 }
 0x20a   : > { %v1659_v30 = vpop.f32.mrf.mxu0 }
 0x20b   : > { %v1708_v56 = vpop.f32.mrf.mxu1  ;;  %v1660_v13 = vadd.f32 %v1659_v30, %v5412_v10 }
 0x20d   : > { %v5417_v38 = vadd.f32 %v1708_v56, %v1660_v13 }
 0x20f   : > { %v1910_v6 = vmul.f32 %v5417_v38, %v5417_v38 }
 0x210   : > { %v1757_v28 = vpop.f32.mrf.mxu2 }
 0x211   : > { %v1758_v19 = vadd.f32 %v1757_v28, %v5415_v27  ;;  %v1806_v3 = vpop.f32.mrf.mxu3 }
 0x212   : > { %v1661_v59 = vpop.f32.mrf.mxu0 }
 0x213   : > { %v5420_v63 = vadd.f32 %v1806_v3, %v1758_v19  ;;  %v1710_v4 = vpop.f32.mrf.mxu1  ;;  %v1662_v16 = vadd.f32 %v1661_v59, %v5412_v10 }
 0x215   : > { %v1846_v7 = vadd.f32 %v5420_v63, %v5417_v38  ;;  %v1911_v51 = vmul.f32 %v5420_v63, %v5420_v63  ;;  %v5429_v24 = vadd.f32 %v1710_v4, %v1662_v16 }
 0x217   : > { %1847 = vadd.xlane.f32.xlu2 %v1846_v7  ;;  %v1942_v12 = vadd.f32 %v1911_v51, %v1910_v6  ;;  %v1912_v21 = vmul.f32 %v5429_v24, %v5429_v24 }
 0x218   : > { %v1759_v20 = vpop.f32.mrf.mxu2 }
 0x219   : > { %v1760_v48 = vadd.f32 %v1759_v20, %v5415_v27  ;;  %v1808_v40 = vpop.f32.mrf.mxu3  ;;  %1943 = vadd.xlane.f32.xlu1 %v1942_v12 }
 0x21a   : > { %v1664_v58 = vpop.f32.mrf.mxu0 }
 0x21b   : > { %v5432_v41 = vadd.f32 %v1808_v40, %v1760_v48  ;;  %v1713_v54 = vpop.f32.mrf.mxu1  ;;  %v1665_v46 = vadd.f32 %v1664_v58, %v5412_v10 }
 0x21d   : > { %v1849_v18 = vadd.f32 %v5432_v41, %v5429_v24  ;;  %v1913_v39 = vmul.f32 %v5432_v41, %v5432_v41  ;;  %v5441_v36 = vadd.f32 %v1713_v54, %v1665_v46 }
 0x21f   : > { %1850 = vadd.xlane.f32.xlu0 %v1849_v18  ;;  %v1945_v23 = vadd.f32 %v1913_v39, %v1912_v21  ;;  %v1914_v55 = vmul.f32 %v5441_v36, %v5441_v36 }
 0x220   : > { %v1762_v50 = vpop.f32.mrf.mxu2 }
 0x221   : > { %1946 = vadd.xlane.f32.xlu2 %v1945_v23  ;;  %v1763_v14 = vadd.f32 %v1762_v50, %v5415_v27  ;;  %v1811_v1 = vpop.f32.mrf.mxu3 }
 0x222   : > { %v1666_v5 = vpop.f32.mrf.mxu0 }
 0x223   : > { %v5444_v43 = vadd.f32 %v1811_v1, %v1763_v14  ;;  %v1715_v17 = vpop.f32.mrf.mxu1  ;;  %v1667_v35 = vadd.f32 %v1666_v5, %v5412_v10 }
 0x225   : > { %v1852_v53 = vadd.f32 %v5444_v43, %v5441_v36  ;;  %v1915_v49 = vmul.f32 %v5444_v43, %v5444_v43  ;;  %v5453_v52 = vadd.f32 %v1715_v17, %v1667_v35 }
 0x227   : > { %1853 = vadd.xlane.f32.xlu0 %v1852_v53  ;;  %v1948_v60 = vadd.f32 %v1915_v49, %v1914_v55  ;;  %v1916_v8 = vmul.f32 %v5453_v52, %v5453_v52 }
 0x228   : > { %v1764_v34 = vpop.f32.mrf.mxu2 }
 0x229   : > { %v1765_v2 = vadd.f32 %v1764_v34, %v5415_v27  ;;  %v1813_v33 = vpop.f32.mrf.mxu3  ;;  %1949 = vadd.xlane.f32.xlu2 %v1948_v60 }
 0x22a   : > { %v1669_v42 = vpop.f32.mrf.mxu0 }
 0x22b   : > { %v5456_v29 = vadd.f32 %v1813_v33, %v1765_v2  ;;  %v1718_v61 = vpop.f32.mrf.mxu1  ;;  %v1670_v57 = vadd.f32 %v1669_v42, %v5412_v10 }
 0x22d   : > { %v1855_v22 = vadd.f32 %v5456_v29, %v5453_v52  ;;  %v1917_v37 = vmul.f32 %v5456_v29, %v5456_v29  ;;  %v5465_v11 = vadd.f32 %v1718_v61, %v1670_v57 }
 0x22f   : > { %1856 = vadd.xlane.f32.xlu1 %v1855_v22  ;;  %v1951_v31 = vadd.f32 %v1917_v37, %v1916_v8  ;;  %v1918_v9 = vmul.f32 %v5465_v11, %v5465_v11 }
 0x230   : > { %v1767_v15 = vpop.f32.mrf.mxu2 }
 0x231   : > { %v1768_v0 = vadd.f32 %v1767_v15, %v5415_v27  ;;  %v1816_v25 = vpop.f32.mrf.mxu3  ;;  %1952 = vadd.xlane.f32.xlu0 %v1951_v31 }
 0x232   : > { %v1671_v45 = vpop.f32.mrf.mxu0 }
 0x233   : > { %v5468_v62 = vadd.f32 %v1816_v25, %v1768_v0  ;;  %v1720_v32 = vpop.f32.mrf.mxu1  ;;  %v1672_v44 = vadd.f32 %v1671_v45, %v5412_v10 }
 0x235   : > { %v1858_v47 = vadd.f32 %v5468_v62, %v5465_v11  ;;  %v1919_v30 = vmul.f32 %v5468_v62, %v5468_v62  ;;  %v5477_v28 = vadd.f32 %v1720_v32, %v1672_v44 }
 0x237   : > { %1859 = vadd.xlane.f32.xlu1 %v1858_v47  ;;  %v1954_v56 = vadd.f32 %v1919_v30, %v1918_v9  ;;  %v1920_v51 = vmul.f32 %v5477_v28, %v5477_v28  ;;  %v4235_v47 = vld [vmem:[#allocation8 + $0x74] sm:$0xf]  ;;  %v4069_v9 = vld [vmem:[#allocation8 + $0x78] sm:$0xf0] }
 0x238   : > { %v1769_v13 = vpop.f32.mrf.mxu2  ;;  %v4251_v30 = vld [vmem:[#allocation8 + $0xf4] sm:$0xf] }
 0x239   : > { %v1770_v19 = vadd.f32 %v1769_v13, %v5415_v27  ;;  %v1818_v3 = vpop.f32.mrf.mxu3  ;;  %1955 = vadd.xlane.f32.xlu0 %v1954_v56  ;;  %v4072_v56 = vor.u32 %v4235_v47, %v4069_v9  ;;  %v4133_v13 = vld [vmem:[#allocation8 + $0xf8] sm:$0xf0] }
 0x23a   : > { %v1674_v59 = vpop.f32.mrf.mxu0 }
 0x23b   : > { %v5480_v4 = vadd.f32 %v1818_v3, %v1770_v19  ;;  %v1723_v16 = vpop.f32.mrf.mxu1  ;;  %v1675_v7 = vadd.f32 %v1674_v59, %v5412_v10  ;;  %v4136_v3 = vor.u32 %v4251_v30, %v4133_v13  ;;  %2781 = vmatpush.bf16.msra.mxu2 %v4072_v56 }
 0x23d   : > { %v1861_v6 = vadd.f32 %v5480_v4, %v5477_v28  ;;  %v1921_v12 = vmul.f32 %v5480_v4, %v5480_v4  ;;  %v5489_v40 = vadd.f32 %v1723_v16, %v1675_v7  ;;  %2830 = vmatpush.bf16.msra.mxu3 %v4136_v3 }
 0x23f   : > { %1862 = vadd.xlane.f32.xlu2 %v1861_v6  ;;  %v1957_v20 = vadd.f32 %v1921_v12, %v1920_v51  ;;  %v1922_v50 = vmul.f32 %v5489_v40, %v5489_v40 }
 0x240   : > { %v1772_v48 = vpop.f32.mrf.mxu2 }
 0x241   : > { %v1773_v58 = vadd.f32 %v1772_v48, %v5415_v27  ;;  %v1821_v54 = vpop.f32.mrf.mxu3  ;;  %1958 = vadd.xlane.f32.xlu1 %v1957_v20 }
 0x242   : > { %v1676_v18 = vpop.f32.mrf.mxu0 }
 0x243   : > { %v5492_v21 = vadd.f32 %v1821_v54, %v1773_v58  ;;  %v1725_v39 = vpop.f32.mrf.mxu1  ;;  %v1677_v46 = vadd.f32 %v1676_v18, %v5412_v10 }
 0x245   : > { %v1864_v23 = vadd.f32 %v5492_v21, %v5489_v40  ;;  %v1923_v14 = vmul.f32 %v5492_v21, %v5492_v21  ;;  %v5501_v17 = vadd.f32 %v1725_v39, %v1677_v46  ;;  %v4067_v39 = vld [vmem:[#allocation8 + $0x70] sm:$0xf]  ;;  %v4236_v46 = vld [vmem:[#allocation8 + $0x74] sm:$0xf0] }
 0x247   : > { %1865 = vadd.xlane.f32.xlu2 %v1864_v23  ;;  %v1960_v1 = vadd.f32 %v1923_v14, %v1922_v50  ;;  %v1924_v33 = vmul.f32 %v5501_v17, %v5501_v17  ;;  %v4131_v23 = vld [vmem:[#allocation8 + $0xf0] sm:$0xf]  ;;  %v4068_v50 = vor.u32 %v4236_v46, %v4067_v39  ;;  %v4252_v14 = vld [vmem:[#allocation8 + $0xf4] sm:$0xf0] }
 0x248   : > { %v1774_v5 = vpop.f32.mrf.mxu2 }
 0x249   : > { %v1775_v35 = vadd.f32 %v1774_v5, %v5415_v27  ;;  %v1823_v53 = vpop.f32.mrf.mxu3  ;;  %1961 = vadd.xlane.f32.xlu1 %v1960_v1  ;;  %v4132_v5 = vor.u32 %v4252_v14, %v4131_v23  ;;  %2683 = vmatpush.bf16.msra.mxu0 %v4068_v50 }
 0x24a   : > { %v1679_v55 = vpop.f32.mrf.mxu0 }
 0x24b   : > { %v5504_v49 = vadd.f32 %v1823_v53, %v1775_v35  ;;  %v1728_v60 = vpop.f32.mrf.mxu1  ;;  %v1680_v34 = vadd.f32 %v1679_v55, %v5412_v10  ;;  %2732 = vmatpush.bf16.msra.mxu1 %v4132_v5 }
 0x24d   : > { %v1867_v2 = vadd.f32 %v5504_v49, %v5501_v17  ;;  %v1925_v42 = vmul.f32 %v5504_v49, %v5504_v49  ;;  %v5513_v22 = vadd.f32 %v1728_v60, %v1680_v34 }
 0x24f   : > { %1868 = vadd.xlane.f32.xlu0 %v1867_v2  ;;  %v1963_v61 = vadd.f32 %v1925_v42, %v1924_v33  ;;  %v1926_v32 = vmul.f32 %v5513_v22, %v5513_v22 }
 0x250   : > { %v1777_v57 = vpop.f32.mrf.mxu2 }
 0x251   : > { %v1778_v8 = vadd.f32 %v1777_v57, %v5415_v27  ;;  %v1826_v37 = vpop.f32.mrf.mxu3  ;;  %1964 = vadd.xlane.f32.xlu2 %v1963_v61 }
 0x252   : > { %v1681_v31 = vpop.f32.mrf.mxu0 }
 0x253   : > { %v5516_v15 = vadd.f32 %v1826_v37, %v1778_v8  ;;  %v1730_v0 = vpop.f32.mrf.mxu1  ;;  %v1682_v25 = vadd.f32 %v1681_v31, %v5412_v10  ;;  %v4233_v37 = vld [vmem:[#allocation8 + $0x64] sm:$0xf]  ;;  %v4061_v31 = vld [vmem:[#allocation8 + $0x68] sm:$0xf0] }
 0x255   : > { %v1870_v45 = vadd.f32 %v5516_v15, %v5513_v22  ;;  %v1927_v44 = vmul.f32 %v5516_v15, %v5516_v15  ;;  %v5525_v16 = vadd.f32 %v1730_v0, %v1682_v25  ;;  %v4249_v0 = vld [vmem:[#allocation8 + $0xe4] sm:$0xf]  ;;  %v4064_v25 = vor.u32 %v4233_v37, %v4061_v31 }
 0x257   : > { %1871 = vadd.xlane.f32.xlu0 %v1870_v45  ;;  %v1966_v19 = vadd.f32 %v1927_v44, %v1926_v32  ;;  %v1928_v54 = vmul.f32 %v5525_v16, %v5525_v16  ;;  %v4125_v45 = vld [vmem:[#allocation8 + $0xe8] sm:$0xf0]  ;;  %2782 = vmatpush.bf16.msra.mxu2 %v4064_v25 }
 0x258   : > { %v1779_v59 = vpop.f32.mrf.mxu2  ;;  %v4128_v44 = vor.u32 %v4249_v0, %v4125_v45 }
 0x259   : > { %v1780_v7 = vadd.f32 %v1779_v59, %v5415_v27  ;;  %v1828_v6 = vpop.f32.mrf.mxu3  ;;  %1967 = vadd.xlane.f32.xlu2 %v1966_v19 }
 0x25a   : > { %v1684_v51 = vpop.f32.mrf.mxu0  ;;  %2831 = vmatpush.bf16.msra.mxu3 %v4128_v44 }
 0x25b   : > { %v5528_v12 = vadd.f32 %v1828_v6, %v1780_v7  ;;  %v1733_v20 = vpop.f32.mrf.mxu1  ;;  %v1685_v48 = vadd.f32 %v1684_v51, %v5412_v10  ;;  %v4059_v7 = vld [vmem:[#allocation8 + $0x60] sm:$0xf]  ;;  %v4234_v6 = vld [vmem:[#allocation8 + $0x64] sm:$0xf0] }
 0x25d   : > { %v1873_v58 = vadd.f32 %v5528_v12, %v5525_v16  ;;  %v1929_v18 = vmul.f32 %v5528_v12, %v5528_v12  ;;  %v5537_v53 = vadd.f32 %v1733_v20, %v1685_v48 }
 0x25f   : > { %1874 = vadd.xlane.f32.xlu1 %v1873_v58  ;;  %v1969_v1 = vadd.f32 %v1929_v18, %v1928_v54  ;;  %v1930_v57 = vmul.f32 %v5537_v53, %v5537_v53  ;;  %v4060_v58 = vor.u32 %v4234_v6, %v4059_v7  ;;  %v4123_v6 = vld [vmem:[#allocation8 + $0xe0] sm:$0xf] }
 0x260   : > { %v1782_v35 = vpop.f32.mrf.mxu2 }
 0x261   : > { %v1783_v55 = vadd.f32 %v1782_v35, %v5415_v27  ;;  %1970 = vadd.xlane.f32.xlu0 %v1969_v1  ;;  %v1831_v60 = vpop.f32.mrf.mxu3  ;;  %2684 = vmatpush.bf16.msra.mxu0 %v4060_v58 }
 0x262   : > { %v1686_v34 = vpop.f32.mrf.mxu0 }
 0x263   : > { %v5540_v2 = vadd.f32 %v1831_v60, %v1783_v55  ;;  %v1687_v33 = vadd.f32 %v1686_v34, %v5412_v10  ;;  %v1735_v42 = vpop.f32.mrf.mxu1 }
 0x265   : > { %v1876_v61 = vadd.f32 %v5540_v2, %v5537_v53  ;;  %v1931_v8 = vmul.f32 %v5540_v2, %v5540_v2  ;;  %v5549_v47 = vadd.f32 %v1735_v42, %v1687_v33 }
 0x267   : > { %1877 = vadd.xlane.f32.xlu1 %v1876_v61  ;;  %v1972_v32 = vadd.f32 %v1931_v8, %v1930_v57  ;;  %v1932_v59 = vmul.f32 %v5549_v47, %v5549_v47 }
 0x268   : > { %v1784_v9 = vpop.f32.mrf.mxu2 }
 0x269   : > { %v1785_v30 = vadd.f32 %v1784_v9, %v5415_v27  ;;  %1973 = vadd.xlane.f32.xlu0 %v1972_v32  ;;  %v1833_v56 = vpop.f32.mrf.mxu3 }
 0x26a   : > { %v1689_v13 = vpop.f32.mrf.mxu0 }
 0x26b   : > { %v5552_v19 = vadd.f32 %v1833_v56, %v1785_v30  ;;  %v1738_v3 = vpop.f32.mrf.mxu1  ;;  %v1690_v51 = vadd.f32 %v1689_v13, %v5412_v10 }
 0x26d   : > { %v1879_v20 = vadd.f32 %v5552_v19, %v5549_v47  ;;  %v1933_v48 = vmul.f32 %v5552_v19, %v5552_v19  ;;  %v5561_v39 = vadd.f32 %v1738_v3, %v1690_v51  ;;  %v4250_v51 = vld [vmem:[#allocation8 + $0xe4] sm:$0xf0] }
 0x26f   : > { %1880 = vadd.xlane.f32.xlu2 %v1879_v20  ;;  %v1975_v54 = vadd.f32 %v1933_v48, %v1932_v59  ;;  %v1934_v55 = vmul.f32 %v5561_v39, %v5561_v39 }
 0x270   : > { %v1787_v18 = vpop.f32.mrf.mxu2 }
 0x271   : > { %v1788_v46 = vadd.f32 %v1787_v18, %v5415_v27  ;;  %1976 = vadd.xlane.f32.xlu1 %v1975_v54  ;;  %v1836_v23 = vpop.f32.mrf.mxu3  ;;  %v4124_v54 = vor.u32 %v4250_v51, %v4123_v6  ;;  %v4043_v6 = vld [vmem:[#allocation8 + $0x40] sm:$0xf] }
 0x272   : > { %v1691_v50 = vpop.f32.mrf.mxu0 }
 0x273   : > { %v5564_v14 = vadd.f32 %v1836_v23, %v1788_v46  ;;  %v1740_v1 = vpop.f32.mrf.mxu1  ;;  %v1692_v5 = vadd.f32 %v1691_v50, %v5412_v10  ;;  %2733 = vmatpush.bf16.msra.mxu1 %v4124_v54  ;;  %v4107_v54 = vld [vmem:[#allocation8 + $0xc0] sm:$0xf] }
 0x275   : > { %v1882_v35 = vadd.f32 %v5564_v14, %v5561_v39  ;;  %v1935_v60 = vmul.f32 %v5564_v14, %v5564_v14  ;;  %v5573_v42 = vadd.f32 %v1740_v1, %v1692_v5  ;;  %v4053_v1 = vld [vmem:[#allocation8 + $0x58] sm:$0xf0]  ;;  %v4247_v5 = vld [vmem:[#allocation8 + $0xd4] sm:$0xf] }
 0x277   : > { %1883 = vadd.xlane.f32.xlu2 %v1882_v35  ;;  %v1978_v34 = vadd.f32 %v1935_v60, %v1934_v55  ;;  %v1936_v45 = vmul.f32 %v5573_v42, %v5573_v42 }
 0x278   : > { %v1789_v33 = vpop.f32.mrf.mxu2 }
 0x279   : > { %v1790_v61 = vadd.f32 %v1789_v33, %v5415_v27  ;;  %1979 = vadd.xlane.f32.xlu1 %v1978_v34  ;;  %v1838_v57 = vpop.f32.mrf.mxu3  ;;  %v4117_v34 = vld [vmem:[#allocation8 + $0xd8] sm:$0xf0]  ;;  %v4051_v33 = vld [vmem:[#allocation8 + $0x50] sm:$0xf] }
 0x27a   : > { %v1694_v8 = vpop.f32.mrf.mxu0 }
 0x27b   : > { %v5576_v37 = vadd.f32 %v1838_v57, %v1790_v61  ;;  %v1695_v31 = vadd.f32 %v1694_v8, %v5412_v10  ;;  %v1743_v0 = vpop.f32.mrf.mxu1  ;;  %v4232_v61 = vld [vmem:[#allocation8 + $0x54] sm:$0xf0] }
 0x27d   : > { %v1885_v25 = vadd.f32 %v5576_v37, %v5573_v42  ;;  %v1937_v32 = vmul.f32 %v5576_v37, %v5576_v37  ;;  %v5585_v30 = vadd.f32 %v1743_v0, %v1695_v31  ;;  %v4120_v31 = vor.u32 %v4247_v5, %v4117_v34  ;;  %v4109_v5 = vld [vmem:[#allocation8 + $0xc8] sm:$0xf0]  ;;  %v4035_v34 = vld [vmem:[#allocation8 + $0x30] sm:$0xf] }
 0x27e   : > { %v4052_v0 = vor.u32 %v4232_v61, %v4051_v33  ;;  %v4228_v33 = vld [vmem:[#allocation8 + $0x34] sm:$0xf0] }
 0x27f   : > { %1886 = vadd.xlane.f32.xlu0 %v1885_v25  ;;  %v1981_v44 = vadd.f32 %v1937_v32, %v1936_v45  ;;  %v1938_v48 = vmul.f32 %v5585_v30, %v5585_v30  ;;  %v4115_v25 = vld [vmem:[#allocation8 + $0xd0] sm:$0xf]  ;;  %v4248_v45 = vld [vmem:[#allocation8 + $0xd4] sm:$0xf0]  ;;  %2832 = vmatpush.bf16.msra.mxu3 %v4120_v31 }
 0x280   : > { %v1792_v9 = vpop.f32.mrf.mxu2  ;;  %2685 = vmatpush.bf16.msra.mxu0 %v4052_v0  ;;  %v4099_v31 = vld [vmem:[#allocation8 + $0xb0] sm:$0xf]  ;;  %v4244_v0 = vld [vmem:[#allocation8 + $0xb4] sm:$0xf0] }
 0x281   : > { %v1793_v56 = vadd.f32 %v1792_v9, %v5415_v27  ;;  %1982 = vadd.xlane.f32.xlu2 %v1981_v44  ;;  %v1841_v13 = vpop.f32.mrf.mxu3  ;;  %v4116_v9 = vor.u32 %v4248_v45, %v4115_v25  ;;  %v4227_v25 = vld [vmem:[#allocation8 + $0x34] sm:$0xf] }
 0x282   : > { %v1696_v3 = vpop.f32.mrf.mxu0 }
 0x283   : > { %v5588_v59 = vadd.f32 %v1841_v13, %v1793_v56  ;;  %v1697_v7 = vadd.f32 %v1696_v3, %v5412_v10  ;;  %v1745_v18 = vpop.f32.mrf.mxu1  ;;  %v4231_v10 = vld [vmem:[#allocation8 + $0x54] sm:$0xf]  ;;  %v4229_v3 = vld [vmem:[#allocation8 + $0x44] sm:$0xf]  ;;  %2734 = vmatpush.bf16.msra.mxu1 %v4116_v9  ;;  %v4100_v9 = vor.u32 %v4244_v0, %v4099_v31  ;;  %v4083_v31 = vld [vmem:[#allocation8 + $0x90] sm:$0xf] }
 0x284   : > { %v4056_v60 = vor.u32 %v4231_v10, %v4053_v1  ;;  %v4245_v1 = vld [vmem:[#allocation8 + $0xc4] sm:$0xf] }
 0x285   : > { %v1888_v20 = vadd.f32 %v5588_v59, %v5585_v30  ;;  %v1939_v58 = vmul.f32 %v5588_v59, %v5588_v59  ;;  %v5597_v23 = vadd.f32 %v1745_v18, %v1697_v7  ;;  %v4045_v7 = vld [vmem:[#allocation8 + $0x48] sm:$0xf0]  ;;  %v4246_v18 = vld [vmem:[#allocation8 + $0xc4] sm:$0xf0] }
 0x286   : > { %2783 = vmatpush.bf16.msra.mxu2 %v4056_v60  ;;  %v4108_v10 = vor.u32 %v4246_v18, %v4107_v54  ;;  %v4242_v18 = vld [vmem:[#allocation8 + $0xa4] sm:$0xf0] }
 0x287   : > { %1889 = vadd.xlane.f32.xlu0 %v1888_v20  ;;  %v1984_v46 = vadd.f32 %v1939_v58, %v1938_v48  ;;  %v1940_v13 = vmul.f32 %v5597_v23, %v5597_v23  ;;  %v4048_v48 = vor.u32 %v4229_v3, %v4045_v7  ;;  %v4230_v58 = vld [vmem:[#allocation8 + $0x44] sm:$0xf0]  ;;  %v4101_v7 = vld [vmem:[#allocation8 + $0xb8] sm:$0xf0] }
 0x288   : > { %v1794_v50 = vpop.f32.mrf.mxu2  ;;  %2735 = vmatpush.bf16.msra.mxu1 %v4108_v10 }
 0x289   : > { %v1795_v35 = vadd.f32 %v1794_v50, %v5415_v27  ;;  %1985 = vadd.xlane.f32.xlu2 %v1984_v46  ;;  %v1843_v57 = vpop.f32.mrf.mxu3  ;;  %v4044_v50 = vor.u32 %v4230_v58, %v4043_v6  ;;  %v4027_v6 = vld [vmem:[#allocation8 + $0x20] sm:$0xf] }
 0x28a   : > { %v1848_v55 = vpop.xlane.xlu2 %1847  ;;  %2784 = vmatpush.bf16.msra.mxu2 %v4048_v48 }
 0x28b   : > { %v5601_v8 = vmul.f32 %v1848_v55, %v5079_v26  ;;  %v5603_v32 = vadd.f32 %v1843_v57, %v1795_v35  ;;  %v4112_v55 = vor.u32 %v4245_v1, %v4109_v5  ;;  %2686 = vmatpush.bf16.msra.mxu0 %v4044_v50  ;;  %v4036_v57 = vor.u32 %v4228_v33, %v4035_v34  ;;  %v4029_v50 = vld [vmem:[#allocation8 + $0x28] sm:$0xf0]  ;;  %v4019_v33 = vld [vmem:[#allocation8 + $0x10] sm:$0xf] }
 0x28c   : > { %v1944_v44 = vpop.xlane.xlu1 %1943  ;;  %2736 = vmatpush.bf16.msra.mxu1 %v4100_v9 }
 0x28d   : > { %6715 = vst [vmem:[#allocation16_spill] sm:$0xff] %v5603_v32  ;;  %v1990_v27 = vmul.f32 %v1944_v44, %v5079_v26  ;;  %v2006_v56 = vmul.f32 %v5601_v8, %v5601_v8  ;;  %v1891_v51 = vadd.f32 %v5603_v32, %v5597_v23  ;;  %v1941_v20 = vmul.f32 %v5603_v32, %v5603_v32 }
 0x28e   : > { %2833 = vmatpush.bf16.msra.mxu3 %v4112_v55  ;;  %v4093_v55 = vld [vmem:[#allocation8 + $0xa8] sm:$0xf0] }
 0x28f   : > { %v2022_v46 = vsub.f32 %v1990_v27, %v2006_v56  ;;  %1892 = vadd.xlane.f32.xlu1 %v1891_v51  ;;  %v1987_v35 = vadd.f32 %v1941_v20, %v1940_v13  ;;  %v4037_v27 = vld [vmem:[#allocation8 + $0x38] sm:$0xf0]  ;;  %v4243_v56 = vld [vmem:[#allocation8 + $0xb4] sm:$0xf]  ;;  %v4226_v51 = vld [vmem:[#allocation8 + $0x24] sm:$0xf0]  ;;  %2687 = vmatpush.bf16.msra.mxu0 %v4036_v57 }
 0x290   : > { %v4040_v3 = vor.u32 %v4227_v25, %v4037_v27  ;;  %v4091_v20 = vld [vmem:[#allocation8 + $0xa0] sm:$0xf]  ;;  %v4104_v54 = vor.u32 %v4243_v56, %v4101_v7  ;;  %v4028_v10 = vor.u32 %v4226_v51, %v4027_v6  ;;  %v4240_v25 = vld [vmem:[#allocation8 + $0x94] sm:$0xf0]  ;;  %v4223_v27 = vld [vmem:[#allocation8 + $0x14] sm:$0xf] }
 0x291   : > { %v2038_v60 = vmax.f32 %v2022_v46, 0.0  ;;  %1988 = vadd.xlane.f32.xlu0 %v1987_v35  ;;  %v4225_v46 = vld [vmem:[#allocation8 + $0x24] sm:$0xf]  ;;  %v4092_v1 = vor.u32 %v4242_v18, %v4091_v20  ;;  %v4084_v9 = vor.u32 %v4240_v25, %v4083_v31  ;;  %v4239_v7 = vld [vmem:[#allocation8 + $0x94] sm:$0xf] }
 0x292   : > { %v1851_v61 = vpop.xlane.xlu0 %1850  ;;  %2785 = vmatpush.bf16.msra.mxu2 %v4040_v3  ;;  %v4032_v5 = vor.u32 %v4225_v46, %v4029_v50  ;;  %v4241_v35 = vld [vmem:[#allocation8 + $0xa4] sm:$0xf]  ;;  %2834 = vmatpush.bf16.msra.mxu3 %v4104_v54  ;;  %v4021_v3 = vld [vmem:[#allocation8 + $0x18] sm:$0xf0]  ;;  %v4011_v46 = vld [vmem:[#allocation8] sm:$0xf] }
 0x293   : > { %v5614_v45 = vadd.f32 1e-05, %v2038_v60  ;;  %v5617_v44 = vmul.f32 %v1851_v61, %v5079_v26  ;;  %v4096_v34 = vor.u32 %v4241_v35, %v4093_v55  ;;  %v4224_v61 = vld [vmem:[#allocation8 + $0x14] sm:$0xf0]  ;;  %2688 = vmatpush.bf16.msra.mxu0 %v4028_v10  ;;  %2737 = vmatpush.bf16.msra.mxu1 %v4092_v1  ;;  %v4085_v6 = vld [vmem:[#allocation8 + $0x98] sm:$0xf0]  ;;  %v4024_v54 = vor.u32 %v4223_v27, %v4021_v3 }
 0x294   : > { %v1947_v13 = vpop.xlane.xlu2 %1946  ;;  %v4020_v57 = vor.u32 %v4224_v61, %v4019_v33  ;;  %v4088_v18 = vor.u32 %v4239_v7, %v4085_v6  ;;  %v4222_v50 = vld [vmem:[#allocation8 + $0x4] sm:$0xf0]  ;;  %v4075_v1 = vld [vmem:[#allocation8 + $0x80] sm:$0xf]  ;;  %v4221_v35 = vld [vmem:[#allocation8 + $0x4] sm:$0xf] }
 0x295   : > { %4381 = vrsqrt.f32 %v5614_v45  ;;  %v1991_v48 = vmul.f32 %v1947_v13, %v5079_v26  ;;  %v2007_v58 = vmul.f32 %v5617_v44, %v5617_v44  ;;  %v4237_v33 = vld [vmem:[#allocation8 + $0x84] sm:$0xf]  ;;  %v4077_v61 = vld [vmem:[#allocation8 + $0x88] sm:$0xf0]  ;;  %vm2108_vm2 = vweird.f32 %v5614_v45 }
 0x296   : > { %2786 = vmatpush.bf16.msra.mxu2 %v4032_v5  ;;  %2835 = vmatpush.bf16.msra.mxu3 %v4096_v34  ;;  %v4238_v5 = vld [vmem:[#allocation8 + $0x84] sm:$0xf0]  ;;  %v4013_v34 = vld [vmem:[#allocation8 + $0x8] sm:$0xf0] }
 0x297   : > { %v2023_v60 = vsub.f32 %v1991_v48, %v2007_v58  ;;  %2689 = vmatpush.bf16.msra.mxu0 %v4020_v57  ;;  %2738 = vmatpush.bf16.msra.mxu1 %v4084_v9  ;;  %v4076_v25 = vor.u32 %v4238_v5, %v4075_v1  ;;  %v4016_v27 = vor.u32 %v4221_v35, %v4013_v34 }
 0x298   : > { %v4080_v57 = vor.u32 %v4237_v33, %v4077_v61  ;;  %v2054_v35 = vsub.f32 %v5417_v38, %v5601_v8 }
 0x299   : > { %v2039_v0 = vmax.f32 %v2023_v60, 0.0 }
 0x29a   : > { %v1854_v13 = vpop.xlane.xlu0 %1853  ;;  %2787 = vmatpush.bf16.msra.mxu2 %v4024_v54  ;;  %2836 = vmatpush.bf16.msra.mxu3 %v4088_v18 }
 0x29b   : > { %v4382_v56 = vpop.eup %4381  ;;  %v5624_v20 = vadd.f32 1e-05, %v2039_v0  ;;  %v5627_v48 = vmul.f32 %v1854_v13, %v5079_v26  ;;  %v4012_v0 = vor.u32 %v4222_v50, %v4011_v46  ;;  %2739 = vmatpush.bf16.msra.mxu1 %v4076_v25 }
 0x29c   : > { %v2103_v51 = vmul.f32 %v4382_v56, %v5614_v45  ;;  %v1950_v58 = vpop.xlane.xlu2 %1949  ;;  %vm2109_vm1 = vweird.f32 %v4382_v56  ;;  %v2055_v45 = vsub.f32 %v5420_v63, %v5601_v8  ;;  %v2056_v8 = vsub.f32 %v5429_v24, %v5617_v44 }
 0x29d   : > { %4383 = vrsqrt.f32 %v5624_v20  ;;  %v1992_v55 = vmul.f32 %v1950_v58, %v5079_v26  ;;  %v2008_v60 = vmul.f32 %v5627_v48, %v5627_v48  ;;  %2690 = vmatpush.bf16.msra.mxu0 %v4012_v0  ;;  %vm2110_vm3 = vmor %vm2108_vm2, %vm2109_vm1  ;;  %vm2118_vm5 = vweird.f32 %v5624_v20 }
 0x29e   : > { %v2104_v10 = vmul.f32 %v4382_v56, %v2103_v51  ;;  %2788 = vmatpush.bf16.msra.mxu2 %v4016_v27  ;;  %2837 = vmatpush.bf16.msra.mxu3 %v4080_v57 }
 0x29f   : > { %v2024_v13 = vsub.f32 %v1992_v55, %v2008_v60  ;;  %v1452_v60 = vld [vmem:[#allocation10 + $0x5] ss:$8 sm:$0x3] }
 0x2a0   : > { %v2105_v31 = vmul.f32 0.5, %v2104_v10  ;;  %v1450_v10 = vld [vmem:[#allocation10 + $0x4] ss:$8 sm:$0x3]  ;;  %v5657_v63 = vperm.slane %v1452_v60, 1 }
 0x2a1   : > { %v2040_v7 = vmax.f32 %v2024_v13, 0.0  ;;  %v5648_v33 = vperm.slane %v1450_v10, 0  ;;  %v5650_v0 = vperm.slane %v1450_v10, 1  ;;  %v5652_v13 = vperm.slane %v1452_v60, 0 }
 0x2a2   : > { %v2106_v3 = vsub.f32 1.5, %v2105_v31  ;;  %v1857_v6 = vpop.xlane.xlu1 %1856 }
 0x2a3   : > { %v4384_v51 = vpop.eup %4383  ;;  %v5634_v58 = vmul.f32 %v1857_v6, %v5079_v26  ;;  %v5638_v18 = vadd.f32 1e-05, %v2040_v7 }
 0x2a4   : > { %v2107_v9 = vmul.f32 %v4382_v56, %v2106_v3  ;;  %v2113_v54 = vmul.f32 %v4384_v51, %v5624_v20  ;;  %v1953_v46 = vpop.xlane.xlu0 %1952  ;;  %vm2119_vm4 = vweird.f32 %v4384_v51 }
 0x2a5   : > { %v2009_v50 = vmul.f32 %v5634_v58, %v5634_v58  ;;  %4385 = vrsqrt.f32 %v5638_v18  ;;  %v1993_v55 = vmul.f32 %v1953_v46, %v5079_v26  ;;  %vm2120_vm6 = vmor %vm2118_vm5, %vm2119_vm4  ;;  %vm2128_vm8 = vweird.f32 %v5638_v18 }
 0x2a6   : > { %v2111_v1 = vsel %vm2110_vm3, %v4382_v56, %v2107_v9  ;;  %v2114_v5 = vmul.f32 %v4384_v51, %v2113_v54  ;;  %v2057_v54 = vsub.f32 %v5432_v41, %v5617_v44 }
 0x2a7   : > { %v2262_v61 = vmul.f32 %v2111_v1, %v2054_v35  ;;  %v2025_v31 = vsub.f32 %v1993_v55, %v2009_v50  ;;  %v2263_v56 = vmul.f32 %v2111_v1, %v2055_v45 }
 0x2a8   : > { %v2115_v34 = vmul.f32 0.5, %v2114_v5 }
 0x2a9   : > { %v2041_v38 = vmax.f32 %v2025_v31, 0.0  ;;  %v2299_v9 = vmul.f32 %v5648_v33, %v2262_v61  ;;  %v2300_v10 = vmul.f32 %v5650_v0, %v2263_v56 }
 0x2aa   : > { %v2116_v25 = vsub.f32 1.5, %v2115_v34  ;;  %v1860_v27 = vpop.xlane.xlu1 %1859 }
 0x2ab   : > { %v5655_v57 = vmul.f32 %v1860_v27, %v5079_v26  ;;  %v4386_v3 = vpop.eup %4385  ;;  %v5666_v50 = vadd.f32 1e-05, %v2041_v38  ;;  %v2336_v41 = vadd.f32 %v5652_v13, %v2299_v9 }
 0x2ac   : > { %v2117_v7 = vmul.f32 %v4384_v51, %v2116_v25  ;;  %v1956_v6 = vpop.xlane.xlu0 %1955  ;;  %v2123_v46 = vmul.f32 %v4386_v3, %v5638_v18  ;;  %vm2129_vm7 = vweird.f32 %v4386_v3 }
 0x2ad   : > { %v2010_v24 = vmul.f32 %v5655_v57, %v5655_v57  ;;  %v1994_v5 = vmul.f32 %v1956_v6, %v5079_v26  ;;  %4387 = vrsqrt.f32 %v5666_v50  ;;  %vm2368_vm9 = vcmp.ge.f32.partialorder %v2336_v41, 0.0  ;;  %vm2130_vm10 = vmor %vm2128_vm8, %vm2129_vm7 }
 0x2ae   : > { %v2121_v1 = vsel %vm2120_vm6, %v4384_v51, %v2117_v7  ;;  %v2124_v55 = vmul.f32 %v4386_v3, %v2123_v46  ;;  %v2337_v51 = vadd.f32 %v5657_v63, %v2300_v10  ;;  %v2400_v10 = vmul.f32 0.01, %v2336_v41 }
 0x2af   : > { %v2264_v20 = vmul.f32 %v2121_v1, %v2056_v8  ;;  %v2265_v35 = vmul.f32 %v2121_v1, %v2057_v54  ;;  %v2026_v45 = vsub.f32 %v1994_v5, %v2010_v24  ;;  %v2058_v8 = vsub.f32 %v5441_v36, %v5627_v48 }
 0x2b0   : > { %v2125_v34 = vmul.f32 0.5, %v2124_v55  ;;  %vm2369_vm11 = vcmp.ge.f32.partialorder %v2337_v51, 0.0  ;;  %v2401_v24 = vmul.f32 0.01, %v2337_v51  ;;  %vm2138_vm15 = vweird.f32 %v5666_v50 }
 0x2b1   : > { %v2301_v44 = vmul.f32 %v5648_v33, %v2264_v20  ;;  %v2302_v60 = vmul.f32 %v5650_v0, %v2265_v35  ;;  %v2042_v61 = vmax.f32 %v2026_v45, 0.0  ;;  %v2432_v45 = vsel %vm2368_vm9, %v2336_v41, %v2400_v10 }
 0x2b2   : > { %v1863_v31 = vpop.xlane.xlu2 %1862  ;;  %v2126_v25 = vsub.f32 1.5, %v2125_v34  ;;  %v2059_v34 = vsub.f32 %v5444_v43, %v5627_v48  ;;  %v2433_v32 = vsel %vm2369_vm11, %v2337_v51, %v2401_v24  ;;  %v2060_v51 = vsub.f32 %v5453_v52, %v5634_v58 }
 0x2b3   : > { %v2338_v56 = vadd.f32 %v5652_v13, %v2301_v44  ;;  %v5679_v27 = vmul.f32 %v1863_v31, %v5079_v26  ;;  %v2339_v38 = vadd.f32 %v5657_v63, %v2302_v60  ;;  %v5685_v7 = vadd.f32 1e-05, %v2042_v61  ;;  %v4388_v9 = vpop.eup %4387 }
 0x2b4   : > { %v1959_v6 = vpop.xlane.xlu1 %1958  ;;  %v2127_v54 = vmul.f32 %v4386_v3, %v2126_v25  ;;  %v2133_v1 = vmul.f32 %v4388_v9, %v5666_v50  ;;  %vm2139_vm14 = vweird.f32 %v4388_v9 }
 0x2b5   : > { %v2011_v46 = vmul.f32 %v5679_v27, %v5679_v27  ;;  %4389 = vrsqrt.f32 %v5685_v7  ;;  %v1995_v18 = vmul.f32 %v1959_v6, %v5079_v26  ;;  %vm2370_vm12 = vcmp.ge.f32.partialorder %v2338_v56, 0.0  ;;  %vm2140_vm0 = vmor %vm2138_vm15, %vm2139_vm14 }
 0x2b6   : > { %v2131_v36 = vsel %vm2130_vm10, %v4386_v3, %v2127_v54  ;;  %v2402_v5 = vmul.f32 0.01, %v2338_v56  ;;  %v2134_v35 = vmul.f32 %v4388_v9, %v2133_v1  ;;  %vm2371_vm13 = vcmp.ge.f32.partialorder %v2339_v38, 0.0 }
 0x2b7   : > { %v2266_v20 = vmul.f32 %v2131_v36, %v2058_v8  ;;  %v2027_v55 = vsub.f32 %v1995_v18, %v2011_v46  ;;  %v2403_v60 = vmul.f32 0.01, %v2339_v38  ;;  %v2267_v1 = vmul.f32 %v2131_v36, %v2059_v34 }
 0x2b8   : > { %v2434_v44 = vsel %vm2370_vm12, %v2338_v56, %v2402_v5  ;;  %v2135_v61 = vmul.f32 0.5, %v2134_v35  ;;  %vm2148_vm2 = vweird.f32 %v5685_v7 }
 0x2b9   : > { %v2464_v25 = vpack.c.bf16 %v2434_v44, %v2432_v45  ;;  %v2043_v3 = vmax.f32 %v2027_v55, 0.0  ;;  %v2435_v8 = vsel %vm2371_vm13, %v2339_v38, %v2403_v60  ;;  %v2303_v43 = vmul.f32 %v5648_v33, %v2266_v20 }
 0x2ba   : > { %v1866_v31 = vpop.xlane.xlu2 %1865  ;;  %v2136_v46 = vsub.f32 1.5, %v2135_v61  ;;  %v2465_v41 = vpack.c.bf16 %v2435_v8, %v2433_v32  ;;  %v2061_v32 = vsub.f32 %v5456_v29, %v5634_v58  ;;  %v2304_v50 = vmul.f32 %v5650_v0, %v2267_v1 }
 0x2bb   : > { %v5696_v6 = vmul.f32 %v1866_v31, %v5079_v26  ;;  %v4390_v54 = vpop.eup %4389  ;;  %2691 = vmatmul.bf16.vlgmr.msra.gmra.mxu0 %v2464_v25  ;;  %2789 = vmatmul.bf16.vlgmr.msra.gmra.mxu2 %v2464_v25  ;;  %v5700_v10 = vadd.f32 1e-05, %v2043_v3  ;;  %v2340_v52 = vadd.f32 %v5652_v13, %v2303_v43 }
 0x2bc   : > { %v1962_v56 = vpop.xlane.xlu1 %1961  ;;  %v2143_v48 = vmul.f32 %v4390_v54, %v5685_v7  ;;  %v2137_v24 = vmul.f32 %v4388_v9, %v2136_v46  ;;  %2740 = vmatmul.bf16.vlgmr.msra.gmra.mxu1 %v2465_v41  ;;  %2838 = vmatmul.bf16.vlgmr.msra.gmra.mxu3 %v2465_v41  ;;  %vm2149_vm1 = vweird.f32 %v4390_v54  ;;  %v2341_v31 = vadd.f32 %v5657_v63, %v2304_v50 }
 0x2bd   : > { %v1996_v38 = vmul.f32 %v1962_v56, %v5079_v26  ;;  %4391 = vrsqrt.f32 %v5700_v10  ;;  %v2012_v18 = vmul.f32 %v5696_v6, %v5696_v6  ;;  %v2404_v1 = vmul.f32 0.01, %v2340_v52  ;;  %vm2150_vm3 = vmor %vm2148_vm2, %vm2149_vm1 }
 0x2be   : > { %v2144_v36 = vmul.f32 %v4390_v54, %v2143_v48  ;;  %v2141_v5 = vsel %vm2140_vm0, %v4388_v9, %v2137_v24  ;;  %v2062_v9 = vsub.f32 %v5465_v11, %v5655_v57  ;;  %vm2372_vm4 = vcmp.ge.f32.partialorder %v2340_v52, 0.0 }
 0x2bf   : > { %v2268_v20 = vmul.f32 %v2141_v5, %v2060_v51  ;;  %v2269_v35 = vmul.f32 %v2141_v5, %v2061_v32  ;;  %v2028_v45 = vsub.f32 %v1996_v38, %v2012_v18  ;;  %v2063_v7 = vsub.f32 %v5468_v62, %v5655_v57 }
 0x2c0   : > { %v2145_v55 = vmul.f32 0.5, %v2144_v36  ;;  %vm2373_vm5 = vcmp.ge.f32.partialorder %v2341_v31, 0.0  ;;  %v2405_v38 = vmul.f32 0.01, %v2341_v31  ;;  %v2436_v36 = vsel %vm2372_vm4, %v2340_v52, %v2404_v1 }
 0x2c1   : > { %v2044_v58 = vmax.f32 %v2028_v45, 0.0  ;;  %v2305_v34 = vmul.f32 %v5648_v33, %v2268_v20  ;;  %v2306_v46 = vmul.f32 %v5650_v0, %v2269_v35  ;;  %vm2158_vm9 = vweird.f32 %v5700_v10 }
 0x2c2   : > { %v1869_v44 = vpop.xlane.xlu0 %1868  ;;  %v2146_v29 = vsub.f32 1.5, %v2145_v55 }
 0x2c3   : > { %v5715_v60 = vmul.f32 %v1869_v44, %v5079_v26  ;;  %v4392_v25 = vpop.eup %4391  ;;  %v5722_v8 = vadd.f32 1e-05, %v2044_v58  ;;  %v2342_v48 = vadd.f32 %v5652_v13, %v2305_v34  ;;  %v2343_v18 = vadd.f32 %v5657_v63, %v2306_v46 }
 0x2c4   : > { %v1965_v61 = vpop.xlane.xlu2 %1964  ;;  %v2147_v3 = vmul.f32 %v4390_v54, %v2146_v29  ;;  %v2153_v41 = vmul.f32 %v4392_v25, %v5700_v10  ;;  %vm2159_vm7 = vweird.f32 %v4392_v25  ;;  %v2437_v34 = vsel %vm2373_vm5, %v2341_v31, %v2405_v38 }
 0x2c5   : > { %v1997_v56 = vmul.f32 %v1965_v61, %v5079_v26  ;;  %v2013_v11 = vmul.f32 %v5715_v60, %v5715_v60  ;;  %4393 = vrsqrt.f32 %v5722_v8  ;;  %vm2374_vm6 = vcmp.ge.f32.partialorder %v2342_v48, 0.0  ;;  %vm2160_vm10 = vmor %vm2158_vm9, %vm2159_vm7 }
 0x2c6   : > { %v2151_v43 = vsel %vm2150_vm3, %v4390_v54, %v2147_v3  ;;  %v2154_v51 = vmul.f32 %v4392_v25, %v2153_v41  ;;  %v2406_v32 = vmul.f32 0.01, %v2342_v48  ;;  %vm2375_vm8 = vcmp.ge.f32.partialorder %v2343_v18, 0.0 }
 0x2c7   : > { %v2029_v24 = vsub.f32 %v1997_v56, %v2013_v11  ;;  %v2270_v5 = vmul.f32 %v2151_v43, %v2062_v9  ;;  %v2407_v57 = vmul.f32 0.01, %v2343_v18  ;;  %v2271_v55 = vmul.f32 %v2151_v43, %v2063_v7 }
 0x2c8   : > { %v2155_v50 = vmul.f32 0.5, %v2154_v51  ;;  %v2438_v62 = vsel %vm2374_vm6, %v2342_v48, %v2406_v32  ;;  %v2064_v41 = vsub.f32 %v5477_v28, %v5679_v27  ;;  %v2065_v10 = vsub.f32 %v5480_v4, %v5679_v27 }
 0x2c9   : > { %v2045_v20 = vmax.f32 %v2029_v24, 0.0  ;;  %v2466_v29 = vpack.c.bf16 %v2438_v62, %v2436_v36  ;;  %v2439_v9 = vsel %vm2375_vm8, %v2343_v18, %v2407_v57  ;;  %v2307_v46 = vmul.f32 %v5648_v33, %v2270_v5 }
 0x2ca   : > { %v1872_v35 = vpop.xlane.xlu0 %1871  ;;  %v2156_v45 = vsub.f32 1.5, %v2155_v50  ;;  %v2467_v31 = vpack.c.bf16 %v2439_v9, %v2437_v34  ;;  %v2308_v43 = vmul.f32 %v5650_v0, %v2271_v55  ;;  %v2066_v28 = vsub.f32 %v5489_v40, %v5696_v6 }
 0x2cb   : > { %v5736_v54 = vmul.f32 %v1872_v35, %v5079_v26  ;;  %v5738_v44 = vadd.f32 1e-05, %v2045_v20  ;;  %v4394_v52 = vpop.eup %4393  ;;  %2696 = vmatmul.bf16.gmra.mxu0 %v2466_v29  ;;  %2794 = vmatmul.bf16.gmra.mxu2 %v2466_v29  ;;  %v2067_v4 = vsub.f32 %v5492_v21, %v5696_v6  ;;  %v2344_v32 = vadd.f32 %v5652_v13, %v2307_v46 }
 0x2cc   : > { %v1968_v58 = vpop.xlane.xlu2 %1967  ;;  %v2157_v3 = vmul.f32 %v4392_v25, %v2156_v45  ;;  %v2163_v1 = vmul.f32 %v4394_v52, %v5722_v8  ;;  %2745 = vmatmul.bf16.gmra.mxu1 %v2467_v31  ;;  %2843 = vmatmul.bf16.gmra.mxu3 %v2467_v31  ;;  %vm2169_vm11 = vweird.f32 %v4394_v52  ;;  %v2345_v21 = vadd.f32 %v5657_v63, %v2308_v43 }
 0x2cd   : > { %v1998_v61 = vmul.f32 %v1968_v58, %v5079_v26  ;;  %4395 = vrsqrt.f32 %v5738_v44  ;;  %v2014_v56 = vmul.f32 %v5736_v54, %v5736_v54  ;;  %vm2168_vm12 = vweird.f32 %v5722_v8 }
 0x2ce   : > { %v2161_v11 = vsel %vm2160_vm10, %v4392_v25, %v2157_v3  ;;  %v2164_v7 = vmul.f32 %v4394_v52, %v2163_v1  ;;  %v2068_v25 = vsub.f32 %v5501_v17, %v5715_v60  ;;  %v2069_v6 = vsub.f32 %v5504_v49, %v5715_v60  ;;  %vm2170_vm14 = vmor %vm2168_vm12, %vm2169_vm11 }
 0x2cf   : > { %v2272_v48 = vmul.f32 %v2161_v11, %v2064_v41  ;;  %v2273_v51 = vmul.f32 %v2161_v11, %v2065_v10  ;;  %v2030_v24 = vsub.f32 %v1998_v61, %v2014_v56  ;;  %vm2376_vm13 = vcmp.ge.f32.partialorder %v2344_v32, 0.0 }
 0x2d0   : > { %v2165_v27 = vmul.f32 0.5, %v2164_v7  ;;  %v2408_v58 = vmul.f32 0.01, %v2344_v32  ;;  %v2409_v9 = vmul.f32 0.01, %v2345_v21  ;;  %vm2377_vm2 = vcmp.ge.f32.partialorder %v2345_v21, 0.0 }
 0x2d1   : > { %v2046_v36 = vmax.f32 %v2030_v24, 0.0  ;;  %v2309_v5 = vmul.f32 %v5648_v33, %v2272_v48  ;;  %v2310_v35 = vmul.f32 %v5650_v0, %v2273_v51  ;;  %vm2178_vm3 = vweird.f32 %v5738_v44 }
 0x2d2   : > { %v1875_v38 = vpop.xlane.xlu1 %1874  ;;  %v2166_v20 = vsub.f32 1.5, %v2165_v27  ;;  %v2440_v7 = vsel %vm2376_vm13, %v2344_v32, %v2408_v58 }
 0x2d3   : > { %v5762_v18 = vmul.f32 %v1875_v38, %v5079_v26  ;;  %v4396_v50 = vpop.eup %4395  ;;  %v5771_v62 = vadd.f32 1e-05, %v2046_v36  ;;  %v2346_v8 = vadd.f32 %v5652_v13, %v2309_v5  ;;  %v2347_v60 = vadd.f32 %v5657_v63, %v2310_v35 }
 0x2d4   : > { %v1971_v40 = vpop.xlane.xlu0 %1970  ;;  %v2173_v17 = vmul.f32 %v4396_v50, %v5738_v44  ;;  %v2167_v57 = vmul.f32 %v4394_v52, %v2166_v20  ;;  %vm2179_vm1 = vweird.f32 %v4396_v50  ;;  %v2441_v36 = vsel %vm2377_vm2, %v2345_v21, %v2409_v9 }
 0x2d5   : > { %v2015_v55 = vmul.f32 %v5762_v18, %v5762_v18  ;;  %v1999_v45 = vmul.f32 %v1971_v40, %v5079_v26  ;;  %4397 = vrsqrt.f32 %v5771_v62  ;;  %vm2378_vm15 = vcmp.ge.f32.partialorder %v2346_v8, 0.0  ;;  %vm2180_vm4 = vmor %vm2178_vm3, %vm2179_vm1 }
 0x2d6   : > { %v2174_v29 = vmul.f32 %v4396_v50, %v2173_v17  ;;  %v2171_v34 = vsel %vm2170_vm14, %v4394_v52, %v2167_v57  ;;  %v2410_v10 = vmul.f32 0.01, %v2346_v8  ;;  %vm2379_vm0 = vcmp.ge.f32.partialorder %v2347_v60, 0.0 }
 0x2d7   : > { %v2031_v49 = vsub.f32 %v1999_v45, %v2015_v55  ;;  %v2274_v61 = vmul.f32 %v2171_v34, %v2066_v28  ;;  %v2275_v3 = vmul.f32 %v2171_v34, %v2067_v4  ;;  %v2411_v31 = vmul.f32 0.01, %v2347_v60 }
 0x2d8   : > { %v2175_v1 = vmul.f32 0.5, %v2174_v29  ;;  %v2442_v43 = vsel %vm2378_vm15, %v2346_v8, %v2410_v10  ;;  %v2070_v55 = vsub.f32 %v5513_v22, %v5736_v54  ;;  %vm2188_vm5 = vweird.f32 %v5771_v62 }
 0x2d9   : > { %v2047_v46 = vmax.f32 %v2031_v49, 0.0  ;;  %v2443_v48 = vsel %vm2379_vm0, %v2347_v60, %v2411_v31  ;;  %v2468_v28 = vpack.c.bf16 %v2442_v43, %v2440_v7  ;;  %v2311_v27 = vmul.f32 %v5648_v33, %v2274_v61 }
 0x2da   : > { %v1878_v41 = vpop.xlane.xlu1 %1877  ;;  %v2176_v56 = vsub.f32 1.5, %v2175_v1  ;;  %v2312_v5 = vmul.f32 %v5650_v0, %v2275_v3  ;;  %v2469_v32 = vpack.c.bf16 %v2443_v48, %v2441_v36 }
 0x2db   : > { %v5780_v11 = vmul.f32 %v1878_v41, %v5079_v26  ;;  %v5782_v52 = vadd.f32 1e-05, %v2047_v46  ;;  %v4398_v51 = vpop.eup %4397  ;;  %2701 = vmatmul.bf16.gmra.mxu0 %v2468_v28  ;;  %2799 = vmatmul.bf16.gmra.mxu2 %v2468_v28  ;;  %v2348_v21 = vadd.f32 %v5652_v13, %v2311_v27 }
 0x2dc   : > { %v2177_v24 = vmul.f32 %v4396_v50, %v2176_v56  ;;  %v1974_v4 = vpop.xlane.xlu0 %1973  ;;  %v2183_v38 = vmul.f32 %v4398_v51, %v5771_v62  ;;  %2750 = vmatmul.bf16.gmra.mxu1 %v2469_v32  ;;  %2848 = vmatmul.bf16.gmra.mxu3 %v2469_v32  ;;  %v2349_v22 = vadd.f32 %v5657_v63, %v2312_v5  ;;  %vm2189_vm6 = vweird.f32 %v4398_v51 }
 0x2dd   : > { %4399 = vrsqrt.f32 %v5782_v52  ;;  %v2016_v40 = vmul.f32 %v5780_v11, %v5780_v11  ;;  %v2000_v57 = vmul.f32 %v1974_v4, %v5079_v26  ;;  %vm2380_vm7 = vcmp.ge.f32.partialorder %v2348_v21, 0.0  ;;  %vm2190_vm8 = vmor %vm2188_vm5, %vm2189_vm6 }
 0x2de   : > { %v2181_v20 = vsel %vm2180_vm4, %v4396_v50, %v2177_v24  ;;  %v2184_v17 = vmul.f32 %v4398_v51, %v2183_v38  ;;  %v2412_v1 = vmul.f32 0.01, %v2348_v21  ;;  %vm2381_vm10 = vcmp.ge.f32.partialorder %v2349_v22, 0.0 }
 0x2df   : > { %v2276_v44 = vmul.f32 %v2181_v20, %v2068_v25  ;;  %v2277_v35 = vmul.f32 %v2181_v20, %v2069_v6  ;;  %v2032_v50 = vsub.f32 %v2000_v57, %v2016_v40  ;;  %v2071_v25 = vsub.f32 %v5516_v15, %v5736_v54 }
 0x2e0   : > { %v2185_v45 = vmul.f32 0.5, %v2184_v17  ;;  %v2444_v28 = vsel %vm2380_vm7, %v2348_v21, %v2412_v1  ;;  %v2413_v62 = vmul.f32 0.01, %v2349_v22  ;;  %v2072_v40 = vsub.f32 %v5525_v16, %v5762_v18 }
 0x2e1   : > { %v2313_v8 = vmul.f32 %v5648_v33, %v2276_v44  ;;  %v2314_v58 = vmul.f32 %v5650_v0, %v2277_v35  ;;  %v2048_v60 = vmax.f32 %v2032_v50, 0.0  ;;  %v2073_v44 = vsub.f32 %v5528_v12, %v5762_v18 }
 0x2e2   : > { %v1881_v29 = vpop.xlane.xlu2 %1880  ;;  %v2186_v49 = vsub.f32 1.5, %v2185_v45  ;;  %vm2198_vm13 = vweird.f32 %v5782_v52  ;;  %v2445_v21 = vsel %vm2381_vm10, %v2349_v22, %v2413_v62 }
 0x2e3   : > { %v5802_v6 = vmul.f32 %v1881_v29, %v5079_v26  ;;  %v4400_v34 = vpop.eup %4399  ;;  %v2350_v61 = vadd.f32 %v5652_v13, %v2313_v8  ;;  %v2351_v15 = vadd.f32 %v5657_v63, %v2314_v58  ;;  %v5808_v46 = vadd.f32 1e-05, %v2048_v60 }
 0x2e4   : > { %v1977_v9 = vpop.xlane.xlu1 %1976  ;;  %v2193_v3 = vmul.f32 %v4400_v34, %v5782_v52  ;;  %v2187_v54 = vmul.f32 %v4398_v51, %v2186_v49  ;;  %vm2199_vm11 = vweird.f32 %v4400_v34  ;;  %v2074_v49 = vsub.f32 %v5537_v53, %v5780_v11 }
 0x2e5   : > { %v2017_v41 = vmul.f32 %v5802_v6, %v5802_v6  ;;  %v2001_v10 = vmul.f32 %v1977_v9, %v5079_v26  ;;  %vm2382_vm9 = vcmp.ge.f32.partialorder %v2350_v61, 0.0  ;;  %v2414_v56 = vmul.f32 0.01, %v2350_v61  ;;  %vm2200_vm14 = vmor %vm2198_vm13, %vm2199_vm11 }
 0x2e6   : > { %v2194_v31 = vmul.f32 %v4400_v34, %v2193_v3  ;;  %v2191_v7 = vsel %vm2190_vm8, %v4398_v51, %v2187_v54  ;;  %4401 = vrsqrt.f32 %v5808_v46  ;;  %vm2383_vm12 = vcmp.ge.f32.partialorder %v2351_v15, 0.0 }
 0x2e7   : > { %v2033_v43 = vsub.f32 %v2001_v10, %v2017_v41  ;;  %v2278_v48 = vmul.f32 %v2191_v7, %v2070_v55  ;;  %v2446_v4 = vsel %vm2382_vm9, %v2350_v61, %v2414_v56  ;;  %v2279_v27 = vmul.f32 %v2191_v7, %v2071_v25 }
 0x2e8   : > { %v2195_v24 = vmul.f32 0.5, %v2194_v31  ;;  %v2470_v32 = vpack.c.bf16 %v2446_v4, %v2444_v28  ;;  %v2415_v51 = vmul.f32 0.01, %v2351_v15  ;;  %v2075_v53 = vsub.f32 %v5540_v2, %v5780_v11 }
 0x2e9   : > { %v2049_v38 = vmax.f32 %v2033_v43, 0.0  ;;  %v2315_v57 = vmul.f32 %v5648_v33, %v2278_v48  ;;  %v2316_v12 = vmul.f32 %v5650_v0, %v2279_v27  ;;  %vm2208_vm0 = vweird.f32 %v5808_v46 }
 0x2ea   : > { %v1884_v36 = vpop.xlane.xlu2 %1883  ;;  %v2196_v5 = vsub.f32 1.5, %v2195_v24  ;;  %v2447_v45 = vsel %vm2383_vm12, %v2351_v15, %v2415_v51 }
 0x2eb   : > { %v5818_v20 = vmul.f32 %v1884_v36, %v5079_v26  ;;  %v5824_v35 = vadd.f32 1e-05, %v2049_v38  ;;  %v2471_v16 = vpack.c.bf16 %v2447_v45, %v2445_v21  ;;  %2706 = vmatmul.bf16.gmra.mxu0 %v2470_v32  ;;  %2804 = vmatmul.bf16.gmra.mxu2 %v2470_v32  ;;  %v2352_v22 = vadd.f32 %v5652_v13, %v2315_v57 }
 0x2ec   : > { %v1980_v17 = vpop.xlane.xlu1 %1979  ;;  %v2197_v55 = vmul.f32 %v4400_v34, %v2196_v5  ;;  %v4402_v50 = vpop.eup %4401  ;;  %v2353_v15 = vadd.f32 %v5657_v63, %v2316_v12 }
 0x2ed   : > { %4403 = vrsqrt.f32 %v5824_v35  ;;  %v2002_v29 = vmul.f32 %v1980_v17, %v5079_v26  ;;  %v2203_v8 = vmul.f32 %v4402_v50, %v5808_v46  ;;  %v2018_v52 = vmul.f32 %v5818_v20, %v5818_v20  ;;  %2755 = vmatmul.bf16.gmra.mxu1 %v2471_v16  ;;  %2853 = vmatmul.bf16.gmra.mxu3 %v2471_v16 }
 0x2ee   : > { %v2201_v18 = vsel %vm2200_vm14, %v4400_v34, %v2197_v55  ;;  %v2416_v3 = vmul.f32 0.01, %v2352_v22  ;;  %vm2384_vm15 = vcmp.ge.f32.partialorder %v2352_v22, 0.0  ;;  %vm2209_vm1 = vweird.f32 %v4402_v50 }
 0x2ef   : > { %v2280_v58 = vmul.f32 %v2201_v18, %v2072_v40  ;;  %v2281_v25 = vmul.f32 %v2201_v18, %v2073_v44  ;;  %v2204_v60 = vmul.f32 %v4402_v50, %v2203_v8  ;;  %v2034_v9 = vsub.f32 %v2002_v29, %v2018_v52  ;;  %vm2210_vm3 = vmor %vm2208_vm0, %vm2209_vm1 }
 0x2f0   : > { %v2448_v38 = vsel %vm2384_vm15, %v2352_v22, %v2416_v3  ;;  %vm2385_vm2 = vcmp.ge.f32.partialorder %v2353_v15, 0.0  ;;  %v2417_v36 = vmul.f32 0.01, %v2353_v15  ;;  %vm2218_vm7 = vweird.f32 %v5824_v35 }
 0x2f1   : > { %v2317_v34 = vmul.f32 %v5648_v33, %v2280_v58  ;;  %v2318_v1 = vmul.f32 %v5650_v0, %v2281_v25  ;;  %v2205_v54 = vmul.f32 0.5, %v2204_v60  ;;  %v2050_v41 = vmax.f32 %v2034_v9, 0.0 }
 0x2f2   : > { %v1887_v61 = vpop.xlane.xlu0 %1886  ;;  %v2077_v60 = vsub.f32 %v5552_v19, %v5802_v6 }
 0x2f3   : > { %v5843_v10 = vmul.f32 %v1887_v61, %v5079_v26  ;;  %v4404_v31 = vpop.eup %4403  ;;  %v2354_v7 = vadd.f32 %v5652_v13, %v2317_v34  ;;  %v2355_v43 = vadd.f32 %v5657_v63, %v2318_v1  ;;  %v2206_v48 = vsub.f32 1.5, %v2205_v54 }
 0x2f4   : > { %v1983_v56 = vpop.xlane.xlu2 %1982  ;;  %v2213_v24 = vmul.f32 %v4404_v31, %v5824_v35  ;;  %v5851_v28 = vadd.f32 1e-05, %v2050_v41  ;;  %vm2219_vm6 = vweird.f32 %v4404_v31 }
 0x2f5   : > { %v2003_v4 = vmul.f32 %v1983_v56, %v5079_v26  ;;  %v2019_v27 = vmul.f32 %v5843_v10, %v5843_v10  ;;  %v2207_v2 = vmul.f32 %v4402_v50, %v2206_v48  ;;  %vm2386_vm4 = vcmp.ge.f32.partialorder %v2354_v7, 0.0  ;;  %vm2220_vm8 = vmor %vm2218_vm7, %vm2219_vm6 }
 0x2f6   : > { %v2214_v11 = vmul.f32 %v4404_v31, %v2213_v24  ;;  %4405 = vrsqrt.f32 %v5851_v28  ;;  %v2418_v5 = vmul.f32 0.01, %v2354_v7  ;;  %vm2387_vm5 = vcmp.ge.f32.partialorder %v2355_v43, 0.0 }
 0x2f7   : > { %v2035_v62 = vsub.f32 %v2003_v4, %v2019_v27  ;;  %v2211_v32 = vsel %vm2210_vm3, %v4402_v50, %v2207_v2  ;;  %v2419_v40 = vmul.f32 0.01, %v2355_v43  ;;  %v2449_v50 = vsel %vm2385_vm2, %v2353_v15, %v2417_v36 }
 0x2f8   : > { %v2215_v51 = vmul.f32 0.5, %v2214_v11  ;;  %v2282_v44 = vmul.f32 %v2211_v32, %v2074_v49  ;;  %v2283_v17 = vmul.f32 %v2211_v32, %v2075_v53  ;;  %v2450_v55 = vsel %vm2386_vm4, %v2354_v7, %v2418_v5 }
 0x2f9   : > { %v2051_v57 = vmax.f32 %v2035_v62, 0.0  ;;  %v2472_v16 = vpack.c.bf16 %v2450_v55, %v2448_v38  ;;  %v2451_v29 = vsel %vm2387_vm5, %v2355_v43, %v2419_v40  ;;  %v2076_v49 = vsub.f32 %v5549_v47, %v5802_v6 }
 0x2fa   : > { %v1890_v21 = vpop.xlane.xlu0 %1889  ;;  %v2216_v45 = vsub.f32 1.5, %v2215_v51  ;;  %v2473_v58 = vpack.c.bf16 %v2451_v29, %v2449_v50  ;;  %v2319_v22 = vmul.f32 %v5648_v33, %v2282_v44  ;;  %v2320_v34 = vmul.f32 %v5650_v0, %v2283_v17 }
 0x2fb   : > { %v5860_v12 = vmul.f32 %v1890_v21, %v5079_v26  ;;  %v5863_v46 = vadd.f32 1e-05, %v2051_v57  ;;  %2711 = vmatmul.bf16.gmra.mxu0 %v2472_v16  ;;  %2809 = vmatmul.bf16.gmra.mxu2 %v2472_v16  ;;  %v2078_v53 = vsub.f32 %v5561_v39, %v5818_v20  ;;  %vm2228_vm10 = vweird.f32 %v5851_v28 }
 0x2fc   : > { %v1986_v18 = vpop.xlane.xlu2 %1985  ;;  %v4406_v8 = vpop.eup %4405  ;;  %v2217_v52 = vmul.f32 %v4404_v31, %v2216_v45  ;;  %v2356_v6 = vadd.f32 %v5652_v13, %v2319_v22  ;;  %v2357_v43 = vadd.f32 %v5657_v63, %v2320_v34  ;;  %v2079_v17 = vsub.f32 %v5564_v14, %v5818_v20 }
 0x2fd   : > { %v2004_v25 = vmul.f32 %v1986_v18, %v5079_v26  ;;  %v2223_v35 = vmul.f32 %v4406_v8, %v5851_v28  ;;  %4407 = vrsqrt.f32 %v5863_v46  ;;  %v2020_v61 = vmul.f32 %v5860_v12, %v5860_v12  ;;  %2760 = vmatmul.bf16.gmra.mxu1 %v2473_v58  ;;  %2858 = vmatmul.bf16.gmra.mxu3 %v2473_v58 }
 0x2fe   : > { %v2221_v9 = vsel %vm2220_vm8, %v4404_v31, %v2217_v52  ;;  %vm2229_vm9 = vweird.f32 %v4406_v8  ;;  %vm2388_vm11 = vcmp.ge.f32.partialorder %v2356_v6, 0.0  ;;  %v2420_v5 = vmul.f32 0.01, %v2356_v6 }
 0x2ff   : > { %v2284_v3 = vmul.f32 %v2221_v9, %v2076_v49  ;;  %v2285_v1 = vmul.f32 %v2221_v9, %v2077_v60  ;;  %v2224_v47 = vmul.f32 %v4406_v8, %v2223_v35  ;;  %v2036_v19 = vsub.f32 %v2004_v25, %v2020_v61  ;;  %vm2230_vm12 = vmor %vm2228_vm10, %vm2229_vm9 }
 0x300   : > { %v2421_v51 = vmul.f32 0.01, %v2357_v43  ;;  %vm2389_vm15 = vcmp.ge.f32.partialorder %v2357_v43, 0.0  ;;  %v2452_v16 = vsel %vm2388_vm11, %v2356_v6, %v2420_v5  ;;  %v2080_v14 = vsub.f32 %v5573_v42, %v5843_v10 }
 0x301   : > { %v2225_v15 = vmul.f32 0.5, %v2224_v47  ;;  %v2321_v41 = vmul.f32 %v5648_v33, %v2284_v3  ;;  %v2322_v31 = vmul.f32 %v5650_v0, %v2285_v1  ;;  %v2052_v56 = vmax.f32 %v2036_v19, 0.0 }
 0x302   : > { %v1893_v54 = vpop.xlane.xlu1 %1892  ;;  %v2453_v25 = vsel %vm2389_vm15, %v2357_v43, %v2421_v51  ;;  %vm2238_vm1 = vweird.f32 %v5863_v46  ;;  %v2081_v60 = vsub.f32 %v5576_v37, %v5843_v10 }
 0x303   : > { %v5884_v7 = vmul.f32 %v1893_v54, %v5079_v26  ;;  %v4408_v48 = vpop.eup %4407  ;;  %v2226_v24 = vsub.f32 1.5, %v2225_v15  ;;  %v2358_v27 = vadd.f32 %v5652_v13, %v2321_v41  ;;  %v2359_v38 = vadd.f32 %v5657_v63, %v2322_v31 }
 0x304   : > { %v1989_v4 = vpop.xlane.xlu0 %1988  ;;  %v2233_v2 = vmul.f32 %v4408_v48, %v5863_v46  ;;  %v5891_v11 = vadd.f32 1e-05, %v2052_v56  ;;  %vm2239_vm0 = vweird.f32 %v4408_v48  ;;  %v2082_v31 = vsub.f32 %v5585_v30, %v5860_v12 }
 0x305   : > { %v2227_v39 = vmul.f32 %v4406_v8, %v2226_v24  ;;  %v2021_v36 = vmul.f32 %v5884_v7, %v5884_v7  ;;  %v2005_v62 = vmul.f32 %v1989_v4, %v5079_v26  ;;  %vm2390_vm13 = vcmp.ge.f32.partialorder %v2358_v27, 0.0  ;;  %vm2240_vm2 = vmor %vm2238_vm1, %vm2239_vm0 }
 0x306   : > { %v2234_v32 = vmul.f32 %v4408_v48, %v2233_v2  ;;  %4409 = vrsqrt.f32 %v5891_v11  ;;  %v2422_v44 = vmul.f32 0.01, %v2358_v27  ;;  %vm2391_vm14 = vcmp.ge.f32.partialorder %v2359_v38, 0.0 }
 0x307   : > { %v2231_v40 = vsel %vm2230_vm12, %v4406_v8, %v2227_v39  ;;  %v2037_v28 = vsub.f32 %v2005_v62, %v2021_v36  ;;  %v2423_v55 = vmul.f32 0.01, %v2359_v38  ;;  %vm2248_vm4 = vweird.f32 %v5891_v11 }
 0x308   : > { %v2235_v57 = vmul.f32 0.5, %v2234_v32  ;;  %v2286_v21 = vmul.f32 %v2231_v40, %v2078_v53  ;;  %v2454_v29 = vsel %vm2390_vm13, %v2358_v27, %v2422_v44  ;;  %v2287_v58 = vmul.f32 %v2231_v40, %v2079_v17 }
 0x309   : > { %v2053_v45 = vmax.f32 %v2037_v28, 0.0  ;;  %v2474_v18 = vpack.c.bf16 %v2454_v29, %v2452_v16  ;;  %v2455_v52 = vsel %vm2391_vm14, %v2359_v38, %v2423_v55  ;;  %v2083_v30 = vsub.f32 %v5588_v59, %v5860_v12  ;;  %v6716_v55 = vld [vmem:[#allocation16_spill] sm:$0xff] }
 0x30a   : > { %v2236_v50 = vsub.f32 1.5, %v2235_v57  ;;  %v2475_v49 = vpack.c.bf16 %v2455_v52, %v2453_v25  ;;  %v2323_v9 = vmul.f32 %v5648_v33, %v2286_v21  ;;  %v2324_v1 = vmul.f32 %v5650_v0, %v2287_v58 }
 0x30b   : > { %v5900_v8 = vadd.f32 1e-05, %v2053_v45  ;;  %2716 = vmatmul.bf16.gmra.mxu0 %v2474_v18  ;;  %2814 = vmatmul.bf16.gmra.mxu2 %v2474_v18  ;;  %v2084_v57 = vsub.f32 %v5597_v23, %v5884_v7  ;;  %v2085_v21 = vsub.f32 %v6716_v55, %v5884_v7 }
 0x30c   : > { %v4410_v22 = vpop.eup %4409  ;;  %v2237_v20 = vmul.f32 %v4408_v48, %v2236_v50  ;;  %v2360_v10 = vadd.f32 %v5652_v13, %v2323_v9  ;;  %v2361_v54 = vadd.f32 %v5657_v63, %v2324_v1 }
 0x30d   : > { %v2243_v35 = vmul.f32 %v4410_v22, %v5891_v11  ;;  %4411 = vrsqrt.f32 %v5900_v8  ;;  %2765 = vmatmul.bf16.gmra.mxu1 %v2475_v49  ;;  %2863 = vmatmul.bf16.gmra.mxu3 %v2475_v49  ;;  %vm2249_vm3 = vweird.f32 %v4410_v22  ;;  %vm2258_vm11 = vweird.f32 %v5900_v8 }
 0x30e   : > { %v2241_v61 = vsel %vm2240_vm2, %v4408_v48, %v2237_v20  ;;  %v2424_v43 = vmul.f32 0.01, %v2360_v10  ;;  %vm2250_vm6 = vmor %vm2248_vm4, %vm2249_vm3  ;;  %vm2392_vm7 = vcmp.ge.f32.partialorder %v2360_v10, 0.0  ;;  %v2425_v2 = vmul.f32 0.01, %v2361_v54 }
 0x30f   : > { %v2288_v34 = vmul.f32 %v2241_v61, %v2080_v14  ;;  %v2289_v3 = vmul.f32 %v2241_v61, %v2081_v60  ;;  %v2244_v42 = vmul.f32 %v4410_v22, %v2243_v35  ;;  %vm2393_vm9 = vcmp.ge.f32.partialorder %v2361_v54, 0.0 }
 0x310   : > { %v2456_v11 = vsel %vm2392_vm7, %v2360_v10, %v2424_v43  ;;  %v2457_v40 = vsel %vm2393_vm9, %v2361_v54, %v2425_v2 }
 0x311   : > { %v2245_v46 = vmul.f32 0.5, %v2244_v42  ;;  %v2325_v37 = vmul.f32 %v5648_v33, %v2288_v34  ;;  %v2326_v47 = vmul.f32 %v5650_v0, %v2289_v3 }
 0x313   : > { %v4412_v19 = vpop.eup %4411  ;;  %v2246_v6 = vsub.f32 1.5, %v2245_v46  ;;  %v2362_v15 = vadd.f32 %v5652_v13, %v2325_v37  ;;  %v2363_v41 = vadd.f32 %v5657_v63, %v2326_v47 }
 0x314   : > { %v2253_v53 = vmul.f32 %v4412_v19, %v5900_v8  ;;  %vm2259_vm10 = vweird.f32 %v4412_v19 }
 0x315   : > { %v2247_v56 = vmul.f32 %v4410_v22, %v2246_v6  ;;  %vm2394_vm5 = vcmp.ge.f32.partialorder %v2362_v15, 0.0  ;;  %v2426_v48 = vmul.f32 0.01, %v2362_v15  ;;  %vm2395_vm8 = vcmp.ge.f32.partialorder %v2363_v41, 0.0  ;;  %vm2260_vm12 = vmor %vm2258_vm11, %vm2259_vm10 }
 0x316   : > { %v2254_v24 = vmul.f32 %v4412_v19, %v2253_v53  ;;  %v2427_v4 = vmul.f32 0.01, %v2363_v41 }
 0x317   : > { %v2251_v27 = vsel %vm2250_vm6, %v4410_v22, %v2247_v56  ;;  %v2458_v38 = vsel %vm2394_vm5, %v2362_v15, %v2426_v48 }
 0x318   : > { %v2290_v39 = vmul.f32 %v2251_v27, %v2082_v31  ;;  %v2255_v36 = vmul.f32 0.5, %v2254_v24  ;;  %v2459_v62 = vsel %vm2395_vm8, %v2363_v41, %v2427_v4  ;;  %v2476_v32 = vpack.c.bf16 %v2458_v38, %v2456_v11 }
 0x319   : > { %v2291_v51 = vmul.f32 %v2251_v27, %v2083_v30  ;;  %v2477_v44 = vpack.c.bf16 %v2459_v62, %v2457_v40 }
 0x31a   : > { %v2256_v5 = vsub.f32 1.5, %v2255_v36  ;;  %v2327_v17 = vmul.f32 %v5648_v33, %v2290_v39 }
 0x31b   : > { %2721 = vmatmul.bf16.gmra.mxu0 %v2476_v32  ;;  %2819 = vmatmul.bf16.gmra.mxu2 %v2476_v32  ;;  %v2328_v16 = vmul.f32 %v5650_v0, %v2291_v51 }
 0x31c   : > { %v2257_v28 = vmul.f32 %v4412_v19, %v2256_v5  ;;  %v2364_v29 = vadd.f32 %v5652_v13, %v2327_v17 }
 0x31d   : > { %2770 = vmatmul.bf16.gmra.mxu1 %v2477_v44  ;;  %2868 = vmatmul.bf16.gmra.mxu3 %v2477_v44  ;;  %v2365_v7 = vadd.f32 %v5657_v63, %v2328_v16 }
 0x31e   : > { %v2261_v59 = vsel %vm2260_vm12, %v4412_v19, %v2257_v28  ;;  %v2428_v58 = vmul.f32 0.01, %v2364_v29  ;;  %vm2396_vm14 = vcmp.ge.f32.partialorder %v2364_v29, 0.0 }
 0x31f   : > { %v2292_v12 = vmul.f32 %v2261_v59, %v2084_v57  ;;  %v2293_v45 = vmul.f32 %v2261_v59, %v2085_v21  ;;  %v2429_v14 = vmul.f32 0.01, %v2365_v7  ;;  %vm2397_vm0 = vcmp.ge.f32.partialorder %v2365_v7, 0.0 }
 0x320   : > { %v2460_v20 = vsel %vm2396_vm14, %v2364_v29, %v2428_v58 }
 0x321   : > { %v2329_v50 = vmul.f32 %v5648_v33, %v2292_v12  ;;  %v2330_v18 = vmul.f32 %v5650_v0, %v2293_v45  ;;  %v2461_v60 = vsel %vm2397_vm0, %v2365_v7, %v2429_v14 }
 0x323   : > { %v2366_v23 = vadd.f32 %v5652_v13, %v2329_v50  ;;  %v2367_v52 = vadd.f32 %v5657_v63, %v2330_v18  ;;  %v2481_v13 = vld [vmem:[#allocation10 + $0x6] ss:$8 sm:$0x3] }
 0x324   : > { %v5936_v63 = vperm.slane %v2481_v13, 0  ;;  %v5941_v3 = vperm.slane %v2481_v13, 1 }
 0x325   : > { %vm2398_vm13 = vcmp.ge.f32.partialorder %v2366_v23, 0.0  ;;  %v2430_v8 = vmul.f32 0.01, %v2366_v23  ;;  %v2431_v25 = vmul.f32 0.01, %v2367_v52  ;;  %vm2399_vm15 = vcmp.ge.f32.partialorder %v2367_v52, 0.0 }
 0x327   : > { %v2462_v22 = vsel %vm2398_vm13, %v2366_v23, %v2430_v8  ;;  %v2463_v49 = vsel %vm2399_vm15, %v2367_v52, %v2431_v25 }
 0x328   : > { %v2478_v33 = vpack.c.bf16 %v2462_v22, %v2460_v20  ;;  %v2479_v0 = vpack.c.bf16 %v2463_v49, %v2461_v60 }
 0x32b   : > { %2726 = vmatmul.bf16.gmra.mxu0 %v2478_v33  ;;  %2824 = vmatmul.bf16.gmra.mxu2 %v2478_v33 }
 0x32d   : > { %2775 = vmatmul.bf16.gmra.mxu1 %v2479_v0  ;;  %2873 = vmatmul.bf16.gmra.mxu3 %v2479_v0 }
 0x338   : > { %v2692_v35 = vpop.f32.mrf.mxu0 }
 0x339   : > { %v2693_v9 = vadd.f32 %v2692_v35, %v5936_v63  ;;  %v2741_v61 = vpop.f32.mrf.mxu1 }
 0x33b   : > { %v5939_v34 = vadd.f32 %v2741_v61, %v2693_v9 }
 0x33d   : > { %6717 = vst [vmem:[#allocation16_spill] sm:$0xff] %v5939_v34 }
 0x33e   : > { %v2790_v42 = vpop.f32.mrf.mxu2 }
 0x33f   : > { %v2791_v1 = vadd.f32 %v2790_v42, %v5941_v3  ;;  %v2839_v46 = vpop.f32.mrf.mxu3 }
 0x340   : > { %v2694_v37 = vpop.f32.mrf.mxu0 }
 0x341   : > { %v5944_v10 = vadd.f32 %v2839_v46, %v2791_v1  ;;  %v2695_v47 = vadd.f32 %v2694_v37, %v5936_v63  ;;  %v2743_v19 = vpop.f32.mrf.mxu1 }
 0x343   : > { %6718 = vst [vmem:[#allocation17_spill] sm:$0xff] %v5944_v10  ;;  %v5947_v6 = vadd.f32 %v2743_v19, %v2695_v47 }
 0x346   : > { %v2792_v15 = vpop.f32.mrf.mxu2 }
 0x347   : > { %v2793_v54 = vadd.f32 %v2792_v15, %v5941_v3  ;;  %v2841_v41 = vpop.f32.mrf.mxu3 }
 0x348   : > { %v2697_v53 = vpop.f32.mrf.mxu0 }
 0x349   : > { %v5950_v31 = vadd.f32 %v2841_v41, %v2793_v54  ;;  %v2698_v56 = vadd.f32 %v2697_v53, %v5936_v63  ;;  %v2746_v43 = vpop.f32.mrf.mxu1 }
 0x34b   : > { %6719 = vst [vmem:[#allocation18_spill] sm:$0xff] %v5950_v31  ;;  %v5953_v48 = vadd.f32 %v2746_v43, %v2698_v56 }
 0x34e   : > { %v2795_v24 = vpop.f32.mrf.mxu2 }
 0x34f   : > { %v2796_v4 = vadd.f32 %v2795_v24, %v5941_v3  ;;  %v2844_v38 = vpop.f32.mrf.mxu3 }
 0x350   : > { %v2699_v27 = vpop.f32.mrf.mxu0 }
 0x351   : > { %v2700_v2 = vadd.f32 %v2699_v27, %v5936_v63  ;;  %v5957_v39 = vadd.f32 %v2844_v38, %v2796_v4  ;;  %v2748_v36 = vpop.f32.mrf.mxu1 }
 0x353   : > { %v5959_v30 = vadd.f32 %v2748_v36, %v2700_v2 }
 0x356   : > { %v2797_v11 = vpop.f32.mrf.mxu2 }
 0x357   : > { %v2798_v62 = vadd.f32 %v2797_v11, %v5941_v3  ;;  %v2846_v5 = vpop.f32.mrf.mxu3 }
 0x358   : > { %v2702_v32 = vpop.f32.mrf.mxu0 }
 0x359   : > { %v5962_v51 = vadd.f32 %v2846_v5, %v2798_v62  ;;  %v2703_v40 = vadd.f32 %v2702_v32, %v5936_v63  ;;  %v2751_v28 = vpop.f32.mrf.mxu1 }
 0x35b   : > { %v5965_v44 = vadd.f32 %v2751_v28, %v2703_v40 }
 0x35d   : > { %6720 = vst [vmem:[#allocation19_spill] sm:$0xff] %v5965_v44 }
 0x35e   : > { %v2800_v17 = vpop.f32.mrf.mxu2 }
 0x35f   : > { %v2801_v57 = vadd.f32 %v2800_v17, %v5941_v3  ;;  %v2849_v55 = vpop.f32.mrf.mxu3 }
 0x360   : > { %v2704_v21 = vpop.f32.mrf.mxu0 }
 0x361   : > { %v5968_v59 = vadd.f32 %v2849_v55, %v2801_v57  ;;  %v2705_v12 = vadd.f32 %v2704_v21, %v5936_v63  ;;  %v2753_v45 = vpop.f32.mrf.mxu1 }
 0x363   : > { %v5971_v16 = vadd.f32 %v2753_v45, %v2705_v12 }
 0x366   : > { %v2802_v29 = vpop.f32.mrf.mxu2 }
 0x367   : > { %v2803_v50 = vadd.f32 %v2802_v29, %v5941_v3  ;;  %v2851_v18 = vpop.f32.mrf.mxu3 }
 0x368   : > { %v2707_v23 = vpop.f32.mrf.mxu0 }
 0x369   : > { %v5974_v7 = vadd.f32 %v2851_v18, %v2803_v50  ;;  %v2708_v52 = vadd.f32 %v2707_v23, %v5936_v63 }
 0x36a   : > { %v2756_v58 = vpop.f32.mrf.mxu1 }
 0x36b   : > { %v5977_v8 = vadd.f32 %v2756_v58, %v2708_v52 }
 0x36e   : > { %v2805_v25 = vpop.f32.mrf.mxu2 }
 0x36f   : > { %v2806_v22 = vadd.f32 %v2805_v25, %v5941_v3 }
 0x370   : > { %v2854_v14 = vpop.f32.mrf.mxu3  ;;  %v2709_v20 = vpop.f32.mrf.mxu0 }
 0x371   : > { %v5980_v49 = vadd.f32 %v2854_v14, %v2806_v22  ;;  %v2710_v33 = vadd.f32 %v2709_v20, %v5936_v63 }
 0x372   : > { %v2758_v60 = vpop.f32.mrf.mxu1 }
 0x373   : > { %v5983_v0 = vadd.f32 %v2758_v60, %v2710_v33 }
 0x376   : > { %v2807_v13 = vpop.f32.mrf.mxu2 }
 0x377   : > { %v2808_v35 = vadd.f32 %v2807_v13, %v5941_v3 }
 0x378   : > { %v2856_v9 = vpop.f32.mrf.mxu3  ;;  %v2712_v61 = vpop.f32.mrf.mxu0 }
 0x379   : > { %v5986_v42 = vadd.f32 %v2856_v9, %v2808_v35  ;;  %v2713_v1 = vadd.f32 %v2712_v61, %v5936_v63 }
 0x37a   : > { %v2761_v46 = vpop.f32.mrf.mxu1 }
 0x37b   : > { %v5989_v37 = vadd.f32 %v2761_v46, %v2713_v1 }
 0x37e   : > { %v2810_v47 = vpop.f32.mrf.mxu2 }
 0x37f   : > { %v2811_v19 = vadd.f32 %v2810_v47, %v5941_v3 }
 0x380   : > { %v2859_v15 = vpop.f32.mrf.mxu3  ;;  %v2714_v54 = vpop.f32.mrf.mxu0 }
 0x381   : > { %v5992_v41 = vadd.f32 %v2859_v15, %v2811_v19  ;;  %v2715_v53 = vadd.f32 %v2714_v54, %v5936_v63 }
 0x382   : > { %v2763_v56 = vpop.f32.mrf.mxu1 }
 0x383   : > { %v5995_v43 = vadd.f32 %v2763_v56, %v2715_v53 }
 0x386   : > { %v2812_v24 = vpop.f32.mrf.mxu2 }
 0x387   : > { %v2813_v4 = vadd.f32 %v2812_v24, %v5941_v3 }
 0x388   : > { %v2861_v27 = vpop.f32.mrf.mxu3  ;;  %v2717_v38 = vpop.f32.mrf.mxu0 }
 0x389   : > { %v5998_v2 = vadd.f32 %v2861_v27, %v2813_v4  ;;  %v2718_v11 = vadd.f32 %v2717_v38, %v5936_v63 }
 0x38a   : > { %v2766_v36 = vpop.f32.mrf.mxu1 }
 0x38b   : > { %v6002_v28 = vadd.f32 %v2766_v36, %v2718_v11 }
 0x38e   : > { %v2815_v62 = vpop.f32.mrf.mxu2 }
 0x38f   : > { %v2816_v5 = vadd.f32 %v2815_v62, %v5941_v3 }
 0x390   : > { %v2864_v32 = vpop.f32.mrf.mxu3  ;;  %v2719_v40 = vpop.f32.mrf.mxu0 }
 0x391   : > { %v6004_v17 = vadd.f32 %v2864_v32, %v2816_v5  ;;  %v2720_v21 = vadd.f32 %v2719_v40, %v5936_v63 }
 0x392   : > { %v2768_v57 = vpop.f32.mrf.mxu1 }
 0x393   : > { %v2909_v55 = vadd.f32 %v6004_v17, %v6002_v28  ;;  %v6010_v18 = vadd.f32 %v2768_v57, %v2720_v21 }
 0x395   : > { %2910 = vadd.xlane.f32.xlu0 %v2909_v55 }
 0x396   : > { %v2817_v12 = vpop.f32.mrf.mxu2 }
 0x397   : > { %v2818_v45 = vadd.f32 %v2817_v12, %v5941_v3 }
 0x398   : > { %v2866_v29 = vpop.f32.mrf.mxu3  ;;  %v2722_v50 = vpop.f32.mrf.mxu0 }
 0x399   : > { %v6012_v23 = vadd.f32 %v2866_v29, %v2818_v45  ;;  %v2723_v58 = vadd.f32 %v2722_v50, %v5936_v63 }
 0x39a   : > { %v2771_v52 = vpop.f32.mrf.mxu1 }
 0x39b   : > { %v2912_v25 = vadd.f32 %v6012_v23, %v6010_v18  ;;  %v6017_v14 = vadd.f32 %v2771_v52, %v2723_v58 }
 0x39d   : > { %2913 = vadd.xlane.f32.xlu1 %v2912_v25  ;;  %v2967_v1 = vmul.f32 %v6017_v14, %v6017_v14 }
 0x39e   : > { %v2820_v22 = vpop.f32.mrf.mxu2 }
 0x39f   : > { %v2821_v20 = vadd.f32 %v2820_v22, %v5941_v3 }
 0x3a0   : > { %v2869_v33 = vpop.f32.mrf.mxu3  ;;  %v2724_v60 = vpop.f32.mrf.mxu0 }
 0x3a1   : > { %v6020_v13 = vadd.f32 %v2869_v33, %v2821_v20  ;;  %v2725_v9 = vadd.f32 %v2724_v60, %v5936_v63  ;;  %v2966_v60 = vmul.f32 %v6012_v23, %v6012_v23 }
 0x3a2   : > { %v2773_v35 = vpop.f32.mrf.mxu1 }
 0x3a3   : > { %v2915_v61 = vadd.f32 %v6020_v13, %v6017_v14  ;;  %v2968_v46 = vmul.f32 %v6020_v13, %v6020_v13  ;;  %v6029_v15 = vadd.f32 %v2773_v35, %v2725_v9  ;;  %v2965_v9 = vmul.f32 %v6010_v18, %v6010_v18 }
 0x3a5   : > { %2916 = vadd.xlane.f32.xlu2 %v2915_v61  ;;  %v3011_v47 = vadd.f32 %v2968_v46, %v2967_v1  ;;  %v2969_v38 = vmul.f32 %v6029_v15, %v6029_v15 }
 0x3a6   : > { %v2822_v19 = vpop.f32.mrf.mxu2 }
 0x3a7   : > { %v2823_v54 = vadd.f32 %v2822_v19, %v5941_v3  ;;  %3012 = vadd.xlane.f32.xlu1 %v3011_v47  ;;  %v2964_v47 = vmul.f32 %v6004_v17, %v6004_v17  ;;  %v2963_v19 = vmul.f32 %v6002_v28, %v6002_v28 }
 0x3a8   : > { %v2871_v53 = vpop.f32.mrf.mxu3  ;;  %v2727_v56 = vpop.f32.mrf.mxu0 }
 0x3a9   : > { %v6032_v24 = vadd.f32 %v2871_v53, %v2823_v54  ;;  %v2728_v4 = vadd.f32 %v2727_v56, %v5936_v63  ;;  %v2960_v54 = vmul.f32 %v5992_v41, %v5992_v41  ;;  %v3005_v53 = vadd.f32 %v2964_v47, %v2963_v19 }
 0x3aa   : > { %v2776_v11 = vpop.f32.mrf.mxu1  ;;  %v2959_v56 = vmul.f32 %v5989_v37, %v5989_v37  ;;  %v2950_v47 = vmul.f32 %v5962_v51, %v5962_v51  ;;  %v2888_v19 = vadd.f32 %v5962_v51, %v5959_v30 }
 0x3ab   : > { %v2918_v27 = vadd.f32 %v6032_v24, %v6029_v15  ;;  %v2970_v36 = vmul.f32 %v6032_v24, %v6032_v24  ;;  %v6041_v32 = vadd.f32 %v2776_v11, %v2728_v4  ;;  %v2961_v11 = vmul.f32 %v5995_v43, %v5995_v43 }
 0x3ac   : > { %v2999_v4 = vadd.f32 %v2960_v54, %v2959_v56  ;;  %v2949_v54 = vmul.f32 %v5959_v30, %v5959_v30 }
 0x3ad   : > { %2919 = vadd.xlane.f32.xlu0 %v2918_v27  ;;  %v3014_v62 = vadd.f32 %v2970_v36, %v2969_v38  ;;  %v2971_v29 = vmul.f32 %v6041_v32, %v6041_v32  ;;  %v2903_v27 = vadd.f32 %v5992_v41, %v5989_v37  ;;  %v2962_v38 = vmul.f32 %v5998_v2, %v5998_v2 }
 0x3ae   : > { %v2825_v5 = vpop.f32.mrf.mxu2  ;;  %v2906_v36 = vadd.f32 %v5998_v2, %v5995_v43  ;;  %v2984_v56 = vadd.f32 %v2950_v47, %v2949_v54 }
 0x3af   : > { %v2826_v40 = vadd.f32 %v2825_v5, %v5941_v3  ;;  %3015 = vadd.xlane.f32.xlu2 %v3014_v62  ;;  %v2900_v62 = vadd.f32 %v5986_v42, %v5983_v0  ;;  %v3002_v5 = vadd.f32 %v2962_v38, %v2961_v11  ;;  %v2943_v38 = vmul.f32 %v5939_v34, %v5939_v34 }
 0x3b0   : > { %v2874_v57 = vpop.f32.mrf.mxu3  ;;  %v2729_v55 = vpop.f32.mrf.mxu0  ;;  %v2946_v11 = vmul.f32 %v5950_v31, %v5950_v31 }
 0x3b1   : > { %v6044_v21 = vadd.f32 %v2874_v57, %v2826_v40  ;;  %v2730_v12 = vadd.f32 %v2729_v55, %v5936_v63  ;;  %v2956_v40 = vmul.f32 %v5980_v49, %v5980_v49  ;;  %v2897_v57 = vadd.f32 %v5980_v49, %v5977_v8 }
 0x3b2   : > { %v2778_v58 = vpop.f32.mrf.mxu1  ;;  %v2955_v55 = vmul.f32 %v5977_v8, %v5977_v8 }
 0x3b3   : > { %v2921_v45 = vadd.f32 %v6044_v21, %v6041_v32  ;;  %v2972_v50 = vmul.f32 %v6044_v21, %v6044_v21  ;;  %v6053_v22 = vadd.f32 %v2778_v58, %v2730_v12  ;;  %v2891_v12 = vadd.f32 %v5968_v59, %v5965_v44 }
 0x3b5   : > { %2922 = vadd.xlane.f32.xlu1 %v2921_v45  ;;  %v3017_v52 = vadd.f32 %v2972_v50, %v2971_v29  ;;  %v2973_v61 = vmul.f32 %v6053_v22, %v6053_v22  ;;  %v2993_v45 = vadd.f32 %v2956_v40, %v2955_v55  ;;  %v2958_v29 = vmul.f32 %v5986_v42, %v5986_v42 }
 0x3b6   : > { %v2827_v25 = vpop.f32.mrf.mxu2  ;;  %v2957_v50 = vmul.f32 %v5983_v0, %v5983_v0 }
 0x3b7   : > { %v2828_v20 = vadd.f32 %v2827_v25, %v5941_v3  ;;  %3018 = vadd.xlane.f32.xlu0 %v3017_v52  ;;  %v3008_v3 = vadd.f32 %v2966_v60, %v2965_v9  ;;  %v2954_v52 = vmul.f32 %v5974_v7, %v5974_v7  ;;  %v2953_v25 = vmul.f32 %v5971_v16, %v5971_v16 }
 0x3b8   : > { %v2876_v33 = vpop.f32.mrf.mxu3  ;;  %v2996_v58 = vadd.f32 %v2958_v29, %v2957_v50  ;;  %v2952_v60 = vmul.f32 %v5968_v59, %v5968_v59  ;;  %v2948_v9 = vmul.f32 %v5957_v39, %v5957_v39 }
 0x3b9   : > { %v6056_v63 = vadd.f32 %v2876_v33, %v2828_v20  ;;  %v2990_v20 = vadd.f32 %v2954_v52, %v2953_v25  ;;  %v2894_v33 = vadd.f32 %v5974_v7, %v5971_v16 }
 0x3bb   : > { %v2924_v35 = vadd.f32 %v6056_v63, %v6053_v22  ;;  %v2974_v1 = vmul.f32 %v6056_v63, %v6056_v63 }
 0x3bd   : > { %2925 = vadd.xlane.f32.xlu2 %v2924_v35  ;;  %v3020_v46 = vadd.f32 %v2974_v1, %v2973_v61  ;;  %v2951_v35 = vmul.f32 %v5965_v44, %v5965_v44  ;;  %v2947_v1 = vmul.f32 %v5953_v48, %v5953_v48 }
 0x3bf   : > { %3009 = vadd.xlane.f32.xlu0 %v3008_v3  ;;  %3021 = vadd.xlane.f32.xlu1 %v3020_v46  ;;  %v2987_v61 = vadd.f32 %v2952_v60, %v2951_v35  ;;  %v2981_v3 = vadd.f32 %v2948_v9, %v2947_v1  ;;  %v2885_v46 = vadd.f32 %v5957_v39, %v5953_v48 }
 0x3c5   : > { %3006 = vadd.xlane.f32.xlu2 %v3005_v53  ;;  %v2882_v53 = vadd.f32 %v5950_v31, %v5947_v6 }
 0x3c7   : > { %3000 = vadd.xlane.f32.xlu0 %v2999_v4  ;;  %2904 = vadd.xlane.f32.xlu1 %v2903_v27  ;;  %v2944_v4 = vmul.f32 %v5944_v10, %v5944_v10  ;;  %v2879_v27 = vadd.f32 %v5944_v10, %v5939_v34 }
 0x3cd   : > { %2907 = vadd.xlane.f32.xlu2 %v2906_v36  ;;  %v2975_v36 = vadd.f32 %v2944_v4, %v2943_v38 }
 0x3cf   : > { %2901 = vadd.xlane.f32.xlu0 %v2900_v62  ;;  %3003 = vadd.xlane.f32.xlu1 %v3002_v5  ;;  %v2945_v62 = vmul.f32 %v5947_v6, %v5947_v6 }
 0x3d1   : > { %v2978_v5 = vadd.f32 %v2946_v11, %v2945_v62 }
 0x3d5   : > { %2898 = vadd.xlane.f32.xlu2 %v2897_v57 }
 0x3d7   : > { %2892 = vadd.xlane.f32.xlu0 %v2891_v12  ;;  %2994 = vadd.xlane.f32.xlu1 %v2993_v45 }
 0x3dd   : > { %2997 = vadd.xlane.f32.xlu2 %v2996_v58 }
 0x3df   : > { %2991 = vadd.xlane.f32.xlu0 %v2990_v20  ;;  %2895 = vadd.xlane.f32.xlu1 %v2894_v33 }
 0x3e5   : > { %2988 = vadd.xlane.f32.xlu2 %v2987_v61 }
 0x3e7   : > { %2982 = vadd.xlane.f32.xlu0 %v2981_v3  ;;  %2886 = vadd.xlane.f32.xlu1 %v2885_v46 }
 0x3ed   : > { %2889 = vadd.xlane.f32.xlu2 %v2888_v19 }
 0x3ef   : > { %2883 = vadd.xlane.f32.xlu0 %v2882_v53  ;;  %2985 = vadd.xlane.f32.xlu1 %v2984_v56 }
 0x3f5   : > { %2880 = vadd.xlane.f32.xlu2 %v2879_v27 }
 0x3f7   : > { %2976 = vadd.xlane.f32.xlu1 %v2975_v36 }
 0x3fd   : > { %2979 = vadd.xlane.f32.xlu2 %v2978_v5 }
 0x408   : > { %v2911_v57 = vpop.xlane.xlu0 %2910 }
 0x409   : > { %v6154_v11 = vmul.f32 %v2911_v57, %v5079_v26 }
 0x410   : > { %v2914_v40 = vpop.xlane.xlu1 %2913 }
 0x418   : > { %v2917_v55 = vpop.xlane.xlu2 %2916 }
 0x419   : > { %v6133_v12 = vmul.f32 %v2917_v55, %v5079_v26 }
 0x41a   : > { %v3013_v45 = vpop.xlane.xlu1 %3012 }
 0x41b   : > { %v3035_v29 = vmul.f32 %v3013_v45, %v5079_v26  ;;  %v3051_v50 = vmul.f32 %v6133_v12, %v6133_v12  ;;  %v6157_v45 = vmul.f32 %v2914_v40, %v5079_v26 }
 0x41d   : > { %v3067_v52 = vsub.f32 %v3035_v29, %v3051_v50 }
 0x41f   : > { %v3083_v58 = vmax.f32 %v3067_v52, 0.0 }
 0x420   : > { %v2920_v25 = vpop.xlane.xlu0 %2919 }
 0x421   : > { %v3131_v20 = vadd.f32 1e-05, %v3083_v58  ;;  %v6139_v33 = vmul.f32 %v2920_v25, %v5079_v26 }
 0x422   : > { %v3016_v60 = vpop.xlane.xlu2 %3015 }
 0x423   : > { %4413 = vrsqrt.f32 %v3131_v20  ;;  %v3036_v35 = vmul.f32 %v3016_v60, %v5079_v26  ;;  %v3052_v9 = vmul.f32 %v6139_v33, %v6139_v33  ;;  %vm3261_vm2 = vweird.f32 %v3131_v20 }
 0x425   : > { %v3068_v61 = vsub.f32 %v3036_v35, %v3052_v9 }
 0x427   : > { %v3084_v1 = vmax.f32 %v3068_v61, 0.0  ;;  %v2483_v61 = vld [vmem:[#allocation10 + $0x7] ss:$8 sm:$0x3] }
 0x428   : > { %v2923_v3 = vpop.xlane.xlu1 %2922 }
 0x429   : > { %v4414_v46 = vpop.eup %4413  ;;  %v6145_v47 = vmul.f32 %v2923_v3, %v5079_v26  ;;  %v6147_v54 = vadd.f32 1e-05, %v3084_v1 }
 0x42a   : > { %v3256_v19 = vmul.f32 %v4414_v46, %v3131_v20  ;;  %v3019_v53 = vpop.xlane.xlu0 %3018  ;;  %vm3262_vm1 = vweird.f32 %v4414_v46  ;;  %v3049_v20 = vmul.f32 %v6154_v11, %v6154_v11 }
 0x42b   : > { %v3053_v56 = vmul.f32 %v6145_v47, %v6145_v47  ;;  %v3037_v4 = vmul.f32 %v3019_v53, %v5079_v26  ;;  %4415 = vrsqrt.f32 %v6147_v54  ;;  %vm3263_vm3 = vmor %vm3261_vm2, %vm3262_vm1  ;;  %vm3271_vm5 = vweird.f32 %v6147_v54 }
 0x42c   : > { %v3257_v27 = vmul.f32 %v4414_v46, %v3256_v19  ;;  %v3111_v19 = vsub.f32 %v6017_v14, %v6133_v12  ;;  %v2485_v14 = vld [vmem:[#allocation10 + $0x10] ss:$8 sm:$0x3] }
 0x42d   : > { %v3069_v38 = vsub.f32 %v3037_v4, %v3053_v56  ;;  %v6197_v4 = vperm.slane %v2485_v14, 0 }
 0x42e   : > { %v3258_v36 = vmul.f32 0.5, %v3257_v27  ;;  %v3050_v27 = vmul.f32 %v6157_v45, %v6157_v45 }
 0x42f   : > { %v3085_v62 = vmax.f32 %v3069_v38, 0.0 }
 0x430   : > { %v3259_v5 = vsub.f32 1.5, %v3258_v36  ;;  %v2926_v55 = vpop.xlane.xlu2 %2925 }
 0x431   : > { %v6159_v29 = vadd.f32 1e-05, %v3085_v62  ;;  %v6162_v50 = vmul.f32 %v2926_v55, %v5079_v26  ;;  %v4416_v52 = vpop.eup %4415 }
 0x432   : > { %v3260_v58 = vmul.f32 %v4414_v46, %v3259_v5  ;;  %v3022_v25 = vpop.xlane.xlu1 %3021  ;;  %v3010_v60 = vpop.xlane.xlu0 %3009  ;;  %v3266_v35 = vmul.f32 %v4416_v52, %v6147_v54  ;;  %v6186_v5 = vperm.slane %v2483_v61, 0  ;;  %vm3272_vm4 = vweird.f32 %v4416_v52 }
 0x433   : > { %4417 = vrsqrt.f32 %v6159_v29  ;;  %v3054_v1 = vmul.f32 %v6162_v50, %v6162_v50  ;;  %v3038_v56 = vmul.f32 %v3022_v25, %v5079_v26  ;;  %v3034_v38 = vmul.f32 %v3010_v60, %v5079_v26  ;;  %vm3273_vm6 = vmor %vm3271_vm5, %vm3272_vm4 }
 0x434   : > { %v3264_v9 = vsel %vm3263_vm3, %v4414_v46, %v3260_v58  ;;  %v3267_v53 = vmul.f32 %v4416_v52, %v3266_v35  ;;  %v3112_v46 = vsub.f32 %v6020_v13, %v6133_v12  ;;  %v3113_v58 = vsub.f32 %v6029_v15, %v6139_v33 }
 0x435   : > { %v3319_v36 = vmul.f32 %v3264_v9, %v3111_v19  ;;  %v3070_v55 = vsub.f32 %v3038_v56, %v3054_v1  ;;  %v3114_v25 = vsub.f32 %v6032_v24, %v6139_v33  ;;  %v6192_v35 = vperm.slane %v2483_v61, 1 }
 0x436   : > { %v3268_v62 = vmul.f32 0.5, %v3267_v53  ;;  %v3066_v13 = vsub.f32 %v3034_v38, %v3050_v27  ;;  %v6207_v54 = vperm.slane %v2485_v14, 1  ;;  %vm3281_vm7 = vweird.f32 %v6159_v29 }
 0x437   : > { %v3086_v60 = vmax.f32 %v3070_v55, 0.0  ;;  %v3356_v27 = vmul.f32 %v6186_v5, %v3319_v36 }
 0x438   : > { %v3007_v12 = vpop.xlane.xlu2 %3006  ;;  %v3269_v57 = vsub.f32 1.5, %v3268_v62  ;;  %v3082_v53 = vmax.f32 %v3066_v13, 0.0 }
 0x439   : > { %v4418_v40 = vpop.eup %4417  ;;  %v3033_v19 = vmul.f32 %v3007_v12, %v5079_v26  ;;  %v6199_v33 = vadd.f32 1e-05, %v3086_v60  ;;  %v3115_v12 = vsub.f32 %v6041_v32, %v6145_v47  ;;  %v3320_v60 = vmul.f32 %v3264_v9, %v3112_v46 }
 0x43a   : > { %v3276_v1 = vmul.f32 %v4418_v40, %v6159_v29  ;;  %v2905_v56 = vpop.xlane.xlu1 %2904  ;;  %v3001_v15 = vpop.xlane.xlu0 %3000  ;;  %v3270_v24 = vmul.f32 %v4416_v52, %v3269_v57  ;;  %v6202_v62 = vadd.f32 1e-05, %v3082_v53  ;;  %vm3282_vm8 = vweird.f32 %v4418_v40 }
 0x43b   : > { %v3065_v61 = vsub.f32 %v3033_v19, %v3049_v20  ;;  %v6205_v55 = vmul.f32 %v2905_v56, %v5079_v26  ;;  %4419 = vrsqrt.f32 %v6199_v33  ;;  %v3116_v20 = vsub.f32 %v6044_v21, %v6145_v47  ;;  %vm3283_vm9 = vmor %vm3281_vm7, %vm3282_vm8 }
 0x43c   : > { %v3277_v38 = vmul.f32 %v4418_v40, %v3276_v1  ;;  %v3274_v13 = vsel %vm3273_vm6, %v4416_v52, %v3270_v24  ;;  %4421 = vrsqrt.f32 %v6202_v62  ;;  %v3393_v52 = vadd.f32 %v6197_v4, %v3356_v27 }
 0x43d   : > { %v3081_v57 = vmax.f32 %v3065_v61, 0.0  ;;  %v3321_v19 = vmul.f32 %v3274_v13, %v3113_v58  ;;  %v3047_v9 = vmul.f32 %v6205_v55, %v6205_v55  ;;  %v3031_v46 = vmul.f32 %v3001_v15, %v5079_v26 }
 0x43e   : > { %v3278_v36 = vmul.f32 0.5, %v3277_v38  ;;  %v3322_v53 = vmul.f32 %v3274_v13, %v3114_v25  ;;  %v6231_v38 = vmul.f32 %v6192_v35, %v3320_v60  ;;  %v3457_v47 = vmul.f32 0.01, %v3393_v52 }
 0x43f   : > { %v6216_v1 = vadd.f32 1e-05, %v3081_v57  ;;  %v3063_v24 = vsub.f32 %v3031_v46, %v3047_v9  ;;  %v3358_v3 = vmul.f32 %v6186_v5, %v3321_v19  ;;  %vm3291_vm10 = vweird.f32 %v6199_v33 }
 0x440   : > { %v3279_v14 = vsub.f32 1.5, %v3278_v36  ;;  %v2908_v21 = vpop.xlane.xlu2 %2907  ;;  %vm3425_vm11 = vcmp.ge.f32.partialorder %v3393_v52, 0.0  ;;  %vm3251_vm12 = vweird.f32 %v6202_v62 }
 0x441   : > { %4423 = vrsqrt.f32 %v6216_v1  ;;  %v6228_v58 = vmul.f32 %v2908_v21, %v5079_v26  ;;  %v4420_v57 = vpop.eup %4419  ;;  %v3079_v13 = vmax.f32 %v3063_v24, 0.0  ;;  %v6258_v10 = vadd.f32 %v6197_v4, %v3358_v3 }
 0x442   : > { %v3280_v56 = vmul.f32 %v4418_v40, %v3279_v14  ;;  %v3004_v61 = vpop.xlane.xlu1 %3003  ;;  %v2902_v27 = vpop.xlane.xlu0 %2901  ;;  %v3286_v25 = vmul.f32 %v4420_v57, %v6199_v33  ;;  %v6260_v19 = vsel %vm3425_vm11, %v3393_v52, %v3457_v47  ;;  %vm3292_vm13 = vweird.f32 %v4420_v57 }
 0x443   : > { %v3048_v15 = vmul.f32 %v6228_v58, %v6228_v58  ;;  %v3032_v36 = vmul.f32 %v3004_v61, %v5079_v26  ;;  %v4422_v32 = vpop.eup %4421  ;;  %v6248_v29 = vadd.f32 1e-05, %v3079_v13  ;;  %v6251_v61 = vmul.f32 %v6192_v35, %v3322_v53  ;;  %vm3293_vm0 = vmor %vm3291_vm10, %vm3292_vm13 }
 0x444   : > { %v3284_v60 = vsel %vm3283_vm9, %v4418_v40, %v3280_v56  ;;  %v3246_v14 = vmul.f32 %v4422_v32, %v6202_v62  ;;  %v3287_v46 = vmul.f32 %v4420_v57, %v3286_v25  ;;  %vm3252_vm14 = vweird.f32 %v4422_v32 }
 0x445   : > { %v3064_v21 = vsub.f32 %v3032_v36, %v3048_v15  ;;  %v3323_v34 = vmul.f32 %v3284_v60, %v3115_v12  ;;  %4425 = vrsqrt.f32 %v6248_v29  ;;  %vm3241_vm15 = vweird.f32 %v6216_v1  ;;  %vm3253_vm1 = vmor %vm3251_vm12, %vm3252_vm14 }
 0x446   : > { %v3247_v40 = vmul.f32 %v4422_v32, %v3246_v14  ;;  %v3288_v9 = vmul.f32 0.5, %v3287_v46  ;;  %v3324_v14 = vmul.f32 %v3284_v60, %v3116_v20  ;;  %vm3221_vm3 = vweird.f32 %v6248_v29 }
 0x447   : > { %v6253_v24 = vpop.eup %4423  ;;  %v3080_v13 = vmax.f32 %v3064_v21, 0.0  ;;  %v3360_v21 = vmul.f32 %v6186_v5, %v3323_v34  ;;  %vm3427_vm11 = vcmp.ge.f32.partialorder %v6258_v10, 0.0 }
 0x448   : > { %v3236_v25 = vmul.f32 %v6253_v24, %v6216_v1  ;;  %v2899_v53 = vpop.xlane.xlu2 %2898  ;;  %v3248_v15 = vmul.f32 0.5, %v3247_v40  ;;  %v3289_v56 = vsub.f32 1.5, %v3288_v9  ;;  %v6275_v40 = vmul.f32 %v2902_v27, %v5079_v26 }
 0x449   : > { %v6269_v52 = vmul.f32 %v2899_v53, %v5079_v26  ;;  %v6272_v31 = vadd.f32 1e-05, %v3080_v13  ;;  %v6289_v34 = vmul.f32 %v6192_v35, %v3324_v14  ;;  %vm3242_vm2 = vweird.f32 %v6253_v24 }
 0x44a   : > { %v3237_v3 = vmul.f32 %v6253_v24, %v3236_v25  ;;  %v2995_v12 = vpop.xlane.xlu1 %2994  ;;  %v2893_v47 = vpop.xlane.xlu0 %2892  ;;  %v3249_v46 = vsub.f32 1.5, %v3248_v15  ;;  %v3290_v20 = vmul.f32 %v4420_v57, %v3289_v56  ;;  %v6721_v14 = vsub.f32 %v6053_v22, %v6162_v50  ;;  %vm3243_vm5 = vmor %vm3241_vm15, %vm3242_vm2 }
 0x44b   : > { %v6279_v9 = vmul.f32 %v2893_v47, %v5079_v26  ;;  %4427 = vrsqrt.f32 %v6272_v31  ;;  %v3045_v53 = vmul.f32 %v6269_v52, %v6269_v52  ;;  %v3029_v27 = vmul.f32 %v2995_v12, %v5079_v26  ;;  %v4426_v15 = vpop.eup %4425 }
 0x44c   : > { %v3238_v60 = vmul.f32 0.5, %v3237_v3  ;;  %v3250_v25 = vmul.f32 %v4422_v32, %v3249_v46  ;;  %v3294_v56 = vsel %vm3293_vm0, %v4420_v57, %v3290_v20  ;;  %v3216_v3 = vmul.f32 %v4426_v15, %v6248_v29 }
 0x44d   : > { %v3325_v57 = vmul.f32 %v3294_v56, %v6721_v14  ;;  %v3061_v14 = vsub.f32 %v3029_v27, %v3045_v53  ;;  %v6723_v47 = vsub.f32 %v6010_v18, %v6157_v45  ;;  %v3046_v46 = vmul.f32 %v6275_v40, %v6275_v40 }
 0x44e   : > { %v3239_v13 = vsub.f32 1.5, %v3238_v60  ;;  %v3254_v33 = vsel %vm3253_vm1, %v4422_v32, %v3250_v25  ;;  %v6722_v60 = vsub.f32 %v6056_v63, %v6162_v50  ;;  %v3217_v22 = vmul.f32 %v4426_v15, %v3216_v3 }
 0x44f   : > { %v6317_v36 = vmul.f32 %v3254_v33, %v6723_v47  ;;  %v6724_v50 = vsub.f32 %v6012_v23, %v6157_v45  ;;  %vm3222_vm4 = vweird.f32 %v4426_v15  ;;  %v3077_v18 = vmax.f32 %v3061_v14, 0.0 }
 0x450   : > { %v2998_v20 = vpop.xlane.xlu2 %2997  ;;  %v3326_v25 = vmul.f32 %v3294_v56, %v6722_v60  ;;  %v3240_v12 = vmul.f32 %v6253_v24, %v3239_v13  ;;  %v3218_v53 = vmul.f32 0.5, %v3217_v22  ;;  %v3362_v13 = vmul.f32 %v6186_v5, %v3325_v57  ;;  %vm3223_vm7 = vmor %vm3221_vm3, %vm3222_vm4 }
 0x451   : > { %v3030_v62 = vmul.f32 %v2998_v20, %v5079_v26  ;;  %v4428_v63 = vpop.eup %4427  ;;  %v6327_v56 = vmul.f32 %v3254_v33, %v6724_v50  ;;  %vm3231_vm6 = vweird.f32 %v6272_v31  ;;  %v6341_v60 = vadd.f32 1e-05, %v3077_v18 }
 0x452   : > { %v2896_v44 = vpop.xlane.xlu1 %2895  ;;  %v2992_v27 = vpop.xlane.xlu0 %2991  ;;  %v3226_v3 = vmul.f32 %v4428_v63, %v6272_v31  ;;  %v3363_v23 = vmul.f32 %v6192_v35, %v3326_v25  ;;  %v3244_v45 = vsel %vm3243_vm5, %v6253_v24, %v3240_v12  ;;  %v3219_v33 = vsub.f32 1.5, %v3218_v53 }
 0x453   : > { %v3062_v47 = vsub.f32 %v3030_v62, %v3046_v46  ;;  %v6336_v20 = vmul.f32 %v2896_v44, %v5079_v26  ;;  %v3028_v1 = vmul.f32 %v2992_v27, %v5079_v26  ;;  %v3043_v14 = vmul.f32 %v6279_v9, %v6279_v9 }
 0x454   : > { %v3227_v57 = vmul.f32 %v4428_v63, %v3226_v3  ;;  %v3220_v62 = vmul.f32 %v4426_v15, %v3219_v33  ;;  %4429 = vrsqrt.f32 %v6341_v60  ;;  %v3397_v24 = vadd.f32 %v6197_v4, %v3360_v21 }
 0x455   : > { %v3078_v22 = vmax.f32 %v3062_v47, 0.0  ;;  %v3044_v44 = vmul.f32 %v6336_v20, %v6336_v20  ;;  %v6725_v12 = vsub.f32 %v6002_v28, %v6154_v11  ;;  %v3399_v18 = vadd.f32 %v6197_v4, %v3362_v13 }
 0x456   : > { %v3228_v25 = vmul.f32 0.5, %v3227_v57  ;;  %v6726_v27 = vsub.f32 %v6004_v17, %v6154_v11  ;;  %vm3232_vm8 = vweird.f32 %v4428_v63  ;;  %v3224_v47 = vsel %vm3223_vm7, %v4426_v15, %v3220_v62 }
 0x457   : > { %v6353_v46 = vmul.f32 %v3244_v45, %v6725_v12  ;;  %v6355_v50 = vadd.f32 1e-05, %v3078_v22  ;;  %v3060_v21 = vsub.f32 %v3028_v1, %v3044_v44  ;;  %v3097_v13 = vsub.f32 %v5971_v16, %v6336_v20  ;;  %vm3233_vm12 = vmor %vm3231_vm6, %vm3232_vm8  ;;  %v6735_v16 = vld [vmem:[#allocation18_spill] sm:$0xff] }
 0x458   : > { %v2989_v53 = vpop.xlane.xlu2 %2988  ;;  %v6361_v3 = vmul.f32 %v3244_v45, %v6726_v27  ;;  %v3229_v33 = vsub.f32 1.5, %v3228_v25  ;;  %vm3431_vm9 = vcmp.ge.f32.partialorder %v3399_v18, 0.0  ;;  %v3461_v17 = vmul.f32 0.01, %v3397_v24 }
 0x459   : > { %v3027_v28 = vmul.f32 %v2989_v53, %v5079_v26  ;;  %4431 = vrsqrt.f32 %v6355_v50  ;;  %v3076_v57 = vmax.f32 %v3060_v21, 0.0  ;;  %vm3429_vm10 = vcmp.ge.f32.partialorder %v3397_v24, 0.0 }
 0x45a   : > { %v3230_v11 = vmul.f32 %v4428_v63, %v3229_v33  ;;  %v3463_v45 = vmul.f32 0.01, %v3399_v18  ;;  %v3398_v29 = vadd.f32 %v6207_v54, %v6289_v34  ;;  %v2887_v1 = vpop.xlane.xlu1 %2886  ;;  %v4430_v15 = vpop.eup %4429  ;;  %v3098_v62 = vsub.f32 %v5974_v7, %v6336_v20  ;;  %v6736_v7 = vld [vmem:[#allocation16_spill] sm:$0xff] }
 0x45b   : > { %v3059_v22 = vsub.f32 %v3027_v28, %v3043_v14  ;;  %v6375_v44 = vadd.f32 1e-05, %v3076_v57  ;;  %v3400_v14 = vadd.f32 %v6207_v54, %v3363_v23  ;;  %v6727_v25 = vsub.f32 %v5989_v37, %v6205_v55 }
 0x45c   : > { %v3196_v34 = vmul.f32 %v4430_v15, %v6341_v60  ;;  %vm3201_vm13 = vweird.f32 %v6341_v60  ;;  %v3495_v27 = vsel %vm3431_vm9, %v3399_v18, %v3463_v45  ;;  %v3234_v21 = vsel %vm3233_vm12, %v4428_v63, %v3230_v11  ;;  %v2983_v18 = vpop.xlane.xlu0 %2982 }
 0x45d   : > { %v3075_v12 = vmax.f32 %v3059_v22, 0.0  ;;  %v6381_v53 = vmul.f32 %v3224_v47, %v6727_v25  ;;  %4433 = vrsqrt.f32 %v6375_v44  ;;  %v3493_v23 = vsel %vm3429_vm10, %v3397_v24, %v3461_v17 }
 0x45e   : > { %v6392_v28 = vmul.f32 %v2887_v1, %v5079_v26  ;;  %v3197_v33 = vmul.f32 %v4430_v15, %v3196_v34  ;;  %v3511_v31 = vpack.c.bf16 %v3495_v27, %v3493_v23  ;;  %vm3430_vm14 = vcmp.ge.f32.partialorder %v3398_v29, 0.0 }
 0x45f   : > { %v6394_v37 = vpop.eup %4431  ;;  %v6396_v57 = vadd.f32 1e-05, %v3075_v12  ;;  %v6728_v22 = vsub.f32 %v5992_v41, %v6205_v55  ;;  %vm3432_vm15 = vcmp.ge.f32.partialorder %v3400_v14, 0.0  ;;  %v3462_v24 = vmul.f32 0.01, %v3398_v29 }
 0x460   : > { %v3206_v63 = vmul.f32 %v6394_v37, %v6355_v50  ;;  %v3198_v17 = vmul.f32 0.5, %v3197_v33  ;;  %vm3202_vm0 = vweird.f32 %v4430_v15  ;;  %vm3211_vm1 = vweird.f32 %v6355_v50  ;;  %3528 = vmatpush.bf16.xpose.msrb.mxu0 %v3511_v31  ;;  %v2890_v45 = vpop.xlane.xlu2 %2889 }
 0x461   : > { %v6401_v25 = vmul.f32 %v3224_v47, %v6728_v22  ;;  %4435 = vrsqrt.f32 %v6396_v57  ;;  %v3464_v11 = vmul.f32 0.01, %v3400_v14  ;;  %v6729_v41 = vsub.f32 %v5995_v43, %v6228_v58  ;;  %vm3203_vm4 = vmor %vm3201_vm13, %vm3202_vm0 }
 0x462   : > { %v6730_v47 = vsub.f32 %v5998_v2, %v6228_v58  ;;  %v3207_v12 = vmul.f32 %v6394_v37, %v3206_v63  ;;  %v3494_v34 = vsel %vm3430_vm14, %v3398_v29, %v3462_v24  ;;  %v3199_v27 = vsub.f32 1.5, %v3198_v17 }
 0x463   : > { %v6410_v55 = vmul.f32 %v3234_v21, %v6729_v41  ;;  %v3496_v23 = vsel %vm3432_vm15, %v3400_v14, %v3464_v11  ;;  %v3041_v33 = vmul.f32 %v6392_v28, %v6392_v28  ;;  %v3025_v31 = vmul.f32 %v2983_v18, %v5079_v26  ;;  %v4434_v22 = vpop.eup %4433 }
 0x464   : > { %v6415_v1 = vmul.f32 %v3234_v21, %v6730_v47  ;;  %v3208_v43 = vmul.f32 0.5, %v3207_v12  ;;  %v3512_v41 = vpack.c.bf16 %v3496_v23, %v3494_v34  ;;  %v6423_v32 = vmul.f32 %v2890_v45, %v5079_v26 }
 0x465   : > { %v3459_v2 = vmul.f32 0.01, %v6258_v10  ;;  %v3200_v58 = vmul.f32 %v4430_v15, %v3199_v27  ;;  %vm3212_vm2 = vweird.f32 %v6394_v37  ;;  %v3186_v29 = vmul.f32 %v4434_v22, %v6375_v44 }
 0x466   : > { %vm3191_vm3 = vweird.f32 %v6375_v44  ;;  %v3057_v14 = vsub.f32 %v3025_v31, %v3041_v33  ;;  %v3209_v21 = vsub.f32 1.5, %v3208_v43  ;;  %3541 = vmatpush.bf16.xpose.msrb.mxu1 %v3512_v41  ;;  %v3091_v63 = vsub.f32 %v5953_v48, %v6392_v28  ;;  %vm3213_vm7 = vmor %vm3211_vm1, %vm3212_vm2 }
 0x467   : > { %v3092_v24 = vsub.f32 %v5957_v39, %v6392_v28  ;;  %v3491_v18 = vsel %vm3427_vm11, %v6258_v10, %v3459_v2  ;;  %v4436_v17 = vpop.eup %4435  ;;  %v3204_v11 = vsel %vm3203_vm4, %v4430_v15, %v3200_v58  ;;  %v3187_v45 = vmul.f32 %v4434_v22, %v3186_v29 }
 0x468   : > { %v3073_v47 = vmax.f32 %v3057_v14, 0.0  ;;  %v3509_v12 = vpack.c.bf16 %v3491_v18, %v6260_v19  ;;  %v3210_v60 = vmul.f32 %v6394_v37, %v3209_v21  ;;  %vm3192_vm5 = vweird.f32 %v4434_v22  ;;  %v2881_v14 = vpop.xlane.xlu2 %2880 }
 0x469   : > { %v3176_v34 = vmul.f32 %v4436_v17, %v6396_v57  ;;  %vm3181_vm6 = vweird.f32 %v6396_v57  ;;  %v3093_v27 = vsub.f32 %v5959_v30, %v6423_v32  ;;  %v3188_v23 = vmul.f32 0.5, %v3187_v45  ;;  %vm3193_vm11 = vmor %vm3191_vm3, %vm3192_vm5  ;;  %v6737_v57 = vld [vmem:[#allocation17_spill] sm:$0xff] }
 0x46a   : > { %v6445_v33 = vadd.f32 1e-05, %v3073_v47  ;;  %v3094_v10 = vsub.f32 %v5962_v51, %v6423_v32  ;;  %3529 = vmatpush.bf16.xpose.msrb.mxu0 %v3509_v12  ;;  %v3394_v19 = vadd.f32 %v6207_v54, %v6231_v38  ;;  %v6731_v15 = vsub.f32 %v5977_v8, %v6269_v52  ;;  %v2986_v38 = vpop.xlane.xlu1 %2985 }
 0x46b   : > { %v6732_v43 = vsub.f32 %v5980_v49, %v6269_v52  ;;  %v3177_v2 = vmul.f32 %v4436_v17, %v3176_v34  ;;  %v3396_v58 = vadd.f32 %v6207_v54, %v6251_v61  ;;  %v3214_v29 = vsel %vm3213_vm7, %v6394_v37, %v3210_v60  ;;  %v2884_v52 = vpop.xlane.xlu0 %2883 }
 0x46c   : > { %v6454_v31 = vmul.f32 %v3204_v11, %v6731_v15  ;;  %v3189_v8 = vsub.f32 1.5, %v3188_v23  ;;  %4437 = vrsqrt.f32 %v6445_v33  ;;  %v3042_v49 = vmul.f32 %v6423_v32, %v6423_v32 }
 0x46d   : > { %v6459_v41 = vmul.f32 %v3204_v11, %v6732_v43  ;;  %v3178_v21 = vmul.f32 0.5, %v3177_v2  ;;  %vm3182_vm8 = vweird.f32 %v4436_v17  ;;  %vm3426_vm9 = vcmp.ge.f32.partialorder %v3394_v19, 0.0 }
 0x46e   : > { %vm3428_vm10 = vcmp.ge.f32.partialorder %v3396_v58, 0.0  ;;  %v3190_v50 = vmul.f32 %v4434_v22, %v3189_v8  ;;  %v3458_v18 = vmul.f32 0.01, %v3394_v19  ;;  %v3460_v11 = vmul.f32 0.01, %v3396_v58  ;;  %vm3183_vm12 = vmor %vm3181_vm6, %vm3182_vm8 }
 0x46f   : > { %v3026_v61 = vmul.f32 %v2986_v38, %v5079_v26  ;;  %v6733_v37 = vsub.f32 %v5983_v0, %v6275_v40  ;;  %v3179_v47 = vsub.f32 1.5, %v3178_v21  ;;  %v6481_v12 = vmul.f32 %v2884_v52, %v5079_v26 }
 0x470   : > { %v6484_v60 = vmul.f32 %v2881_v14, %v5079_v26  ;;  %v3194_v34 = vsel %vm3193_vm11, %v4434_v22, %v3190_v50  ;;  %v3490_v23 = vsel %vm3426_vm9, %v3394_v19, %v3458_v18  ;;  %v3492_v15 = vsel %vm3428_vm10, %v3396_v58, %v3460_v11  ;;  %v6738_v11 = vld [vmem:[#allocation19_spill] sm:$0xff] }
 0x471   : > { %v6475_v45 = vmul.f32 %v3214_v29, %v6733_v37  ;;  %v3058_v43 = vsub.f32 %v3026_v61, %v3042_v49  ;;  %v6734_v0 = vsub.f32 %v5986_v42, %v6275_v40  ;;  %v3180_v38 = vmul.f32 %v4436_v17, %v3179_v47 }
 0x472   : > { %v3510_v8 = vpack.c.bf16 %v3492_v15, %v3490_v23  ;;  %v3352_v44 = vmul.f32 %v6186_v5, %v6353_v46  ;;  %v4438_v21 = vpop.eup %4437  ;;  %v6496_v52 = vmul.f32 %v3194_v34, %v3097_v13  ;;  %v6501_v22 = vmul.f32 %v3194_v34, %v3098_v62  ;;  %v2977_v18 = vpop.xlane.xlu1 %2976 }
 0x473   : > { %v6489_v2 = vmul.f32 %v3214_v29, %v6734_v0  ;;  %v3074_v42 = vmax.f32 %v3058_v43, 0.0  ;;  %v3089_v40 = vsub.f32 %v5947_v6, %v6481_v12  ;;  %v3184_v46 = vsel %vm3183_vm12, %v4436_v17, %v3180_v38  ;;  %v2980_v0 = vpop.xlane.xlu2 %2979 }
 0x474   : > { %v3156_v19 = vmul.f32 %v4438_v21, %v6445_v33  ;;  %vm3161_vm13 = vweird.f32 %v6445_v33  ;;  %3542 = vmatpush.bf16.xpose.msrb.mxu1 %v3510_v8  ;;  %v3087_v20 = vsub.f32 %v6736_v7, %v6484_v60  ;;  %vm3162_vm14 = vweird.f32 %v4438_v21 }
 0x475   : > { %v6514_v62 = vadd.f32 1e-05, %v3074_v42  ;;  %v3088_v58 = vsub.f32 %v6737_v57, %v6484_v60  ;;  %v3354_v17 = vmul.f32 %v6186_v5, %v6317_v36  ;;  %v3389_v49 = vadd.f32 %v6197_v4, %v3352_v44  ;;  %vm3163_vm3 = vmor %vm3161_vm13, %vm3162_vm14 }
 0x476   : > { %v3157_v29 = vmul.f32 %v4438_v21, %v3156_v19  ;;  %v3353_v14 = vmul.f32 %v6192_v35, %v6361_v3  ;;  %v3355_v50 = vmul.f32 %v6192_v35, %v6327_v56  ;;  %v6739_v61 = vsub.f32 %v6738_v11, %v6279_v9 }
 0x477   : > { %4439 = vrsqrt.f32 %v6514_v62  ;;  %v3391_v47 = vadd.f32 %v6197_v4, %v3354_v17  ;;  %v3039_v36 = vmul.f32 %v6484_v60, %v6484_v60  ;;  %vm3421_vm15 = vcmp.ge.f32.partialorder %v3389_v49, 0.0 }
 0x478   : > { %v6528_v37 = vmul.f32 %v3184_v46, %v6739_v61  ;;  %v3158_v34 = vmul.f32 0.5, %v3157_v29  ;;  %v3453_v23 = vmul.f32 0.01, %v3389_v49  ;;  %v3390_v3 = vadd.f32 %v6207_v54, %v3353_v14 }
 0x479   : > { %vm3423_vm0 = vcmp.ge.f32.partialorder %v3391_v47, 0.0  ;;  %v3455_v56 = vmul.f32 0.01, %v3391_v47  ;;  %v3392_v15 = vadd.f32 %v6207_v54, %v3355_v50  ;;  %v3023_v43 = vmul.f32 %v2977_v18, %v5079_v26 }
 0x47a   : > { %v3159_v38 = vsub.f32 1.5, %v3158_v34  ;;  %v3485_v8 = vsel %vm3421_vm15, %v3389_v49, %v3453_v23  ;;  %vm3422_vm1 = vcmp.ge.f32.partialorder %v3390_v3, 0.0  ;;  %v3454_v44 = vmul.f32 0.01, %v3390_v3 }
 0x47b   : > { %v3487_v42 = vsel %vm3423_vm0, %v3391_v47, %v3455_v56  ;;  %vm3424_vm2 = vcmp.ge.f32.partialorder %v3392_v15, 0.0  ;;  %v3456_v19 = vmul.f32 0.01, %v3392_v15  ;;  %v3055_v17 = vsub.f32 %v3023_v43, %v3039_v36 }
 0x47c   : > { %v3160_v29 = vmul.f32 %v4438_v21, %v3159_v38  ;;  %v3507_v11 = vpack.c.bf16 %v3487_v42, %v3485_v8  ;;  %v3486_v61 = vsel %vm3422_vm1, %v3390_v3, %v3454_v44  ;;  %v3024_v14 = vmul.f32 %v2980_v0, %v5079_v26 }
 0x47d   : > { %v4440_v13 = vpop.eup %4439  ;;  %v3488_v50 = vsel %vm3424_vm2, %v3392_v15, %v3456_v19  ;;  %v3071_v18 = vmax.f32 %v3055_v17, 0.0  ;;  %v3040_v49 = vmul.f32 %v6481_v12, %v6481_v12  ;;  %v3348_v47 = vmul.f32 %v6186_v5, %v6381_v53 }
 0x47e   : > { %v6740_v36 = vsub.f32 %v5968_v59, %v6279_v9  ;;  %v3164_v23 = vsel %vm3163_vm3, %v4438_v21, %v3160_v29  ;;  %v3166_v26 = vmul.f32 %v4440_v13, %v6514_v62  ;;  %3530 = vmatpush.bf16.xpose.msrb.mxu0 %v3507_v11  ;;  %v3508_v3 = vpack.c.bf16 %v3488_v50, %v3486_v61 }
 0x47f   : > { %vm3171_vm4 = vweird.f32 %v6514_v62  ;;  %vm3172_vm5 = vweird.f32 %v4440_v13  ;;  %v6552_v33 = vadd.f32 1e-05, %v3071_v18  ;;  %v3056_v56 = vsub.f32 %v3024_v14, %v3040_v49 }
 0x480   : > { %v6548_v34 = vmul.f32 %v3184_v46, %v6740_v36  ;;  %v3167_v15 = vmul.f32 %v4440_v13, %v3166_v26  ;;  %3543 = vmatpush.bf16.xpose.msrb.mxu1 %v3508_v3  ;;  %v3350_v53 = vmul.f32 %v6186_v5, %v6410_v55  ;;  %v3385_v59 = vadd.f32 %v6197_v4, %v3348_v47  ;;  %vm3173_vm10 = vmor %vm3171_vm4, %vm3172_vm5 }
 0x481   : > { %v3349_v9 = vmul.f32 %v6192_v35, %v6401_v25  ;;  %v6562_v21 = vmul.f32 %v3164_v23, %v3091_v63  ;;  %4441 = vrsqrt.f32 %v6552_v33  ;;  %v3072_v46 = vmax.f32 %v3056_v56, 0.0 }
 0x482   : > { %v3351_v43 = vmul.f32 %v6192_v35, %v6415_v1  ;;  %v3168_v0 = vmul.f32 0.5, %v3167_v15  ;;  %v3387_v38 = vadd.f32 %v6197_v4, %v3350_v53  ;;  %vm3417_vm6 = vcmp.ge.f32.partialorder %v3385_v59, 0.0 }
 0x483   : > { %v3449_v55 = vmul.f32 0.01, %v3385_v59  ;;  %v6568_v8 = vadd.f32 1e-05, %v3072_v46  ;;  %v3386_v25 = vadd.f32 %v6207_v54, %v3349_v9  ;;  %v3344_v48 = vmul.f32 %v6186_v5, %v6454_v31 }
 0x484   : > { %v3388_v44 = vadd.f32 %v6207_v54, %v3351_v43  ;;  %v6577_v63 = vmul.f32 %v3164_v23, %v3092_v24  ;;  %v3169_v1 = vsub.f32 1.5, %v3168_v0  ;;  %vm3419_vm7 = vcmp.ge.f32.partialorder %v3387_v38, 0.0 }
 0x485   : > { %v3451_v42 = vmul.f32 0.01, %v3387_v38  ;;  %4443 = vrsqrt.f32 %v6568_v8  ;;  %v3481_v19 = vsel %vm3417_vm6, %v3385_v59, %v3449_v55  ;;  %vm3418_vm8 = vcmp.ge.f32.partialorder %v3386_v25, 0.0 }
 0x486   : > { %vm3420_vm9 = vcmp.ge.f32.partialorder %v3388_v44, 0.0  ;;  %v3170_v17 = vmul.f32 %v4440_v13, %v3169_v1  ;;  %v3450_v11 = vmul.f32 0.01, %v3386_v25  ;;  %v3452_v61 = vmul.f32 0.01, %v3388_v44 }
 0x487   : > { %v3483_v29 = vsel %vm3419_vm7, %v3387_v38, %v3451_v42  ;;  %v4442_v14 = vpop.eup %4441  ;;  %v3346_v28 = vmul.f32 %v6186_v5, %v6475_v45  ;;  %v3381_v24 = vadd.f32 %v6197_v4, %v3344_v48  ;;  %v3345_v31 = vmul.f32 %v6192_v35, %v6459_v41 }
 0x488   : > { %v3505_v39 = vpack.c.bf16 %v3483_v29, %v3481_v19  ;;  %v3174_v50 = vsel %vm3173_vm10, %v4440_v13, %v3170_v17  ;;  %v3136_v18 = vmul.f32 %v4442_v14, %v6552_v33  ;;  %vm3141_vm11 = vweird.f32 %v6552_v33 }
 0x489   : > { %vm3142_vm12 = vweird.f32 %v4442_v14  ;;  %v3482_v49 = vsel %vm3418_vm8, %v3386_v25, %v3450_v11  ;;  %v3301_v62 = vmul.f32 %v3174_v50, %v3093_v27  ;;  %v6597_v45 = vmul.f32 %v3174_v50, %v3094_v10 }
 0x48a   : > { %3531 = vmatpush.bf16.xpose.msrb.mxu0 %v3505_v39  ;;  %v3484_v41 = vsel %vm3420_vm9, %v3388_v44, %v3452_v61  ;;  %v3383_v13 = vadd.f32 %v6197_v4, %v3346_v28  ;;  %v3137_v47 = vmul.f32 %v4442_v14, %v3136_v18  ;;  %vm3413_vm13 = vcmp.ge.f32.partialorder %v3381_v24, 0.0  ;;  %vm3143_vm3 = vmor %vm3141_vm11, %vm3142_vm12 }
 0x48b   : > { %v3506_v36 = vpack.c.bf16 %v3484_v41, %v3482_v49  ;;  %v3445_v23 = vmul.f32 0.01, %v3381_v24  ;;  %v4444_v26 = vpop.eup %4443  ;;  %v3347_v30 = vmul.f32 %v6192_v35, %v6489_v2  ;;  %v3382_v27 = vadd.f32 %v6207_v54, %v3345_v31 }
 0x48c   : > { %vm3415_vm14 = vcmp.ge.f32.partialorder %v3383_v13, 0.0  ;;  %v3447_v3 = vmul.f32 0.01, %v3383_v13  ;;  %v3138_v51 = vmul.f32 0.5, %v3137_v47  ;;  %v3146_v32 = vmul.f32 %v4444_v26, %v6568_v8 }
 0x48d   : > { %vm3151_vm15 = vweird.f32 %v6568_v8  ;;  %vm3152_vm0 = vweird.f32 %v4444_v26  ;;  %3544 = vmatpush.bf16.xpose.msrb.mxu1 %v3506_v36  ;;  %v3477_v10 = vsel %vm3413_vm13, %v3381_v24, %v3445_v23  ;;  %v3384_v15 = vadd.f32 %v6207_v54, %v3347_v30 }
 0x48e   : > { %v3479_v56 = vsel %vm3415_vm14, %v3383_v13, %v3447_v3  ;;  %vm3414_vm1 = vcmp.ge.f32.partialorder %v3382_v27, 0.0  ;;  %v3446_v53 = vmul.f32 0.01, %v3382_v27  ;;  %v3139_v59 = vsub.f32 1.5, %v3138_v51  ;;  %vm3153_vm6 = vmor %vm3151_vm15, %vm3152_vm0 }
 0x48f   : > { %v3147_v9 = vmul.f32 %v4444_v26, %v3146_v32  ;;  %v3503_v46 = vpack.c.bf16 %v3479_v56, %v3477_v10  ;;  %v3340_v2 = vmul.f32 %v6186_v5, %v6528_v37  ;;  %vm3416_vm2 = vcmp.ge.f32.partialorder %v3384_v15, 0.0 }
 0x490   : > { %v3448_v43 = vmul.f32 0.01, %v3384_v15  ;;  %v3478_v0 = vsel %vm3414_vm1, %v3382_v27, %v3446_v53  ;;  %v3342_v38 = vmul.f32 %v6186_v5, %v6496_v52  ;;  %v3140_v55 = vmul.f32 %v4442_v14, %v3139_v59 }
 0x491   : > { %v3148_v25 = vmul.f32 0.5, %v3147_v9  ;;  %v3377_v44 = vadd.f32 %v6197_v4, %v3340_v2  ;;  %v3341_v48 = vmul.f32 %v6192_v35, %v6548_v34  ;;  %v3343_v42 = vmul.f32 %v6192_v35, %v6501_v22  ;;  %v3522_v2 = vld [vmem:[#allocation10 + $0x12] ss:$0 sm:$0xff] }
 0x492   : > { %3532 = vmatpush.bf16.xpose.msrb.mxu0 %v3503_v46  ;;  %v3480_v1 = vsel %vm3416_vm2, %v3384_v15, %v3448_v43  ;;  %v3379_v37 = vadd.f32 %v6197_v4, %v3342_v38  ;;  %v3336_v52 = vmul.f32 %v6186_v5, %v6562_v21  ;;  %v3144_v19 = vsel %vm3143_vm3, %v4442_v14, %v3140_v55 }
 0x493   : > { %v3149_v17 = vsub.f32 1.5, %v3148_v25  ;;  %v3504_v29 = vpack.c.bf16 %v3480_v1, %v3478_v0  ;;  %vm3409_vm4 = vcmp.ge.f32.partialorder %v3377_v44, 0.0  ;;  %v3295_v34 = vmul.f32 %v3144_v19, %v3087_v20  ;;  %v3514_v25 = vld [vmem:[#allocation10 + $0x11] ss:$8 sm:$0x3] }
 0x494   : > { %v3296_v33 = vmul.f32 %v3144_v19, %v3088_v58  ;;  %vm3411_vm5 = vcmp.ge.f32.partialorder %v3379_v37, 0.0  ;;  %v3441_v11 = vmul.f32 0.01, %v3377_v44  ;;  %v3443_v22 = vmul.f32 0.01, %v3379_v37 }
 0x495   : > { %v3150_v61 = vmul.f32 %v4444_v26, %v3149_v17  ;;  %3545 = vmatpush.bf16.xpose.msrb.mxu1 %v3504_v29  ;;  %v3378_v39 = vadd.f32 %v6207_v54, %v3341_v48  ;;  %v3380_v21 = vadd.f32 %v6207_v54, %v3343_v42  ;;  %v3338_v7 = vmul.f32 %v6186_v5, %v3301_v62 }
 0x496   : > { %v3473_v14 = vsel %vm3409_vm4, %v3377_v44, %v3441_v11  ;;  %v3373_v20 = vadd.f32 %v6197_v4, %v3336_v52  ;;  %v3337_v60 = vmul.f32 %v6192_v35, %v6577_v63  ;;  %v3475_v58 = vsel %vm3411_vm5, %v3379_v37, %v3443_v22 }
 0x497   : > { %v3154_v57 = vsel %vm3153_vm6, %v4444_v26, %v3150_v61  ;;  %vm3410_vm7 = vcmp.ge.f32.partialorder %v3378_v39, 0.0  ;;  %vm3412_vm8 = vcmp.ge.f32.partialorder %v3380_v21, 0.0  ;;  %v6741_v8 = vsub.f32 %v6735_v16, %v6481_v12 }
 0x498   : > { %v3297_v28 = vmul.f32 %v3154_v57, %v3089_v40  ;;  %v3501_v31 = vpack.c.bf16 %v3475_v58, %v3473_v14  ;;  %v3442_v50 = vmul.f32 0.01, %v3378_v39  ;;  %v3444_v18 = vmul.f32 0.01, %v3380_v21 }
 0x499   : > { %v3298_v24 = vmul.f32 %v3154_v57, %v6741_v8  ;;  %v3375_v49 = vadd.f32 %v6197_v4, %v3338_v7  ;;  %vm3405_vm9 = vcmp.ge.f32.partialorder %v3373_v20, 0.0  ;;  %v3437_v62 = vmul.f32 0.01, %v3373_v20 }
 0x49a   : > { %3533 = vmatpush.bf16.xpose.msrb.mxu0 %v3501_v31  ;;  %v3474_v63 = vsel %vm3410_vm7, %v3378_v39, %v3442_v50  ;;  %v3339_v41 = vmul.f32 %v6192_v35, %v6597_v45  ;;  %v3374_v13 = vadd.f32 %v6207_v54, %v3337_v60  ;;  %v3332_v6 = vmul.f32 %v6186_v5, %v3295_v34 }
 0x49b   : > { %v3476_v40 = vsel %vm3412_vm8, %v3380_v21, %v3444_v18  ;;  %vm3407_vm10 = vcmp.ge.f32.partialorder %v3375_v49, 0.0  ;;  %v3439_v12 = vmul.f32 0.01, %v3375_v49  ;;  %v3469_v16 = vsel %vm3405_vm9, %v3373_v20, %v3437_v62 }
 0x49c   : > { %v3502_v47 = vpack.c.bf16 %v3476_v40, %v3474_v63  ;;  %v3376_v36 = vadd.f32 %v6207_v54, %v3339_v41  ;;  %vm3406_vm11 = vcmp.ge.f32.partialorder %v3374_v13, 0.0  ;;  %v3438_v23 = vmul.f32 0.01, %v3374_v13 }
 0x49d   : > { %v3471_v26 = vsel %vm3407_vm10, %v3375_v49, %v3439_v12  ;;  %v3334_v3 = vmul.f32 %v6186_v5, %v3297_v28  ;;  %v3369_v30 = vadd.f32 %v6197_v4, %v3332_v6  ;;  %v3333_v45 = vmul.f32 %v6192_v35, %v3296_v33 }
 0x49e   : > { %3546 = vmatpush.bf16.xpose.msrb.mxu1 %v3502_v47  ;;  %v3499_v27 = vpack.c.bf16 %v3471_v26, %v3469_v16  ;;  %vm3408_vm12 = vcmp.ge.f32.partialorder %v3376_v36, 0.0  ;;  %v3440_v51 = vmul.f32 0.01, %v3376_v36  ;;  %v3335_v10 = vmul.f32 %v6192_v35, %v3298_v24 }
 0x49f   : > { %v3371_v32 = vadd.f32 %v6197_v4, %v3334_v3  ;;  %v3470_v56 = vsel %vm3406_vm11, %v3374_v13, %v3438_v23  ;;  %v3433_v53 = vmul.f32 0.01, %v3369_v30  ;;  %v3370_v9 = vadd.f32 %v6207_v54, %v3333_v45 }
 0x4a0   : > { %v3472_v15 = vsel %vm3408_vm12, %v3376_v36, %v3440_v51  ;;  %vm3401_vm14 = vcmp.ge.f32.partialorder %v3369_v30, 0.0  ;;  %v3372_v46 = vadd.f32 %v6207_v54, %v3335_v10  ;;  %v4680_v38 = vmov 0  }
 0x4a1   : > { %vm3403_vm13 = vcmp.ge.f32.partialorder %v3371_v32, 0.0  ;;  %v3435_v59 = vmul.f32 0.01, %v3371_v32  ;;  %v3500_v5 = vpack.c.bf16 %v3472_v15, %v3470_v56  ;;  %4346 = vset.pattern.permute.xlu0 %v4680_v38  ;;  %v3465_v4 = vsel %vm3401_vm14, %v3369_v30, %v3433_v53 }
 0x4a2   : > { %3534 = vmatpush.bf16.xpose.msrb.mxu0 %v3499_v27  ;;  %vm3404_vm15 = vcmp.ge.f32.partialorder %v3372_v46, 0.0  ;;  %v3436_v0 = vmul.f32 0.01, %v3372_v46  ;;  %v3434_v35 = vmul.f32 0.01, %v3370_v9  ;;  %3525 = vperm.xlu0 %4346, %v3522_v2   ;;  %vm3402_vm0 = vcmp.ge.f32.partialorder %v3370_v9, 0.0 }
 0x4a3   : > { %v3467_v43 = vsel %vm3403_vm13, %v3371_v32, %v3435_v59  ;;  %v3516_v1 = vperm.slane %v3514_v25, 0  ;;  %v3517_v42 = vperm.slane %v3514_v25, 1 }
 0x4a4   : > { %v3497_v55 = vpack.c.bf16 %v3467_v43, %v3465_v4  ;;  %v3468_v44 = vsel %vm3404_vm15, %v3372_v46, %v3436_v0  ;;  %v3466_v48 = vsel %vm3402_vm0, %v3370_v9, %v3434_v35 }
 0x4a5   : > { %v3498_v54 = vpack.c.bf16 %v3468_v44, %v3466_v48  ;;  %v3520_v37 = vpack.c.bf16 %v3516_v1, %v3516_v1  ;;  %v3521_v52 = vpack.c.bf16 %v3517_v42, %v3517_v42 }
 0x4a6   : > { %3547 = vmatpush.bf16.xpose.msrb.mxu1 %v3500_v5 }
 0x4aa   : > { %3535 = vmatpush.bf16.xpose.msrb.mxu0 %v3497_v55 }
 0x4ae   : > { %3548 = vmatpush.bf16.xpose.msrb.mxu1 %v3498_v54 }
 0x4b1   : > { %3536 = vmatmul.bf16.vlgmr.msrb.gmra.mxu0 %v3520_v37 }
 0x4b5   : > { %3549 = vmatmul.bf16.vlgmr.msrb.gmra.mxu1 %v3521_v52 }
 0x514   : > { %v3526_v19 = vpop.permute.xlu0 %3525 }
 0x52e   : > { %v3537_v17 = vpop.f32.mrf.mxu0 }
 0x52f   : > { %v3538_v29 = vadd.f32 %v3537_v17, %v3526_v19 }
 0x532   : > { %v3550_v34 = vpop.f32.mrf.mxu1 }
 0x533   : > { %v3551_v33 = vadd.f32 %v3550_v34, %v3538_v29 }
 0x535   : > { %3554 = vst [vmem:[%s310_s8] sm:$0x1] %v3551_v33 }
 0x536   : > { %v3539_v11 = vpop.f32.mrf.mxu0 }
 0x537   : > { %4622 = shalt.err (!%p4619_p10)
}
 0x538   : > { %4271 = dma.vmem_to_hbm [thread:$0]  (%p4807_p5), %s3567_s9, 16, %s3569_s10, %s3556_s14  }
 0x53a   : > { %v3552_v61 = vpop.f32.mrf.mxu1 }
 0x53b PF: > { %s3580_s6 = sand.u32 1, %s4657_s18   ;;  %p6742_p12 = scmp.ge.s32.totalorder %s4669_s21, 2 }
 0x53c   : > { %s3581_s11 = scalar_lea.sflag [#allocation4], %s3580_s6 }
 0x53d   : > { %p4291_p13 = pnand %p6742_p12, %p4746_p6 }
 0x53f   : > { %p4292_p0 = pneg %p4291_p13 }
 0x541   : > { %4652 = dma.done.wait (%p4292_p0), %s3581_s11, 16  }
 0x542   : > { %4654 = vsyncadd (%p4292_p0), %s3581_s11, 4294967280  ;;  %p20_p3 = scmp.ge.s32.totalorder %s4794_s13, 4   ;;  %s6743_s18 = smov %s4661_s19 }
 0x543   : > { %s6744_s19 = smov %s4665_s20  ;;  %s6745_s20 = smov %s4803_s16 }
 0x544   : > { %s6746_s21 = smov %s4794_s13  ;;  %22 = sbr.rel (!%p20_p3) target bundleno = 7 (0x7), region = 110 }
 0x549   :  { %3586 = vsyncpa [#allocation3], 1 }
 0x54a   :  { %3588 = vsyncpa [#allocation3 + $0x1], 1 }
 0x54b   :  { %3589 = vsyncpa [#allocation6], 1 }
 0x54c   :  { %3590 = vsyncpa [#allocation9], 1 }
 0x54d   :  { %3591 = vsyncpa [#allocation4], 1 }
 0x54e   :  { %3593 = vsyncpa [#allocation4 + $0x1], 1 }

</bundles_post_ra>
